<compile_context>
chip_gen: v6e
topology: v6e:2x2x1
jax: 0.10.0
libtpu: 0.0.40
codegen_flags: <defaults>
</compile_context>

<pallas_src>
import functools
import math

import jax
import jax.numpy as jnp
import numpy as np
from jax import lax
from jax.experimental import pallas as pl
from jax.experimental.pallas import tpu as pltpu

# ---------------------------------------------------------------------------
# config (small synthetic shapes consistent with the module)
# ---------------------------------------------------------------------------
B, C, N, V, W = 2, 4, 3, 4, 4        # buffer: (b, c, n, v, w)
SPA_DIM = 32
NUM_HEADS = 8
MASK_FIELD = (3, 3)                  # self.mask_field is set outside __init__ in SAnet
NEG_INF = -1e30                      # additive "-inf": exp underflows to exactly 0


# ---------------------------------------------------------------------------
# attention mask (host-side, same semantics as BasicTrans.gen_mask)
# ---------------------------------------------------------------------------
def gen_mask(h, w, k_h, k_w):
    mask = np.zeros((h, w, h, w), np.float32)
    k_h_left, k_h_right = k_h // 2, k_h - k_h // 2
    k_w_left, k_w_right = k_w // 2, k_w - k_w // 2
    for i in range(h):
        for j in range(w):
            mask[i, j,
                 max(0, i - k_h_left):min(h, i + k_h_right),
                 max(0, j - k_w_left):min(w, j + k_w_right)] = 1.0
    mask = mask.reshape(h * w, h * w)
    out = np.where(mask == 0.0, NEG_INF, 0.0).astype(np.float32)
    return jnp.asarray(out)


# ---------------------------------------------------------------------------
# Pallas kernel: full BasicTrans token pipeline, all BN batch elements folded
# ---------------------------------------------------------------------------
def basic_trans_kernel(x_ref, mask_ref, w_cx_ref, w_qk_ref, w_off_ref, w_ff2_ref,
                       o_ref, *, num_heads, spa_dim, channels, eps=1e-5):
    D = spa_dim
    dh = D // num_heads

    x = x_ref[...]                         # (T, C)   T = BN*S
    mask = mask_ref[...]                   # (T, T)   block-diag local mask (0 / NEG_INF)

    # fused linear_in + value projection + linear_out weights:
    #   w_cx = [w_in | w_in@wv | w_out^T]   (C, 3D)
    w_cx = w_cx_ref[...]
    tv = jnp.dot(x, w_cx[:, :2 * D], preferred_element_type=jnp.float32)    # (T, 2D)
    tok = tv[:, :D]                        # epi_token (pre-norm); also the value input
    v = tv[:, D:]                          # value projection
    w_out_cd = w_cx[:, 2 * D:]             # (C, D) == linear_out.weight (torch layout)

    # pre-attention LayerNorm (gamma/beta folded into w_qk host-side)
    mean1 = jnp.mean(tok, axis=-1, keepdims=True)
    var1 = jnp.mean((tok - mean1) ** 2, axis=-1, keepdims=True)
    tok_nrm = (tok - mean1) * lax.rsqrt(var1 + eps)

    w_qk_b = w_qk_ref[...]                 # (D+1, 2D): folded weights + bias row
    qk = jnp.dot(tok_nrm, w_qk_b[:D, :], preferred_element_type=jnp.float32)
    qk = qk + w_qk_b[D:D + 1, :]           # beta @ [wq*scale | wk]
    q = qk[:, :D]                          # q is pre-scaled by 1/sqrt(dh)
    k = qk[:, D:]

    w_off_b = w_off_ref[...]               # (D+1, 3D)
    wo = w_off_b[:D, :D]                   # (D, D)  attention out_proj
    wff1 = w_off_b[:D, D:]                 # (D, 2D) feed-forward up-proj (gamma2 folded)
    ff1_bias = w_off_b[D:D + 1, D:]        # (1, 2D) beta2 @ wff1

    # multi-head attention over all BN batches at once (block-diag mask keeps
    # batches independent); per-head out-projection accumulated via linearity.
    attn = jnp.zeros((tok.shape[0], D), jnp.float32)
    for h in range(num_heads):
        sl = slice(h * dh, (h + 1) * dh)
        qh, kh, vh = q[:, sl], k[:, sl], v[:, sl]
        s = lax.dot_general(qh, kh, (((1,), (1,)), ((), ())),
                            preferred_element_type=jnp.float32) + mask      # (T, T)
        s = s - jnp.max(s, axis=-1, keepdims=True)
        p = jnp.exp(s)
        p = p * pl.reciprocal(jnp.sum(p, axis=-1, keepdims=True), approx=True)
        h_out = jnp.dot(p, vh, preferred_element_type=jnp.float32)          # (T, dh)
        attn = attn + jnp.dot(h_out, wo[sl, :],
                              preferred_element_type=jnp.float32)           # (T, D)

    tok = attn + tok                       # residual 1

    # feed-forward: LN (folded) -> Linear(D,2D) -> ReLU -> Linear(2D,D)  (dropout = 0)
    mean2 = jnp.mean(tok, axis=-1, keepdims=True)
    var2 = jnp.mean((tok - mean2) ** 2, axis=-1, keepdims=True)
    ffn = (tok - mean2) * lax.rsqrt(var2 + eps)
    ff = jnp.dot(ffn, wff1, preferred_element_type=jnp.float32) + ff1_bias
    ff = jnp.maximum(ff, 0.0)
    ff = jnp.dot(ff, w_ff2_ref[...], preferred_element_type=jnp.float32)
    tok = ff + tok                         # residual 2

    # linear_out, computed transposed so the store is lane-dense: (C, T)
    out_t = lax.dot_general(w_out_cd, tok, (((1,), (1,)), ((), ())),
                            preferred_element_type=jnp.float32)
    o_ref[...] = out_t.astype(o_ref.dtype)


# ---------------------------------------------------------------------------
# wrapper: layout rearranges + host-side weight folds, single pallas_call
# ---------------------------------------------------------------------------
@functools.partial(jax.jit, static_argnames=("num_heads",))
def basic_trans_forward(buffer, params, mask_small, num_heads):
    b, c, n, v, w = buffer.shape
    BN, S = b * n, v * w
    T = BN * S
    D = params["w_in"].shape[1]
    dh = D // num_heads
    scale = 1.0 / math.sqrt(dh)

    # 'b c n v w -> ((b n) (v w)) c'
    x = jnp.transpose(buffer, (0, 2, 3, 4, 1)).reshape(T, c)

    # block-diagonal additive mask over the folded (b n) batch:
    # within-batch blocks carry the local-window mask, cross-batch is NEG_INF.
    same_batch = (jnp.arange(T)[:, None] // S) == (jnp.arange(T)[None, :] // S)
    big_mask = jnp.where(same_batch, jnp.tile(mask_small, (BN, BN)),
                         jnp.float32(NEG_INF))

    # ---- host-side weight folds (exact algebra, fewer DMAs + fewer in-kernel ops)
    # [w_in | w_in@wv | w_out^T]  : one matmul yields tok AND v; out-proj weight rides along
    w_cx = jnp.concatenate([params["w_in"],
                            params["w_in"] @ params["wv"],
                            params["w_out"].T], axis=1)                     # (C, 3D)

    # LN1 affine + 1/sqrt(dh) folded into the q/k projection, beta becomes a bias row
    w_qk = jnp.concatenate([params["wq"] * scale, params["wk"]], axis=1)    # (D, 2D)
    w_qk_b = jnp.concatenate([params["g1"].T * w_qk,
                              params["b1"] @ w_qk], axis=0)                 # (D+1, 2D)

    # LN2 affine folded into the FFN up-projection; packed next to the out_proj
    wff1_f = params["g2"].T * params["wff1"]                                # (D, 2D)
    b_ff1 = params["b2"] @ params["wff1"]                                   # (1, 2D)
    w_off = jnp.concatenate([params["wo"], wff1_f], axis=1)                 # (D, 3D)
    last_row = jnp.concatenate([jnp.zeros((1, D), jnp.float32), b_ff1], axis=1)
    w_off_b = jnp.concatenate([w_off, last_row], axis=0)                    # (D+1, 3D)

    kern = functools.partial(basic_trans_kernel, num_heads=num_heads,
                             spa_dim=D, channels=c)
    vspec = pl.BlockSpec(memory_space=pltpu.MemorySpace.VMEM)
    out_t = pl.pallas_call(
        kern,
        out_shape=jax.ShapeDtypeStruct((c, T), jnp.float32),
        in_specs=[vspec] * 6,
        out_specs=vspec,
    )(x, big_mask, w_cx, w_qk_b, w_off_b, params["wff2"])

    # '(c) ((b n)(v w)) -> b c n v w'
    return jnp.transpose(out_t.reshape(c, b, n, v, w), (1, 0, 2, 3, 4))


# ---------------------------------------------------------------------------
# deterministic parameter init (same shapes as the torch module; synthetic).
# LayerNorm gamma/beta are randomized (non-default) so the host-side folds are
# actually exercised by the correctness check below.
# ---------------------------------------------------------------------------
def init_params(key, channels, spa_dim):
    D, Cc = spa_dim, channels
    ks = jax.random.split(key, 10)

    def u(k, shape, fan_in):
        bound = 1.0 / math.sqrt(fan_in)
        return jax.random.uniform(k, shape, jnp.float32, -bound, bound)

    in_proj = u(ks[1], (3 * D, D), D)          # attention.in_proj_weight (3D, D)
    return {
        "w_in":  u(ks[0], (Cc, D), Cc),                         # linear_in.weight.T
        "g1":    jax.random.uniform(ks[6], (1, D), jnp.float32, 0.5, 1.5),
        "b1":    jax.random.uniform(ks[7], (1, D), jnp.float32, -0.2, 0.2),
        "wq":    in_proj[:D].T,
        "wk":    in_proj[D:2 * D].T,
        "wv":    in_proj[2 * D:].T,
        "wo":    u(ks[2], (D, D), D).T,                         # out_proj.weight.T
        "g2":    jax.random.uniform(ks[8], (1, D), jnp.float32, 0.5, 1.5),
        "b2":    jax.random.uniform(ks[9], (1, D), jnp.float32, -0.2, 0.2),
        "wff1":  u(ks[3], (2 * D, D), D).T,                     # (D, 2D)
        "wff2":  u(ks[4], (D, 2 * D), 2 * D).T,                 # (2D, D)
        "w_out": u(ks[5], (Cc, D), D).T,                        # linear_out.weight.T
    }


# ---------------------------------------------------------------------------
# pure-JAX reference (same math, un-folded weights) for a correctness check
# ---------------------------------------------------------------------------
def reference(buffer, params, mask, num_heads):
    b, c, n, v, w = buffer.shape
    x = jnp.transpose(buffer, (0, 2, 3, 4, 1)).reshape(b * n, v * w, c)

    def ln(t, g, bta):
        m = t.mean(-1, keepdims=True)
        var = ((t - m) ** 2).mean(-1, keepdims=True)
        return (t - m) / jnp.sqrt(var + 1e-5) * g + bta

    tok = x @ params["w_in"]
    tokn = ln(tok, params["g1"], params["b1"])
    q, k, vv = tokn @ params["wq"], tokn @ params["wk"], tok @ params["wv"]
    BN, S, D = q.shape
    dh = D // num_heads
    qh = q.reshape(BN, S, num_heads, dh)
    kh = k.reshape(BN, S, num_heads, dh)
    vh = vv.reshape(BN, S, num_heads, dh)
    scores = jnp.einsum("bshd,bthd->bhst", qh, kh) / math.sqrt(dh) + mask
    p = jax.nn.softmax(scores, axis=-1)
    o = jnp.einsum("bhst,bthd->bshd", p, vh).reshape(BN, S, D) @ params["wo"]
    tok = o + tok
    ff = jnp.maximum(ln(tok, params["g2"], params["b2"]) @ params["wff1"], 0.0) @ params["wff2"]
    tok = ff + tok
    out = tok @ params["w_out"]
    return jnp.transpose(out.reshape(b, n, v, w, c), (0, 4, 1, 2, 3))


# ---------------------------------------------------------------------------
if __name__ == "__main__":
    key = jax.random.PRNGKey(0)
    k_buf, k_par = jax.random.split(key)

    buffer = jax.random.normal(k_buf, (B, C, N, V, W), jnp.float32)
    params = init_params(k_par, C, SPA_DIM)
    mask = gen_mask(V, W, MASK_FIELD[0], MASK_FIELD[1])

    out = basic_trans_forward(buffer, params, mask, num_heads=NUM_HEADS)
    out = jax.block_until_ready(out)

    ref = jax.block_until_ready(reference(buffer, params, mask, NUM_HEADS))
    assert out.shape == (B, C, N, V, W)
    np.testing.assert_allclose(np.asarray(out), np.asarray(ref), rtol=1e-2, atol=1e-2)

    print("KERNEL_OK")
</pallas_src>

<mosaic_0001>
module attributes {stable_mosaic.version = 11 : i64} {
  func.func @basic_trans_kernel(%arg0: memref<96x4xf32, #tpu.memory_space<vmem>>, %arg1: memref<96x96xf32, #tpu.memory_space<vmem>>, %arg2: memref<4x96xf32, #tpu.memory_space<vmem>>, %arg3: memref<33x64xf32, #tpu.memory_space<vmem>>, %arg4: memref<33x96xf32, #tpu.memory_space<vmem>>, %arg5: memref<64x32xf32, #tpu.memory_space<vmem>>, %arg6: memref<4x96xf32, #tpu.memory_space<vmem>>) attributes {dimension_semantics = [], scalar_prefetch = 0 : i64, scratch_operands = 0 : i64, tpu.core_type = #tpu.core_type<tc>} {
    %c0 = arith.constant 0 : index
    %c0_0 = arith.constant 0 : index
    %0 = vector.load %arg0[%c0, %c0_0] : memref<96x4xf32, #tpu.memory_space<vmem>>, vector<96x4xf32>
    %c0_1 = arith.constant 0 : index
    %c0_2 = arith.constant 0 : index
    %1 = vector.load %arg1[%c0_1, %c0_2] : memref<96x96xf32, #tpu.memory_space<vmem>>, vector<96x96xf32>
    %c0_3 = arith.constant 0 : index
    %c0_4 = arith.constant 0 : index
    %2 = vector.load %arg2[%c0_3, %c0_4] : memref<4x96xf32, #tpu.memory_space<vmem>>, vector<4x96xf32>
    %3 = vector.extract_strided_slice %2 {offsets = [0, 0], sizes = [4, 64], strides = [1, 1]} : vector<4x96xf32> to vector<4x64xf32>
    %cst = arith.constant dense<0.000000e+00> : vector<96x64xf32>
    %4 = tpu.matmul %0, %3, %cst {dimension_numbers = #tpu.dot_dimension_numbers<[1], [0], [0], [1], [0, 0, 1, 1], [], []>} : vector<96x4xf32>, vector<4x64xf32>, vector<96x64xf32> -> vector<96x64xf32>
    %5 = vector.extract_strided_slice %4 {offsets = [0, 0], sizes = [96, 32], strides = [1, 1]} : vector<96x64xf32> to vector<96x32xf32>
    %6 = vector.extract_strided_slice %4 {offsets = [0, 32], sizes = [96, 32], strides = [1, 1]} : vector<96x64xf32> to vector<96x32xf32>
    %7 = vector.extract_strided_slice %2 {offsets = [0, 64], sizes = [4, 32], strides = [1, 1]} : vector<4x96xf32> to vector<4x32xf32>
    %cst_5 = arith.constant dense<0.000000e+00> : vector<96xf32>
    %8 = vector.multi_reduction <add>, %5, %cst_5 [1] : vector<96x32xf32> to vector<96xf32>
    %9 = vector.shape_cast %8 : vector<96xf32> to vector<96x1xf32>
    %cst_6 = arith.constant 3.200000e+01 : f32
    %10 = vector.broadcast %cst_6 : f32 to vector<96x1xf32>
    %11 = arith.divf %9, %10 : vector<96x1xf32>
    %12 = vector.broadcast %11 : vector<96x1xf32> to vector<96x32xf32>
    %13 = arith.subf %5, %12 : vector<96x32xf32>
    %14 = arith.mulf %13, %13 : vector<96x32xf32>
    %cst_7 = arith.constant dense<0.000000e+00> : vector<96xf32>
    %15 = vector.multi_reduction <add>, %14, %cst_7 [1] : vector<96x32xf32> to vector<96xf32>
    %16 = vector.shape_cast %15 : vector<96xf32> to vector<96x1xf32>
    %cst_8 = arith.constant 3.200000e+01 : f32
    %17 = vector.broadcast %cst_8 : f32 to vector<96x1xf32>
    %18 = arith.divf %16, %17 : vector<96x1xf32>
    %19 = vector.broadcast %11 : vector<96x1xf32> to vector<96x32xf32>
    %20 = arith.subf %5, %19 : vector<96x32xf32>
    %cst_9 = arith.constant 9.99999974E-6 : f32
    %21 = vector.broadcast %cst_9 : f32 to vector<96x1xf32>
    %22 = arith.addf %18, %21 : vector<96x1xf32>
    %23 = math.rsqrt %22 : vector<96x1xf32>
    %24 = vector.broadcast %23 : vector<96x1xf32> to vector<96x32xf32>
    %25 = arith.mulf %20, %24 : vector<96x32xf32>
    %c0_10 = arith.constant 0 : index
    %c0_11 = arith.constant 0 : index
    %26 = vector.load %arg3[%c0_10, %c0_11] : memref<33x64xf32, #tpu.memory_space<vmem>>, vector<33x64xf32>
    %27 = vector.extract_strided_slice %26 {offsets = [0, 0], sizes = [32, 64], strides = [1, 1]} : vector<33x64xf32> to vector<32x64xf32>
    %cst_12 = arith.constant dense<0.000000e+00> : vector<96x64xf32>
    %28 = tpu.matmul %25, %27, %cst_12 {dimension_numbers = #tpu.dot_dimension_numbers<[1], [0], [0], [1], [0, 0, 1, 1], [], []>} : vector<96x32xf32>, vector<32x64xf32>, vector<96x64xf32> -> vector<96x64xf32>
    %29 = vector.extract_strided_slice %26 {offsets = [32, 0], sizes = [1, 64], strides = [1, 1]} : vector<33x64xf32> to vector<1x64xf32>
    %30 = vector.broadcast %29 : vector<1x64xf32> to vector<96x64xf32>
    %31 = arith.addf %28, %30 : vector<96x64xf32>
    %32 = vector.extract_strided_slice %31 {offsets = [0, 0], sizes = [96, 32], strides = [1, 1]} : vector<96x64xf32> to vector<96x32xf32>
    %33 = vector.extract_strided_slice %31 {offsets = [0, 32], sizes = [96, 32], strides = [1, 1]} : vector<96x64xf32> to vector<96x32xf32>
    %c0_13 = arith.constant 0 : index
    %c0_14 = arith.constant 0 : index
    %34 = vector.load %arg4[%c0_13, %c0_14] : memref<33x96xf32, #tpu.memory_space<vmem>>, vector<33x96xf32>
    %35 = vector.extract_strided_slice %34 {offsets = [0, 0], sizes = [32, 32], strides = [1, 1]} : vector<33x96xf32> to vector<32x32xf32>
    %36 = vector.extract_strided_slice %34 {offsets = [0, 32], sizes = [32, 64], strides = [1, 1]} : vector<33x96xf32> to vector<32x64xf32>
    %37 = vector.extract_strided_slice %34 {offsets = [32, 32], sizes = [1, 64], strides = [1, 1]} : vector<33x96xf32> to vector<1x64xf32>
    %cst_15 = arith.constant 0.000000e+00 : f32
    %38 = vector.broadcast %cst_15 : f32 to vector<96x32xf32>
    %39 = vector.extract_strided_slice %32 {offsets = [0, 0], sizes = [96, 4], strides = [1, 1]} : vector<96x32xf32> to vector<96x4xf32>
    %40 = vector.extract_strided_slice %33 {offsets = [0, 0], sizes = [96, 4], strides = [1, 1]} : vector<96x32xf32> to vector<96x4xf32>
    %41 = vector.extract_strided_slice %6 {offsets = [0, 0], sizes = [96, 4], strides = [1, 1]} : vector<96x32xf32> to vector<96x4xf32>
    %cst_16 = arith.constant dense<0.000000e+00> : vector<96x96xf32>
    %42 = tpu.matmul %39, %40, %cst_16 {dimension_numbers = #tpu.dot_dimension_numbers<[1], [1], [0], [0], [0, 0, 1, 0], [], []>} : vector<96x4xf32>, vector<96x4xf32>, vector<96x96xf32> -> vector<96x96xf32>
    %43 = arith.addf %42, %1 : vector<96x96xf32>
    %cst_17 = arith.constant dense<0xFF800000> : vector<96xf32>
    %44 = vector.multi_reduction <maximumf>, %43, %cst_17 [1] : vector<96x96xf32> to vector<96xf32>
    %45 = vector.shape_cast %44 : vector<96xf32> to vector<96x1xf32>
    %46 = vector.broadcast %45 : vector<96x1xf32> to vector<96x96xf32>
    %47 = arith.subf %43, %46 : vector<96x96xf32>
    %48 = math.exp %47 : vector<96x96xf32>
    %cst_18 = arith.constant dense<0.000000e+00> : vector<96xf32>
    %49 = vector.multi_reduction <add>, %48, %cst_18 [1] : vector<96x96xf32> to vector<96xf32>
    %50 = vector.shape_cast %49 : vector<96xf32> to vector<96x1xf32>
    %51 = tpu.reciprocal %50 {approx = true} : vector<96x1xf32> -> vector<96x1xf32>
    %52 = vector.broadcast %51 : vector<96x1xf32> to vector<96x96xf32>
    %53 = arith.mulf %48, %52 : vector<96x96xf32>
    %cst_19 = arith.constant dense<0.000000e+00> : vector<96x4xf32>
    %54 = tpu.matmul %53, %41, %cst_19 {dimension_numbers = #tpu.dot_dimension_numbers<[1], [0], [0], [1], [0, 0, 1, 1], [], []>} : vector<96x96xf32>, vector<96x4xf32>, vector<96x4xf32> -> vector<96x4xf32>
    %55 = vector.extract_strided_slice %35 {offsets = [0, 0], sizes = [4, 32], strides = [1, 1]} : vector<32x32xf32> to vector<4x32xf32>
    %cst_20 = arith.constant dense<0.000000e+00> : vector<96x32xf32>
    %56 = tpu.matmul %54, %55, %cst_20 {dimension_numbers = #tpu.dot_dimension_numbers<[1], [0], [0], [1], [0, 0, 1, 1], [], []>} : vector<96x4xf32>, vector<4x32xf32>, vector<96x32xf32> -> vector<96x32xf32>
    %57 = arith.addf %38, %56 : vector<96x32xf32>
    %58 = vector.extract_strided_slice %32 {offsets = [0, 4], sizes = [96, 4], strides = [1, 1]} : vector<96x32xf32> to vector<96x4xf32>
    %59 = vector.extract_strided_slice %33 {offsets = [0, 4], sizes = [96, 4], strides = [1, 1]} : vector<96x32xf32> to vector<96x4xf32>
    %60 = vector.extract_strided_slice %6 {offsets = [0, 4], sizes = [96, 4], strides = [1, 1]} : vector<96x32xf32> to vector<96x4xf32>
    %cst_21 = arith.constant dense<0.000000e+00> : vector<96x96xf32>
    %61 = tpu.matmul %58, %59, %cst_21 {dimension_numbers = #tpu.dot_dimension_numbers<[1], [1], [0], [0], [0, 0, 1, 0], [], []>} : vector<96x4xf32>, vector<96x4xf32>, vector<96x96xf32> -> vector<96x96xf32>
    %62 = arith.addf %61, %1 : vector<96x96xf32>
    %cst_22 = arith.constant dense<0xFF800000> : vector<96xf32>
    %63 = vector.multi_reduction <maximumf>, %62, %cst_22 [1] : vector<96x96xf32> to vector<96xf32>
    %64 = vector.shape_cast %63 : vector<96xf32> to vector<96x1xf32>
    %65 = vector.broadcast %64 : vector<96x1xf32> to vector<96x96xf32>
    %66 = arith.subf %62, %65 : vector<96x96xf32>
    %67 = math.exp %66 : vector<96x96xf32>
    %cst_23 = arith.constant dense<0.000000e+00> : vector<96xf32>
    %68 = vector.multi_reduction <add>, %67, %cst_23 [1] : vector<96x96xf32> to vector<96xf32>
    %69 = vector.shape_cast %68 : vector<96xf32> to vector<96x1xf32>
    %70 = tpu.reciprocal %69 {approx = true} : vector<96x1xf32> -> vector<96x1xf32>
    %71 = vector.broadcast %70 : vector<96x1xf32> to vector<96x96xf32>
    %72 = arith.mulf %67, %71 : vector<96x96xf32>
    %cst_24 = arith.constant dense<0.000000e+00> : vector<96x4xf32>
    %73 = tpu.matmul %72, %60, %cst_24 {dimension_numbers = #tpu.dot_dimension_numbers<[1], [0], [0], [1], [0, 0, 1, 1], [], []>} : vector<96x96xf32>, vector<96x4xf32>, vector<96x4xf32> -> vector<96x4xf32>
    %74 = vector.extract_strided_slice %35 {offsets = [4, 0], sizes = [4, 32], strides = [1, 1]} : vector<32x32xf32> to vector<4x32xf32>
    %cst_25 = arith.constant dense<0.000000e+00> : vector<96x32xf32>
    %75 = tpu.matmul %73, %74, %cst_25 {dimension_numbers = #tpu.dot_dimension_numbers<[1], [0], [0], [1], [0, 0, 1, 1], [], []>} : vector<96x4xf32>, vector<4x32xf32>, vector<96x32xf32> -> vector<96x32xf32>
    %76 = arith.addf %57, %75 : vector<96x32xf32>
    %77 = vector.extract_strided_slice %32 {offsets = [0, 8], sizes = [96, 4], strides = [1, 1]} : vector<96x32xf32> to vector<96x4xf32>
    %78 = vector.extract_strided_slice %33 {offsets = [0, 8], sizes = [96, 4], strides = [1, 1]} : vector<96x32xf32> to vector<96x4xf32>
    %79 = vector.extract_strided_slice %6 {offsets = [0, 8], sizes = [96, 4], strides = [1, 1]} : vector<96x32xf32> to vector<96x4xf32>
    %cst_26 = arith.constant dense<0.000000e+00> : vector<96x96xf32>
    %80 = tpu.matmul %77, %78, %cst_26 {dimension_numbers = #tpu.dot_dimension_numbers<[1], [1], [0], [0], [0, 0, 1, 0], [], []>} : vector<96x4xf32>, vector<96x4xf32>, vector<96x96xf32> -> vector<96x96xf32>
    %81 = arith.addf %80, %1 : vector<96x96xf32>
    %cst_27 = arith.constant dense<0xFF800000> : vector<96xf32>
    %82 = vector.multi_reduction <maximumf>, %81, %cst_27 [1] : vector<96x96xf32> to vector<96xf32>
    %83 = vector.shape_cast %82 : vector<96xf32> to vector<96x1xf32>
    %84 = vector.broadcast %83 : vector<96x1xf32> to vector<96x96xf32>
    %85 = arith.subf %81, %84 : vector<96x96xf32>
    %86 = math.exp %85 : vector<96x96xf32>
    %cst_28 = arith.constant dense<0.000000e+00> : vector<96xf32>
    %87 = vector.multi_reduction <add>, %86, %cst_28 [1] : vector<96x96xf32> to vector<96xf32>
    %88 = vector.shape_cast %87 : vector<96xf32> to vector<96x1xf32>
    %89 = tpu.reciprocal %88 {approx = true} : vector<96x1xf32> -> vector<96x1xf32>
    %90 = vector.broadcast %89 : vector<96x1xf32> to vector<96x96xf32>
    %91 = arith.mulf %86, %90 : vector<96x96xf32>
    %cst_29 = arith.constant dense<0.000000e+00> : vector<96x4xf32>
    %92 = tpu.matmul %91, %79, %cst_29 {dimension_numbers = #tpu.dot_dimension_numbers<[1], [0], [0], [1], [0, 0, 1, 1], [], []>} : vector<96x96xf32>, vector<96x4xf32>, vector<96x4xf32> -> vector<96x4xf32>
    %93 = vector.extract_strided_slice %35 {offsets = [8, 0], sizes = [4, 32], strides = [1, 1]} : vector<32x32xf32> to vector<4x32xf32>
    %cst_30 = arith.constant dense<0.000000e+00> : vector<96x32xf32>
    %94 = tpu.matmul %92, %93, %cst_30 {dimension_numbers = #tpu.dot_dimension_numbers<[1], [0], [0], [1], [0, 0, 1, 1], [], []>} : vector<96x4xf32>, vector<4x32xf32>, vector<96x32xf32> -> vector<96x32xf32>
    %95 = arith.addf %76, %94 : vector<96x32xf32>
    %96 = vector.extract_strided_slice %32 {offsets = [0, 12], sizes = [96, 4], strides = [1, 1]} : vector<96x32xf32> to vector<96x4xf32>
    %97 = vector.extract_strided_slice %33 {offsets = [0, 12], sizes = [96, 4], strides = [1, 1]} : vector<96x32xf32> to vector<96x4xf32>
    %98 = vector.extract_strided_slice %6 {offsets = [0, 12], sizes = [96, 4], strides = [1, 1]} : vector<96x32xf32> to vector<96x4xf32>
    %cst_31 = arith.constant dense<0.000000e+00> : vector<96x96xf32>
    %99 = tpu.matmul %96, %97, %cst_31 {dimension_numbers = #tpu.dot_dimension_numbers<[1], [1], [0], [0], [0, 0, 1, 0], [], []>} : vector<96x4xf32>, vector<96x4xf32>, vector<96x96xf32> -> vector<96x96xf32>
    %100 = arith.addf %99, %1 : vector<96x96xf32>
    %cst_32 = arith.constant dense<0xFF800000> : vector<96xf32>
    %101 = vector.multi_reduction <maximumf>, %100, %cst_32 [1] : vector<96x96xf32> to vector<96xf32>
    %102 = vector.shape_cast %101 : vector<96xf32> to vector<96x1xf32>
    %103 = vector.broadcast %102 : vector<96x1xf32> to vector<96x96xf32>
    %104 = arith.subf %100, %103 : vector<96x96xf32>
    %105 = math.exp %104 : vector<96x96xf32>
    %cst_33 = arith.constant dense<0.000000e+00> : vector<96xf32>
    %106 = vector.multi_reduction <add>, %105, %cst_33 [1] : vector<96x96xf32> to vector<96xf32>
    %107 = vector.shape_cast %106 : vector<96xf32> to vector<96x1xf32>
    %108 = tpu.reciprocal %107 {approx = true} : vector<96x1xf32> -> vector<96x1xf32>
    %109 = vector.broadcast %108 : vector<96x1xf32> to vector<96x96xf32>
    %110 = arith.mulf %105, %109 : vector<96x96xf32>
    %cst_34 = arith.constant dense<0.000000e+00> : vector<96x4xf32>
    %111 = tpu.matmul %110, %98, %cst_34 {dimension_numbers = #tpu.dot_dimension_numbers<[1], [0], [0], [1], [0, 0, 1, 1], [], []>} : vector<96x96xf32>, vector<96x4xf32>, vector<96x4xf32> -> vector<96x4xf32>
    %112 = vector.extract_strided_slice %35 {offsets = [12, 0], sizes = [4, 32], strides = [1, 1]} : vector<32x32xf32> to vector<4x32xf32>
    %cst_35 = arith.constant dense<0.000000e+00> : vector<96x32xf32>
    %113 = tpu.matmul %111, %112, %cst_35 {dimension_numbers = #tpu.dot_dimension_numbers<[1], [0], [0], [1], [0, 0, 1, 1], [], []>} : vector<96x4xf32>, vector<4x32xf32>, vector<96x32xf32> -> vector<96x32xf32>
    %114 = arith.addf %95, %113 : vector<96x32xf32>
    %115 = vector.extract_strided_slice %32 {offsets = [0, 16], sizes = [96, 4], strides = [1, 1]} : vector<96x32xf32> to vector<96x4xf32>
    %116 = vector.extract_strided_slice %33 {offsets = [0, 16], sizes = [96, 4], strides = [1, 1]} : vector<96x32xf32> to vector<96x4xf32>
    %117 = vector.extract_strided_slice %6 {offsets = [0, 16], sizes = [96, 4], strides = [1, 1]} : vector<96x32xf32> to vector<96x4xf32>
    %cst_36 = arith.constant dense<0.000000e+00> : vector<96x96xf32>
    %118 = tpu.matmul %115, %116, %cst_36 {dimension_numbers = #tpu.dot_dimension_numbers<[1], [1], [0], [0], [0, 0, 1, 0], [], []>} : vector<96x4xf32>, vector<96x4xf32>, vector<96x96xf32> -> vector<96x96xf32>
    %119 = arith.addf %118, %1 : vector<96x96xf32>
    %cst_37 = arith.constant dense<0xFF800000> : vector<96xf32>
    %120 = vector.multi_reduction <maximumf>, %119, %cst_37 [1] : vector<96x96xf32> to vector<96xf32>
    %121 = vector.shape_cast %120 : vector<96xf32> to vector<96x1xf32>
    %122 = vector.broadcast %121 : vector<96x1xf32> to vector<96x96xf32>
    %123 = arith.subf %119, %122 : vector<96x96xf32>
    %124 = math.exp %123 : vector<96x96xf32>
    %cst_38 = arith.constant dense<0.000000e+00> : vector<96xf32>
    %125 = vector.multi_reduction <add>, %124, %cst_38 [1] : vector<96x96xf32> to vector<96xf32>
    %126 = vector.shape_cast %125 : vector<96xf32> to vector<96x1xf32>
    %127 = tpu.reciprocal %126 {approx = true} : vector<96x1xf32> -> vector<96x1xf32>
    %128 = vector.broadcast %127 : vector<96x1xf32> to vector<96x96xf32>
    %129 = arith.mulf %124, %128 : vector<96x96xf32>
    %cst_39 = arith.constant dense<0.000000e+00> : vector<96x4xf32>
    %130 = tpu.matmul %129, %117, %cst_39 {dimension_numbers = #tpu.dot_dimension_numbers<[1], [0], [0], [1], [0, 0, 1, 1], [], []>} : vector<96x96xf32>, vector<96x4xf32>, vector<96x4xf32> -> vector<96x4xf32>
    %131 = vector.extract_strided_slice %35 {offsets = [16, 0], sizes = [4, 32], strides = [1, 1]} : vector<32x32xf32> to vector<4x32xf32>
    %cst_40 = arith.constant dense<0.000000e+00> : vector<96x32xf32>
    %132 = tpu.matmul %130, %131, %cst_40 {dimension_numbers = #tpu.dot_dimension_numbers<[1], [0], [0], [1], [0, 0, 1, 1], [], []>} : vector<96x4xf32>, vector<4x32xf32>, vector<96x32xf32> -> vector<96x32xf32>
    %133 = arith.addf %114, %132 : vector<96x32xf32>
    %134 = vector.extract_strided_slice %32 {offsets = [0, 20], sizes = [96, 4], strides = [1, 1]} : vector<96x32xf32> to vector<96x4xf32>
    %135 = vector.extract_strided_slice %33 {offsets = [0, 20], sizes = [96, 4], strides = [1, 1]} : vector<96x32xf32> to vector<96x4xf32>
    %136 = vector.extract_strided_slice %6 {offsets = [0, 20], sizes = [96, 4], strides = [1, 1]} : vector<96x32xf32> to vector<96x4xf32>
    %cst_41 = arith.constant dense<0.000000e+00> : vector<96x96xf32>
    %137 = tpu.matmul %134, %135, %cst_41 {dimension_numbers = #tpu.dot_dimension_numbers<[1], [1], [0], [0], [0, 0, 1, 0], [], []>} : vector<96x4xf32>, vector<96x4xf32>, vector<96x96xf32> -> vector<96x96xf32>
    %138 = arith.addf %137, %1 : vector<96x96xf32>
    %cst_42 = arith.constant dense<0xFF800000> : vector<96xf32>
    %139 = vector.multi_reduction <maximumf>, %138, %cst_42 [1] : vector<96x96xf32> to vector<96xf32>
    %140 = vector.shape_cast %139 : vector<96xf32> to vector<96x1xf32>
    %141 = vector.broadcast %140 : vector<96x1xf32> to vector<96x96xf32>
    %142 = arith.subf %138, %141 : vector<96x96xf32>
    %143 = math.exp %142 : vector<96x96xf32>
    %cst_43 = arith.constant dense<0.000000e+00> : vector<96xf32>
    %144 = vector.multi_reduction <add>, %143, %cst_43 [1] : vector<96x96xf32> to vector<96xf32>
    %145 = vector.shape_cast %144 : vector<96xf32> to vector<96x1xf32>
    %146 = tpu.reciprocal %145 {approx = true} : vector<96x1xf32> -> vector<96x1xf32>
    %147 = vector.broadcast %146 : vector<96x1xf32> to vector<96x96xf32>
    %148 = arith.mulf %143, %147 : vector<96x96xf32>
    %cst_44 = arith.constant dense<0.000000e+00> : vector<96x4xf32>
    %149 = tpu.matmul %148, %136, %cst_44 {dimension_numbers = #tpu.dot_dimension_numbers<[1], [0], [0], [1], [0, 0, 1, 1], [], []>} : vector<96x96xf32>, vector<96x4xf32>, vector<96x4xf32> -> vector<96x4xf32>
    %150 = vector.extract_strided_slice %35 {offsets = [20, 0], sizes = [4, 32], strides = [1, 1]} : vector<32x32xf32> to vector<4x32xf32>
    %cst_45 = arith.constant dense<0.000000e+00> : vector<96x32xf32>
    %151 = tpu.matmul %149, %150, %cst_45 {dimension_numbers = #tpu.dot_dimension_numbers<[1], [0], [0], [1], [0, 0, 1, 1], [], []>} : vector<96x4xf32>, vector<4x32xf32>, vector<96x32xf32> -> vector<96x32xf32>
    %152 = arith.addf %133, %151 : vector<96x32xf32>
    %153 = vector.extract_strided_slice %32 {offsets = [0, 24], sizes = [96, 4], strides = [1, 1]} : vector<96x32xf32> to vector<96x4xf32>
    %154 = vector.extract_strided_slice %33 {offsets = [0, 24], sizes = [96, 4], strides = [1, 1]} : vector<96x32xf32> to vector<96x4xf32>
    %155 = vector.extract_strided_slice %6 {offsets = [0, 24], sizes = [96, 4], strides = [1, 1]} : vector<96x32xf32> to vector<96x4xf32>
    %cst_46 = arith.constant dense<0.000000e+00> : vector<96x96xf32>
    %156 = tpu.matmul %153, %154, %cst_46 {dimension_numbers = #tpu.dot_dimension_numbers<[1], [1], [0], [0], [0, 0, 1, 0], [], []>} : vector<96x4xf32>, vector<96x4xf32>, vector<96x96xf32> -> vector<96x96xf32>
    %157 = arith.addf %156, %1 : vector<96x96xf32>
    %cst_47 = arith.constant dense<0xFF800000> : vector<96xf32>
    %158 = vector.multi_reduction <maximumf>, %157, %cst_47 [1] : vector<96x96xf32> to vector<96xf32>
    %159 = vector.shape_cast %158 : vector<96xf32> to vector<96x1xf32>
    %160 = vector.broadcast %159 : vector<96x1xf32> to vector<96x96xf32>
    %161 = arith.subf %157, %160 : vector<96x96xf32>
    %162 = math.exp %161 : vector<96x96xf32>
    %cst_48 = arith.constant dense<0.000000e+00> : vector<96xf32>
    %163 = vector.multi_reduction <add>, %162, %cst_48 [1] : vector<96x96xf32> to vector<96xf32>
    %164 = vector.shape_cast %163 : vector<96xf32> to vector<96x1xf32>
    %165 = tpu.reciprocal %164 {approx = true} : vector<96x1xf32> -> vector<96x1xf32>
    %166 = vector.broadcast %165 : vector<96x1xf32> to vector<96x96xf32>
    %167 = arith.mulf %162, %166 : vector<96x96xf32>
    %cst_49 = arith.constant dense<0.000000e+00> : vector<96x4xf32>
    %168 = tpu.matmul %167, %155, %cst_49 {dimension_numbers = #tpu.dot_dimension_numbers<[1], [0], [0], [1], [0, 0, 1, 1], [], []>} : vector<96x96xf32>, vector<96x4xf32>, vector<96x4xf32> -> vector<96x4xf32>
    %169 = vector.extract_strided_slice %35 {offsets = [24, 0], sizes = [4, 32], strides = [1, 1]} : vector<32x32xf32> to vector<4x32xf32>
    %cst_50 = arith.constant dense<0.000000e+00> : vector<96x32xf32>
    %170 = tpu.matmul %168, %169, %cst_50 {dimension_numbers = #tpu.dot_dimension_numbers<[1], [0], [0], [1], [0, 0, 1, 1], [], []>} : vector<96x4xf32>, vector<4x32xf32>, vector<96x32xf32> -> vector<96x32xf32>
    %171 = arith.addf %152, %170 : vector<96x32xf32>
    %172 = vector.extract_strided_slice %32 {offsets = [0, 28], sizes = [96, 4], strides = [1, 1]} : vector<96x32xf32> to vector<96x4xf32>
    %173 = vector.extract_strided_slice %33 {offsets = [0, 28], sizes = [96, 4], strides = [1, 1]} : vector<96x32xf32> to vector<96x4xf32>
    %174 = vector.extract_strided_slice %6 {offsets = [0, 28], sizes = [96, 4], strides = [1, 1]} : vector<96x32xf32> to vector<96x4xf32>
    %cst_51 = arith.constant dense<0.000000e+00> : vector<96x96xf32>
    %175 = tpu.matmul %172, %173, %cst_51 {dimension_numbers = #tpu.dot_dimension_numbers<[1], [1], [0], [0], [0, 0, 1, 0], [], []>} : vector<96x4xf32>, vector<96x4xf32>, vector<96x96xf32> -> vector<96x96xf32>
    %176 = arith.addf %175, %1 : vector<96x96xf32>
    %cst_52 = arith.constant dense<0xFF800000> : vector<96xf32>
    %177 = vector.multi_reduction <maximumf>, %176, %cst_52 [1] : vector<96x96xf32> to vector<96xf32>
    %178 = vector.shape_cast %177 : vector<96xf32> to vector<96x1xf32>
    %179 = vector.broadcast %178 : vector<96x1xf32> to vector<96x96xf32>
    %180 = arith.subf %176, %179 : vector<96x96xf32>
    %181 = math.exp %180 : vector<96x96xf32>
    %cst_53 = arith.constant dense<0.000000e+00> : vector<96xf32>
    %182 = vector.multi_reduction <add>, %181, %cst_53 [1] : vector<96x96xf32> to vector<96xf32>
    %183 = vector.shape_cast %182 : vector<96xf32> to vector<96x1xf32>
    %184 = tpu.reciprocal %183 {approx = true} : vector<96x1xf32> -> vector<96x1xf32>
    %185 = vector.broadcast %184 : vector<96x1xf32> to vector<96x96xf32>
    %186 = arith.mulf %181, %185 : vector<96x96xf32>
    %cst_54 = arith.constant dense<0.000000e+00> : vector<96x4xf32>
    %187 = tpu.matmul %186, %174, %cst_54 {dimension_numbers = #tpu.dot_dimension_numbers<[1], [0], [0], [1], [0, 0, 1, 1], [], []>} : vector<96x96xf32>, vector<96x4xf32>, vector<96x4xf32> -> vector<96x4xf32>
    %188 = vector.extract_strided_slice %35 {offsets = [28, 0], sizes = [4, 32], strides = [1, 1]} : vector<32x32xf32> to vector<4x32xf32>
    %cst_55 = arith.constant dense<0.000000e+00> : vector<96x32xf32>
    %189 = tpu.matmul %187, %188, %cst_55 {dimension_numbers = #tpu.dot_dimension_numbers<[1], [0], [0], [1], [0, 0, 1, 1], [], []>} : vector<96x4xf32>, vector<4x32xf32>, vector<96x32xf32> -> vector<96x32xf32>
    %190 = arith.addf %171, %189 : vector<96x32xf32>
    %191 = arith.addf %190, %5 : vector<96x32xf32>
    %cst_56 = arith.constant dense<0.000000e+00> : vector<96xf32>
    %192 = vector.multi_reduction <add>, %191, %cst_56 [1] : vector<96x32xf32> to vector<96xf32>
    %193 = vector.shape_cast %192 : vector<96xf32> to vector<96x1xf32>
    %cst_57 = arith.constant 3.200000e+01 : f32
    %194 = vector.broadcast %cst_57 : f32 to vector<96x1xf32>
    %195 = arith.divf %193, %194 : vector<96x1xf32>
    %196 = vector.broadcast %195 : vector<96x1xf32> to vector<96x32xf32>
    %197 = arith.subf %191, %196 : vector<96x32xf32>
    %198 = arith.mulf %197, %197 : vector<96x32xf32>
    %cst_58 = arith.constant dense<0.000000e+00> : vector<96xf32>
    %199 = vector.multi_reduction <add>, %198, %cst_58 [1] : vector<96x32xf32> to vector<96xf32>
    %200 = vector.shape_cast %199 : vector<96xf32> to vector<96x1xf32>
    %cst_59 = arith.constant 3.200000e+01 : f32
    %201 = vector.broadcast %cst_59 : f32 to vector<96x1xf32>
    %202 = arith.divf %200, %201 : vector<96x1xf32>
    %203 = vector.broadcast %195 : vector<96x1xf32> to vector<96x32xf32>
    %204 = arith.subf %191, %203 : vector<96x32xf32>
    %cst_60 = arith.constant 9.99999974E-6 : f32
    %205 = vector.broadcast %cst_60 : f32 to vector<96x1xf32>
    %206 = arith.addf %202, %205 : vector<96x1xf32>
    %207 = math.rsqrt %206 : vector<96x1xf32>
    %208 = vector.broadcast %207 : vector<96x1xf32> to vector<96x32xf32>
    %209 = arith.mulf %204, %208 : vector<96x32xf32>
    %cst_61 = arith.constant dense<0.000000e+00> : vector<96x64xf32>
    %210 = tpu.matmul %209, %36, %cst_61 {dimension_numbers = #tpu.dot_dimension_numbers<[1], [0], [0], [1], [0, 0, 1, 1], [], []>} : vector<96x32xf32>, vector<32x64xf32>, vector<96x64xf32> -> vector<96x64xf32>
    %211 = vector.broadcast %37 : vector<1x64xf32> to vector<96x64xf32>
    %212 = arith.addf %210, %211 : vector<96x64xf32>
    %cst_62 = arith.constant 0.000000e+00 : f32
    %213 = vector.broadcast %cst_62 : f32 to vector<96x64xf32>
    %214 = arith.maximumf %212, %213 : vector<96x64xf32>
    %c0_63 = arith.constant 0 : index
    %c0_64 = arith.constant 0 : index
    %215 = vector.load %arg5[%c0_63, %c0_64] : memref<64x32xf32, #tpu.memory_space<vmem>>, vector<64x32xf32>
    %cst_65 = arith.constant dense<0.000000e+00> : vector<96x32xf32>
    %216 = tpu.matmul %214, %215, %cst_65 {dimension_numbers = #tpu.dot_dimension_numbers<[1], [0], [0], [1], [0, 0, 1, 1], [], []>} : vector<96x64xf32>, vector<64x32xf32>, vector<96x32xf32> -> vector<96x32xf32>
    %217 = arith.addf %216, %191 : vector<96x32xf32>
    %cst_66 = arith.constant dense<0.000000e+00> : vector<4x96xf32>
    %218 = tpu.matmul %7, %217, %cst_66 {dimension_numbers = #tpu.dot_dimension_numbers<[1], [1], [0], [0], [0, 0, 1, 0], [], []>} : vector<4x32xf32>, vector<96x32xf32>, vector<4x96xf32> -> vector<4x96xf32>
    %c0_67 = arith.constant 0 : index
    %c0_68 = arith.constant 0 : index
    %219 = vector.load %arg6[%c0_67, %c0_68] : memref<4x96xf32, #tpu.memory_space<vmem>>, vector<4x96xf32>
    tpu.vector_store %arg6[%c0_67, %c0_68], %218 {strides = array<i32>} : memref<4x96xf32, #tpu.memory_space<vmem>>, vector<4x96xf32>,
    return
  }
}

</mosaic_0001>

<bundles_post_ra>
// kernel: tile.8
= control target key start
LH: loop header
LB: loop body
LE: loop exit
PB: predicated region body
PF: predicated region fallthrough
CT: control target
= control target key end

     0   :  { %s696_s0 = inlined_call_operand.vmem [shape: f32[16,16], index: 0, kind: input, shape index: {}]   ;;  %s697_s1 = inlined_call_operand.vmem [shape: f32[6,16,6,16], index: 1, kind: output, shape index: {}]  }
   0x1   :  { %v4_v0 = vld [vmem:[%s696_s0] ss:$0 sm:$0xff]  ;;  %v245_v1 = vld [vmem:[%s696_s0 + $0x1] ss:$0 sm:$0xff]  ;;  %v252_v2 = vld [vmem:[%s696_s0 + $0x2] ss:$0 sm:$0xff] }
   0x2   :  { %5 = vst [vmem:[%s697_s1] sm:$0xff] %v4_v0  ;;  %240 = vst [vmem:[%s697_s1 + $0x80] sm:$0xff] %v4_v0  ;;  %v259_v3 = vld [vmem:[%s696_s0 + $0x3] ss:$0 sm:$0xff]  ;;  %v266_v4 = vld [vmem:[%s696_s0 + $0x4] ss:$0 sm:$0xff] }
   0x3   :  { %241 = vst [vmem:[%s697_s1 + $0x100] sm:$0xff] %v4_v0  ;;  %242 = vst [vmem:[%s697_s1 + $0x180] sm:$0xff] %v4_v0  ;;  %v273_v5 = vld [vmem:[%s696_s0 + $0x5] ss:$0 sm:$0xff]  ;;  %v280_v6 = vld [vmem:[%s696_s0 + $0x6] ss:$0 sm:$0xff] }
   0x4   :  { %243 = vst [vmem:[%s697_s1 + $0x200] sm:$0xff] %v4_v0  ;;  %244 = vst [vmem:[%s697_s1 + $0x280] sm:$0xff] %v4_v0  ;;  %v287_v7 = vld [vmem:[%s696_s0 + $0x7] ss:$0 sm:$0xff]  ;;  %v294_v8 = vld [vmem:[%s696_s0 + $0x8] ss:$0 sm:$0xff] }
   0x5   :  { %246 = vst [vmem:[%s697_s1 + $0x8] sm:$0xff] %v245_v1  ;;  %247 = vst [vmem:[%s697_s1 + $0x88] sm:$0xff] %v245_v1  ;;  %v301_v9 = vld [vmem:[%s696_s0 + $0x9] ss:$0 sm:$0xff]  ;;  %v308_v10 = vld [vmem:[%s696_s0 + $0xa] ss:$0 sm:$0xff] }
   0x6   :  { %248 = vst [vmem:[%s697_s1 + $0x108] sm:$0xff] %v245_v1  ;;  %249 = vst [vmem:[%s697_s1 + $0x188] sm:$0xff] %v245_v1  ;;  %v315_v11 = vld [vmem:[%s696_s0 + $0xb] ss:$0 sm:$0xff]  ;;  %v322_v12 = vld [vmem:[%s696_s0 + $0xc] ss:$0 sm:$0xff] }
   0x7   :  { %250 = vst [vmem:[%s697_s1 + $0x208] sm:$0xff] %v245_v1  ;;  %251 = vst [vmem:[%s697_s1 + $0x288] sm:$0xff] %v245_v1  ;;  %v329_v13 = vld [vmem:[%s696_s0 + $0xd] ss:$0 sm:$0xff]  ;;  %v336_v14 = vld [vmem:[%s696_s0 + $0xe] ss:$0 sm:$0xff] }
   0x8   :  { %253 = vst [vmem:[%s697_s1 + $0x10] sm:$0xff] %v252_v2  ;;  %254 = vst [vmem:[%s697_s1 + $0x90] sm:$0xff] %v252_v2  ;;  %v343_v15 = vld [vmem:[%s696_s0 + $0xf] ss:$0 sm:$0xff] }
   0x9   :  { %255 = vst [vmem:[%s697_s1 + $0x110] sm:$0xff] %v252_v2  ;;  %256 = vst [vmem:[%s697_s1 + $0x190] sm:$0xff] %v252_v2 }
   0xa   :  { %257 = vst [vmem:[%s697_s1 + $0x210] sm:$0xff] %v252_v2  ;;  %258 = vst [vmem:[%s697_s1 + $0x290] sm:$0xff] %v252_v2 }
   0xb   :  { %260 = vst [vmem:[%s697_s1 + $0x18] sm:$0xff] %v259_v3  ;;  %261 = vst [vmem:[%s697_s1 + $0x98] sm:$0xff] %v259_v3 }
   0xc   :  { %262 = vst [vmem:[%s697_s1 + $0x118] sm:$0xff] %v259_v3  ;;  %263 = vst [vmem:[%s697_s1 + $0x198] sm:$0xff] %v259_v3 }
   0xd   :  { %264 = vst [vmem:[%s697_s1 + $0x218] sm:$0xff] %v259_v3  ;;  %265 = vst [vmem:[%s697_s1 + $0x298] sm:$0xff] %v259_v3 }
   0xe   :  { %267 = vst [vmem:[%s697_s1 + $0x20] sm:$0xff] %v266_v4  ;;  %268 = vst [vmem:[%s697_s1 + $0xa0] sm:$0xff] %v266_v4 }
   0xf   :  { %269 = vst [vmem:[%s697_s1 + $0x120] sm:$0xff] %v266_v4  ;;  %270 = vst [vmem:[%s697_s1 + $0x1a0] sm:$0xff] %v266_v4 }
  0x10   :  { %271 = vst [vmem:[%s697_s1 + $0x220] sm:$0xff] %v266_v4  ;;  %272 = vst [vmem:[%s697_s1 + $0x2a0] sm:$0xff] %v266_v4 }
  0x11   :  { %274 = vst [vmem:[%s697_s1 + $0x28] sm:$0xff] %v273_v5  ;;  %275 = vst [vmem:[%s697_s1 + $0xa8] sm:$0xff] %v273_v5 }
  0x12   :  { %276 = vst [vmem:[%s697_s1 + $0x128] sm:$0xff] %v273_v5  ;;  %277 = vst [vmem:[%s697_s1 + $0x1a8] sm:$0xff] %v273_v5 }
  0x13   :  { %278 = vst [vmem:[%s697_s1 + $0x228] sm:$0xff] %v273_v5  ;;  %279 = vst [vmem:[%s697_s1 + $0x2a8] sm:$0xff] %v273_v5 }
  0x14   :  { %281 = vst [vmem:[%s697_s1 + $0x30] sm:$0xff] %v280_v6  ;;  %282 = vst [vmem:[%s697_s1 + $0xb0] sm:$0xff] %v280_v6 }
  0x15   :  { %283 = vst [vmem:[%s697_s1 + $0x130] sm:$0xff] %v280_v6  ;;  %284 = vst [vmem:[%s697_s1 + $0x1b0] sm:$0xff] %v280_v6 }
  0x16   :  { %285 = vst [vmem:[%s697_s1 + $0x230] sm:$0xff] %v280_v6  ;;  %286 = vst [vmem:[%s697_s1 + $0x2b0] sm:$0xff] %v280_v6 }
  0x17   :  { %288 = vst [vmem:[%s697_s1 + $0x38] sm:$0xff] %v287_v7  ;;  %289 = vst [vmem:[%s697_s1 + $0xb8] sm:$0xff] %v287_v7 }
  0x18   :  { %290 = vst [vmem:[%s697_s1 + $0x138] sm:$0xff] %v287_v7  ;;  %291 = vst [vmem:[%s697_s1 + $0x1b8] sm:$0xff] %v287_v7 }
  0x19   :  { %292 = vst [vmem:[%s697_s1 + $0x238] sm:$0xff] %v287_v7  ;;  %293 = vst [vmem:[%s697_s1 + $0x2b8] sm:$0xff] %v287_v7 }
  0x1a   :  { %295 = vst [vmem:[%s697_s1 + $0x40] sm:$0xff] %v294_v8  ;;  %296 = vst [vmem:[%s697_s1 + $0xc0] sm:$0xff] %v294_v8 }
  0x1b   :  { %297 = vst [vmem:[%s697_s1 + $0x140] sm:$0xff] %v294_v8  ;;  %298 = vst [vmem:[%s697_s1 + $0x1c0] sm:$0xff] %v294_v8 }
  0x1c   :  { %299 = vst [vmem:[%s697_s1 + $0x240] sm:$0xff] %v294_v8  ;;  %300 = vst [vmem:[%s697_s1 + $0x2c0] sm:$0xff] %v294_v8 }
  0x1d   :  { %302 = vst [vmem:[%s697_s1 + $0x48] sm:$0xff] %v301_v9  ;;  %303 = vst [vmem:[%s697_s1 + $0xc8] sm:$0xff] %v301_v9 }
  0x1e   :  { %304 = vst [vmem:[%s697_s1 + $0x148] sm:$0xff] %v301_v9  ;;  %305 = vst [vmem:[%s697_s1 + $0x1c8] sm:$0xff] %v301_v9 }
  0x1f   :  { %306 = vst [vmem:[%s697_s1 + $0x248] sm:$0xff] %v301_v9  ;;  %307 = vst [vmem:[%s697_s1 + $0x2c8] sm:$0xff] %v301_v9 }
  0x20   :  { %309 = vst [vmem:[%s697_s1 + $0x50] sm:$0xff] %v308_v10  ;;  %310 = vst [vmem:[%s697_s1 + $0xd0] sm:$0xff] %v308_v10 }
  0x21   :  { %311 = vst [vmem:[%s697_s1 + $0x150] sm:$0xff] %v308_v10  ;;  %312 = vst [vmem:[%s697_s1 + $0x1d0] sm:$0xff] %v308_v10 }
  0x22   :  { %313 = vst [vmem:[%s697_s1 + $0x250] sm:$0xff] %v308_v10  ;;  %314 = vst [vmem:[%s697_s1 + $0x2d0] sm:$0xff] %v308_v10 }
  0x23   :  { %316 = vst [vmem:[%s697_s1 + $0x58] sm:$0xff] %v315_v11  ;;  %317 = vst [vmem:[%s697_s1 + $0xd8] sm:$0xff] %v315_v11 }
  0x24   :  { %318 = vst [vmem:[%s697_s1 + $0x158] sm:$0xff] %v315_v11  ;;  %319 = vst [vmem:[%s697_s1 + $0x1d8] sm:$0xff] %v315_v11 }
  0x25   :  { %320 = vst [vmem:[%s697_s1 + $0x258] sm:$0xff] %v315_v11  ;;  %321 = vst [vmem:[%s697_s1 + $0x2d8] sm:$0xff] %v315_v11 }
  0x26   :  { %323 = vst [vmem:[%s697_s1 + $0x60] sm:$0xff] %v322_v12  ;;  %324 = vst [vmem:[%s697_s1 + $0xe0] sm:$0xff] %v322_v12 }
  0x27   :  { %325 = vst [vmem:[%s697_s1 + $0x160] sm:$0xff] %v322_v12  ;;  %326 = vst [vmem:[%s697_s1 + $0x1e0] sm:$0xff] %v322_v12 }
  0x28   :  { %327 = vst [vmem:[%s697_s1 + $0x260] sm:$0xff] %v322_v12  ;;  %328 = vst [vmem:[%s697_s1 + $0x2e0] sm:$0xff] %v322_v12 }
  0x29   :  { %330 = vst [vmem:[%s697_s1 + $0x68] sm:$0xff] %v329_v13  ;;  %331 = vst [vmem:[%s697_s1 + $0xe8] sm:$0xff] %v329_v13 }
  0x2a   :  { %332 = vst [vmem:[%s697_s1 + $0x168] sm:$0xff] %v329_v13  ;;  %333 = vst [vmem:[%s697_s1 + $0x1e8] sm:$0xff] %v329_v13 }
  0x2b   :  { %334 = vst [vmem:[%s697_s1 + $0x268] sm:$0xff] %v329_v13  ;;  %335 = vst [vmem:[%s697_s1 + $0x2e8] sm:$0xff] %v329_v13 }
  0x2c   :  { %337 = vst [vmem:[%s697_s1 + $0x70] sm:$0xff] %v336_v14  ;;  %338 = vst [vmem:[%s697_s1 + $0xf0] sm:$0xff] %v336_v14 }
  0x2d   :  { %339 = vst [vmem:[%s697_s1 + $0x170] sm:$0xff] %v336_v14  ;;  %340 = vst [vmem:[%s697_s1 + $0x1f0] sm:$0xff] %v336_v14 }
  0x2e   :  { %341 = vst [vmem:[%s697_s1 + $0x270] sm:$0xff] %v336_v14  ;;  %342 = vst [vmem:[%s697_s1 + $0x2f0] sm:$0xff] %v336_v14 }
  0x2f   :  { %344 = vst [vmem:[%s697_s1 + $0x78] sm:$0xff] %v343_v15  ;;  %345 = vst [vmem:[%s697_s1 + $0xf8] sm:$0xff] %v343_v15 }
  0x30   :  { %346 = vst [vmem:[%s697_s1 + $0x178] sm:$0xff] %v343_v15  ;;  %347 = vst [vmem:[%s697_s1 + $0x1f8] sm:$0xff] %v343_v15 }
  0x31   :  { %348 = vst [vmem:[%s697_s1 + $0x278] sm:$0xff] %v343_v15  ;;  %349 = vst [vmem:[%s697_s1 + $0x2f8] sm:$0xff] %v343_v15 }

// kernel: tile.9
= control target key start
LH: loop header
LB: loop body
LE: loop exit
PB: predicated region body
PF: predicated region fallthrough
CT: control target
= control target key end

     0   :  { %vm4_vm0 = vcmask 1047556   ;;  %s975_s14 = smov 80   ;;  %s976_s13 = smov 64   ;;  %vm6_vm1 = vcmask 130048   ;;  %vm115_vm2 = vcmask 786048   ;;  %vm246_vm3 = vcmask 654848   ;;  %s1842_s0 = inlined_call_operand.vmem [shape: f32[6,16,6,16], index: 0, kind: input, shape index: {}]   ;;  %s1843_s1 = inlined_call_operand.vmem [shape: f32[96,96], index: 1, kind: output, shape index: {}]  }
   0x1   :  { %v800_v0 = vld [vmem:[%s1842_s0 + $0x205] ss:$8 sm:$0xf]   ;;  %v832_v36 = vld [vmem:[%s1842_s0 + $0x104] ss:$8 sm:$0xf]  }
   0x2   :  { %v801_v1 = vld [vmem:[%s1842_s0 + $0x205] ss:$8 sm:$0xf0]   ;;  %v833_v37 = vld [vmem:[%s1842_s0 + $0x104] ss:$8 sm:$0xf0]  }
   0x3   :  { %v133_v2 = vsel %vm4_vm0, %v801_v1, %v800_v0  ;;  %v795_v3 = vld [vmem:[%s1842_s0 + $0x5] ss:$8 sm:$0xf]   ;;  %v830_v38 = vld [vmem:[%s1842_s0 + $0x4] ss:$8 sm:$0xf]   ;;  %v253_v40 = vsel %vm4_vm0, %v833_v37, %v832_v36 }
   0x4   :  { %v796_v4 = vld [vmem:[%s1842_s0 + $0x5] ss:$8 sm:$0xf0]   ;;  %134 = vrot.lane.b32.xlu1 %v133_v2, %s975_s14  ;;  %v831_v39 = vld [vmem:[%s1842_s0 + $0x4] ss:$8 sm:$0xf0]  }
   0x5   :  { %v112_v5 = vsel %vm4_vm0, %v796_v4, %v795_v3  ;;  %v803_v6 = vld [vmem:[%s1842_s0 + $0x45] ss:$8 sm:$0xf]   ;;  %v243_v41 = vsel %vm4_vm0, %v831_v39, %v830_v38  ;;  %v838_v42 = vld [vmem:[%s1842_s0 + $0x44] ss:$8 sm:$0xf]  }
   0x6   :  { %v804_v7 = vld [vmem:[%s1842_s0 + $0x45] ss:$8 sm:$0xf0]   ;;  %113 = vrot.lane.b32.xlu0 %v112_v5, %s975_s14  ;;  %v839_v43 = vld [vmem:[%s1842_s0 + $0x44] ss:$8 sm:$0xf0]  }
   0x7   :  { %v144_v8 = vsel %vm4_vm0, %v804_v7, %v803_v6  ;;  %v797_v9 = vld [vmem:[%s1842_s0 + $0x105] ss:$8 sm:$0xf]   ;;  %v835_v44 = vld [vmem:[%s1842_s0 + $0x204] ss:$8 sm:$0xf]   ;;  %v275_v46 = vsel %vm4_vm0, %v839_v43, %v838_v42 }
   0x8   :  { %v798_v10 = vld [vmem:[%s1842_s0 + $0x105] ss:$8 sm:$0xf0]   ;;  %145 = vrot.lane.b32.xlu1 %v144_v8, %s975_s14  ;;  %v836_v45 = vld [vmem:[%s1842_s0 + $0x204] ss:$8 sm:$0xf0]  }
   0x9   :  { %v122_v11 = vsel %vm4_vm0, %v798_v10, %v797_v9  ;;  %v809_v12 = vld [vmem:[%s1842_s0 + $0x245] ss:$8 sm:$0xf]   ;;  %v264_v47 = vsel %vm4_vm0, %v836_v45, %v835_v44  ;;  %v844_v48 = vld [vmem:[%s1842_s0 + $0x244] ss:$8 sm:$0xf]  }
   0xa   :  { %v810_v13 = vld [vmem:[%s1842_s0 + $0x245] ss:$8 sm:$0xf0]   ;;  %123 = vrot.lane.b32.xlu0 %v122_v11, %s975_s14  ;;  %v845_v49 = vld [vmem:[%s1842_s0 + $0x244] ss:$8 sm:$0xf0]  }
   0xb   :  { %v806_v14 = vld [vmem:[%s1842_s0 + $0x145] ss:$8 sm:$0xf]   ;;  %v166_v16 = vsel %vm4_vm0, %v810_v13, %v809_v12  ;;  %v841_v50 = vld [vmem:[%s1842_s0 + $0x144] ss:$8 sm:$0xf]   ;;  %v297_v52 = vsel %vm4_vm0, %v845_v49, %v844_v48 }
   0xc   :  { %v807_v15 = vld [vmem:[%s1842_s0 + $0x145] ss:$8 sm:$0xf0]   ;;  %167 = vrot.lane.b32.xlu1 %v166_v16, %s975_s14  ;;  %v842_v51 = vld [vmem:[%s1842_s0 + $0x144] ss:$8 sm:$0xf0]  }
   0xd   :  { %v155_v17 = vsel %vm4_vm0, %v807_v15, %v806_v14  ;;  %v815_v18 = vld [vmem:[%s1842_s0 + $0x185] ss:$8 sm:$0xf]   ;;  %v286_v53 = vsel %vm4_vm0, %v842_v51, %v841_v50  ;;  %v850_v54 = vld [vmem:[%s1842_s0 + $0x184] ss:$8 sm:$0xf]  }
   0xe   :  { %v816_v19 = vld [vmem:[%s1842_s0 + $0x185] ss:$8 sm:$0xf0]   ;;  %156 = vrot.lane.b32.xlu0 %v155_v17, %s975_s14  ;;  %v851_v55 = vld [vmem:[%s1842_s0 + $0x184] ss:$8 sm:$0xf0]  }
   0xf   :  { %v812_v20 = vld [vmem:[%s1842_s0 + $0x85] ss:$8 sm:$0xf]   ;;  %v188_v22 = vsel %vm4_vm0, %v816_v19, %v815_v18  ;;  %v847_v56 = vld [vmem:[%s1842_s0 + $0x84] ss:$8 sm:$0xf]   ;;  %v319_v58 = vsel %vm4_vm0, %v851_v55, %v850_v54 }
  0x10   :  { %v813_v21 = vld [vmem:[%s1842_s0 + $0x85] ss:$8 sm:$0xf0]   ;;  %189 = vrot.lane.b32.xlu1 %v188_v22, %s975_s14  ;;  %v848_v57 = vld [vmem:[%s1842_s0 + $0x84] ss:$8 sm:$0xf0]  }
  0x11   :  { %v177_v23 = vsel %vm4_vm0, %v813_v21, %v812_v20  ;;  %v821_v24 = vld [vmem:[%s1842_s0 + $0xc5] ss:$8 sm:$0xf]   ;;  %v308_v59 = vsel %vm4_vm0, %v848_v57, %v847_v56  ;;  %v856_v60 = vld [vmem:[%s1842_s0 + $0xc4] ss:$8 sm:$0xf]  }
  0x12   :  { %v822_v25 = vld [vmem:[%s1842_s0 + $0xc5] ss:$8 sm:$0xf0]   ;;  %178 = vrot.lane.b32.xlu0 %v177_v23, %s975_s14  ;;  %v857_v61 = vld [vmem:[%s1842_s0 + $0xc4] ss:$8 sm:$0xf0]  }
  0x13   :  { %v818_v26 = vld [vmem:[%s1842_s0 + $0x285] ss:$8 sm:$0xf]   ;;  %v210_v28 = vsel %vm4_vm0, %v822_v25, %v821_v24  ;;  %v853_v62 = vld [vmem:[%s1842_s0 + $0x284] ss:$8 sm:$0xf]   ;;  %v341_v0 = vsel %vm4_vm0, %v857_v61, %v856_v60 }
  0x14   :  { %v819_v27 = vld [vmem:[%s1842_s0 + $0x285] ss:$8 sm:$0xf0]   ;;  %211 = vrot.lane.b32.xlu1 %v210_v28, %s975_s14  ;;  %v854_v63 = vld [vmem:[%s1842_s0 + $0x284] ss:$8 sm:$0xf0]  }
  0x15   :  { %v199_v29 = vsel %vm4_vm0, %v819_v27, %v818_v26  ;;  %v827_v30 = vld [vmem:[%s1842_s0 + $0x2c5] ss:$8 sm:$0xf]   ;;  %v330_v1 = vsel %vm4_vm0, %v854_v63, %v853_v62  ;;  %v862_v2 = vld [vmem:[%s1842_s0 + $0x2c4] ss:$8 sm:$0xf]  }
  0x16   :  { %v828_v31 = vld [vmem:[%s1842_s0 + $0x2c5] ss:$8 sm:$0xf0]   ;;  %200 = vrot.lane.b32.xlu0 %v199_v29, %s975_s14  ;;  %v863_v3 = vld [vmem:[%s1842_s0 + $0x2c4] ss:$8 sm:$0xf0]  }
  0x17   :  { %v824_v32 = vld [vmem:[%s1842_s0 + $0x1c5] ss:$8 sm:$0xf]   ;;  %v232_v34 = vsel %vm4_vm0, %v828_v31, %v827_v30  ;;  %v859_v4 = vld [vmem:[%s1842_s0 + $0x1c4] ss:$8 sm:$0xf]   ;;  %v363_v6 = vsel %vm4_vm0, %v863_v3, %v862_v2 }
  0x18   :  { %v825_v33 = vld [vmem:[%s1842_s0 + $0x1c5] ss:$8 sm:$0xf0]   ;;  %233 = vrot.lane.b32.xlu1 %v232_v34, %s975_s14  ;;  %v860_v5 = vld [vmem:[%s1842_s0 + $0x1c4] ss:$8 sm:$0xf0]  }
  0x19   :  { %v221_v35 = vsel %vm4_vm0, %v825_v33, %v824_v32  ;;  %v352_v7 = vsel %vm4_vm0, %v860_v5, %v859_v4  ;;  %v867_v8 = vld [vmem:[%s1842_s0 + $0x103] ss:$8 sm:$0xf]   ;;  %s977_s5 = smov 48   ;;  %s978_s10 = smov 32   ;;  %vm377_vm4 = vcmask 523648  }
  0x1a   :  { %222 = vrot.lane.b32.xlu0 %v221_v35, %s975_s14  ;;  %v868_v9 = vld [vmem:[%s1842_s0 + $0x103] ss:$8 sm:$0xf0]   ;;  %v783_v33 = vld [vmem:[%s1842_s0 + $0x200] ss:$8 sm:$0xf]  }
  0x1b   :  { %v865_v10 = vld [vmem:[%s1842_s0 + $0x3] ss:$8 sm:$0xf]   ;;  %v384_v12 = vsel %vm4_vm0, %v868_v9, %v867_v8  ;;  %v784_v34 = vld [vmem:[%s1842_s0 + $0x200] ss:$8 sm:$0xf0]  }
  0x1c   :  { %254 = vrot.lane.b32.xlu1 %v253_v40, %s976_s13  ;;  %v866_v11 = vld [vmem:[%s1842_s0 + $0x3] ss:$8 sm:$0xf0]   ;;  %v76_v36 = vsel %vm4_vm0, %v784_v34, %v783_v33  ;;  %v2_v37 = vld [vmem:[%s1842_s0] ss:$8 sm:$0xf]  }
  0x1d   :  { %v374_v13 = vsel %vm4_vm0, %v866_v11, %v865_v10  ;;  %v873_v14 = vld [vmem:[%s1842_s0 + $0x43] ss:$8 sm:$0xf]   ;;  %v3_v38 = vld [vmem:[%s1842_s0] ss:$8 sm:$0xf0]  }
  0x1e   :  { %244 = vrot.lane.b32.xlu0 %v243_v41, %s976_s13  ;;  %v874_v15 = vld [vmem:[%s1842_s0 + $0x43] ss:$8 sm:$0xf0]   ;;  %785 = vst.msk [vmem:[%s1843_s1 + $0x40] sm:$0xff] %vm6_vm1, %v76_v36   ;;  %v5_v41 = vsel %vm4_vm0, %v3_v38, %v2_v37  ;;  %s979_s3 = smov 16   ;;  %vm508_vm5 = vcmask 392448  }
  0x1f   :  { %v870_v16 = vld [vmem:[%s1842_s0 + $0x203] ss:$8 sm:$0xf]   ;;  %v406_v18 = vsel %vm4_vm0, %v874_v15, %v873_v14  ;;  %7 = vst.msk [vmem:[%s1843_s1] sm:$0xff] %vm6_vm1, %v5_v41   ;;  %vm639_vm6 = vcmask 261248  }
  0x20   :  { %276 = vrot.lane.b32.xlu1 %v275_v46, %s976_s13  ;;  %v871_v17 = vld [vmem:[%s1842_s0 + $0x203] ss:$8 sm:$0xf0]   ;;  %v763_v48 = vld [vmem:[%s1842_s0 + $0x40] ss:$8 sm:$0xf0]  }
  0x21   :  { %v395_v19 = vsel %vm4_vm0, %v871_v17, %v870_v16  ;;  %v879_v20 = vld [vmem:[%s1842_s0 + $0x243] ss:$8 sm:$0xf]   ;;  %v771_v51 = vld [vmem:[%s1842_s0 + $0x100] ss:$8 sm:$0xf]  }
  0x22   :  { %265 = vrot.lane.b32.xlu0 %v264_v47, %s976_s13  ;;  %v880_v21 = vld [vmem:[%s1842_s0 + $0x243] ss:$8 sm:$0xf0]   ;;  %v762_v47 = vld [vmem:[%s1842_s0 + $0x40] ss:$8 sm:$0xf]  }
  0x23   :  { %v876_v22 = vld [vmem:[%s1842_s0 + $0x143] ss:$8 sm:$0xf]   ;;  %v428_v24 = vsel %vm4_vm0, %v880_v21, %v879_v20  ;;  %v13_v50 = vsel %vm4_vm0, %v763_v48, %v762_v47  ;;  %v786_v54 = vld [vmem:[%s1842_s0 + $0x240] ss:$8 sm:$0xf]  }
  0x24   :  { %298 = vrot.lane.b32.xlu1 %v297_v52, %s976_s13  ;;  %v877_v23 = vld [vmem:[%s1842_s0 + $0x143] ss:$8 sm:$0xf0]   ;;  %v772_v52 = vld [vmem:[%s1842_s0 + $0x100] ss:$8 sm:$0xf0]  }
  0x25   :  { %v417_v25 = vsel %vm4_vm0, %v877_v23, %v876_v22  ;;  %v885_v26 = vld [vmem:[%s1842_s0 + $0x183] ss:$8 sm:$0xf]   ;;  %764 = vst.msk [vmem:[%s1843_s1 + $0x8] sm:$0xff] %vm6_vm1, %v13_v50  }
  0x26   :  { %287 = vrot.lane.b32.xlu0 %v286_v53, %s976_s13  ;;  %v886_v27 = vld [vmem:[%s1842_s0 + $0x183] ss:$8 sm:$0xf0]   ;;  %v40_v53 = vsel %vm4_vm0, %v772_v52, %v771_v51  ;;  %v787_v55 = vld [vmem:[%s1842_s0 + $0x240] ss:$8 sm:$0xf0]  }
  0x27   :  { %v882_v28 = vld [vmem:[%s1842_s0 + $0x83] ss:$8 sm:$0xf]   ;;  %v450_v32 = vsel %vm4_vm0, %v886_v27, %v885_v26  ;;  %v902_v56 = vld [vmem:[%s1842_s0 + $0x102] ss:$8 sm:$0xf]  }
  0x28   :  { %320 = vrot.lane.b32.xlu1 %v319_v58, %s976_s13  ;;  %v883_v29 = vld [vmem:[%s1842_s0 + $0x83] ss:$8 sm:$0xf0]   ;;  %v903_v57 = vld [vmem:[%s1842_s0 + $0x102] ss:$8 sm:$0xf0]   ;;  %v85_v58 = vsel %vm4_vm0, %v787_v55, %v786_v54 }
  0x29   :  { %v891_v30 = vld [vmem:[%s1842_s0 + $0xc3] ss:$8 sm:$0xf]   ;;  %v439_v35 = vsel %vm4_vm0, %v883_v29, %v882_v28  ;;  %773 = vst.msk [vmem:[%s1843_s1 + $0x20] sm:$0xff] %vm6_vm1, %v40_v53   ;;  %788 = vst.msk [vmem:[%s1843_s1 + $0x48] sm:$0xff] %vm6_vm1, %v85_v58   ;;  %v515_v15 = vsel %vm4_vm0, %v903_v57, %v902_v56 }
  0x2a   :  { %309 = vrot.lane.b32.xlu0 %v308_v59, %s976_s13  ;;  %v892_v31 = vld [vmem:[%s1842_s0 + $0xc3] ss:$8 sm:$0xf0]   ;;  %v774_v59 = vld [vmem:[%s1842_s0 + $0x140] ss:$8 sm:$0xf]  }
  0x2b   :  { %v888_v39 = vld [vmem:[%s1842_s0 + $0x283] ss:$8 sm:$0xf]   ;;  %v472_v44 = vsel %vm4_vm0, %v892_v31, %v891_v30  ;;  %v775_v60 = vld [vmem:[%s1842_s0 + $0x140] ss:$8 sm:$0xf0]  }
  0x2c   :  { %342 = vrot.lane.b32.xlu1 %v341_v0, %s976_s13  ;;  %v889_v40 = vld [vmem:[%s1842_s0 + $0x283] ss:$8 sm:$0xf0]   ;;  %v900_v62 = vld [vmem:[%s1842_s0 + $0x2] ss:$8 sm:$0xf]   ;;  %v49_v0 = vsel %vm4_vm0, %v775_v60, %v774_v59 }
  0x2d   :  { %v897_v42 = vld [vmem:[%s1842_s0 + $0x2c3] ss:$8 sm:$0xf]   ;;  %v461_v49 = vsel %vm4_vm0, %v889_v40, %v888_v39  ;;  %v901_v63 = vld [vmem:[%s1842_s0 + $0x2] ss:$8 sm:$0xf0]  }
  0x2e   :  { %331 = vrot.lane.b32.xlu0 %v330_v1, %s976_s13  ;;  %v898_v43 = vld [vmem:[%s1842_s0 + $0x2c3] ss:$8 sm:$0xf0]   ;;  %v777_v1 = vld [vmem:[%s1842_s0 + $0x180] ss:$8 sm:$0xf]  }
  0x2f   :  { %v894_v45 = vld [vmem:[%s1842_s0 + $0x1c3] ss:$8 sm:$0xf]   ;;  %v494_v61 = vsel %vm4_vm0, %v898_v43, %v897_v42  ;;  %v778_v2 = vld [vmem:[%s1842_s0 + $0x180] ss:$8 sm:$0xf0]  }
  0x30   :  { %364 = vrot.lane.b32.xlu1 %v363_v6, %s976_s13  ;;  %v895_v46 = vld [vmem:[%s1842_s0 + $0x1c3] ss:$8 sm:$0xf0]   ;;  %776 = vst.msk [vmem:[%s1843_s1 + $0x28] sm:$0xff] %vm6_vm1, %v49_v0   ;;  %v58_v4 = vsel %vm4_vm0, %v778_v2, %v777_v1 }
  0x31   :  { %v483_v3 = vsel %vm4_vm0, %v895_v46, %v894_v45  ;;  %v765_v5 = vld [vmem:[%s1842_s0 + $0x80] ss:$8 sm:$0xf]   ;;  %779 = vst.msk [vmem:[%s1843_s1 + $0x30] sm:$0xff] %vm6_vm1, %v58_v4  }
  0x32   :  { %353 = vrot.lane.b32.xlu0 %v352_v7, %s976_s13  ;;  %v766_v6 = vld [vmem:[%s1842_s0 + $0x80] ss:$8 sm:$0xf0]   ;;  %v908_v10 = vld [vmem:[%s1842_s0 + $0x42] ss:$8 sm:$0xf]  }
  0x33   :  { %v22_v7 = vsel %vm4_vm0, %v766_v6, %v765_v5  ;;  %v768_v8 = vld [vmem:[%s1842_s0 + $0xc0] ss:$8 sm:$0xf]   ;;  %v909_v11 = vld [vmem:[%s1842_s0 + $0x42] ss:$8 sm:$0xf0]  }
  0x34   :  { %385 = vrot.lane.b32.xlu1 %v384_v12, %s977_s5  ;;  %v769_v9 = vld [vmem:[%s1842_s0 + $0xc0] ss:$8 sm:$0xf0]   ;;  %767 = vst.msk [vmem:[%s1843_s1 + $0x10] sm:$0xff] %vm6_vm1, %v22_v7   ;;  %v537_v26 = vsel %vm4_vm0, %v909_v11, %v908_v10 }
  0x35   :  { %v31_v12 = vsel %vm4_vm0, %v769_v9, %v768_v8  ;;  %v790_v14 = vld [vmem:[%s1842_s0 + $0x280] ss:$8 sm:$0xf0]   ;;  %v905_v23 = vld [vmem:[%s1842_s0 + $0x202] ss:$8 sm:$0xf]  }
  0x36   :  { %375 = vrot.lane.b32.xlu0 %v374_v13, %s977_s5  ;;  %v789_v13 = vld [vmem:[%s1842_s0 + $0x280] ss:$8 sm:$0xf]   ;;  %770 = vst.msk [vmem:[%s1843_s1 + $0x18] sm:$0xff] %vm6_vm1, %v31_v12  }
  0x37   :  { %v94_v16 = vsel %vm4_vm0, %v790_v14, %v789_v13  ;;  %v792_v17 = vld [vmem:[%s1842_s0 + $0x2c0] ss:$8 sm:$0xf]   ;;  %v914_v28 = vld [vmem:[%s1842_s0 + $0x242] ss:$8 sm:$0xf]  }
  0x38   :  { %407 = vrot.lane.b32.xlu1 %v406_v18, %s977_s5  ;;  %v793_v18 = vld [vmem:[%s1842_s0 + $0x2c0] ss:$8 sm:$0xf0]   ;;  %791 = vst.msk [vmem:[%s1843_s1 + $0x50] sm:$0xff] %vm6_vm1, %v94_v16  }
  0x39   :  { %v103_v20 = vsel %vm4_vm0, %v793_v18, %v792_v17  ;;  %v780_v21 = vld [vmem:[%s1842_s0 + $0x1c0] ss:$8 sm:$0xf]   ;;  %v915_v29 = vld [vmem:[%s1842_s0 + $0x242] ss:$8 sm:$0xf0]  }
  0x3a   :  { %396 = vrot.lane.b32.xlu0 %v395_v19, %s977_s5  ;;  %v505_v19 = vsel %vm4_vm0, %v901_v63, %v900_v62  ;;  %v781_v22 = vld [vmem:[%s1842_s0 + $0x1c0] ss:$8 sm:$0xf0]   ;;  %794 = vst.msk [vmem:[%s1843_s1 + $0x58] sm:$0xff] %vm6_vm1, %v103_v20  }
  0x3b   :  { %v911_v30 = vld [vmem:[%s1842_s0 + $0x142] ss:$8 sm:$0xf]   ;;  %v937_v52 = vld [vmem:[%s1842_s0 + $0x101] ss:$8 sm:$0xf]  }
  0x3c   :  { %429 = vrot.lane.b32.xlu1 %v428_v24, %s977_s5  ;;  %v906_v24 = vld [vmem:[%s1842_s0 + $0x202] ss:$8 sm:$0xf0]   ;;  %v938_v53 = vld [vmem:[%s1842_s0 + $0x101] ss:$8 sm:$0xf0]  }
  0x3d   :  { %v526_v27 = vsel %vm4_vm0, %v906_v24, %v905_v23  ;;  %v912_v31 = vld [vmem:[%s1842_s0 + $0x142] ss:$8 sm:$0xf0]   ;;  %v935_v54 = vld [vmem:[%s1842_s0 + $0x1] ss:$8 sm:$0xf]   ;;  %v646_v56 = vsel %vm4_vm0, %v938_v53, %v937_v52 }
  0x3e   :  { %418 = vrot.lane.b32.xlu0 %v417_v25, %s977_s5  ;;  %v67_v25 = vsel %vm4_vm0, %v781_v22, %v780_v21  ;;  %v548_v33 = vsel %vm4_vm0, %v912_v31, %v911_v30  ;;  %v920_v34 = vld [vmem:[%s1842_s0 + $0x182] ss:$8 sm:$0xf]   ;;  %v936_v55 = vld [vmem:[%s1842_s0 + $0x1] ss:$8 sm:$0xf0]  }
  0x3f   :  { %782 = vst.msk [vmem:[%s1843_s1 + $0x38] sm:$0xff] %vm6_vm1, %v67_v25   ;;  %v917_v36 = vld [vmem:[%s1842_s0 + $0x82] ss:$8 sm:$0xf]   ;;  %v636_v57 = vsel %vm4_vm0, %v936_v55, %v935_v54 }
  0x40   :  { %451 = vrot.lane.b32.xlu1 %v450_v32, %s977_s5  ;;  %v559_v32 = vsel %vm4_vm0, %v915_v29, %v914_v28  ;;  %v918_v37 = vld [vmem:[%s1842_s0 + $0x82] ss:$8 sm:$0xf0]   ;;  %v943_v58 = vld [vmem:[%s1842_s0 + $0x41] ss:$8 sm:$0xf]  }
  0x41   :  { %v570_v39 = vsel %vm4_vm0, %v918_v37, %v917_v36  ;;  %v926_v40 = vld [vmem:[%s1842_s0 + $0xc2] ss:$8 sm:$0xf]   ;;  %v944_v59 = vld [vmem:[%s1842_s0 + $0x41] ss:$8 sm:$0xf0]  }
  0x42   :  { %440 = vrot.lane.b32.xlu0 %v439_v35, %s977_s5  ;;  %v921_v35 = vld [vmem:[%s1842_s0 + $0x182] ss:$8 sm:$0xf0]   ;;  %v940_v60 = vld [vmem:[%s1842_s0 + $0x201] ss:$8 sm:$0xf]   ;;  %v668_v62 = vsel %vm4_vm0, %v944_v59, %v943_v58 }
  0x43   :  { %v581_v38 = vsel %vm4_vm0, %v921_v35, %v920_v34  ;;  %v927_v41 = vld [vmem:[%s1842_s0 + $0xc2] ss:$8 sm:$0xf0]   ;;  %v949_v0 = vld [vmem:[%s1842_s0 + $0x241] ss:$8 sm:$0xf]  }
  0x44   :  { %473 = vrot.lane.b32.xlu1 %v472_v44, %s977_s5  ;;  %v923_v42 = vld [vmem:[%s1842_s0 + $0x282] ss:$8 sm:$0xf]   ;;  %v603_v44 = vsel %vm4_vm0, %v927_v41, %v926_v40  ;;  %v950_v1 = vld [vmem:[%s1842_s0 + $0x241] ss:$8 sm:$0xf0]  }
  0x45   :  { %v924_v43 = vld [vmem:[%s1842_s0 + $0x282] ss:$8 sm:$0xf0]   ;;  %v946_v2 = vld [vmem:[%s1842_s0 + $0x141] ss:$8 sm:$0xf]   ;;  %v690_v4 = vsel %vm4_vm0, %v950_v1, %v949_v0 }
  0x46   :  { %462 = vrot.lane.b32.xlu0 %v461_v49, %s977_s5  ;;  %v592_v45 = vsel %vm4_vm0, %v924_v43, %v923_v42  ;;  %v932_v46 = vld [vmem:[%s1842_s0 + $0x2c2] ss:$8 sm:$0xf]   ;;  %v955_v6 = vld [vmem:[%s1842_s0 + $0x181] ss:$8 sm:$0xf]  }
  0x47   :  { %v933_v47 = vld [vmem:[%s1842_s0 + $0x2c2] ss:$8 sm:$0xf0]   ;;  %v956_v7 = vld [vmem:[%s1842_s0 + $0x181] ss:$8 sm:$0xf0]  }
  0x48   :  { %495 = vrot.lane.b32.xlu1 %v494_v61, %s977_s5  ;;  %v929_v48 = vld [vmem:[%s1842_s0 + $0x1c2] ss:$8 sm:$0xf]   ;;  %v625_v50 = vsel %vm4_vm0, %v933_v47, %v932_v46  ;;  %v941_v61 = vld [vmem:[%s1842_s0 + $0x201] ss:$8 sm:$0xf0]   ;;  %v712_v10 = vsel %vm4_vm0, %v956_v7, %v955_v6 }
  0x49   :  { %v930_v49 = vld [vmem:[%s1842_s0 + $0x1c2] ss:$8 sm:$0xf0]   ;;  %v657_v63 = vsel %vm4_vm0, %v941_v61, %v940_v60  ;;  %v952_v8 = vld [vmem:[%s1842_s0 + $0x81] ss:$8 sm:$0xf]  }
  0x4a   :  { %484 = vrot.lane.b32.xlu0 %v483_v3, %s977_s5  ;;  %v614_v51 = vsel %vm4_vm0, %v930_v49, %v929_v48  ;;  %v947_v3 = vld [vmem:[%s1842_s0 + $0x141] ss:$8 sm:$0xf0]  }
  0x4b   :  { %v679_v5 = vsel %vm4_vm0, %v947_v3, %v946_v2  ;;  %v953_v9 = vld [vmem:[%s1842_s0 + $0x81] ss:$8 sm:$0xf0]  }
  0x4c   :  { %516 = vrot.lane.b32.xlu1 %v515_v15, %s978_s10  ;;  %v701_v11 = vsel %vm4_vm0, %v953_v9, %v952_v8  ;;  %v961_v12 = vld [vmem:[%s1842_s0 + $0xc1] ss:$8 sm:$0xf]  }
  0x4d   :  { %v962_v13 = vld [vmem:[%s1842_s0 + $0xc1] ss:$8 sm:$0xf0]  }
  0x4e   :  { %506 = vrot.lane.b32.xlu0 %v505_v19, %s978_s10  ;;  %v958_v14 = vld [vmem:[%s1842_s0 + $0x281] ss:$8 sm:$0xf]   ;;  %v734_v16 = vsel %vm4_vm0, %v962_v13, %v961_v12 }
  0x4f   :  { %v959_v15 = vld [vmem:[%s1842_s0 + $0x281] ss:$8 sm:$0xf0]  }
  0x50   :  { %538 = vrot.lane.b32.xlu1 %v537_v26, %s978_s10  ;;  %v723_v17 = vsel %vm4_vm0, %v959_v15, %v958_v14  ;;  %v967_v18 = vld [vmem:[%s1842_s0 + $0x2c1] ss:$8 sm:$0xf]  }
  0x51   :  { %v968_v19 = vld [vmem:[%s1842_s0 + $0x2c1] ss:$8 sm:$0xf0]  }
  0x52   :  { %527 = vrot.lane.b32.xlu0 %v526_v27, %s978_s10  ;;  %v964_v20 = vld [vmem:[%s1842_s0 + $0x1c1] ss:$8 sm:$0xf]   ;;  %v756_v22 = vsel %vm4_vm0, %v968_v19, %v967_v18 }
  0x53   :  { %v965_v21 = vld [vmem:[%s1842_s0 + $0x1c1] ss:$8 sm:$0xf0]  }
  0x54   :  { %560 = vrot.lane.b32.xlu1 %v559_v32, %s978_s10  ;;  %v745_v24 = vsel %vm4_vm0, %v965_v21, %v964_v20 }
  0x56   :  { %549 = vrot.lane.b32.xlu0 %v548_v33, %s978_s10 }
  0x58   :  { %582 = vrot.lane.b32.xlu1 %v581_v38, %s978_s10 }
  0x5a   :  { %571 = vrot.lane.b32.xlu0 %v570_v39, %s978_s10 }
  0x5c   :  { %604 = vrot.lane.b32.xlu1 %v603_v44, %s978_s10 }
  0x5e   :  { %593 = vrot.lane.b32.xlu0 %v592_v45, %s978_s10 }
  0x60   :  { %626 = vrot.lane.b32.xlu1 %v625_v50, %s978_s10 }
  0x62   :  { %615 = vrot.lane.b32.xlu0 %v614_v51, %s978_s10 }
  0x64   :  { %647 = vrot.lane.b32.xlu1 %v646_v56, %s979_s3 }
  0x66   :  { %637 = vrot.lane.b32.xlu0 %v636_v57, %s979_s3 }
  0x68   :  { %669 = vrot.lane.b32.xlu1 %v668_v62, %s979_s3 }
  0x6a   :  { %658 = vrot.lane.b32.xlu0 %v657_v63, %s979_s3 }
  0x6c   :  { %691 = vrot.lane.b32.xlu1 %v690_v4, %s979_s3 }
  0x6e   :  { %680 = vrot.lane.b32.xlu0 %v679_v5, %s979_s3 }
  0x70   :  { %713 = vrot.lane.b32.xlu1 %v712_v10, %s979_s3 }
  0x72   :  { %702 = vrot.lane.b32.xlu0 %v701_v11, %s979_s3 }
  0x74   :  { %735 = vrot.lane.b32.xlu1 %v734_v16, %s979_s3 }
  0x76   :  { %724 = vrot.lane.b32.xlu0 %v723_v17, %s979_s3  ;;  %v135_v23 = vpop.permute.xlu1 %134  }
  0x77   :  { %802 = vst.msk [vmem:[%s1843_s1 + $0x40] sm:$0xff] %vm115_vm2, %v135_v23  }
  0x78   :  { %v114_v25 = vpop.permute.xlu0 %113   ;;  %757 = vrot.lane.b32.xlu1 %v756_v22, %s979_s3 }
  0x79   :  { %116 = vst.msk [vmem:[%s1843_s1] sm:$0xff] %vm115_vm2, %v114_v25  }
  0x7a   :  { %746 = vrot.lane.b32.xlu0 %v745_v24, %s979_s3  ;;  %v146_v26 = vpop.permute.xlu1 %145  }
  0x7b   :  { %805 = vst.msk [vmem:[%s1843_s1 + $0x8] sm:$0xff] %vm115_vm2, %v146_v26  }
  0x7c   :  { %v124_v27 = vpop.permute.xlu0 %123  }
  0x7d   :  { %799 = vst.msk [vmem:[%s1843_s1 + $0x20] sm:$0xff] %vm115_vm2, %v124_v27  }
  0x7e   :  { %v168_v28 = vpop.permute.xlu1 %167  }
  0x7f   :  { %811 = vst.msk [vmem:[%s1843_s1 + $0x48] sm:$0xff] %vm115_vm2, %v168_v28  }
  0x80   :  { %v157_v29 = vpop.permute.xlu0 %156  }
  0x81   :  { %808 = vst.msk [vmem:[%s1843_s1 + $0x28] sm:$0xff] %vm115_vm2, %v157_v29  }
  0x82   :  { %v190_v30 = vpop.permute.xlu1 %189  }
  0x83   :  { %817 = vst.msk [vmem:[%s1843_s1 + $0x30] sm:$0xff] %vm115_vm2, %v190_v30  }
  0x84   :  { %v179_v31 = vpop.permute.xlu0 %178  }
  0x85   :  { %814 = vst.msk [vmem:[%s1843_s1 + $0x10] sm:$0xff] %vm115_vm2, %v179_v31  }
  0x86   :  { %v212_v32 = vpop.permute.xlu1 %211  }
  0x87   :  { %823 = vst.msk [vmem:[%s1843_s1 + $0x18] sm:$0xff] %vm115_vm2, %v212_v32  }
  0x88   :  { %v201_v33 = vpop.permute.xlu0 %200  }
  0x89   :  { %820 = vst.msk [vmem:[%s1843_s1 + $0x50] sm:$0xff] %vm115_vm2, %v201_v33  }
  0x8a   :  { %v234_v34 = vpop.permute.xlu1 %233  }
  0x8b   :  { %829 = vst.msk [vmem:[%s1843_s1 + $0x58] sm:$0xff] %vm115_vm2, %v234_v34  }
  0x8c   :  { %v223_v35 = vpop.permute.xlu0 %222  }
  0x8d   :  { %826 = vst.msk [vmem:[%s1843_s1 + $0x38] sm:$0xff] %vm115_vm2, %v223_v35  }
  0x8e   :  { %v255_v36 = vpop.permute.xlu1 %254  }
  0x8f   :  { %834 = vst.msk [vmem:[%s1843_s1 + $0x20] sm:$0xff] %vm246_vm3, %v255_v36  }
  0x90   :  { %v245_v37 = vpop.permute.xlu0 %244  }
  0x91   :  { %247 = vst.msk [vmem:[%s1843_s1] sm:$0xff] %vm246_vm3, %v245_v37  }
  0x92   :  { %v277_v38 = vpop.permute.xlu1 %276  }
  0x93   :  { %840 = vst.msk [vmem:[%s1843_s1 + $0x8] sm:$0xff] %vm246_vm3, %v277_v38  }
  0x94   :  { %v266_v39 = vpop.permute.xlu0 %265  }
  0x95   :  { %837 = vst.msk [vmem:[%s1843_s1 + $0x40] sm:$0xff] %vm246_vm3, %v266_v39  }
  0x96   :  { %v299_v40 = vpop.permute.xlu1 %298  }
  0x97   :  { %846 = vst.msk [vmem:[%s1843_s1 + $0x48] sm:$0xff] %vm246_vm3, %v299_v40  }
  0x98   :  { %v288_v41 = vpop.permute.xlu0 %287  }
  0x99   :  { %843 = vst.msk [vmem:[%s1843_s1 + $0x28] sm:$0xff] %vm246_vm3, %v288_v41  }
  0x9a   :  { %v321_v42 = vpop.permute.xlu1 %320  }
  0x9b   :  { %852 = vst.msk [vmem:[%s1843_s1 + $0x30] sm:$0xff] %vm246_vm3, %v321_v42  }
  0x9c   :  { %v310_v43 = vpop.permute.xlu0 %309  }
  0x9d   :  { %849 = vst.msk [vmem:[%s1843_s1 + $0x10] sm:$0xff] %vm246_vm3, %v310_v43  }
  0x9e   :  { %v343_v44 = vpop.permute.xlu1 %342  }
  0x9f   :  { %858 = vst.msk [vmem:[%s1843_s1 + $0x18] sm:$0xff] %vm246_vm3, %v343_v44  }
  0xa0   :  { %v332_v45 = vpop.permute.xlu0 %331  }
  0xa1   :  { %855 = vst.msk [vmem:[%s1843_s1 + $0x50] sm:$0xff] %vm246_vm3, %v332_v45  }
  0xa2   :  { %v365_v46 = vpop.permute.xlu1 %364  }
  0xa3   :  { %864 = vst.msk [vmem:[%s1843_s1 + $0x58] sm:$0xff] %vm246_vm3, %v365_v46  }
  0xa4   :  { %v354_v47 = vpop.permute.xlu0 %353  }
  0xa5   :  { %861 = vst.msk [vmem:[%s1843_s1 + $0x38] sm:$0xff] %vm246_vm3, %v354_v47  }
  0xa6   :  { %v386_v48 = vpop.permute.xlu1 %385  }
  0xa7   :  { %869 = vst.msk [vmem:[%s1843_s1 + $0x20] sm:$0xff] %vm377_vm4, %v386_v48  }
  0xa8   :  { %v376_v49 = vpop.permute.xlu0 %375  }
  0xa9   :  { %378 = vst.msk [vmem:[%s1843_s1] sm:$0xff] %vm377_vm4, %v376_v49  }
  0xaa   :  { %v408_v50 = vpop.permute.xlu1 %407  }
  0xab   :  { %875 = vst.msk [vmem:[%s1843_s1 + $0x8] sm:$0xff] %vm377_vm4, %v408_v50  }
  0xac   :  { %v397_v51 = vpop.permute.xlu0 %396  }
  0xad   :  { %872 = vst.msk [vmem:[%s1843_s1 + $0x40] sm:$0xff] %vm377_vm4, %v397_v51  }
  0xae   :  { %v430_v52 = vpop.permute.xlu1 %429  }
  0xaf   :  { %881 = vst.msk [vmem:[%s1843_s1 + $0x48] sm:$0xff] %vm377_vm4, %v430_v52  }
  0xb0   :  { %v419_v53 = vpop.permute.xlu0 %418  }
  0xb1   :  { %878 = vst.msk [vmem:[%s1843_s1 + $0x28] sm:$0xff] %vm377_vm4, %v419_v53  }
  0xb2   :  { %v452_v54 = vpop.permute.xlu1 %451  }
  0xb3   :  { %887 = vst.msk [vmem:[%s1843_s1 + $0x30] sm:$0xff] %vm377_vm4, %v452_v54  }
  0xb4   :  { %v441_v55 = vpop.permute.xlu0 %440  }
  0xb5   :  { %884 = vst.msk [vmem:[%s1843_s1 + $0x10] sm:$0xff] %vm377_vm4, %v441_v55  }
  0xb6   :  { %v474_v56 = vpop.permute.xlu1 %473  }
  0xb7   :  { %893 = vst.msk [vmem:[%s1843_s1 + $0x18] sm:$0xff] %vm377_vm4, %v474_v56  }
  0xb8   :  { %v463_v57 = vpop.permute.xlu0 %462  }
  0xb9   :  { %890 = vst.msk [vmem:[%s1843_s1 + $0x50] sm:$0xff] %vm377_vm4, %v463_v57  }
  0xba   :  { %v496_v58 = vpop.permute.xlu1 %495  }
  0xbb   :  { %899 = vst.msk [vmem:[%s1843_s1 + $0x58] sm:$0xff] %vm377_vm4, %v496_v58  }
  0xbc   :  { %v485_v59 = vpop.permute.xlu0 %484  }
  0xbd   :  { %896 = vst.msk [vmem:[%s1843_s1 + $0x38] sm:$0xff] %vm377_vm4, %v485_v59  }
  0xbe   :  { %v517_v60 = vpop.permute.xlu1 %516  }
  0xbf   :  { %904 = vst.msk [vmem:[%s1843_s1 + $0x20] sm:$0xff] %vm508_vm5, %v517_v60  }
  0xc0   :  { %v507_v61 = vpop.permute.xlu0 %506  }
  0xc1   :  { %509 = vst.msk [vmem:[%s1843_s1] sm:$0xff] %vm508_vm5, %v507_v61  }
  0xc2   :  { %v539_v62 = vpop.permute.xlu1 %538  }
  0xc3   :  { %910 = vst.msk [vmem:[%s1843_s1 + $0x8] sm:$0xff] %vm508_vm5, %v539_v62  }
  0xc4   :  { %v528_v63 = vpop.permute.xlu0 %527  }
  0xc5   :  { %907 = vst.msk [vmem:[%s1843_s1 + $0x40] sm:$0xff] %vm508_vm5, %v528_v63  }
  0xc6   :  { %v561_v0 = vpop.permute.xlu1 %560  }
  0xc7   :  { %916 = vst.msk [vmem:[%s1843_s1 + $0x48] sm:$0xff] %vm508_vm5, %v561_v0  }
  0xc8   :  { %v550_v1 = vpop.permute.xlu0 %549  }
  0xc9   :  { %913 = vst.msk [vmem:[%s1843_s1 + $0x28] sm:$0xff] %vm508_vm5, %v550_v1  }
  0xca   :  { %v583_v2 = vpop.permute.xlu1 %582  }
  0xcb   :  { %922 = vst.msk [vmem:[%s1843_s1 + $0x30] sm:$0xff] %vm508_vm5, %v583_v2  }
  0xcc   :  { %v572_v3 = vpop.permute.xlu0 %571  }
  0xcd   :  { %919 = vst.msk [vmem:[%s1843_s1 + $0x10] sm:$0xff] %vm508_vm5, %v572_v3  }
  0xce   :  { %v605_v4 = vpop.permute.xlu1 %604  }
  0xcf   :  { %928 = vst.msk [vmem:[%s1843_s1 + $0x18] sm:$0xff] %vm508_vm5, %v605_v4  }
  0xd0   :  { %v594_v5 = vpop.permute.xlu0 %593  }
  0xd1   :  { %925 = vst.msk [vmem:[%s1843_s1 + $0x50] sm:$0xff] %vm508_vm5, %v594_v5  }
  0xd2   :  { %v627_v6 = vpop.permute.xlu1 %626  }
  0xd3   :  { %934 = vst.msk [vmem:[%s1843_s1 + $0x58] sm:$0xff] %vm508_vm5, %v627_v6  }
  0xd4   :  { %v616_v7 = vpop.permute.xlu0 %615  }
  0xd5   :  { %931 = vst.msk [vmem:[%s1843_s1 + $0x38] sm:$0xff] %vm508_vm5, %v616_v7  }
  0xd6   :  { %v648_v8 = vpop.permute.xlu1 %647  }
  0xd7   :  { %939 = vst.msk [vmem:[%s1843_s1 + $0x20] sm:$0xff] %vm639_vm6, %v648_v8  }
  0xd8   :  { %v638_v9 = vpop.permute.xlu0 %637  }
  0xd9   :  { %640 = vst.msk [vmem:[%s1843_s1] sm:$0xff] %vm639_vm6, %v638_v9  }
  0xda   :  { %v670_v10 = vpop.permute.xlu1 %669  }
  0xdb   :  { %945 = vst.msk [vmem:[%s1843_s1 + $0x8] sm:$0xff] %vm639_vm6, %v670_v10  }
  0xdc   :  { %v659_v11 = vpop.permute.xlu0 %658  }
  0xdd   :  { %942 = vst.msk [vmem:[%s1843_s1 + $0x40] sm:$0xff] %vm639_vm6, %v659_v11  }
  0xde   :  { %v692_v12 = vpop.permute.xlu1 %691  }
  0xdf   :  { %951 = vst.msk [vmem:[%s1843_s1 + $0x48] sm:$0xff] %vm639_vm6, %v692_v12  }
  0xe0   :  { %v681_v13 = vpop.permute.xlu0 %680  }
  0xe1   :  { %948 = vst.msk [vmem:[%s1843_s1 + $0x28] sm:$0xff] %vm639_vm6, %v681_v13  }
  0xe2   :  { %v714_v14 = vpop.permute.xlu1 %713  }
  0xe3   :  { %957 = vst.msk [vmem:[%s1843_s1 + $0x30] sm:$0xff] %vm639_vm6, %v714_v14  }
  0xe4   :  { %v703_v15 = vpop.permute.xlu0 %702  }
  0xe5   :  { %954 = vst.msk [vmem:[%s1843_s1 + $0x10] sm:$0xff] %vm639_vm6, %v703_v15  }
  0xe6   :  { %v736_v16 = vpop.permute.xlu1 %735  }
  0xe7   :  { %963 = vst.msk [vmem:[%s1843_s1 + $0x18] sm:$0xff] %vm639_vm6, %v736_v16  }
  0xe8   :  { %v725_v17 = vpop.permute.xlu0 %724  }
  0xe9   :  { %960 = vst.msk [vmem:[%s1843_s1 + $0x50] sm:$0xff] %vm639_vm6, %v725_v17  }
  0xea   :  { %v758_v18 = vpop.permute.xlu1 %757  }
  0xeb   :  { %969 = vst.msk [vmem:[%s1843_s1 + $0x58] sm:$0xff] %vm639_vm6, %v758_v18  }
  0xec   :  { %v747_v19 = vpop.permute.xlu0 %746  }
  0xed   :  { %966 = vst.msk [vmem:[%s1843_s1 + $0x38] sm:$0xff] %vm639_vm6, %v747_v19  }

// kernel: basic_trans_forward.1
= control target key start
LH: loop header
LB: loop body
LE: loop exit
PB: predicated region body
PF: predicated region fallthrough
CT: control target
= control target key end

     0   :  { %vm85_vm0 = vcmask 1043456   ;;  %vm48_vm1 = vcmask 31744   ;;  %vm214_vm2 = vcmask 261120   ;;  %s9481_s8 = smov 92   ;;  %vm756_vm3 = vcmask 785408   ;;  %s9482_s9 = smov 124   ;;  %s13004_s2 = inlined_call_operand.vmem [shape: f32[4,96], index: 2, kind: input, shape index: {}]   ;;  %s13005_s0 = inlined_call_operand.vmem [shape: f32[96,4], index: 0, kind: input, shape index: {}]   ;;  %s13006_s3 = inlined_call_operand.vmem [shape: f32[33,64], index: 3, kind: input, shape index: {}]   ;;  %s13007_s1 = inlined_call_operand.vmem [shape: f32[96,96], index: 1, kind: input, shape index: {}]   ;;  %s13008_s4 = inlined_call_operand.vmem [shape: f32[33,96], index: 4, kind: input, shape index: {}]   ;;  %s13009_s5 = inlined_call_operand.vmem [shape: f32[64,32], index: 5, kind: input, shape index: {}]   ;;  %s13010_s6 = inlined_call_operand.vmem [shape: f32[4,96], index: 6, kind: output, shape index: {}]  }
   0x1   :  { %v47_v0 = vld [vmem:[%s13004_s2] sm:$0xf]  ;;  %v24_v2 = vld [vmem:[%s13005_s0 + $0x8] sm:$0xff]  ;;  %v25_v3 = vld [vmem:[%s13005_s0 + $0x10] sm:$0xff]  ;;  %s9484_s10 = smov 120   ;;  %s9485_s11 = smov 84  }
   0x2   :  { %v23_v1 = vld [vmem:[%s13005_s0] sm:$0xff]  ;;  %8001 = vmatprep.subr.msk.mxu0 %vm85_vm0, %v47_v0  ;;  %v26_v4 = vld [vmem:[%s13005_s0 + $0x18] sm:$0xff]  ;;  %v28_v6 = vld [vmem:[%s13005_s0 + $0x28] sm:$0xff]  ;;  %s9486_s14 = smov 116   ;;  %s9487_s16 = smov 80   ;;  %vm6701_vm4 = vcmask 523264  }
   0x3   :  { %8003 = vmatprep.mubr.msk.f32.mxu0 %vm48_vm1, %v23_v1  ;;  %8002 = vmatpush3.msk.msra.mxu0 %vm85_vm0, %v47_v0  ;;  %v27_v5 = vld [vmem:[%s13005_s0 + $0x20] sm:$0xff]  ;;  %v29_v7 = vld [vmem:[%s13005_s0 + $0x30] sm:$0xff]  ;;  %v30_v8 = vld [vmem:[%s13005_s0 + $0x38] sm:$0xff]  ;;  %s9489_s19 = smov 76   ;;  %s9491_s21 = smov 72   ;;  %vm9497_vm5 = vmmov 0  }
   0x4   :  { %8004 = vmatmul.mubr.msk.f32.vlgmr.msra.gmra.mxu0 %vm48_vm1, %v24_v2  ;;  %v31_v9 = vld [vmem:[%s13005_s0 + $0x40] sm:$0xff]  ;;  %v32_v10 = vld [vmem:[%s13005_s0 + $0x48] sm:$0xff]  ;;  %v33_v11 = vld [vmem:[%s13005_s0 + $0x50] sm:$0xff]  ;;  %s9493_s23 = smov 68   ;;  %vm6973_vm6 = vcmask 781312  }
   0x5   :  { %8006 = vmatprep.mubr.msk.f32.mxu0 %vm48_vm1, %v25_v3  ;;  %v34_v12 = vld [vmem:[%s13005_s0 + $0x58] sm:$0xff] }
   0x8   :  { %8007 = vmatmul.mubr.msk.f32.gmra.mxu0 %vm48_vm1, %v26_v4 }
   0x9   :  { %8009 = vmatprep.mubr.msk.f32.mxu0 %vm48_vm1, %v27_v5 }
   0xc   :  { %8010 = vmatmul.mubr.msk.f32.gmra.mxu0 %vm48_vm1, %v28_v6 }
   0xd   :  { %8012 = vmatprep.mubr.msk.f32.mxu0 %vm48_vm1, %v29_v7 }
  0x10   :  { %8013 = vmatmul.mubr.msk.f32.gmra.mxu0 %vm48_vm1, %v30_v8 }
  0x11   :  { %8015 = vmatprep.mubr.msk.f32.mxu0 %vm48_vm1, %v31_v9 }
  0x14   :  { %8016 = vmatmul.mubr.msk.f32.gmra.mxu0 %vm48_vm1, %v32_v10 }
  0x15   :  { %8018 = vmatprep.mubr.msk.f32.mxu0 %vm48_vm1, %v33_v11 }
  0x18   :  { %8019 = vmatmul.mubr.msk.f32.gmra.mxu0 %vm48_vm1, %v34_v12 }
  0xc4   :  { %v9586_v13 = vpop.f32.mrf.mxu0 }
  0xc5   :  { %13084 = vst [vmem:[#allocation2_spill] sm:$0xff] %v9586_v13  ;;  %v218_v18 = vsel %vm214_vm2, %v9586_v13, 0.0 }
  0xc6   :  { %v9588_v14 = vpop.f32.mrf.mxu0 }
  0xc7   :  { %13085 = vst [vmem:[#allocation3_spill] sm:$0xff] %v9588_v14  ;;  %v215_v15 = vsel %vm214_vm2, %v9588_v14, 0.0 }
  0xc8   :  { %216 = vadd.xlane.f32.xlu0 %v215_v15  ;;  %v9592_v16 = vpop.f32.mrf.mxu0 }
  0xc9   :  { %13086 = vst [vmem:[#allocation4_spill] sm:$0xff] %v9592_v16  ;;  %v224_v22 = vsel %vm214_vm2, %v9592_v16, 0.0 }
  0xca   :  { %v9594_v17 = vpop.f32.mrf.mxu0 }
  0xcb   :  { %13087 = vst [vmem:[#allocation5_spill] sm:$0xff] %v9594_v17  ;;  %v221_v19 = vsel %vm214_vm2, %v9594_v17, 0.0 }
  0xcc   :  { %219 = vadd.xlane.f32.xlu0 %v218_v18  ;;  %222 = vadd.xlane.f32.xlu1 %v221_v19  ;;  %v9600_v20 = vpop.f32.mrf.mxu0 }
  0xcd   :  { %13088 = vst [vmem:[#allocation6_spill] sm:$0xff] %v9600_v20  ;;  %v230_v26 = vsel %vm214_vm2, %v9600_v20, 0.0 }
  0xce   :  { %v9602_v21 = vpop.f32.mrf.mxu0 }
  0xcf   :  { %13089 = vst [vmem:[#allocation7_spill] sm:$0xff] %v9602_v21  ;;  %v227_v23 = vsel %vm214_vm2, %v9602_v21, 0.0 }
  0xd0   :  { %225 = vadd.xlane.f32.xlu1 %v224_v22  ;;  %228 = vadd.xlane.f32.xlu0 %v227_v23  ;;  %v9608_v24 = vpop.f32.mrf.mxu0 }
  0xd1   :  { %13090 = vst [vmem:[#allocation8_spill] sm:$0xff] %v9608_v24  ;;  %v236_v30 = vsel %vm214_vm2, %v9608_v24, 0.0 }
  0xd2   :  { %v9610_v25 = vpop.f32.mrf.mxu0 }
  0xd3   :  { %v233_v27 = vsel %vm214_vm2, %v9610_v25, 0.0 }
  0xd4   :  { %231 = vadd.xlane.f32.xlu1 %v230_v26  ;;  %234 = vadd.xlane.f32.xlu0 %v233_v27  ;;  %v9616_v28 = vpop.f32.mrf.mxu0 }
  0xd5   :  { %v242_v34 = vsel %vm214_vm2, %v9616_v28, 0.0 }
  0xd6   :  { %v9618_v29 = vpop.f32.mrf.mxu0 }
  0xd7   :  { %v239_v31 = vsel %vm214_vm2, %v9618_v29, 0.0 }
  0xd8   :  { %237 = vadd.xlane.f32.xlu1 %v236_v30  ;;  %240 = vadd.xlane.f32.xlu0 %v239_v31  ;;  %v9624_v32 = vpop.f32.mrf.mxu0 }
  0xd9   :  { %13091 = vst [vmem:[#allocation9_spill] sm:$0xff] %v9624_v32  ;;  %v248_v36 = vsel %vm214_vm2, %v9624_v32, 0.0 }
  0xda   :  { %v9626_v33 = vpop.f32.mrf.mxu0 }
  0xdb   :  { %13092 = vst [vmem:[#allocation10_spill] sm:$0xff] %v9626_v33  ;;  %v245_v35 = vsel %vm214_vm2, %v9626_v33, 0.0 }
  0xdc   :  { %243 = vadd.xlane.f32.xlu1 %v242_v34  ;;  %246 = vadd.xlane.f32.xlu0 %v245_v35 }
  0xe0   :  { %249 = vadd.xlane.f32.xlu1 %v248_v36 }
 0x151   :  { %v217_v37 = vpop.xlane.xlu0 %216 }
 0x152   :  { %v252_v38 = vmul.f32 0.03125, %v217_v37 }
 0x154   :  { %v9635_v39 = vsub.f32 %v9588_v14, %v252_v38 }
 0x155   :  { %v220_v40 = vpop.xlane.xlu0 %219  ;;  %v223_v41 = vpop.xlane.xlu1 %222 }
 0x156   :  { %v253_v42 = vmul.f32 0.03125, %v220_v40  ;;  %v254_v43 = vmul.f32 0.03125, %v223_v41  ;;  %v276_v44 = vmul.f32 %v9635_v39, %v9635_v39 }
 0x158   :  { %v9640_v45 = vsub.f32 %v9586_v13, %v253_v42  ;;  %v9643_v46 = vsub.f32 %v9594_v17, %v254_v43  ;;  %v288_v47 = vsel %vm214_vm2, %v276_v44, 0.0 }
 0x159   :  { %v226_v48 = vpop.xlane.xlu1 %225  ;;  %v229_v49 = vpop.xlane.xlu0 %228  ;;  %289 = vadd.xlane.f32.xlu0 %v288_v47 }
 0x15a   :  { %v255_v50 = vmul.f32 0.03125, %v226_v48  ;;  %v256_v51 = vmul.f32 0.03125, %v229_v49  ;;  %v277_v52 = vmul.f32 %v9640_v45, %v9640_v45  ;;  %v278_v53 = vmul.f32 %v9643_v46, %v9643_v46  ;;  %v375_v48 = vld [vmem:[%s13006_s3 + $0x18] sm:$0xff]  ;;  %v374_v49 = vld [vmem:[%s13006_s3 + $0x10] sm:$0xff] }
 0x15b   :  { %8021 = vmatprep.subr.mxu1 %v375_v48 }
 0x15c   :  { %v9651_v54 = vsub.f32 %v9592_v16, %v255_v50  ;;  %v9654_v55 = vsub.f32 %v9602_v21, %v256_v51  ;;  %v291_v56 = vsel %vm214_vm2, %v277_v52, 0.0  ;;  %v294_v57 = vsel %vm214_vm2, %v278_v53, 0.0  ;;  %8022 = vmatpush3.msra.mxu1 %v375_v48  ;;  %v373_v50 = vld [vmem:[%s13006_s3 + $0x8] sm:$0xff]  ;;  %v372_v51 = vld [vmem:[%s13006_s3] sm:$0xff] }
 0x15d   :  { %v232_v58 = vpop.xlane.xlu1 %231  ;;  %v235_v59 = vpop.xlane.xlu0 %234  ;;  %292 = vadd.xlane.f32.xlu1 %v291_v56  ;;  %295 = vadd.xlane.f32.xlu0 %v294_v57 }
 0x15e   :  { %v257_v60 = vmul.f32 0.03125, %v232_v58  ;;  %v258_v61 = vmul.f32 0.03125, %v235_v59  ;;  %v279_v62 = vmul.f32 %v9651_v54, %v9651_v54  ;;  %v280_v63 = vmul.f32 %v9654_v55, %v9654_v55  ;;  %8023 = vmatprep.subr.mxu1 %v374_v49 }
 0x15f   :  { %8024 = vmatpush3.msra.mxu1 %v374_v49 }
 0x160   :  { %v9663_v0 = vsub.f32 %v9600_v20, %v257_v60  ;;  %v9666_v1 = vsub.f32 %v9610_v25, %v258_v61  ;;  %v297_v2 = vsel %vm214_vm2, %v279_v62, 0.0  ;;  %v300_v3 = vsel %vm214_vm2, %v280_v63, 0.0  ;;  %8025 = vmatprep.subr.mxu1 %v373_v50 }
 0x161   :  { %v238_v4 = vpop.xlane.xlu1 %237  ;;  %v241_v5 = vpop.xlane.xlu0 %240  ;;  %298 = vadd.xlane.f32.xlu1 %v297_v2  ;;  %301 = vadd.xlane.f32.xlu0 %v300_v3 }
 0x162   :  { %v259_v6 = vmul.f32 0.03125, %v238_v4  ;;  %v260_v7 = vmul.f32 0.03125, %v241_v5  ;;  %v281_v8 = vmul.f32 %v9663_v0, %v9663_v0  ;;  %v282_v9 = vmul.f32 %v9666_v1, %v9666_v1  ;;  %8026 = vmatpush3.msra.mxu1 %v373_v50 }
 0x163   :  { %8027 = vmatprep.subr.mxu1 %v372_v51 }
 0x164   :  { %v9675_v10 = vsub.f32 %v9608_v24, %v259_v6  ;;  %v9678_v11 = vsub.f32 %v9618_v29, %v260_v7  ;;  %v303_v12 = vsel %vm214_vm2, %v281_v8, 0.0  ;;  %v306_v15 = vsel %vm214_vm2, %v282_v9, 0.0  ;;  %8028 = vmatpush3.msra.mxu1 %v372_v51 }
 0x165   :  { %v244_v18 = vpop.xlane.xlu1 %243  ;;  %304 = vadd.xlane.f32.xlu1 %v303_v12  ;;  %307 = vadd.xlane.f32.xlu0 %v306_v15  ;;  %v247_v19 = vpop.xlane.xlu0 %246 }
 0x166   :  { %v261_v22 = vmul.f32 0.03125, %v244_v18  ;;  %v262_v23 = vmul.f32 0.03125, %v247_v19  ;;  %v283_v26 = vmul.f32 %v9675_v10, %v9675_v10  ;;  %v284_v27 = vmul.f32 %v9678_v11, %v9678_v11 }
 0x168   :  { %v9687_v30 = vsub.f32 %v9616_v28, %v261_v22  ;;  %v9690_v31 = vsub.f32 %v9626_v33, %v262_v23  ;;  %v309_v34 = vsel %vm214_vm2, %v283_v26, 0.0  ;;  %v312_v35 = vsel %vm214_vm2, %v284_v27, 0.0 }
 0x169   :  { %310 = vadd.xlane.f32.xlu1 %v309_v34  ;;  %v250_v36 = vpop.xlane.xlu1 %249  ;;  %313 = vadd.xlane.f32.xlu0 %v312_v35 }
 0x16a   :  { %v263_v37 = vmul.f32 0.03125, %v250_v36  ;;  %v285_v38 = vmul.f32 %v9687_v30, %v9687_v30  ;;  %v286_v40 = vmul.f32 %v9690_v31, %v9690_v31 }
 0x16c   :  { %v9699_v41 = vsub.f32 %v9624_v32, %v263_v37  ;;  %v315_v42 = vsel %vm214_vm2, %v285_v38, 0.0  ;;  %v318_v43 = vsel %vm214_vm2, %v286_v40, 0.0 }
 0x16d   :  { %316 = vadd.xlane.f32.xlu1 %v315_v42  ;;  %319 = vadd.xlane.f32.xlu0 %v318_v43 }
 0x16e   :  { %v287_v44 = vmul.f32 %v9699_v41, %v9699_v41 }
 0x170   :  { %v321_v47 = vsel %vm214_vm2, %v287_v44, 0.0 }
 0x171   :  { %322 = vadd.xlane.f32.xlu1 %v321_v47 }
 0x1e2   :  { %v290_v52 = vpop.xlane.xlu0 %289 }
 0x1e3   :  { %v324_v53 = vmul.f32 0.03125, %v290_v52 }
 0x1e5   :  { %v336_v56 = vadd.f32 1e-05, %v324_v53 }
 0x1e6   :  { %v293_v57 = vpop.xlane.xlu1 %292  ;;  %v296_v58 = vpop.xlane.xlu0 %295 }
 0x1e7   :  { %9008 = vrsqrt.f32 %v336_v56  ;;  %v325_v59 = vmul.f32 0.03125, %v293_v57  ;;  %v326_v60 = vmul.f32 0.03125, %v296_v58 }
 0x1e9   :  { %v337_v61 = vadd.f32 1e-05, %v325_v59  ;;  %v338_v62 = vadd.f32 1e-05, %v326_v60 }
 0x1ea   :  { %v299_v63 = vpop.xlane.xlu1 %298  ;;  %v302_v2 = vpop.xlane.xlu0 %301 }
 0x1eb   :  { %9010 = vrsqrt.f32 %v337_v61  ;;  %v327_v3 = vmul.f32 0.03125, %v299_v63  ;;  %v328_v4 = vmul.f32 0.03125, %v302_v2 }
 0x1ec   :  { %9012 = vrsqrt.f32 %v338_v62 }
 0x1ed   :  { %v339_v5 = vadd.f32 1e-05, %v327_v3  ;;  %v340_v6 = vadd.f32 1e-05, %v328_v4 }
 0x1ee   :  { %v305_v7 = vpop.xlane.xlu1 %304  ;;  %v308_v8 = vpop.xlane.xlu0 %307 }
 0x1ef   :  { %9014 = vrsqrt.f32 %v339_v5  ;;  %v329_v9 = vmul.f32 0.03125, %v305_v7  ;;  %v330_v12 = vmul.f32 0.03125, %v308_v8 }
 0x1f0   :  { %9016 = vrsqrt.f32 %v340_v6 }
 0x1f1   :  { %v341_v15 = vadd.f32 1e-05, %v329_v9  ;;  %v342_v18 = vadd.f32 1e-05, %v330_v12 }
 0x1f2   :  { %v311_v19 = vpop.xlane.xlu1 %310  ;;  %v314_v22 = vpop.xlane.xlu0 %313 }
 0x1f3   :  { %9018 = vrsqrt.f32 %v341_v15  ;;  %v331_v23 = vmul.f32 0.03125, %v311_v19  ;;  %v332_v26 = vmul.f32 0.03125, %v314_v22 }
 0x1f4   :  { %v9009_v27 = vpop.eup %9008  ;;  %9020 = vrsqrt.f32 %v342_v18 }
 0x1f5   :  { %v343_v34 = vadd.f32 1e-05, %v331_v23  ;;  %v344_v35 = vadd.f32 1e-05, %v332_v26  ;;  %v360_v36 = vmul.f32 %v9009_v27, %v9635_v39 }
 0x1f6   :  { %v317_v37 = vpop.xlane.xlu1 %316  ;;  %v320_v38 = vpop.xlane.xlu0 %319 }
 0x1f7   :  { %9022 = vrsqrt.f32 %v343_v34  ;;  %v333_v40 = vmul.f32 0.03125, %v317_v37  ;;  %v334_v42 = vmul.f32 0.03125, %v320_v38  ;;  %8029 = vmatprep.mubr.msk.f32.mxu1 %vm214_vm2, %v360_v36 }
 0x1f8   :  { %v9011_v43 = vpop.eup %9010  ;;  %9024 = vrsqrt.f32 %v344_v35 }
 0x1f9   :  { %v9013_v44 = vpop.eup %9012  ;;  %v345_v47 = vadd.f32 1e-05, %v333_v40  ;;  %v346_v48 = vadd.f32 1e-05, %v334_v42  ;;  %v361_v49 = vmul.f32 %v9011_v43, %v9640_v45 }
 0x1fa   :  { %v323_v50 = vpop.xlane.xlu1 %322  ;;  %v362_v51 = vmul.f32 %v9013_v44, %v9643_v46 }
 0x1fb   :  { %9026 = vrsqrt.f32 %v345_v47  ;;  %v335_v52 = vmul.f32 0.03125, %v323_v50  ;;  %8030 = vmatmul.mubr.msk.f32.vlgmr.msra.gmra.mxu1 %vm214_vm2, %v361_v49 }
 0x1fc   :  { %v9015_v39 = vpop.eup %9014  ;;  %9028 = vrsqrt.f32 %v346_v48  ;;  %8032 = vmatprep.mubr.msk.f32.mxu1 %vm214_vm2, %v362_v51 }
 0x1fd   :  { %v9017_v53 = vpop.eup %9016  ;;  %v347_v56 = vadd.f32 1e-05, %v335_v52  ;;  %v363_v57 = vmul.f32 %v9015_v39, %v9651_v54 }
 0x1fe   :  { %v364_v58 = vmul.f32 %v9017_v53, %v9654_v55 }
 0x1ff   :  { %9030 = vrsqrt.f32 %v347_v56  ;;  %8033 = vmatmul.mubr.msk.f32.gmra.mxu1 %vm214_vm2, %v363_v57 }
 0x200   :  { %v9019_v45 = vpop.eup %9018  ;;  %8035 = vmatprep.mubr.msk.f32.mxu1 %vm214_vm2, %v364_v58 }
 0x201   :  { %v9021_v46 = vpop.eup %9020  ;;  %v365_v59 = vmul.f32 %v9019_v45, %v9663_v0 }
 0x202   :  { %v366_v60 = vmul.f32 %v9021_v46, %v9666_v1 }
 0x203   :  { %8036 = vmatmul.mubr.msk.f32.gmra.mxu1 %vm214_vm2, %v365_v59 }
 0x204   :  { %v9023_v61 = vpop.eup %9022  ;;  %8038 = vmatprep.mubr.msk.f32.mxu1 %vm214_vm2, %v366_v60 }
 0x205   :  { %v9025_v62 = vpop.eup %9024  ;;  %v367_v54 = vmul.f32 %v9023_v61, %v9675_v10 }
 0x206   :  { %v368_v55 = vmul.f32 %v9025_v62, %v9678_v11  ;;  %v6992_v11 = vld [vmem:[%s13006_s3 + $0x20] ss:$0 sm:$0xff]  ;;  %s9480_s3 = smov 96  }
 0x207   :  { %8039 = vmatmul.mubr.msk.f32.gmra.mxu1 %vm214_vm2, %v367_v54 }
 0x208   :  { %v9027_v63 = vpop.eup %9026  ;;  %8041 = vmatprep.mubr.msk.f32.mxu1 %vm214_vm2, %v368_v55 }
 0x209   :  { %v9029_v2 = vpop.eup %9028  ;;  %v369_v0 = vmul.f32 %v9027_v63, %v9687_v30 }
 0x20a   :  { %v370_v1 = vmul.f32 %v9029_v2, %v9690_v31 }
 0x20b   :  { %8042 = vmatmul.mubr.msk.f32.gmra.mxu1 %vm214_vm2, %v369_v0 }
 0x20c   :  { %v9031_v3 = vpop.eup %9030  ;;  %8044 = vmatprep.mubr.msk.f32.mxu1 %vm214_vm2, %v370_v1 }
 0x20d   :  { %v371_v4 = vmul.f32 %v9031_v3, %v9699_v41  ;;  %v9876_v3 = vld [vmem:[%s13007_s1 + $0x8] sm:$0xff] }
 0x20f   :  { %8045 = vmatmul.mubr.msk.f32.gmra.mxu1 %vm214_vm2, %v371_v4 }
 0x2bb   :  { %v8031_v10 = vpop.f32.mrf.mxu1 }
 0x2bc   :  { %v9779_v38 = vadd.f32 %v8031_v10, %v6992_v11  ;;  %v9881_v10 = vld [vmem:[%s13007_s1] sm:$0xff] }
 0x2bd   :  { %v483_v5 = vpop.f32.mrf.mxu1 }
 0x2be   :  { %v9745_v6 = vadd.f32 %v6992_v11, %v483_v5  ;;  %13101 = vst [vmem:[#allocation19_spill] sm:$0xff] %v9779_v38 }
 0x2bf   :  { %v8034_v30 = vpop.f32.mrf.mxu1 }
 0x2c0   :  { %13093 = vst [vmem:[#allocation11_spill] sm:$0xff] %v9745_v6  ;;  %8071 = vmatprep.mubr.msk.f32.mxu0 %vm48_vm1, %v9745_v6  ;;  %v9771_v36 = vadd.f32 %v8034_v30, %v6992_v11  ;;  %v9887_v30 = vld [vmem:[%s13007_s1 + $0x18] sm:$0xff] }
 0x2c1   :  { %v493_v31 = vpop.f32.mrf.mxu1 }
 0x2c2   :  { %13099 = vst [vmem:[#allocation17_spill] sm:$0xff] %v9771_v36  ;;  %v9789_v42 = vadd.f32 %v6992_v11, %v493_v31 }
 0x2c3   :  { %v8037_v7 = vpop.f32.mrf.mxu1 }
 0x2c4   :  { %v9763_v34 = vadd.f32 %v8037_v7, %v6992_v11  ;;  %13103 = vst [vmem:[#allocation21_spill] sm:$0xff] %v9789_v42 }
 0x2c5   :  { %v503_v8 = vpop.f32.mrf.mxu1 }
 0x2c6   :  { %13097 = vst [vmem:[#allocation15_spill] sm:$0xff] %v9763_v34  ;;  %v9783_v40 = vadd.f32 %v6992_v11, %v503_v8 }
 0x2c7   :  { %v8040_v9 = vpop.f32.mrf.mxu1 }
 0x2c8   :  { %v9755_v26 = vadd.f32 %v8040_v9, %v6992_v11  ;;  %13102 = vst [vmem:[#allocation20_spill] sm:$0xff] %v9783_v40 }
 0x2c9   :  { %v513_v12 = vpop.f32.mrf.mxu1 }
 0x2ca   :  { %13095 = vst [vmem:[#allocation13_spill] sm:$0xff] %v9755_v26  ;;  %v9775_v37 = vadd.f32 %v6992_v11, %v513_v12 }
 0x2cb   :  { %v8043_v41 = vpop.f32.mrf.mxu1 }
 0x2cc   :  { %v9759_v27 = vadd.f32 %v8043_v41, %v6992_v11  ;;  %13100 = vst [vmem:[#allocation18_spill] sm:$0xff] %v9775_v37 }
 0x2cd   :  { %v523_v15 = vpop.f32.mrf.mxu1 }
 0x2ce   :  { %13096 = vst [vmem:[#allocation14_spill] sm:$0xff] %v9759_v27  ;;  %v9767_v35 = vadd.f32 %v6992_v11, %v523_v15  ;;  %v9898_v15 = vld [vmem:[%s13007_s1 + $0x10] sm:$0xff] }
 0x2cf   :  { %v8046_v18 = vpop.f32.mrf.mxu1 }
 0x2d0   :  { %v9749_v19 = vadd.f32 %v8046_v18, %v6992_v11  ;;  %13098 = vst [vmem:[#allocation16_spill] sm:$0xff] %v9767_v35  ;;  %v9903_v18 = vld [vmem:[%s13007_s1 + $0x28] sm:$0xff] }
 0x2d1   :  { %v533_v22 = vpop.f32.mrf.mxu1 }
 0x2d2   :  { %v9751_v23 = vadd.f32 %v6992_v11, %v533_v22  ;;  %581 = vrot.lane.b32.xlu0 %v9749_v19, %s9480_s3 }
 0x2d4   :  { %13094 = vst [vmem:[#allocation12_spill] sm:$0xff] %v9751_v23  ;;  %579 = vrot.lane.b32.xlu1 %v9751_v23, %s9480_s3 }
 0x2d6   :  { %573 = vrot.lane.b32.xlu0 %v9755_v26, %s9480_s3 }
 0x2d8   :  { %577 = vrot.lane.b32.xlu1 %v9759_v27, %s9480_s3 }
 0x2da   :  { %569 = vrot.lane.b32.xlu0 %v9763_v34, %s9480_s3 }
 0x2dc   :  { %575 = vrot.lane.b32.xlu1 %v9767_v35, %s9480_s3 }
 0x2de   :  { %565 = vrot.lane.b32.xlu0 %v9771_v36, %s9480_s3 }
 0x2e0   :  { %571 = vrot.lane.b32.xlu1 %v9775_v37, %s9480_s3 }
 0x2e2   :  { %561 = vrot.lane.b32.xlu0 %v9779_v38, %s9480_s3 }
 0x2e4   :  { %567 = vrot.lane.b32.xlu1 %v9783_v40, %s9480_s3 }
 0x2e6   :  { %923 = vrot.lane.b32.xlu0 %v9624_v32, %s9480_s3 }
 0x2e8   :  { %563 = vrot.lane.b32.xlu1 %v9789_v42, %s9480_s3 }
 0x2ea   :  { %915 = vrot.lane.b32.xlu0 %v9608_v24, %s9480_s3 }
 0x2ec   :  { %559 = vrot.lane.b32.xlu1 %v9745_v6, %s9480_s3 }
 0x2ee   :  { %911 = vrot.lane.b32.xlu0 %v9600_v20, %s9480_s3 }
 0x2f0   :  { %921 = vrot.lane.b32.xlu1 %v9626_v33, %s9480_s3 }
 0x2f2   :  { %907 = vrot.lane.b32.xlu0 %v9592_v16, %s9480_s3 }
 0x2f4   :  { %919 = vrot.lane.b32.xlu1 %v9616_v28, %s9480_s3 }
 0x2f6   :  { %903 = vrot.lane.b32.xlu0 %v9586_v13, %s9480_s3 }
 0x2f8   :  { %917 = vrot.lane.b32.xlu1 %v9618_v29, %s9480_s3 }
 0x2fa   :  { %1144 = vrot.lane.b32.xlu0 %v9749_v19, %s9481_s8 }
 0x2fc   :  { %913 = vrot.lane.b32.xlu1 %v9610_v25, %s9480_s3 }
 0x300   :  { %909 = vrot.lane.b32.xlu1 %v9602_v21, %s9480_s3 }
 0x304   :  { %905 = vrot.lane.b32.xlu1 %v9594_v17, %s9480_s3 }
 0x308   :  { %901 = vrot.lane.b32.xlu1 %v9588_v14, %s9480_s3 }
 0x30c   :  { %1142 = vrot.lane.b32.xlu1 %v9751_v23, %s9481_s8 }
 0x344   :  { %v582_v43 = vpop.permute.xlu0 %581 }
 0x345   :  { %8047 = vmatprep.subr.msk.mxu0 %vm48_vm1, %v582_v43 }
 0x346   :  { %8048 = vmatpush3.xpose.msk.msra.mxu0 %vm48_vm1, %v582_v43  ;;  %v580_v44 = vpop.permute.xlu1 %579 }
 0x347   :  { %8049 = vmatprep.subr.msk.mxu0 %vm48_vm1, %v580_v44 }
 0x348   :  { %v574_v47 = vpop.permute.xlu0 %573 }
 0x34a   :  { %8050 = vmatpush3.xpose.msk.msra.mxu0 %vm48_vm1, %v580_v44  ;;  %v578_v48 = vpop.permute.xlu1 %577 }
 0x34b   :  { %8051 = vmatprep.subr.msk.mxu0 %vm48_vm1, %v578_v48 }
 0x34c   :  { %v570_v49 = vpop.permute.xlu0 %569 }
 0x34e   :  { %8052 = vmatpush3.xpose.msk.msra.mxu0 %vm48_vm1, %v578_v48  ;;  %v576_v50 = vpop.permute.xlu1 %575 }
 0x34f   :  { %8053 = vmatprep.subr.msk.mxu0 %vm48_vm1, %v576_v50 }
 0x350   :  { %v566_v51 = vpop.permute.xlu0 %565 }
 0x352   :  { %8054 = vmatpush3.xpose.msk.msra.mxu0 %vm48_vm1, %v576_v50  ;;  %v572_v52 = vpop.permute.xlu1 %571  ;;  %v9921_v50 = vld [vmem:[%s13007_s1 + $0x38] sm:$0xff] }
 0x353   :  { %8055 = vmatprep.subr.msk.mxu0 %vm48_vm1, %v574_v47 }
 0x354   :  { %v562_v39 = vpop.permute.xlu0 %561 }
 0x356   :  { %8056 = vmatpush3.xpose.msk.msra.mxu0 %vm48_vm1, %v574_v47  ;;  %v568_v53 = vpop.permute.xlu1 %567 }
 0x357   :  { %8057 = vmatprep.subr.msk.mxu0 %vm48_vm1, %v572_v52 }
 0x358   :  { %v924_v56 = vpop.permute.xlu0 %923 }
 0x359   :  { %8089 = vmatprep.subr.mxu1 %v924_v56 }
 0x35a   :  { %8058 = vmatpush3.xpose.msk.msra.mxu0 %vm48_vm1, %v572_v52  ;;  %8090 = vmatpush3.msra.mxu1 %v924_v56  ;;  %v564_v57 = vpop.permute.xlu1 %563 }
 0x35b   :  { %8059 = vmatprep.subr.msk.mxu0 %vm48_vm1, %v570_v49 }
 0x35c   :  { %v916_v46 = vpop.permute.xlu0 %915 }
 0x35e   :  { %8060 = vmatpush3.xpose.msk.msra.mxu0 %vm48_vm1, %v570_v49  ;;  %v560_v58 = vpop.permute.xlu1 %559  ;;  %v9916_v49 = vld [vmem:[%s13007_s1 + $0x20] sm:$0xff] }
 0x35f   :  { %8061 = vmatprep.subr.msk.mxu0 %vm48_vm1, %v568_v53 }
 0x360   :  { %v912_v60 = vpop.permute.xlu0 %911 }
 0x362   :  { %8062 = vmatpush3.xpose.msk.msra.mxu0 %vm48_vm1, %v568_v53  ;;  %v922_v45 = vpop.permute.xlu1 %921 }
 0x363   :  { %8063 = vmatprep.subr.msk.mxu0 %vm48_vm1, %v566_v51  ;;  %8091 = vmatprep.subr.mxu1 %v922_v45 }
 0x364   :  { %8092 = vmatpush3.msra.mxu1 %v922_v45  ;;  %v908_v54 = vpop.permute.xlu0 %907  ;;  %v9941_v45 = vld [vmem:[%s13007_s1 + $0x48] sm:$0xff] }
 0x366   :  { %8064 = vmatpush3.xpose.msk.msra.mxu0 %vm48_vm1, %v566_v51  ;;  %v920_v59 = vpop.permute.xlu1 %919 }
 0x367   :  { %8065 = vmatprep.subr.msk.mxu0 %vm48_vm1, %v564_v57  ;;  %8093 = vmatprep.subr.mxu1 %v920_v59 }
 0x368   :  { %8094 = vmatpush3.msra.mxu1 %v920_v59  ;;  %v904_v63 = vpop.permute.xlu0 %903 }
 0x36a   :  { %8066 = vmatpush3.xpose.msk.msra.mxu0 %vm48_vm1, %v564_v57  ;;  %v918_v61 = vpop.permute.xlu1 %917 }
 0x36b   :  { %8067 = vmatprep.subr.msk.mxu0 %vm48_vm1, %v562_v39  ;;  %8095 = vmatprep.subr.mxu1 %v918_v61 }
 0x36c   :  { %8096 = vmatpush3.msra.mxu1 %v918_v61  ;;  %v9855_v1 = vpop.permute.xlu0 %1144 }
 0x36d   :  { %8097 = vmatprep.subr.mxu1 %v916_v46 }
 0x36e   :  { %8068 = vmatpush3.xpose.msk.msra.mxu0 %vm48_vm1, %v562_v39  ;;  %8098 = vmatpush3.msra.mxu1 %v916_v46  ;;  %v914_v62 = vpop.permute.xlu1 %913 }
 0x36f   :  { %8069 = vmatprep.subr.msk.mxu0 %vm48_vm1, %v560_v58  ;;  %8099 = vmatprep.subr.mxu1 %v914_v62 }
 0x370   :  { %8100 = vmatpush3.msra.mxu1 %v914_v62 }
 0x371   :  { %8101 = vmatprep.subr.mxu1 %v912_v60 }
 0x372   :  { %8070 = vmatpush3.xpose.msk.msra.mxu0 %vm48_vm1, %v560_v58  ;;  %8102 = vmatpush3.msra.mxu1 %v912_v60  ;;  %v910_v55 = vpop.permute.xlu1 %909  ;;  %v9936_v58 = vld [vmem:[%s13007_s1 + $0x30] sm:$0xff] }
 0x373   :  { %8103 = vmatprep.subr.mxu1 %v910_v55 }
 0x374   :  { %8104 = vmatpush3.msra.mxu1 %v910_v55  ;;  %v9954_v55 = vld [vmem:[%s13007_s1 + $0x40] sm:$0xff] }
 0x375   :  { %8072 = vmatmul.mubr.msk.f32.vlgmr.msra.gmra.mxu0 %vm48_vm1, %v9779_v38  ;;  %8105 = vmatprep.subr.mxu1 %v908_v54 }
 0x376   :  { %8074 = vmatprep.mubr.msk.f32.mxu0 %vm48_vm1, %v9789_v42  ;;  %8106 = vmatpush3.msra.mxu1 %v908_v54  ;;  %v906_v2 = vpop.permute.xlu1 %905 }
 0x377   :  { %8107 = vmatprep.subr.mxu1 %v906_v2 }
 0x378   :  { %8108 = vmatpush3.msra.mxu1 %v906_v2 }
 0x379   :  { %8075 = vmatmul.mubr.msk.f32.gmra.mxu0 %vm48_vm1, %v9771_v36  ;;  %8109 = vmatprep.subr.mxu1 %v904_v63 }
 0x37a   :  { %8077 = vmatprep.mubr.msk.f32.mxu0 %vm48_vm1, %v9783_v40  ;;  %8110 = vmatpush3.msra.mxu1 %v904_v63  ;;  %v902_v0 = vpop.permute.xlu1 %901  ;;  %v9959_v63 = vld [vmem:[%s13007_s1 + $0x58] sm:$0xff] }
 0x37b   :  { %8111 = vmatprep.subr.mxu1 %v902_v0 }
 0x37c   :  { %8112 = vmatpush3.msra.mxu1 %v902_v0 }
 0x37d   :  { %8078 = vmatmul.mubr.msk.f32.gmra.mxu0 %vm48_vm1, %v9763_v34  ;;  %8131 = vmatprep.subr.msk.mxu1 %vm48_vm1, %v9855_v1 }
 0x37e   :  { %8080 = vmatprep.mubr.msk.f32.mxu0 %vm48_vm1, %v9775_v37 }
 0x381   :  { %8081 = vmatmul.mubr.msk.f32.gmra.mxu0 %vm48_vm1, %v9755_v26 }
 0x382   :  { %8083 = vmatprep.mubr.msk.f32.mxu0 %vm48_vm1, %v9767_v35 }
 0x385   :  { %8084 = vmatmul.mubr.msk.f32.gmra.mxu0 %vm48_vm1, %v9759_v27 }
 0x386   :  { %8086 = vmatprep.mubr.msk.f32.mxu0 %vm48_vm1, %v9751_v23 }
 0x389   :  { %8087 = vmatmul.mubr.msk.f32.gmra.mxu0 %vm48_vm1, %v9749_v19 }
 0x435   :  { %v8073_v4 = vpop.f32.mrf.mxu0 }
 0x436   :  { %v703_v11 = vadd.f32 %v8073_v4, %v9876_v3 }
 0x437   :  { %v697_v5 = vpop.f32.mrf.mxu0 }
 0x438   :  { %v698_v31 = vadd.f32 %v697_v5, %v9881_v10  ;;  %v760_v7 = vsel %vm756_vm3, %v703_v11, -inf }
 0x439   :  { %761 = vmax.xlane.f32.xlu1 %v760_v7  ;;  %v8076_v8 = vpop.f32.mrf.mxu0 }
 0x43a   :  { %v9892_v9 = vadd.f32 %v8076_v8, %v9887_v30  ;;  %v757_v12 = vsel %vm756_vm3, %v698_v31, -inf }
 0x43b   :  { %v707_v41 = vpop.f32.mrf.mxu0  ;;  %758 = vmax.xlane.f32.xlu0 %v757_v12  ;;  %v9971_v12 = vld [vmem:[%s13007_s1 + $0x50] sm:$0xff] }
 0x43c   :  { %v9906_v43 = vadd.f32 %v707_v41, %v9898_v15  ;;  %v766_v47 = vsel %vm756_vm3, %v9892_v9, -inf }
 0x43d   :  { %v8079_v22 = vpop.f32.mrf.mxu0 }
 0x43e   :  { %v9909_v44 = vadd.f32 %v8079_v22, %v9903_v18  ;;  %v763_v56 = vsel %vm756_vm3, %v9906_v43, -inf }
 0x43f   :  { %v717_v48 = vpop.f32.mrf.mxu0  ;;  %767 = vmax.xlane.f32.xlu0 %v766_v47 }
 0x440   :  { %v772_v51 = vsel %vm756_vm3, %v9909_v44, -inf  ;;  %v9926_v39 = vadd.f32 %v717_v48, %v9916_v49 }
 0x441   :  { %773 = vmax.xlane.f32.xlu1 %v772_v51  ;;  %v8082_v52 = vpop.f32.mrf.mxu0  ;;  %v9983_v51 = vpop.permute.xlu1 %1142 }
 0x442   :  { %v9929_v53 = vadd.f32 %v8082_v52, %v9921_v50  ;;  %v769_v62 = vsel %vm756_vm3, %v9926_v39, -inf }
 0x443   :  { %v727_v57 = vpop.f32.mrf.mxu0  ;;  %764 = vmax.xlane.f32.xlu0 %v763_v56 }
 0x444   :  { %v778_v46 = vsel %vm756_vm3, %v9929_v53, -inf  ;;  %v728_v60 = vadd.f32 %v727_v57, %v9936_v58 }
 0x445   :  { %779 = vmax.xlane.f32.xlu1 %v778_v46  ;;  %v8085_v59 = vpop.f32.mrf.mxu0 }
 0x446   :  { %v9947_v61 = vadd.f32 %v8085_v59, %v9941_v45  ;;  %v775_v7 = vsel %vm756_vm3, %v728_v60, -inf }
 0x447   :  { %v737_v54 = vpop.f32.mrf.mxu0  ;;  %770 = vmax.xlane.f32.xlu0 %v769_v62 }
 0x448   :  { %v784_v2 = vsel %vm756_vm3, %v9947_v61, -inf  ;;  %v9964_v4 = vadd.f32 %v737_v54, %v9954_v55 }
 0x449   :  { %785 = vmax.xlane.f32.xlu1 %v784_v2  ;;  %v8088_v0 = vpop.f32.mrf.mxu0 }
 0x44a   :  { %v753_v5 = vadd.f32 %v8088_v0, %v9959_v63  ;;  %v781_v47 = vsel %vm756_vm3, %v9964_v4, -inf }
 0x44b   :  { %v747_v8 = vpop.f32.mrf.mxu0  ;;  %776 = vmax.xlane.f32.xlu0 %v775_v7 }
 0x44c   :  { %v790_v41 = vsel %vm756_vm3, %v753_v5, -inf  ;;  %v9975_v22 = vadd.f32 %v747_v8, %v9971_v12 }
 0x44d   :  { %791 = vmax.xlane.f32.xlu1 %v790_v41 }
 0x44e   :  { %v787_v48 = vsel %vm756_vm3, %v9975_v22, -inf }
 0x44f   :  { %782 = vmax.xlane.f32.xlu0 %v781_v47 }
 0x453   :  { %788 = vmax.xlane.f32.xlu0 %v787_v48 }
 0x469   :  { %1140 = vrot.lane.b32.xlu0 %v9759_v27, %s9481_s8 }
 0x4c2   :  { %v762_v52 = vpop.xlane.xlu1 %761 }
 0x4c3   :  { %v794_v56 = vsub.f32 %v703_v11, %v762_v52 }
 0x4c4   :  { %v759_v57 = vpop.xlane.xlu0 %758 }
 0x4c5   :  { %v807_v46 = vmul.f32 1.442695, %v794_v56  ;;  %v793_v59 = vsub.f32 %v698_v31, %v759_v57 }
 0x4c7   :  { %9032 = vpow2.f32 %v807_v46  ;;  %v805_v62 = vmul.f32 1.442695, %v793_v59 }
 0x4c8   :  { %v768_v8 = vpop.xlane.xlu0 %767 }
 0x4c9   :  { %9034 = vpow2.f32 %v805_v62 }
 0x4ca   :  { %v774_v11 = vpop.xlane.xlu1 %773 }
 0x4cb   :  { %v798_v13 = vsub.f32 %v9909_v44, %v774_v11 }
 0x4cc   :  { %v765_v31 = vpop.xlane.xlu0 %764 }
 0x4cd   :  { %v795_v52 = vsub.f32 %v9906_v43, %v765_v31  ;;  %v815_v21 = vmul.f32 1.442695, %v798_v13 }
 0x4ce   :  { %v780_v41 = vpop.xlane.xlu1 %779 }
 0x4cf   :  { %v809_v57 = vmul.f32 1.442695, %v795_v52 }
 0x4d0   :  { %v771_v47 = vpop.xlane.xlu0 %770 }
 0x4d1   :  { %9036 = vpow2.f32 %v809_v57  ;;  %v797_v16 = vsub.f32 %v9926_v39, %v771_v47 }
 0x4d2   :  { %v786_v48 = vpop.xlane.xlu1 %785 }
 0x4d3   :  { %v813_v31 = vmul.f32 1.442695, %v797_v16 }
 0x4d4   :  { %v9985_v54 = vpop.eup %9032  ;;  %v777_v56 = vpop.xlane.xlu0 %776 }
 0x4d5   :  { %v832_v2 = vsel %vm756_vm3, %v9985_v54, 0.0  ;;  %v799_v46 = vsub.f32 %v728_v60, %v777_v56  ;;  %v800_v60 = vsub.f32 %v9929_v53, %v780_v41 }
 0x4d6   :  { %v9989_v0 = vpop.eup %9034  ;;  %833 = vadd.xlane.f32.xlu1 %v832_v2  ;;  %v792_v59 = vpop.xlane.xlu1 %791 }
 0x4d7   :  { %v829_v7 = vsel %vm756_vm3, %v9989_v0, 0.0  ;;  %v817_v62 = vmul.f32 1.442695, %v799_v46  ;;  %v804_v2 = vsub.f32 %v753_v5, %v792_v59 }
 0x4d8   :  { %830 = vadd.xlane.f32.xlu0 %v829_v7  ;;  %v796_v7 = vsub.f32 %v9892_v9, %v768_v8  ;;  %v819_v8 = vmul.f32 1.442695, %v800_v60 }
 0x4d9   :  { %9038 = vpow2.f32 %v817_v62  ;;  %v827_v17 = vmul.f32 1.442695, %v804_v2 }
 0x4da   :  { %v811_v14 = vmul.f32 1.442695, %v796_v7 }
 0x4db   :  { %9040 = vpow2.f32 %v827_v17  ;;  %v802_v17 = vsub.f32 %v9947_v61, %v786_v48 }
 0x4dc   :  { %9042 = vpow2.f32 %v811_v14  ;;  %v783_v14 = vpop.xlane.xlu0 %782 }
 0x4dd   :  { %9044 = vpow2.f32 %v815_v21  ;;  %v823_v21 = vmul.f32 1.442695, %v802_v17  ;;  %v801_v16 = vsub.f32 %v9964_v4, %v783_v14 }
 0x4de   :  { %v10007_v43 = vpop.eup %9036  ;;  %9046 = vpow2.f32 %v813_v31 }
 0x4df   :  { %v835_v5 = vsel %vm756_vm3, %v10007_v43, 0.0  ;;  %9048 = vpow2.f32 %v819_v8  ;;  %v821_v11 = vmul.f32 1.442695, %v801_v16 }
 0x4e0   :  { %9050 = vpow2.f32 %v823_v21  ;;  %v789_v2 = vpop.xlane.xlu0 %788 }
 0x4e1   :  { %9052 = vpow2.f32 %v821_v11  ;;  %v803_v7 = vsub.f32 %v9975_v22, %v789_v2 }
 0x4e3   :  { %v825_v60 = vmul.f32 1.442695, %v803_v7 }
 0x4e4   :  { %v1141_v31 = vpop.permute.xlu0 %1140 }
 0x4e5   :  { %9054 = vpow2.f32 %v825_v60 }
 0x4e6   :  { %v10012_v9 = vpop.eup %9038 }
 0x4e7   :  { %1136 = vrot.lane.b32.xlu1 %v9755_v26, %s9481_s8  ;;  %v847_v13 = vsel %vm756_vm3, %v10012_v9, 0.0 }
 0x4e8   :  { %v10017_v44 = vpop.eup %9040 }
 0x4e9   :  { %v10020_v39 = vpop.eup %9042  ;;  %v862_v53 = vsel %vm756_vm3, %v10017_v44, 0.0 }
 0x4ea   :  { %v838_v61 = vsel %vm756_vm3, %v10020_v39, 0.0  ;;  %v10026_v41 = vpop.eup %9044 }
 0x4eb   :  { %1134 = vrot.lane.b32.xlu1 %v9775_v37, %s9481_s8  ;;  %v844_v47 = vsel %vm756_vm3, %v10026_v41, 0.0  ;;  %v10030_v48 = vpop.eup %9046 }
 0x4ec   :  { %v841_v4 = vsel %vm756_vm3, %v10030_v48, 0.0  ;;  %v10034_v52 = vpop.eup %9048 }
 0x4ed   :  { %v850_v56 = vsel %vm756_vm3, %v10034_v52, 0.0  ;;  %v10038_v57 = vpop.eup %9050 }
 0x4ee   :  { %1138 = vrot.lane.b32.xlu0 %v9767_v35, %s9481_s8  ;;  %v856_v46 = vsel %vm756_vm3, %v10038_v57, 0.0  ;;  %v10042_v59 = vpop.eup %9052 }
 0x4ef   :  { %1132 = vrot.lane.b32.xlu1 %v9763_v34, %s9481_s8  ;;  %v853_v62 = vsel %vm756_vm3, %v10042_v59, 0.0 }
 0x4f2   :  { %v10073_v17 = vpop.eup %9054 }
 0x4f3   :  { %1130 = vrot.lane.b32.xlu1 %v9783_v40, %s9481_s8  ;;  %v859_v14 = vsel %vm756_vm3, %v10073_v17, 0.0 }
 0x50d   :  { %836 = vadd.xlane.f32.xlu0 %v835_v5 }
 0x511   :  { %848 = vadd.xlane.f32.xlu0 %v847_v13 }
 0x515   :  { %863 = vadd.xlane.f32.xlu0 %v862_v53 }
 0x517   :  { %839 = vadd.xlane.f32.xlu1 %v838_v61 }
 0x51b   :  { %845 = vadd.xlane.f32.xlu1 %v844_v47 }
 0x51f   :  { %842 = vadd.xlane.f32.xlu1 %v841_v4 }
 0x523   :  { %851 = vadd.xlane.f32.xlu1 %v850_v56 }
 0x527   :  { %857 = vadd.xlane.f32.xlu1 %v856_v46 }
 0x52b   :  { %854 = vadd.xlane.f32.xlu1 %v853_v62  ;;  %1128 = vrot.lane.b32.xlu0 %v9771_v36, %s9481_s8 }
 0x52f   :  { %1104 = vrot.lane.b32.xlu0 %v9771_v36, %s9482_s9 }
 0x533   :  { %1108 = vrot.lane.b32.xlu0 %v9763_v34, %s9482_s9 }
 0x537   :  { %1112 = vrot.lane.b32.xlu0 %v9755_v26, %s9482_s9 }
 0x53b   :  { %1116 = vrot.lane.b32.xlu0 %v9759_v27, %s9482_s9 }
 0x53c   :  { %1126 = vrot.lane.b32.xlu1 %v9789_v42, %s9481_s8 }
 0x53f   :  { %1120 = vrot.lane.b32.xlu0 %v9749_v19, %s9482_s9 }
 0x540   :  { %1124 = vrot.lane.b32.xlu1 %v9779_v38, %s9481_s8 }
 0x543   :  { %1473 = vrot.lane.b32.xlu0 %v9624_v32, %s9481_s8 }
 0x544   :  { %1122 = vrot.lane.b32.xlu1 %v9745_v6, %s9481_s8 }
 0x547   :  { %1467 = vrot.lane.b32.xlu0 %v9618_v29, %s9481_s8 }
 0x548   :  { %1098 = vrot.lane.b32.xlu1 %v9745_v6, %s9482_s9 }
 0x54b   :  { %1463 = vrot.lane.b32.xlu0 %v9610_v25, %s9481_s8 }
 0x55f   :  { %v834_v5 = vpop.xlane.xlu1 %833 }
 0x560   :  { %9056 = vrcp.f32 %v834_v5 }
 0x561   :  { %v831_v8 = vpop.xlane.xlu0 %830 }
 0x562   :  { %9058 = vrcp.f32 %v831_v8 }
 0x563   :  { %v1137_v22 = vpop.permute.xlu1 %1136 }
 0x565   :  { %v1139_v11 = vpop.permute.xlu0 %1138 }
 0x56c   :  { %860 = vadd.xlane.f32.xlu1 %v859_v14 }
 0x56d   :  { %v9057_v13 = vpop.eup %9056 }
 0x56e   :  { %v878_v53 = vmul.f32 %v9057_v13, %v9985_v54  ;;  %v1135_v54 = vpop.permute.xlu1 %1134 }
 0x56f   :  { %v9059_v21 = vpop.eup %9058 }
 0x570   :  { %v877_v16 = vmul.f32 %v9059_v21, %v9989_v0 }
 0x572   :  { %8113 = vmatprep.mubr.msk.f32.mxu1 %vm756_vm3, %v877_v16 }
 0x573   :  { %8114 = vmatmul.mubr.msk.f32.vlgmr.msra.gmra.mxu1 %vm756_vm3, %v878_v53 }
 0x574   :  { %8132 = vmatpush3.xpose.msk.msra.mxu1 %vm48_vm1, %v9855_v1  ;;  %v1133_v1 = vpop.permute.xlu1 %1132 }
 0x575   :  { %8133 = vmatprep.subr.msk.mxu1 %vm48_vm1, %v9983_v51 }
 0x578   :  { %8134 = vmatpush3.xpose.msk.msra.mxu1 %vm48_vm1, %v9983_v51  ;;  %v1131_v51 = vpop.permute.xlu1 %1130 }
 0x579   :  { %8135 = vmatprep.subr.msk.mxu1 %vm48_vm1, %v1141_v31 }
 0x57c   :  { %8136 = vmatpush3.xpose.msk.msra.mxu1 %vm48_vm1, %v1141_v31 }
 0x57d   :  { %8137 = vmatprep.subr.msk.mxu1 %vm48_vm1, %v1139_v11  ;;  %1100 = vrot.lane.b32.xlu1 %v9779_v38, %s9482_s9 }
 0x580   :  { %8138 = vmatpush3.xpose.msk.msra.mxu1 %vm48_vm1, %v1139_v11 }
 0x581   :  { %8139 = vmatprep.subr.msk.mxu1 %vm48_vm1, %v1137_v22  ;;  %1102 = vrot.lane.b32.xlu1 %v9789_v42, %s9482_s9 }
 0x584   :  { %8140 = vmatpush3.xpose.msk.msra.mxu1 %vm48_vm1, %v1137_v22 }
 0x585   :  { %8141 = vmatprep.subr.msk.mxu1 %vm48_vm1, %v1135_v54  ;;  %1106 = vrot.lane.b32.xlu1 %v9783_v40, %s9482_s9 }
 0x588   :  { %8142 = vmatpush3.xpose.msk.msra.mxu1 %vm48_vm1, %v1135_v54 }
 0x589   :  { %8143 = vmatprep.subr.msk.mxu1 %vm48_vm1, %v1133_v1  ;;  %1110 = vrot.lane.b32.xlu1 %v9775_v37, %s9482_s9 }
 0x58c   :  { %8144 = vmatpush3.xpose.msk.msra.mxu1 %vm48_vm1, %v1133_v1 }
 0x58d   :  { %8145 = vmatprep.subr.msk.mxu1 %vm48_vm1, %v1131_v51  ;;  %1114 = vrot.lane.b32.xlu1 %v9767_v35, %s9482_s9 }
 0x590   :  { %8146 = vmatpush3.xpose.msk.msra.mxu1 %vm48_vm1, %v1131_v51 }
 0x591   :  { %1118 = vrot.lane.b32.xlu1 %v9751_v23, %s9482_s9 }
 0x595   :  { %1471 = vrot.lane.b32.xlu1 %v9626_v33, %s9481_s8 }
 0x596   :  { %v837_v0 = vpop.xlane.xlu0 %836 }
 0x597   :  { %9060 = vrcp.f32 %v837_v0 }
 0x599   :  { %1469 = vrot.lane.b32.xlu1 %v9616_v28, %s9481_s8 }
 0x59a   :  { %v849_v61 = vpop.xlane.xlu0 %848 }
 0x59d   :  { %1465 = vrot.lane.b32.xlu1 %v9608_v24, %s9481_s8 }
 0x59e   :  { %v864_v47 = vpop.xlane.xlu0 %863 }
 0x5a0   :  { %v840_v4 = vpop.xlane.xlu1 %839 }
 0x5a1   :  { %9062 = vrcp.f32 %v840_v4  ;;  %1461 = vrot.lane.b32.xlu1 %v9600_v20, %s9481_s8 }
 0x5a2   :  { %v1129_v56 = vpop.permute.xlu0 %1128  ;;  %9064 = vrcp.f32 %v849_v61 }
 0x5a3   :  { %8147 = vmatprep.subr.msk.mxu1 %vm48_vm1, %v1129_v56 }
 0x5a4   :  { %v9061_v46 = vpop.eup %9060  ;;  %8148 = vmatpush3.xpose.msk.msra.mxu1 %vm48_vm1, %v1129_v56  ;;  %v846_v62 = vpop.xlane.xlu1 %845 }
 0x5a5   :  { %v879_v2 = vmul.f32 %v9061_v46, %v10007_v43  ;;  %9066 = vrcp.f32 %v846_v62 }
 0x5a6   :  { %v10122_v7 = vpop.permute.xlu0 %1104 }
 0x5a7   :  { %8116 = vmatprep.mubr.msk.f32.mxu1 %vm756_vm3, %v879_v2 }
 0x5a8   :  { %v843_v60 = vpop.xlane.xlu1 %842 }
 0x5a9   :  { %9068 = vrcp.f32 %v843_v60 }
 0x5aa   :  { %v10125_v31 = vpop.permute.xlu0 %1108 }
 0x5ac   :  { %v852_v5 = vpop.xlane.xlu1 %851 }
 0x5ad   :  { %9070 = vrcp.f32 %v852_v5 }
 0x5ae   :  { %v9063_v8 = vpop.eup %9062  ;;  %v10127_v14 = vpop.permute.xlu0 %1112 }
 0x5af   :  { %v880_v13 = vmul.f32 %v9063_v8, %v10020_v39  ;;  %v9065_v16 = vpop.eup %9064 }
 0x5b0   :  { %v858_v21 = vpop.xlane.xlu1 %857  ;;  %v883_v39 = vmul.f32 %v9065_v16, %v10012_v9 }
 0x5b1   :  { %8117 = vmatmul.mubr.msk.f32.gmra.mxu1 %vm756_vm3, %v880_v13  ;;  %9072 = vrcp.f32 %v858_v21 }
 0x5b2   :  { %v10131_v43 = vpop.permute.xlu0 %1116  ;;  %v9067_v22 = vpop.eup %9066 }
 0x5b3   :  { %v882_v0 = vmul.f32 %v9067_v22, %v10026_v41 }
 0x5b4   :  { %v855_v53 = vpop.xlane.xlu1 %854 }
 0x5b5   :  { %9074 = vrcp.f32 %v855_v53 }
 0x5b6   :  { %v9069_v11 = vpop.eup %9068  ;;  %v10133_v54 = vpop.permute.xlu0 %1120  ;;  %9076 = vrcp.f32 %v864_v47 }
 0x5b7   :  { %v881_v1 = vmul.f32 %v9069_v11, %v10030_v48 }
 0x5b8   :  { %v1127_v51 = vpop.permute.xlu1 %1126 }
 0x5b9   :  { %8119 = vmatprep.mubr.msk.f32.mxu1 %vm756_vm3, %v881_v1  ;;  %8149 = vmatprep.subr.msk.mxu1 %vm48_vm1, %v1127_v51 }
 0x5ba   :  { %v9071_v61 = vpop.eup %9070  ;;  %v1474_v4 = vpop.permute.xlu0 %1473  ;;  %8120 = vmatmul.mubr.msk.f32.gmra.mxu1 %vm756_vm3, %v882_v0 }
 0x5bb   :  { %8150 = vmatpush3.xpose.msk.msra.mxu1 %vm48_vm1, %v1127_v51  ;;  %8122 = vmatprep.mubr.msk.f32.mxu1 %vm756_vm3, %v883_v39  ;;  %v884_v56 = vmul.f32 %v9071_v61, %v10034_v52 }
 0x5bc   :  { %8173 = vmatprep.subr.mxu0 %v1474_v4  ;;  %v1125_v48 = vpop.permute.xlu1 %1124 }
 0x5bd   :  { %8174 = vmatpush3.msra.mxu0 %v1474_v4  ;;  %8151 = vmatprep.subr.msk.mxu1 %vm48_vm1, %v1125_v48 }
 0x5be   :  { %8123 = vmatmul.mubr.msk.f32.gmra.mxu1 %vm756_vm3, %v884_v56  ;;  %v9073_v41 = vpop.eup %9072  ;;  %v1468_v11 = vpop.permute.xlu0 %1467 }
 0x5bf   :  { %8152 = vmatpush3.xpose.msk.msra.mxu1 %vm48_vm1, %v1125_v48  ;;  %v886_v52 = vmul.f32 %v9073_v41, %v10038_v57 }
 0x5c0   :  { %v1123_v9 = vpop.permute.xlu1 %1122 }
 0x5c1   :  { %8153 = vmatprep.subr.msk.mxu1 %vm48_vm1, %v1123_v9 }
 0x5c2   :  { %v9075_v46 = vpop.eup %9074 }
 0x5c3   :  { %8154 = vmatpush3.xpose.msk.msra.mxu1 %vm48_vm1, %v1123_v9  ;;  %v885_v62 = vmul.f32 %v9075_v46, %v10042_v59  ;;  %v9077_v21 = vpop.eup %9076 }
 0x5c4   :  { %8966 = vmatprep.subr.mxu1 %v1474_v4  ;;  %v1099_v2 = vpop.permute.xlu1 %1098  ;;  %v888_v59 = vmul.f32 %v9077_v21, %v10017_v44 }
 0x5c5   :  { %8125 = vmatprep.mubr.msk.f32.mxu1 %vm756_vm3, %v885_v62 }
 0x5c6   :  { %8126 = vmatmul.mubr.msk.f32.gmra.mxu1 %vm756_vm3, %v886_v52 }
 0x5f5   :  { %v861_v60 = vpop.xlane.xlu1 %860 }
 0x5f6   :  { %9078 = vrcp.f32 %v861_v60 }
 0x5f9   :  { %v1101_v5 = vpop.permute.xlu1 %1100 }
 0x5fd   :  { %v1103_v8 = vpop.permute.xlu1 %1102 }
 0x601   :  { %v1107_v13 = vpop.permute.xlu1 %1106 }
 0x603   :  { %v9079_v16 = vpop.eup %9078 }
 0x604   :  { %v887_v53 = vmul.f32 %v9079_v16, %v10073_v17 }
 0x605   :  { %v1111_v22 = vpop.permute.xlu1 %1110 }
 0x606   :  { %8128 = vmatprep.mubr.msk.f32.mxu1 %vm756_vm3, %v887_v53 }
 0x607   :  { %8129 = vmatmul.mubr.msk.f32.gmra.mxu1 %vm756_vm3, %v888_v59 }
 0x608   :  { %8155 = vmatprep.mubr.msk.f32.mxu1 %vm48_vm1, %v1099_v2 }
 0x609   :  { %v1115_v57 = vpop.permute.xlu1 %1114 }
 0x60b   :  { %8156 = vmatmul.mubr.msk.f32.vlgmr.msra.gmra.mxu1 %vm48_vm1, %v1101_v5 }
 0x60c   :  { %8978 = vmatpush3.msra.mxu1 %v1474_v4  ;;  %8158 = vmatprep.mubr.msk.f32.mxu1 %vm48_vm1, %v1103_v8 }
 0x60d   :  { %v1119_v47 = vpop.permute.xlu1 %1118 }
 0x60f   :  { %8159 = vmatmul.mubr.msk.f32.gmra.mxu1 %vm48_vm1, %v10122_v7 }
 0x610   :  { %8161 = vmatprep.mubr.msk.f32.mxu1 %vm48_vm1, %v1107_v13 }
 0x611   :  { %v1472_v17 = vpop.permute.xlu1 %1471 }
 0x612   :  { %8175 = vmatprep.subr.mxu0 %v1472_v17  ;;  %8967 = vmatprep.subr.mxu1 %v1472_v17 }
 0x613   :  { %8162 = vmatmul.mubr.msk.f32.gmra.mxu1 %vm48_vm1, %v10125_v31  ;;  %8176 = vmatpush3.msra.mxu0 %v1472_v17  ;;  %v1464_v31 = vpop.permute.xlu0 %1463 }
 0x614   :  { %8979 = vmatpush3.msra.mxu1 %v1472_v17  ;;  %8164 = vmatprep.mubr.msk.f32.mxu1 %vm48_vm1, %v1111_v22 }
 0x615   :  { %v1470_v44 = vpop.permute.xlu1 %1469 }
 0x616   :  { %8177 = vmatprep.subr.mxu0 %v1470_v44  ;;  %8968 = vmatprep.subr.mxu1 %v1470_v44 }
 0x617   :  { %8165 = vmatmul.mubr.msk.f32.gmra.mxu1 %vm48_vm1, %v10127_v14  ;;  %8178 = vmatpush3.msra.mxu0 %v1470_v44 }
 0x618   :  { %8980 = vmatpush3.msra.mxu1 %v1470_v44  ;;  %8167 = vmatprep.mubr.msk.f32.mxu1 %vm48_vm1, %v1115_v57 }
 0x619   :  { %8179 = vmatprep.subr.mxu0 %v1468_v11  ;;  %8969 = vmatprep.subr.mxu1 %v1468_v11  ;;  %v1466_v7 = vpop.permute.xlu1 %1465 }
 0x61a   :  { %8180 = vmatpush3.msra.mxu0 %v1468_v11  ;;  %8981 = vmatpush3.msra.mxu1 %v1468_v11 }
 0x61b   :  { %8181 = vmatprep.subr.mxu0 %v1466_v7  ;;  %8970 = vmatprep.subr.mxu1 %v1466_v7 }
 0x61c   :  { %8168 = vmatmul.mubr.msk.f32.gmra.mxu1 %vm48_vm1, %v10131_v43  ;;  %8182 = vmatpush3.msra.mxu0 %v1466_v7 }
 0x61d   :  { %8982 = vmatpush3.msra.mxu1 %v1466_v7  ;;  %8170 = vmatprep.mubr.msk.f32.mxu1 %vm48_vm1, %v1119_v47  ;;  %v1462_v14 = vpop.permute.xlu1 %1461 }
 0x61e   :  { %8183 = vmatprep.subr.mxu0 %v1464_v31  ;;  %8971 = vmatprep.subr.mxu1 %v1464_v31 }
 0x61f   :  { %8184 = vmatpush3.msra.mxu0 %v1464_v31  ;;  %8983 = vmatpush3.msra.mxu1 %v1464_v31 }
 0x620   :  { %8185 = vmatprep.subr.mxu0 %v1462_v14  ;;  %8972 = vmatprep.subr.mxu1 %v1462_v14 }
 0x621   :  { %8171 = vmatmul.mubr.msk.f32.gmra.mxu1 %vm48_vm1, %v10133_v54  ;;  %8186 = vmatpush3.msra.mxu0 %v1462_v14 }
 0x622   :  { %8984 = vmatpush3.msra.mxu1 %v1462_v14 }
 0x633   :  { %v10174_v1 = vpop.f32.mrf.mxu1 }
 0x635   :  { %v10176_v43 = vpop.f32.mrf.mxu1 }
 0x671   :  { %v10178_v51 = vpop.f32.mrf.mxu1 }
 0x673   :  { %v10180_v0 = vpop.f32.mrf.mxu1 }
 0x67a   :  { %v10182_v39 = vpop.f32.mrf.mxu1 }
 0x67c   :  { %v10184_v61 = vpop.f32.mrf.mxu1 }
 0x67e   :  { %v10186_v4 = vpop.f32.mrf.mxu1 }
 0x680   :  { %v10188_v56 = vpop.f32.mrf.mxu1 }
 0x686   :  { %v10190_v48 = vpop.f32.mrf.mxu1 }
 0x688   :  { %v10192_v54 = vpop.f32.mrf.mxu1 }
 0x6c7   :  { %v10194_v9 = vpop.f32.mrf.mxu1 }
 0x6c9   :  { %v10196_v41 = vpop.f32.mrf.mxu1 }
 0x6cb   :  { %v8157_v46 = vpop.f32.mrf.mxu1 }
 0x6cc   :  { %v1266_v62 = vadd.f32 %v8157_v46, %v9876_v3 }
 0x6cd   :  { %v1260_v52 = vpop.f32.mrf.mxu1 }
 0x6ce   :  { %v1261_v2 = vadd.f32 %v1260_v52, %v9881_v10  ;;  %v1322_v60 = vsel %vm756_vm3, %v1266_v62, -inf }
 0x6cf   :  { %1323 = vmax.xlane.f32.xlu0 %v1322_v60  ;;  %v8160_v5 = vpop.f32.mrf.mxu1 }
 0x6d0   :  { %v10202_v8 = vadd.f32 %v8160_v5, %v9887_v30  ;;  %v1319_v13 = vsel %vm756_vm3, %v1261_v2, -inf }
 0x6d1   :  { %1320 = vmax.xlane.f32.xlu1 %v1319_v13  ;;  %v1270_v21 = vpop.f32.mrf.mxu1 }
 0x6d2   :  { %v10206_v16 = vadd.f32 %v1270_v21, %v9898_v15  ;;  %v1328_v10 = vsel %vm756_vm3, %v10202_v8, -inf  ;;  %v13104_v21 = vld [vmem:[#allocation4_spill] sm:$0xff] }
 0x6d3   :  { %v8163_v53 = vpop.f32.mrf.mxu1 }
 0x6d4   :  { %v10209_v3 = vadd.f32 %v8163_v53, %v9903_v18  ;;  %v1325_v22 = vsel %vm756_vm3, %v10206_v16, -inf  ;;  %v13105_v53 = vld [vmem:[#allocation7_spill] sm:$0xff] }
 0x6d5   :  { %1329 = vmax.xlane.f32.xlu1 %v1328_v10  ;;  %1326 = vmax.xlane.f32.xlu0 %v1325_v22  ;;  %v1280_v30 = vpop.f32.mrf.mxu1 }
 0x6d6   :  { %v10216_v59 = vadd.f32 %v1280_v30, %v9916_v49  ;;  %v1334_v18 = vsel %vm756_vm3, %v10209_v3, -inf }
 0x6d7   :  { %v8166_v57 = vpop.f32.mrf.mxu1 }
 0x6d8   :  { %v10219_v15 = vadd.f32 %v8166_v57, %v9921_v50  ;;  %v1331_v47 = vsel %vm756_vm3, %v10216_v59, -inf }
 0x6d9   :  { %1335 = vmax.xlane.f32.xlu1 %v1334_v18  ;;  %1332 = vmax.xlane.f32.xlu0 %v1331_v47  ;;  %v1290_v17 = vpop.f32.mrf.mxu1 }
 0x6da   :  { %v10226_v44 = vadd.f32 %v1290_v17, %v9936_v58  ;;  %v1340_v49 = vsel %vm756_vm3, %v10219_v15, -inf }
 0x6dc   :  { %v8169_v11 = vpop.f32.mrf.mxu1  ;;  %v1337_v50 = vsel %vm756_vm3, %v10226_v44, -inf }
 0x6dd   :  { %v10233_v7 = vadd.f32 %v8169_v11, %v9941_v45  ;;  %1341 = vmax.xlane.f32.xlu1 %v1340_v49  ;;  %1338 = vmax.xlane.f32.xlu0 %v1337_v50 }
 0x6de   :  { %v1300_v31 = vpop.f32.mrf.mxu1 }
 0x6df   :  { %v10236_v14 = vadd.f32 %v1300_v31, %v9954_v55  ;;  %v1346_v58 = vsel %vm756_vm3, %v10233_v7, -inf }
 0x6e1   :  { %v8172_v46 = vpop.f32.mrf.mxu1  ;;  %1347 = vmax.xlane.f32.xlu1 %v1346_v58  ;;  %v1343_v52 = vsel %vm756_vm3, %v10236_v14, -inf }
 0x6e2   :  { %v10243_v60 = vadd.f32 %v8172_v46, %v9959_v63  ;;  %1344 = vmax.xlane.f32.xlu0 %v1343_v52 }
 0x6e3   :  { %v1310_v45 = vpop.f32.mrf.mxu1 }
 0x6e4   :  { %v10246_v5 = vadd.f32 %v1310_v45, %v9971_v12  ;;  %v1352_v55 = vsel %vm756_vm3, %v10243_v60, -inf }
 0x6e5   :  { %1353 = vmax.xlane.f32.xlu1 %v1352_v55 }
 0x6e6   :  { %v1349_v13 = vsel %vm756_vm3, %v10246_v5, -inf }
 0x6e7   :  { %1350 = vmax.xlane.f32.xlu0 %v1349_v13 }
 0x6f6   :  { %1457 = vrot.lane.b32.xlu1 %v13104_v21, %s9481_s8 }
 0x6fd   :  { %1459 = vrot.lane.b32.xlu0 %v13105_v53, %s9481_s8 }
 0x758   :  { %v1324_v63 = vpop.xlane.xlu0 %1323 }
 0x759   :  { %v1356_v10 = vsub.f32 %v1266_v62, %v1324_v63 }
 0x75a   :  { %v1321_v22 = vpop.xlane.xlu1 %1320 }
 0x75b   :  { %v1369_v30 = vmul.f32 1.442695, %v1356_v10  ;;  %v1355_v12 = vsub.f32 %v1261_v2, %v1321_v22  ;;  %v13106_v10 = vld [vmem:[#allocation2_spill] sm:$0xff]  ;;  %v13107_v22 = vld [vmem:[#allocation3_spill] sm:$0xff] }
 0x75d   :  { %9080 = vpow2.f32 %v1369_v30  ;;  %v1367_v57 = vmul.f32 1.442695, %v1355_v12  ;;  %v13108_v30 = vld [vmem:[#allocation5_spill] sm:$0xff] }
 0x75e   :  { %v1327_v18 = vpop.xlane.xlu0 %1326  ;;  %v1330_v47 = vpop.xlane.xlu1 %1329 }
 0x75f   :  { %9082 = vpow2.f32 %v1367_v57  ;;  %v1357_v12 = vsub.f32 %v10206_v16, %v1327_v18  ;;  %v1358_v57 = vsub.f32 %v10202_v8, %v1330_v47 }
 0x762   :  { %v1333_v17 = vpop.xlane.xlu0 %1332  ;;  %v1336_v11 = vpop.xlane.xlu1 %1335 }
 0x766   :  { %v1339_v49 = vpop.xlane.xlu0 %1338  ;;  %v1342_v50 = vpop.xlane.xlu1 %1341 }
 0x767   :  { %v1362_v21 = vsub.f32 %v10219_v15, %v1342_v50  ;;  %v1361_v16 = vsub.f32 %v10226_v44, %v1339_v49 }
 0x769   :  { %v1381_v20 = vmul.f32 1.442695, %v1362_v21 }
 0x76a   :  { %v10256_v31 = vpop.eup %9080  ;;  %v1348_v58 = vpop.xlane.xlu1 %1347 }
 0x76b   :  { %v1345_v46 = vpop.xlane.xlu0 %1344  ;;  %v1394_v52 = vsel %vm756_vm3, %v10256_v31, 0.0 }
 0x76c   :  { %v10260_v62 = vpop.eup %9082  ;;  %1395 = vadd.xlane.f32.xlu1 %v1394_v52  ;;  %v1371_v52 = vmul.f32 1.442695, %v1357_v12  ;;  %v1363_v15 = vsub.f32 %v10236_v14, %v1345_v46 }
 0x76d   :  { %v1391_v2 = vsel %vm756_vm3, %v10260_v62, 0.0 }
 0x76e   :  { %1392 = vadd.xlane.f32.xlu0 %v1391_v2  ;;  %v1354_v55 = vpop.xlane.xlu1 %1353  ;;  %v1360_v2 = vsub.f32 %v10209_v3, %v1336_v11  ;;  %9084 = vpow2.f32 %v1371_v52  ;;  %v1379_v3 = vmul.f32 1.442695, %v1361_v16 }
 0x76f   :  { %v1366_v18 = vsub.f32 %v10243_v60, %v1354_v55 }
 0x770   :  { %v1351_v45 = vpop.xlane.xlu0 %1350 }
 0x771   :  { %v1389_v47 = vmul.f32 1.442695, %v1366_v18  ;;  %v1365_v21 = vsub.f32 %v10246_v5, %v1351_v45  ;;  %v10367_v18 = vld [vmem:[%s13008_s4] sm:$0xff] }
 0x772   :  { %v1458_v63 = vpop.permute.xlu1 %1457 }
 0x774   :  { %v1460_v13 = vpop.permute.xlu0 %1459 }
 0x775   :  { %8187 = vmatprep.subr.mxu0 %v1460_v13  ;;  %8973 = vmatprep.subr.mxu1 %v1460_v13 }
 0x776   :  { %8188 = vmatpush3.msra.mxu0 %v1460_v13  ;;  %8985 = vmatpush3.msra.mxu1 %v1460_v13  ;;  %v1373_v13 = vmul.f32 1.442695, %v1358_v57 }
 0x777   :  { %8189 = vmatprep.subr.mxu0 %v1458_v63  ;;  %8974 = vmatprep.subr.mxu1 %v1458_v63 }
 0x778   :  { %8190 = vmatpush3.msra.mxu0 %v1458_v63  ;;  %8986 = vmatpush3.msra.mxu1 %v1458_v63  ;;  %v1359_v63 = vsub.f32 %v10216_v59, %v1333_v17  ;;  %9086 = vpow2.f32 %v1373_v13  ;;  %v1383_v59 = vmul.f32 1.442695, %v1363_v15  ;;  %v1649_v15 = vrot.slane %v10367_v18, 4 }
 0x77a   :  { %v1375_v24 = vmul.f32 1.442695, %v1359_v63 }
 0x77b   :  { %v10280_v17 = vpop.eup %9084 }
 0x77c   :  { %v1397_v44 = vsel %vm756_vm3, %v10280_v17, 0.0 }
 0x77d   :  { %1453 = vrot.lane.b32.xlu1 %v13106_v10, %s9481_s8  ;;  %v1377_v10 = vmul.f32 1.442695, %v1360_v2 }
 0x77f   :  { %9088 = vpow2.f32 %v1377_v10 }
 0x780   :  { %9090 = vpow2.f32 %v1381_v20  ;;  %v1387_v20 = vmul.f32 1.442695, %v1365_v21 }
 0x781   :  { %1451 = vrot.lane.b32.xlu1 %v13107_v22, %s9481_s8  ;;  %v1364_v22 = vsub.f32 %v10233_v7, %v1348_v58  ;;  %9092 = vpow2.f32 %v1375_v24 }
 0x783   :  { %v1385_v8 = vmul.f32 1.442695, %v1364_v22 }
 0x784   :  { %1455 = vrot.lane.b32.xlu0 %v13108_v30, %s9481_s8  ;;  %s9483_s8 = smov 88  }
 0x785   :  { %9094 = vpow2.f32 %v1385_v8  ;;  %v10282_v7 = vpop.eup %9086 }
 0x786   :  { %9096 = vpow2.f32 %v1379_v3  ;;  %v1400_v14 = vsel %vm756_vm3, %v10282_v7, 0.0 }
 0x787   :  { %9098 = vpow2.f32 %v1389_v47 }
 0x788   :  { %9100 = vpow2.f32 %v1383_v59 }
 0x789   :  { %9102 = vpow2.f32 %v1387_v20 }
 0x78c   :  { %v10286_v24 = vpop.eup %9088 }
 0x78d   :  { %v10290_v60 = vpop.eup %9090  ;;  %v1406_v5 = vsel %vm756_vm3, %v10286_v24, 0.0 }
 0x78e   :  { %v10294_v11 = vpop.eup %9092  ;;  %v1412_v49 = vsel %vm756_vm3, %v10290_v60, 0.0 }
 0x78f   :  { %v1403_v58 = vsel %vm756_vm3, %v10294_v11, 0.0 }
 0x792   :  { %v10298_v50 = vpop.eup %9094 }
 0x793   :  { %v10302_v46 = vpop.eup %9096  ;;  %v1418_v45 = vsel %vm756_vm3, %v10298_v50, 0.0 }
 0x794   :  { %v10306_v55 = vpop.eup %9098  ;;  %v1409_v10 = vsel %vm756_vm3, %v10302_v46, 0.0 }
 0x795   :  { %v10310_v22 = vpop.eup %9100  ;;  %v1424_v12 = vsel %vm756_vm3, %v10306_v55, 0.0 }
 0x796   :  { %v1415_v57 = vsel %vm756_vm3, %v10310_v22, 0.0  ;;  %v10316_v52 = vpop.eup %9102 }
 0x797   :  { %v1421_v2 = vsel %vm756_vm3, %v10316_v52, 0.0 }
 0x7a3   :  { %1398 = vadd.xlane.f32.xlu0 %v1397_v44 }
 0x7a5   :  { %1401 = vadd.xlane.f32.xlu1 %v1400_v14 }
 0x7a7   :  { %1407 = vadd.xlane.f32.xlu0 %v1406_v5 }
 0x7a9   :  { %1413 = vadd.xlane.f32.xlu1 %v1412_v49 }
 0x7ab   :  { %1404 = vadd.xlane.f32.xlu0 %v1403_v58 }
 0x7ad   :  { %1419 = vadd.xlane.f32.xlu1 %v1418_v45 }
 0x7af   :  { %1410 = vadd.xlane.f32.xlu0 %v1409_v10 }
 0x7b1   :  { %1425 = vadd.xlane.f32.xlu1 %v1424_v12 }
 0x7b3   :  { %1416 = vadd.xlane.f32.xlu0 %v1415_v57 }
 0x7b7   :  { %1422 = vadd.xlane.f32.xlu0 %v1421_v2 }
 0x7c2   :  { %2020 = vrot.lane.b32.xlu1 %v9751_v23, %s9483_s8 }
 0x7c6   :  { %2018 = vrot.lane.b32.xlu1 %v9759_v27, %s9483_s8 }
 0x7ca   :  { %2014 = vrot.lane.b32.xlu1 %v9755_v26, %s9483_s8 }
 0x7cd   :  { %2022 = vrot.lane.b32.xlu0 %v9749_v19, %s9483_s8 }
 0x7ce   :  { %2010 = vrot.lane.b32.xlu1 %v9763_v34, %s9483_s8 }
 0x7d1   :  { %2016 = vrot.lane.b32.xlu0 %v9767_v35, %s9483_s8 }
 0x7d2   :  { %2006 = vrot.lane.b32.xlu1 %v9771_v36, %s9483_s8 }
 0x7d5   :  { %2012 = vrot.lane.b32.xlu0 %v9775_v37, %s9483_s8 }
 0x7d6   :  { %2002 = vrot.lane.b32.xlu1 %v9779_v38, %s9483_s8 }
 0x7d9   :  { %2008 = vrot.lane.b32.xlu0 %v9783_v40, %s9483_s8 }
 0x7da   :  { %1976 = vrot.lane.b32.xlu1 %v9745_v6, %s9484_s10 }
 0x7dd   :  { %2004 = vrot.lane.b32.xlu0 %v9789_v42, %s9483_s8 }
 0x7de   :  { %1980 = vrot.lane.b32.xlu1 %v9789_v42, %s9484_s10 }
 0x7e1   :  { %2000 = vrot.lane.b32.xlu0 %v9745_v6, %s9483_s8 }
 0x7e2   :  { %1984 = vrot.lane.b32.xlu1 %v9783_v40, %s9484_s10 }
 0x7e5   :  { %1978 = vrot.lane.b32.xlu0 %v9779_v38, %s9484_s10 }
 0x7e6   :  { %1988 = vrot.lane.b32.xlu1 %v9775_v37, %s9484_s10 }
 0x7e9   :  { %1982 = vrot.lane.b32.xlu0 %v9771_v36, %s9484_s10 }
 0x7ea   :  { %1992 = vrot.lane.b32.xlu1 %v9767_v35, %s9484_s10 }
 0x7ed   :  { %1986 = vrot.lane.b32.xlu0 %v9763_v34, %s9484_s10 }
 0x7ee   :  { %1996 = vrot.lane.b32.xlu1 %v9751_v23, %s9484_s10 }
 0x7f1   :  { %1990 = vrot.lane.b32.xlu0 %v9755_v26, %s9484_s10 }
 0x7f2   :  { %2748 = vrot.lane.b32.xlu1 %v9749_v19, %s9485_s11 }
 0x7f5   :  { %1994 = vrot.lane.b32.xlu0 %v9759_v27, %s9484_s10  ;;  %v1396_v13 = vpop.xlane.xlu1 %1395 }
 0x7f6   :  { %2744 = vrot.lane.b32.xlu1 %v9759_v27, %s9485_s11  ;;  %9104 = vrcp.f32 %v1396_v13 }
 0x7f7   :  { %v1393_v63 = vpop.xlane.xlu0 %1392 }
 0x7f8   :  { %9106 = vrcp.f32 %v1393_v63 }
 0x7f9   :  { %1998 = vrot.lane.b32.xlu0 %v9749_v19, %s9484_s10  ;;  %v1454_v16 = vpop.permute.xlu1 %1453 }
 0x7fa   :  { %2740 = vrot.lane.b32.xlu1 %v9755_v26, %s9485_s11 }
 0x7fb   :  { %v1456_v8 = vpop.permute.xlu0 %1455 }
 0x7fc   :  { %8191 = vmatprep.subr.mxu0 %v1456_v8  ;;  %8975 = vmatprep.subr.mxu1 %v1456_v8 }
 0x7fd   :  { %2746 = vrot.lane.b32.xlu0 %v9751_v23, %s9485_s11  ;;  %8192 = vmatpush3.msra.mxu0 %v1456_v8  ;;  %v1452_v3 = vpop.permute.xlu1 %1451 }
 0x7fe   :  { %8987 = vmatpush3.msra.mxu1 %v1456_v8  ;;  %2736 = vrot.lane.b32.xlu1 %v9763_v34, %s9485_s11 }
 0x7ff   :  { %8193 = vmatprep.subr.mxu0 %v1454_v16  ;;  %8976 = vmatprep.subr.mxu1 %v1454_v16 }
 0x800   :  { %8194 = vmatpush3.msra.mxu0 %v1454_v16  ;;  %8988 = vmatpush3.msra.mxu1 %v1454_v16 }
 0x801   :  { %8195 = vmatprep.subr.mxu0 %v1452_v3  ;;  %8977 = vmatprep.subr.mxu1 %v1452_v3 }
 0x802   :  { %2742 = vrot.lane.b32.xlu0 %v9767_v35, %s9485_s11  ;;  %8196 = vmatpush3.msra.mxu0 %v1452_v3 }
 0x803   :  { %8989 = vmatpush3.msra.mxu1 %v1452_v3  ;;  %2732 = vrot.lane.b32.xlu1 %v9771_v36, %s9485_s11  ;;  %v9105_v47 = vpop.eup %9104 }
 0x804   :  { %8215 = vmatprep.subr.msk.mxu0 %vm85_vm0, %v1649_v15  ;;  %8235 = vmatprep.subr.msk.mxu1 %vm85_vm0, %v10367_v18  ;;  %v1440_v20 = vmul.f32 %v9105_v47, %v10256_v31 }
 0x805   :  { %v9107_v59 = vpop.eup %9106 }
 0x806   :  { %2738 = vrot.lane.b32.xlu0 %v9775_v37, %s9485_s11  ;;  %v1439_v21 = vmul.f32 %v9107_v59, %v10260_v62 }
 0x807   :  { %2728 = vrot.lane.b32.xlu1 %v9779_v38, %s9485_s11 }
 0x808   :  { %8197 = vmatprep.mubr.msk.f32.mxu0 %vm756_vm3, %v1439_v21 }
 0x809   :  { %8198 = vmatmul.mubr.msk.f32.vlgmr.msra.gmra.mxu0 %vm756_vm3, %v1440_v20 }
 0x80a   :  { %2734 = vrot.lane.b32.xlu0 %v9783_v40, %s9485_s11  ;;  %8216 = vmatpush3.msk.msra.mxu0 %vm85_vm0, %v1649_v15 }
 0x80b   :  { %2702 = vrot.lane.b32.xlu1 %v9745_v6, %s9486_s14 }
 0x80e   :  { %2730 = vrot.lane.b32.xlu0 %v9789_v42, %s9485_s11 }
 0x80f   :  { %2706 = vrot.lane.b32.xlu1 %v9789_v42, %s9486_s14 }
 0x812   :  { %2726 = vrot.lane.b32.xlu0 %v9745_v6, %s9485_s11 }
 0x813   :  { %2710 = vrot.lane.b32.xlu1 %v9783_v40, %s9486_s14 }
 0x816   :  { %2704 = vrot.lane.b32.xlu0 %v9779_v38, %s9486_s14 }
 0x817   :  { %2714 = vrot.lane.b32.xlu1 %v9775_v37, %s9486_s14 }
 0x81a   :  { %2708 = vrot.lane.b32.xlu0 %v9771_v36, %s9486_s14 }
 0x81b   :  { %2718 = vrot.lane.b32.xlu1 %v9767_v35, %s9486_s14 }
 0x81e   :  { %2712 = vrot.lane.b32.xlu0 %v9763_v34, %s9486_s14 }
 0x81f   :  { %2722 = vrot.lane.b32.xlu1 %v9751_v23, %s9486_s14 }
 0x822   :  { %2716 = vrot.lane.b32.xlu0 %v9755_v26, %s9486_s14 }
 0x823   :  { %2349 = vrot.lane.b32.xlu1 %v9626_v33, %s9483_s8 }
 0x826   :  { %2720 = vrot.lane.b32.xlu0 %v9759_v27, %s9486_s14 }
 0x82a   :  { %2724 = vrot.lane.b32.xlu0 %v9749_v19, %s9486_s14 }
 0x82c   :  { %v1399_v31 = vpop.xlane.xlu0 %1398 }
 0x82d   :  { %9108 = vrcp.f32 %v1399_v31 }
 0x82e   :  { %2351 = vrot.lane.b32.xlu0 %v9624_v32, %s9483_s8  ;;  %v1402_v62 = vpop.xlane.xlu1 %1401 }
 0x82f   :  { %9110 = vrcp.f32 %v1402_v62 }
 0x830   :  { %v1408_v44 = vpop.xlane.xlu0 %1407 }
 0x831   :  { %9112 = vrcp.f32 %v1408_v44 }
 0x832   :  { %v1414_v14 = vpop.xlane.xlu1 %1413 }
 0x834   :  { %v1405_v5 = vpop.xlane.xlu0 %1404 }
 0x835   :  { %9114 = vrcp.f32 %v1405_v5 }
 0x836   :  { %v1420_v49 = vpop.xlane.xlu1 %1419  ;;  %9116 = vrcp.f32 %v1414_v14 }
 0x838   :  { %v1411_v58 = vpop.xlane.xlu0 %1410 }
 0x839   :  { %9118 = vrcp.f32 %v1411_v58 }
 0x83a   :  { %v9109_v45 = vpop.eup %9108  ;;  %v1426_v10 = vpop.xlane.xlu1 %1425  ;;  %9120 = vrcp.f32 %v1420_v49 }
 0x83b   :  { %v1441_v12 = vmul.f32 %v9109_v45, %v10280_v17 }
 0x83c   :  { %v9111_v57 = vpop.eup %9110  ;;  %v1417_v2 = vpop.xlane.xlu0 %1416 }
 0x83d   :  { %9122 = vrcp.f32 %v1417_v2  ;;  %8200 = vmatprep.mubr.msk.f32.mxu0 %vm756_vm3, %v1441_v12  ;;  %v1442_v13 = vmul.f32 %v9111_v57, %v10282_v7 }
 0x83e   :  { %v10413_v63 = vpop.permute.xlu1 %2020  ;;  %9124 = vrcp.f32 %v1426_v10  ;;  %v9113_v8 = vpop.eup %9112 }
 0x83f   :  { %8201 = vmatmul.mubr.msk.f32.gmra.mxu0 %vm756_vm3, %v1442_v13  ;;  %v1444_v59 = vmul.f32 %v9113_v8, %v10286_v24 }
 0x840   :  { %v1423_v16 = vpop.xlane.xlu0 %1422 }
 0x841   :  { %9126 = vrcp.f32 %v1423_v16 }
 0x842   :  { %v9115_v3 = vpop.eup %9114  ;;  %v10416_v15 = vpop.permute.xlu1 %2018 }
 0x843   :  { %v1443_v17 = vmul.f32 %v9115_v3, %v10294_v11  ;;  %v9117_v21 = vpop.eup %9116 }
 0x844   :  { %v10419_v47 = vpop.permute.xlu0 %2022  ;;  %v1446_v11 = vmul.f32 %v9117_v21, %v10290_v60 }
 0x845   :  { %8203 = vmatprep.mubr.msk.f32.mxu0 %vm756_vm3, %v1443_v17  ;;  %8255 = vmatprep.subr.msk.mxu0 %vm48_vm1, %v10419_v47 }
 0x846   :  { %v9119_v7 = vpop.eup %9118  ;;  %8204 = vmatmul.mubr.msk.f32.gmra.mxu0 %vm756_vm3, %v1444_v59  ;;  %v10426_v20 = vpop.permute.xlu1 %2014 }
 0x847   :  { %v1445_v31 = vmul.f32 %v9119_v7, %v10302_v46  ;;  %v9121_v44 = vpop.eup %9120 }
 0x848   :  { %v10429_v62 = vpop.permute.xlu0 %2016  ;;  %v1448_v49 = vmul.f32 %v9121_v44, %v10298_v50 }
 0x849   :  { %8206 = vmatprep.mubr.msk.f32.mxu0 %vm756_vm3, %v1445_v31 }
 0x84a   :  { %v9123_v24 = vpop.eup %9122  ;;  %8207 = vmatmul.mubr.msk.f32.gmra.mxu0 %vm756_vm3, %v1446_v11  ;;  %v10434_v14 = vpop.permute.xlu1 %2010 }
 0x84b   :  { %v1447_v5 = vmul.f32 %v9123_v24, %v10310_v22  ;;  %v9125_v45 = vpop.eup %9124 }
 0x84c   :  { %v10438_v58 = vpop.permute.xlu0 %2012  ;;  %v1450_v22 = vmul.f32 %v9125_v45, %v10306_v55 }
 0x84d   :  { %8209 = vmatprep.mubr.msk.f32.mxu1 %vm756_vm3, %v1447_v5 }
 0x84e   :  { %v9127_v46 = vpop.eup %9126  ;;  %8210 = vmatmul.mubr.msk.f32.vlgmr.msra.gmra.mxu1 %vm756_vm3, %v1448_v49  ;;  %v10442_v60 = vpop.permute.xlu1 %2006 }
 0x84f   :  { %v1449_v10 = vmul.f32 %v9127_v46, %v10316_v52  ;;  %8236 = vmatpush3.msk.msra.mxu1 %vm85_vm0, %v10367_v18 }
 0x850   :  { %v10447_v12 = vpop.permute.xlu0 %2008 }
 0x851   :  { %8212 = vmatprep.mubr.msk.f32.mxu1 %vm756_vm3, %v1449_v10 }
 0x852   :  { %8213 = vmatmul.mubr.msk.f32.gmra.mxu1 %vm756_vm3, %v1450_v22  ;;  %v10452_v50 = vpop.permute.xlu1 %2002 }
 0x853   :  { %8237 = vmatprep.mubr.msk.f32.mxu1 %vm48_vm1, %v10176_v43 }
 0x854   :  { %v10456_v57 = vpop.permute.xlu0 %2004 }
 0x856   :  { %8238 = vmatmul.mubr.msk.f32.vlgmr.msra.gmra.mxu1 %vm48_vm1, %v10174_v1  ;;  %v10460_v52 = vpop.permute.xlu1 %1976 }
 0x857   :  { %8240 = vmatprep.mubr.msk.f32.mxu1 %vm48_vm1, %v10180_v0 }
 0x858   :  { %v10464_v55 = vpop.permute.xlu0 %2000 }
 0x85a   :  { %8241 = vmatmul.mubr.msk.f32.gmra.mxu1 %vm48_vm1, %v10178_v51  ;;  %v10468_v18 = vpop.permute.xlu1 %1980 }
 0x85b   :  { %8243 = vmatprep.mubr.msk.f32.mxu1 %vm48_vm1, %v10184_v61 }
 0x85c   :  { %v10472_v43 = vpop.permute.xlu0 %1978 }
 0x85e   :  { %8244 = vmatmul.mubr.msk.f32.gmra.mxu1 %vm48_vm1, %v10182_v39  ;;  %v10476_v1 = vpop.permute.xlu1 %1984 }
 0x85f   :  { %8246 = vmatprep.mubr.msk.f32.mxu1 %vm48_vm1, %v10188_v56 }
 0x860   :  { %v10480_v0 = vpop.permute.xlu0 %1982 }
 0x862   :  { %8247 = vmatmul.mubr.msk.f32.gmra.mxu1 %vm48_vm1, %v10186_v4  ;;  %v10484_v51 = vpop.permute.xlu1 %1988 }
 0x863   :  { %8249 = vmatprep.mubr.msk.f32.mxu1 %vm48_vm1, %v10192_v54 }
 0x864   :  { %v10488_v61 = vpop.permute.xlu0 %1986 }
 0x866   :  { %8250 = vmatmul.mubr.msk.f32.gmra.mxu1 %vm48_vm1, %v10190_v48  ;;  %v10492_v39 = vpop.permute.xlu1 %1992 }
 0x867   :  { %8252 = vmatprep.mubr.msk.f32.mxu1 %vm48_vm1, %v10196_v41 }
 0x868   :  { %v10496_v56 = vpop.permute.xlu0 %1990 }
 0x86a   :  { %8253 = vmatmul.mubr.msk.f32.gmra.mxu1 %vm48_vm1, %v10194_v9  ;;  %v10500_v4 = vpop.permute.xlu1 %1996 }
 0x86c   :  { %v10502_v2 = vpop.permute.xlu0 %1994 }
 0x86e   :  { %v10504_v54 = vpop.permute.xlu1 %2748 }
 0x870   :  { %v10506_v13 = vpop.permute.xlu0 %1998 }
 0x872   :  { %v10508_v16 = vpop.permute.xlu1 %2744 }
 0x874   :  { %v10510_v48 = vpop.permute.xlu0 %2746 }
 0x876   :  { %v10512_v8 = vpop.permute.xlu1 %2740 }
 0x878   :  { %v10514_v41 = vpop.permute.xlu0 %2742 }
 0x87a   :  { %v10516_v3 = vpop.permute.xlu1 %2736 }
 0x87c   :  { %v10518_v17 = vpop.permute.xlu0 %2738 }
 0x87e   :  { %v10520_v9 = vpop.permute.xlu1 %2732 }
 0x880   :  { %v10522_v59 = vpop.permute.xlu0 %2734 }
 0x882   :  { %v10524_v21 = vpop.permute.xlu1 %2728 }
 0x884   :  { %v10526_v7 = vpop.permute.xlu0 %2730 }
 0x886   :  { %v10528_v31 = vpop.permute.xlu1 %2702 }
 0x888   :  { %v10530_v11 = vpop.permute.xlu0 %2726 }
 0x88a   :  { %v10532_v44 = vpop.permute.xlu1 %2706 }
 0x88c   :  { %v10534_v24 = vpop.permute.xlu0 %2704 }
 0x88e   :  { %v10536_v5 = vpop.permute.xlu1 %2710 }
 0x890   :  { %v10538_v49 = vpop.permute.xlu0 %2708 }
 0x892   :  { %v10540_v45 = vpop.permute.xlu1 %2714 }
 0x894   :  { %v10542_v46 = vpop.permute.xlu0 %2712 }
 0x896   :  { %v10546_v22 = vpop.permute.xlu1 %2718 }
 0x898   :  { %v10544_v10 = vpop.permute.xlu0 %2716 }
 0x89a   :  { %v10550_v33 = vpop.permute.xlu1 %2722 }
 0x89c   :  { %v10548_v32 = vpop.permute.xlu0 %2720 }
 0x89e   :  { %v2350_v6 = vpop.permute.xlu1 %2349 }
 0x8a0   :  { %v10552_v42 = vpop.permute.xlu0 %2724 }
 0x8a4   :  { %v2352_v40 = vpop.permute.xlu0 %2351 }
 0x8a5   :  { %8297 = vmatprep.subr.mxu1 %v2352_v40 }
 0x8a6   :  { %8298 = vmatpush3.msra.mxu1 %v2352_v40 }
 0x8a7   :  { %8299 = vmatprep.subr.mxu1 %v2350_v6 }
 0x8a8   :  { %8300 = vmatpush3.msra.mxu1 %v2350_v6 }
 0x8c9   :  { %v8199_v37 = vpop.f32.mrf.mxu0 }
 0x8cb   :  { %v1589_v38 = vpop.f32.mrf.mxu0 }
 0x8cc   :  { %8217 = vmatprep.mubr.msk.f32.mxu0 %vm48_vm1, %v1589_v38 }
 0x8cd   :  { %8218 = vmatmul.mubr.msk.f32.vlgmr.msra.gmra.mxu0 %vm48_vm1, %v8199_v37 }
 0x8ce   :  { %8256 = vmatpush3.xpose.msk.msra.mxu0 %vm48_vm1, %v10419_v47 }
 0x8cf   :  { %8257 = vmatprep.subr.msk.mxu0 %vm48_vm1, %v10413_v63 }
 0x8d2   :  { %8258 = vmatpush3.xpose.msk.msra.mxu0 %vm48_vm1, %v10413_v63 }
 0x8d3   :  { %8259 = vmatprep.subr.msk.mxu0 %vm48_vm1, %v10416_v15 }
 0x8d6   :  { %8260 = vmatpush3.xpose.msk.msra.mxu0 %vm48_vm1, %v10416_v15 }
 0x8d7   :  { %8261 = vmatprep.subr.msk.mxu0 %vm48_vm1, %v10429_v62 }
 0x8da   :  { %8262 = vmatpush3.xpose.msk.msra.mxu0 %vm48_vm1, %v10429_v62 }
 0x8db   :  { %8263 = vmatprep.subr.msk.mxu0 %vm48_vm1, %v10426_v20 }
 0x8de   :  { %8264 = vmatpush3.xpose.msk.msra.mxu0 %vm48_vm1, %v10426_v20 }
 0x8df   :  { %8265 = vmatprep.subr.msk.mxu0 %vm48_vm1, %v10438_v58 }
 0x8e2   :  { %8266 = vmatpush3.xpose.msk.msra.mxu0 %vm48_vm1, %v10438_v58 }
 0x8e3   :  { %8267 = vmatprep.subr.msk.mxu0 %vm48_vm1, %v10434_v14 }
 0x8e6   :  { %8268 = vmatpush3.xpose.msk.msra.mxu0 %vm48_vm1, %v10434_v14 }
 0x8e7   :  { %8269 = vmatprep.subr.msk.mxu0 %vm48_vm1, %v10447_v12 }
 0x8ea   :  { %8270 = vmatpush3.xpose.msk.msra.mxu0 %vm48_vm1, %v10447_v12 }
 0x8eb   :  { %8271 = vmatprep.subr.msk.mxu0 %vm48_vm1, %v10442_v60 }
 0x8ee   :  { %8272 = vmatpush3.xpose.msk.msra.mxu0 %vm48_vm1, %v10442_v60 }
 0x8ef   :  { %8273 = vmatprep.subr.msk.mxu0 %vm48_vm1, %v10456_v57 }
 0x8f2   :  { %8274 = vmatpush3.xpose.msk.msra.mxu0 %vm48_vm1, %v10456_v57 }
 0x8f3   :  { %8275 = vmatprep.subr.msk.mxu0 %vm48_vm1, %v10452_v50 }
 0x8f6   :  { %8276 = vmatpush3.xpose.msk.msra.mxu0 %vm48_vm1, %v10452_v50 }
 0x8f7   :  { %8277 = vmatprep.subr.msk.mxu0 %vm48_vm1, %v10464_v55 }
 0x8fa   :  { %8278 = vmatpush3.xpose.msk.msra.mxu0 %vm48_vm1, %v10464_v55 }
 0x8fb   :  { %8359 = vmatprep.subr.msk.mxu0 %vm48_vm1, %v10504_v54 }
 0x8ff   :  { %v8202_v6 = vpop.f32.mrf.mxu0 }
 0x901   :  { %v1599_v37 = vpop.f32.mrf.mxu0 }
 0x902   :  { %8220 = vmatprep.mubr.msk.f32.mxu0 %vm48_vm1, %v1599_v37  ;;  %v10811_v37 = vld [vmem:[%s13007_s1 + $0x48] sm:$0xff] }
 0x903   :  { %8221 = vmatmul.mubr.msk.f32.gmra.mxu0 %vm48_vm1, %v8202_v6 }
 0x906   :  { %v8205_v38 = vpop.f32.mrf.mxu0 }
 0x908   :  { %v1609_v40 = vpop.f32.mrf.mxu0 }
 0x909   :  { %8223 = vmatprep.mubr.msk.f32.mxu0 %vm48_vm1, %v1609_v40 }
 0x90a   :  { %v8208_v63 = vpop.f32.mrf.mxu0  ;;  %8224 = vmatmul.mubr.msk.f32.gmra.mxu0 %vm48_vm1, %v8205_v38 }
 0x90c   :  { %v1619_v15 = vpop.f32.mrf.mxu0 }
 0x90d   :  { %8226 = vmatprep.mubr.msk.f32.mxu0 %vm48_vm1, %v1619_v15 }
 0x90e   :  { %v8211_v47 = vpop.f32.mrf.mxu1  ;;  %8227 = vmatmul.mubr.msk.f32.gmra.mxu0 %vm48_vm1, %v8208_v63 }
 0x910   :  { %v1629_v20 = vpop.f32.mrf.mxu1 }
 0x911   :  { %8229 = vmatprep.mubr.msk.f32.mxu0 %vm48_vm1, %v1629_v20 }
 0x912   :  { %v8214_v62 = vpop.f32.mrf.mxu1  ;;  %8230 = vmatmul.mubr.msk.f32.gmra.mxu0 %vm48_vm1, %v8211_v47  ;;  %v10823_v47 = vld [vmem:[%s13007_s1 + $0x40] sm:$0xff] }
 0x914   :  { %v1639_v14 = vpop.f32.mrf.mxu1 }
 0x915   :  { %8232 = vmatprep.mubr.msk.f32.mxu0 %vm48_vm1, %v1639_v14  ;;  %v10831_v14 = vld [vmem:[%s13007_s1 + $0x58] sm:$0xff] }
 0x916   :  { %8233 = vmatmul.mubr.msk.f32.gmra.mxu0 %vm48_vm1, %v8214_v62 }
 0x917   :  { %8279 = vmatprep.mubr.msk.f32.mxu0 %vm48_vm1, %v10460_v52 }
 0x91a   :  { %8280 = vmatmul.mubr.msk.f32.vlgmr.msra.gmra.mxu0 %vm48_vm1, %v10472_v43 }
 0x91b   :  { %8360 = vmatpush3.xpose.msk.msra.mxu0 %vm48_vm1, %v10504_v54  ;;  %8282 = vmatprep.mubr.msk.f32.mxu0 %vm48_vm1, %v10468_v18  ;;  %v10753_v54 = vld [vmem:[%s13007_s1 + $0x18] sm:$0xff] }
 0x91c   :  { %8361 = vmatprep.subr.msk.mxu0 %vm48_vm1, %v10510_v48 }
 0x91e   :  { %8283 = vmatmul.mubr.msk.f32.gmra.mxu0 %vm48_vm1, %v10480_v0  ;;  %v10735_v0 = vld [vmem:[%s13007_s1 + $0x8] sm:$0xff] }
 0x91f   :  { %8362 = vmatpush3.xpose.msk.msra.mxu0 %vm48_vm1, %v10510_v48  ;;  %8285 = vmatprep.mubr.msk.f32.mxu0 %vm48_vm1, %v10476_v1 }
 0x920   :  { %8363 = vmatprep.subr.msk.mxu0 %vm48_vm1, %v10508_v16 }
 0x922   :  { %8286 = vmatmul.mubr.msk.f32.gmra.mxu0 %vm48_vm1, %v10488_v61 }
 0x923   :  { %8364 = vmatpush3.xpose.msk.msra.mxu0 %vm48_vm1, %v10508_v16  ;;  %8288 = vmatprep.mubr.msk.f32.mxu0 %vm48_vm1, %v10484_v51 }
 0x924   :  { %8365 = vmatprep.subr.msk.mxu0 %vm48_vm1, %v10514_v41 }
 0x926   :  { %8289 = vmatmul.mubr.msk.f32.gmra.mxu0 %vm48_vm1, %v10496_v56 }
 0x927   :  { %8366 = vmatpush3.xpose.msk.msra.mxu0 %vm48_vm1, %v10514_v41  ;;  %8291 = vmatprep.mubr.msk.f32.mxu0 %vm48_vm1, %v10492_v39  ;;  %v10743_v39 = vld [vmem:[%s13007_s1] sm:$0xff] }
 0x928   :  { %8367 = vmatprep.subr.msk.mxu0 %vm48_vm1, %v10512_v8 }
 0x92a   :  { %8292 = vmatmul.mubr.msk.f32.gmra.mxu0 %vm48_vm1, %v10502_v2 }
 0x92b   :  { %8368 = vmatpush3.xpose.msk.msra.mxu0 %vm48_vm1, %v10512_v8  ;;  %8294 = vmatprep.mubr.msk.f32.mxu0 %vm48_vm1, %v10500_v4  ;;  %v10763_v8 = vld [vmem:[%s13007_s1 + $0x10] sm:$0xff] }
 0x92c   :  { %8369 = vmatprep.subr.msk.mxu0 %vm48_vm1, %v10518_v17 }
 0x92e   :  { %8295 = vmatmul.mubr.msk.f32.gmra.mxu0 %vm48_vm1, %v10506_v13 }
 0x92f   :  { %8370 = vmatpush3.xpose.msk.msra.mxu0 %vm48_vm1, %v10518_v17  ;;  %8383 = vmatprep.mubr.msk.f32.mxu0 %vm48_vm1, %v10528_v31  ;;  %v10771_v17 = vld [vmem:[%s13007_s1 + $0x28] sm:$0xff]  ;;  %v10783_v31 = vld [vmem:[%s13007_s1 + $0x20] sm:$0xff] }
 0x930   :  { %8371 = vmatprep.subr.msk.mxu0 %vm48_vm1, %v10516_v3 }
 0x933   :  { %8372 = vmatpush3.xpose.msk.msra.mxu0 %vm48_vm1, %v10516_v3 }
 0x934   :  { %8373 = vmatprep.subr.msk.mxu0 %vm48_vm1, %v10522_v59 }
 0x937   :  { %8374 = vmatpush3.xpose.msk.msra.mxu0 %vm48_vm1, %v10522_v59 }
 0x938   :  { %8375 = vmatprep.subr.msk.mxu0 %vm48_vm1, %v10520_v9 }
 0x93b   :  { %8376 = vmatpush3.xpose.msk.msra.mxu0 %vm48_vm1, %v10520_v9 }
 0x93c   :  { %8377 = vmatprep.subr.msk.mxu0 %vm48_vm1, %v10526_v7 }
 0x93f   :  { %8378 = vmatpush3.xpose.msk.msra.mxu0 %vm48_vm1, %v10526_v7 }
 0x940   :  { %8379 = vmatprep.subr.msk.mxu0 %vm48_vm1, %v10524_v21 }
 0x943   :  { %8380 = vmatpush3.xpose.msk.msra.mxu0 %vm48_vm1, %v10524_v21 }
 0x944   :  { %8381 = vmatprep.subr.msk.mxu0 %vm48_vm1, %v10530_v11 }
 0x947   :  { %8382 = vmatpush3.xpose.msk.msra.mxu0 %vm48_vm1, %v10530_v11 }
 0x94a   :  { %8384 = vmatmul.mubr.msk.f32.vlgmr.msra.gmra.mxu0 %vm48_vm1, %v10534_v24  ;;  %v10791_v24 = vld [vmem:[%s13007_s1 + $0x38] sm:$0xff] }
 0x94b   :  { %8386 = vmatprep.mubr.msk.f32.mxu0 %vm48_vm1, %v10532_v44 }
 0x94e   :  { %8387 = vmatmul.mubr.msk.f32.gmra.mxu0 %vm48_vm1, %v10538_v49 }
 0x94f   :  { %8389 = vmatprep.mubr.msk.f32.mxu0 %vm48_vm1, %v10536_v5 }
 0x952   :  { %8390 = vmatmul.mubr.msk.f32.gmra.mxu0 %vm48_vm1, %v10542_v46 }
 0x953   :  { %8392 = vmatprep.mubr.msk.f32.mxu0 %vm48_vm1, %v10540_v45 }
 0x956   :  { %8393 = vmatmul.mubr.msk.f32.gmra.mxu0 %vm48_vm1, %v10544_v10  ;;  %v10803_v10 = vld [vmem:[%s13007_s1 + $0x30] sm:$0xff] }
 0x957   :  { %8395 = vmatprep.mubr.msk.f32.mxu0 %vm48_vm1, %v10546_v22 }
 0x95a   :  { %8396 = vmatmul.mubr.msk.f32.gmra.mxu0 %vm48_vm1, %v10548_v32 }
 0x95b   :  { %8398 = vmatprep.mubr.msk.f32.mxu0 %vm48_vm1, %v10550_v33 }
 0x95e   :  { %8399 = vmatmul.mubr.msk.f32.gmra.mxu0 %vm48_vm1, %v10552_v42 }
 0x98d   :  { %v10708_v58 = vpop.f32.mrf.mxu0 }
 0x98f   :  { %v10710_v60 = vpop.f32.mrf.mxu0 }
 0x990   :  { %13109 = vst [vmem:[#allocation7_spill] sm:$0xff] %v10710_v60 }
 0x9c3   :  { %v10712_v12 = vpop.f32.mrf.mxu0 }
 0x9c5   :  { %v10714_v50 = vpop.f32.mrf.mxu0 }
 0x9c6   :  { %13110 = vst [vmem:[#allocation5_spill] sm:$0xff] %v10714_v50 }
 0x9ca   :  { %v10716_v57 = vpop.f32.mrf.mxu0 }
 0x9cc   :  { %v10718_v52 = vpop.f32.mrf.mxu0 }
 0x9cd   :  { %13111 = vst [vmem:[#allocation22_spill] sm:$0xff] %v10718_v52 }
 0x9ce   :  { %v10720_v55 = vpop.f32.mrf.mxu0 }
 0x9cf   :  { %13112 = vst [vmem:[#allocation23_spill] sm:$0xff] %v10720_v55 }
 0x9d0   :  { %v10722_v32 = vpop.f32.mrf.mxu0 }
 0x9d1   :  { %13113 = vst [vmem:[#allocation24_spill] sm:$0xff] %v10722_v32 }
 0x9d2   :  { %v10724_v33 = vpop.f32.mrf.mxu0 }
 0x9d3   :  { %13114 = vst [vmem:[#allocation25_spill] sm:$0xff] %v10724_v33 }
 0x9d4   :  { %v10726_v18 = vpop.f32.mrf.mxu0 }
 0x9d5   :  { %13115 = vst [vmem:[#allocation26_spill] sm:$0xff] %v10726_v18 }
 0x9d6   :  { %v10728_v42 = vpop.f32.mrf.mxu0 }
 0x9d7   :  { %13116 = vst [vmem:[#allocation27_spill] sm:$0xff] %v10728_v42 }
 0x9d8   :  { %v10730_v43 = vpop.f32.mrf.mxu0 }
 0x9d9   :  { %13117 = vst [vmem:[#allocation28_spill] sm:$0xff] %v10730_v43 }
 0x9da   :  { %v8281_v1 = vpop.f32.mrf.mxu0 }
 0x9db   :  { %v10738_v51 = vadd.f32 %v10735_v0, %v8281_v1 }
 0x9dc   :  { %v2138_v61 = vpop.f32.mrf.mxu0 }
 0x9dd   :  { %v10746_v56 = vadd.f32 %v10743_v39, %v2138_v61  ;;  %v2200_v4 = vsel %vm756_vm3, %v10738_v51, -inf }
 0x9de   :  { %2201 = vmax.xlane.f32.xlu0 %v2200_v4  ;;  %v8284_v2 = vpop.f32.mrf.mxu0 }
 0x9df   :  { %v10756_v13 = vadd.f32 %v10753_v54, %v8284_v2  ;;  %v2197_v16 = vsel %vm756_vm3, %v10746_v56, -inf }
 0x9e0   :  { %2198 = vmax.xlane.f32.xlu1 %v2197_v16  ;;  %v2148_v48 = vpop.f32.mrf.mxu0  ;;  %v10843_v16 = vld [vmem:[%s13007_s1 + $0x50] sm:$0xff] }
 0x9e1   :  { %v10766_v41 = vadd.f32 %v10763_v8, %v2148_v48  ;;  %v2206_v59 = vsel %vm756_vm3, %v10756_v13, -inf }
 0x9e2   :  { %v8287_v3 = vpop.f32.mrf.mxu0 }
 0x9e3   :  { %v10774_v9 = vadd.f32 %v10771_v17, %v8287_v3  ;;  %v2203_v21 = vsel %vm756_vm3, %v10766_v41, -inf }
 0x9e4   :  { %2207 = vmax.xlane.f32.xlu1 %v2206_v59  ;;  %2204 = vmax.xlane.f32.xlu0 %v2203_v21  ;;  %v2158_v7 = vpop.f32.mrf.mxu0  ;;  %v13118_v21 = vld [vmem:[#allocation8_spill] sm:$0xff] }
 0x9e5   :  { %v10786_v11 = vadd.f32 %v10783_v31, %v2158_v7  ;;  %v2212_v49 = vsel %vm756_vm3, %v10774_v9, -inf  ;;  %v13119_v7 = vld [vmem:[#allocation6_spill] sm:$0xff] }
 0x9e6   :  { %v8290_v44 = vpop.f32.mrf.mxu0 }
 0x9e7   :  { %v10794_v5 = vadd.f32 %v10791_v24, %v8290_v44  ;;  %v2209_v45 = vsel %vm756_vm3, %v10786_v11, -inf  ;;  %v13120_v44 = vld [vmem:[#allocation2_spill] sm:$0xff] }
 0x9e8   :  { %2213 = vmax.xlane.f32.xlu1 %v2212_v49  ;;  %2210 = vmax.xlane.f32.xlu0 %v2209_v45  ;;  %v2168_v46 = vpop.f32.mrf.mxu0  ;;  %v13121_v49 = vld [vmem:[#allocation4_spill] sm:$0xff]  ;;  %v13122_v45 = vld [vmem:[#allocation3_spill] sm:$0xff] }
 0x9e9   :  { %v10806_v22 = vadd.f32 %v10803_v10, %v2168_v46  ;;  %v2218_v40 = vsel %vm756_vm3, %v10794_v5, -inf }
 0x9ea   :  { %v8293_v6 = vpop.f32.mrf.mxu0 }
 0x9eb   :  { %v10814_v38 = vadd.f32 %v10811_v37, %v8293_v6  ;;  %v2215_v63 = vsel %vm756_vm3, %v10806_v22, -inf }
 0x9ec   :  { %2219 = vmax.xlane.f32.xlu1 %v2218_v40  ;;  %2216 = vmax.xlane.f32.xlu0 %v2215_v63  ;;  %v2178_v15 = vpop.f32.mrf.mxu0 }
 0x9ed   :  { %v10826_v20 = vadd.f32 %v10823_v47, %v2178_v15  ;;  %v2224_v61 = vsel %vm756_vm3, %v10814_v38, -inf }
 0x9ee   :  { %v8296_v62 = vpop.f32.mrf.mxu0 }
 0x9ef   :  { %v10834_v1 = vadd.f32 %v10831_v14, %v8296_v62  ;;  %v2221_v4 = vsel %vm756_vm3, %v10826_v20, -inf }
 0x9f0   :  { %2225 = vmax.xlane.f32.xlu1 %v2224_v61  ;;  %2222 = vmax.xlane.f32.xlu0 %v2221_v4  ;;  %v2188_v2 = vpop.f32.mrf.mxu0 }
 0x9f1   :  { %v10846_v48 = vadd.f32 %v10843_v16, %v2188_v2  ;;  %v2230_v3 = vsel %vm756_vm3, %v10834_v1, -inf }
 0x9f3   :  { %v2227_v59 = vsel %vm756_vm3, %v10846_v48, -inf }
 0x9f4   :  { %2231 = vmax.xlane.f32.xlu1 %v2230_v3  ;;  %2228 = vmax.xlane.f32.xlu0 %v2227_v59 }
 0xa05   :  { %2345 = vrot.lane.b32.xlu1 %v9618_v29, %s9483_s8 }
 0xa09   :  { %2341 = vrot.lane.b32.xlu1 %v9610_v25, %s9483_s8 }
 0xa0a   :  { %2347 = vrot.lane.b32.xlu0 %v9616_v28, %s9483_s8 }
 0xa0d   :  { %2337 = vrot.lane.b32.xlu1 %v13105_v53, %s9483_s8 }
 0xa0e   :  { %2343 = vrot.lane.b32.xlu0 %v13118_v21, %s9483_s8 }
 0xa11   :  { %2333 = vrot.lane.b32.xlu1 %v13108_v30, %s9483_s8 }
 0xa12   :  { %2339 = vrot.lane.b32.xlu0 %v13119_v7, %s9483_s8 }
 0xa15   :  { %2331 = vrot.lane.b32.xlu1 %v13120_v44, %s9483_s8 }
 0xa16   :  { %2335 = vrot.lane.b32.xlu0 %v13121_v49, %s9483_s8 }
 0xa19   :  { %3474 = vrot.lane.b32.xlu1 %v9749_v19, %s9487_s16 }
 0xa1a   :  { %2329 = vrot.lane.b32.xlu0 %v13122_v45, %s9483_s8  ;;  %s9488_s8 = smov 112  }
 0xa67   :  { %v2202_v46 = vpop.xlane.xlu0 %2201 }
 0xa68   :  { %v2234_v6 = vsub.f32 %v10738_v51, %v2202_v46 }
 0xa69   :  { %v2199_v40 = vpop.xlane.xlu1 %2198 }
 0xa6a   :  { %v2247_v63 = vmul.f32 1.442695, %v2234_v6  ;;  %v2233_v15 = vsub.f32 %v10746_v56, %v2199_v40 }
 0xa6c   :  { %9128 = vpow2.f32 %v2247_v63  ;;  %v2245_v62 = vmul.f32 1.442695, %v2233_v15 }
 0xa6d   :  { %v2205_v61 = vpop.xlane.xlu0 %2204  ;;  %v2208_v4 = vpop.xlane.xlu1 %2207 }
 0xa6e   :  { %9130 = vpow2.f32 %v2245_v62  ;;  %v2235_v2 = vsub.f32 %v10766_v41, %v2205_v61  ;;  %v2236_v3 = vsub.f32 %v10756_v13, %v2208_v4 }
 0xa70   :  { %v2249_v59 = vmul.f32 1.442695, %v2235_v2  ;;  %v2251_v32 = vmul.f32 1.442695, %v2236_v3 }
 0xa71   :  { %v2211_v52 = vpop.xlane.xlu0 %2210  ;;  %v2214_v50 = vpop.xlane.xlu1 %2213 }
 0xa72   :  { %9132 = vpow2.f32 %v2249_v59  ;;  %v2237_v51 = vsub.f32 %v10786_v11, %v2211_v52  ;;  %v2238_v46 = vsub.f32 %v10774_v9, %v2214_v50 }
 0xa73   :  { %9134 = vpow2.f32 %v2251_v32 }
 0xa74   :  { %v2253_v56 = vmul.f32 1.442695, %v2237_v51  ;;  %v2255_v6 = vmul.f32 1.442695, %v2238_v46 }
 0xa75   :  { %v2217_v40 = vpop.xlane.xlu0 %2216  ;;  %v2220_v63 = vpop.xlane.xlu1 %2219 }
 0xa76   :  { %9136 = vpow2.f32 %v2253_v56  ;;  %v2239_v15 = vsub.f32 %v10806_v22, %v2217_v40  ;;  %v2240_v41 = vsub.f32 %v10794_v5, %v2220_v63 }
 0xa77   :  { %9138 = vpow2.f32 %v2255_v6 }
 0xa78   :  { %v2257_v13 = vmul.f32 1.442695, %v2239_v15  ;;  %v2259_v62 = vmul.f32 1.442695, %v2240_v41 }
 0xa79   :  { %v10882_v61 = vpop.eup %9128  ;;  %v2223_v4 = vpop.xlane.xlu0 %2222 }
 0xa7a   :  { %v2226_v2 = vpop.xlane.xlu1 %2225  ;;  %9140 = vpow2.f32 %v2257_v13  ;;  %v2241_v50 = vsub.f32 %v10826_v20, %v2223_v4  ;;  %v2272_v32 = vsel %vm756_vm3, %v10882_v61, 0.0 }
 0xa7b   :  { %v2242_v52 = vsub.f32 %v10814_v38, %v2226_v2  ;;  %v10888_v9 = vpop.eup %9130  ;;  %9142 = vpow2.f32 %v2259_v62  ;;  %2273 = vadd.xlane.f32.xlu1 %v2272_v32 }
 0xa7c   :  { %v2261_v11 = vmul.f32 1.442695, %v2241_v50  ;;  %v2269_v22 = vsel %vm756_vm3, %v10888_v9, 0.0 }
 0xa7d   :  { %v2263_v5 = vmul.f32 1.442695, %v2242_v52  ;;  %v10892_v3 = vpop.xlane.xlu0 %2228  ;;  %2270 = vadd.xlane.f32.xlu0 %v2269_v22 }
 0xa7e   :  { %v2232_v59 = vpop.xlane.xlu1 %2231  ;;  %9144 = vpow2.f32 %v2261_v11 }
 0xa7f   :  { %v2244_v20 = vsub.f32 %v10834_v1, %v2232_v59  ;;  %v10895_v38 = vpop.eup %9132  ;;  %9146 = vpow2.f32 %v2263_v5 }
 0xa80   :  { %v10897_v51 = vpop.eup %9134  ;;  %v2275_v56 = vsel %vm756_vm3, %v10895_v38, 0.0 }
 0xa81   :  { %v2267_v46 = vmul.f32 1.442695, %v2244_v20  ;;  %v2348_v6 = vpop.permute.xlu0 %2347  ;;  %2276 = vadd.xlane.f32.xlu0 %v2275_v56  ;;  %v2278_v40 = vsel %vm756_vm3, %v10897_v51, 0.0 }
 0xa82   :  { %v2346_v63 = vpop.permute.xlu1 %2345  ;;  %2279 = vadd.xlane.f32.xlu1 %v2278_v40  ;;  %8301 = vmatprep.subr.mxu1 %v2348_v6 }
 0xa83   :  { %v10903_v15 = vpop.eup %9136  ;;  %9148 = vpow2.f32 %v2267_v46  ;;  %8302 = vmatpush3.msra.mxu1 %v2348_v6 }
 0xa84   :  { %v10905_v1 = vpop.eup %9138  ;;  %8303 = vmatprep.subr.mxu1 %v2346_v63  ;;  %v2281_v41 = vsel %vm756_vm3, %v10903_v15, 0.0 }
 0xa85   :  { %v2344_v13 = vpop.permute.xlu0 %2343  ;;  %v2284_v62 = vsel %vm756_vm3, %v10905_v1, 0.0  ;;  %8304 = vmatpush3.msra.mxu1 %v2346_v63 }
 0xa86   :  { %v2342_v4 = vpop.permute.xlu1 %2341  ;;  %2282 = vadd.xlane.f32.xlu1 %v2281_v41  ;;  %2285 = vadd.xlane.f32.xlu0 %v2284_v62 }
 0xa87   :  { %v10911_v2 = vpop.eup %9140  ;;  %8305 = vmatprep.subr.mxu1 %v2344_v13 }
 0xa88   :  { %v10913_v50 = vpop.eup %9142  ;;  %8306 = vmatpush3.msra.mxu1 %v2344_v13  ;;  %v2287_v52 = vsel %vm756_vm3, %v10911_v2, 0.0 }
 0xa89   :  { %8307 = vmatprep.subr.mxu1 %v2342_v4  ;;  %v2340_v32 = vpop.permute.xlu0 %2339  ;;  %v2290_v11 = vsel %vm756_vm3, %v10913_v50, 0.0 }
 0xa8a   :  { %v2338_v5 = vpop.permute.xlu1 %2337  ;;  %2288 = vadd.xlane.f32.xlu1 %v2287_v52  ;;  %2291 = vadd.xlane.f32.xlu0 %v2290_v11  ;;  %v13124_v52 = vld [vmem:[#allocation18_spill] sm:$0xff]  ;;  %v13126_v11 = vld [vmem:[#allocation20_spill] sm:$0xff] }
 0xa8b   :  { %v10919_v22 = vpop.eup %9144  ;;  %8308 = vmatpush3.msra.mxu1 %v2342_v4  ;;  %v13123_v4 = vld [vmem:[#allocation19_spill] sm:$0xff] }
 0xa8c   :  { %v10921_v59 = vpop.eup %9146  ;;  %8309 = vmatprep.subr.mxu1 %v2340_v32  ;;  %v2293_v20 = vsel %vm756_vm3, %v10919_v22, 0.0 }
 0xa8d   :  { %8310 = vmatpush3.msra.mxu1 %v2340_v32  ;;  %v2336_v46 = vpop.permute.xlu0 %2335  ;;  %v2296_v56 = vsel %vm756_vm3, %v10921_v59, 0.0  ;;  %v13125_v32 = vld [vmem:[#allocation11_spill] sm:$0xff] }
 0xa8e   :  { %v2334_v6 = vpop.permute.xlu1 %2333  ;;  %8311 = vmatprep.subr.mxu1 %v2338_v5  ;;  %2294 = vadd.xlane.f32.xlu1 %v2293_v20  ;;  %v8385_v20 = vpop.f32.mrf.mxu0 }
 0xa8f   :  { %2297 = vadd.xlane.f32.xlu0 %v2296_v56  ;;  %8312 = vmatpush3.msra.mxu1 %v2338_v5  ;;  %v13127_v5 = vld [vmem:[#allocation21_spill] sm:$0xff]  ;;  %v10981_v55 = vadd.f32 %v10735_v0, %v8385_v20 }
 0xa90   :  { %v10927_v40 = vpop.eup %9148  ;;  %8313 = vmatprep.subr.mxu1 %v2336_v46 }
 0xa91   :  { %8314 = vmatpush3.msra.mxu1 %v2336_v46  ;;  %v2302_v63 = vsel %vm756_vm3, %v10927_v40, 0.0  ;;  %v2330_v13 = vpop.permute.xlu0 %2329  ;;  %v2864_v46 = vpop.f32.mrf.mxu0 }
 0xa92   :  { %v2332_v41 = vpop.permute.xlu1 %2331  ;;  %8315 = vmatprep.subr.mxu1 %v2334_v6 }
 0xa93   :  { %2303 = vadd.xlane.f32.xlu0 %v2302_v63  ;;  %8316 = vmatpush3.msra.mxu1 %v2334_v6  ;;  %v8388_v56 = vpop.f32.mrf.mxu0 }
 0xa94   :  { %8317 = vmatprep.subr.mxu1 %v2332_v41  ;;  %v10971_v60 = vadd.f32 %v10753_v54, %v8388_v56 }
 0xa95   :  { %8318 = vmatpush3.msra.mxu1 %v2332_v41  ;;  %v2874_v6 = vpop.f32.mrf.mxu0 }
 0xa96   :  { %v3475_v62 = vpop.permute.xlu1 %3474  ;;  %8319 = vmatprep.subr.mxu1 %v2330_v13  ;;  %v2932_v33 = vsel %vm756_vm3, %v10971_v60, -inf  ;;  %v10989_v56 = vadd.f32 %v10763_v8, %v2874_v6 }
 0xa97   :  { %8463 = vmatprep.subr.msk.mxu0 %vm48_vm1, %v3475_v62  ;;  %8320 = vmatpush3.msra.mxu1 %v2330_v13  ;;  %v8391_v63 = vpop.f32.mrf.mxu0  ;;  %v10968_v13 = vadd.f32 %v10743_v39, %v2864_v46 }
 0xa98   :  { %8464 = vmatpush3.xpose.msk.msra.mxu0 %vm48_vm1, %v3475_v62  ;;  %v10976_v42 = vadd.f32 %v10771_v17, %v8391_v63  ;;  %v2926_v17 = vsel %vm756_vm3, %v10981_v55, -inf  ;;  %v2929_v8 = vsel %vm756_vm3, %v10989_v56, -inf }
 0xa99   :  { %v2884_v41 = vpop.f32.mrf.mxu0  ;;  %v2923_v43 = vsel %vm756_vm3, %v10968_v13, -inf }
 0xa9a   :  { %v2938_v54 = vsel %vm756_vm3, %v10976_v42, -inf }
 0xa9b   :  { %v8394_v62 = vpop.f32.mrf.mxu0 }
 0xa9c   :  { %v10984_v46 = vadd.f32 %v10791_v24, %v8394_v62  ;;  %v10999_v24 = vadd.f32 %v10783_v31, %v2884_v41 }
 0xa9d   :  { %v2894_v18 = vpop.f32.mrf.mxu0 }
 0xa9e   :  { %v2935_v31 = vsel %vm756_vm3, %v10999_v24, -inf }
 0xa9f   :  { %3470 = vrot.lane.b32.xlu1 %v9759_v27, %s9487_s16  ;;  %v8397_v39 = vpop.f32.mrf.mxu0 }
 0xaa0   :  { %v10994_v0 = vadd.f32 %v10811_v37, %v8397_v39  ;;  %v11009_v37 = vadd.f32 %v10803_v10, %v2894_v18 }
 0xaa2   :  { %v2950_v63 = vsel %vm756_vm3, %v10994_v0, -inf }
 0xaa3   :  { %3466 = vrot.lane.b32.xlu1 %v9755_v26, %s9487_s16 }
 0xaa7   :  { %3462 = vrot.lane.b32.xlu1 %v9763_v34, %s9487_s16 }
 0xaa9   :  { %3472 = vrot.lane.b32.xlu0 %v9751_v23, %s9487_s16 }
 0xaab   :  { %3458 = vrot.lane.b32.xlu1 %v9771_v36, %s9487_s16 }
 0xaad   :  { %3468 = vrot.lane.b32.xlu0 %v9767_v35, %s9487_s16 }
 0xaaf   :  { %3454 = vrot.lane.b32.xlu1 %v13123_v4, %s9487_s16 }
 0xab1   :  { %3464 = vrot.lane.b32.xlu0 %v13124_v52, %s9487_s16 }
 0xab3   :  { %3428 = vrot.lane.b32.xlu1 %v13125_v32, %s9488_s8 }
 0xab5   :  { %3460 = vrot.lane.b32.xlu0 %v13126_v11, %s9487_s16 }
 0xab7   :  { %3432 = vrot.lane.b32.xlu1 %v13127_v5, %s9488_s8 }
 0xab9   :  { %3456 = vrot.lane.b32.xlu0 %v13127_v5, %s9487_s16 }
 0xabb   :  { %3436 = vrot.lane.b32.xlu1 %v13126_v11, %s9488_s8 }
 0xabd   :  { %3452 = vrot.lane.b32.xlu0 %v13125_v32, %s9487_s16 }
 0xabf   :  { %3440 = vrot.lane.b32.xlu1 %v13124_v52, %s9488_s8 }
 0xac1   :  { %3430 = vrot.lane.b32.xlu0 %v13123_v4, %s9488_s8 }
 0xac3   :  { %3444 = vrot.lane.b32.xlu1 %v9767_v35, %s9488_s8 }
 0xac5   :  { %3434 = vrot.lane.b32.xlu0 %v9771_v36, %s9488_s8 }
 0xac7   :  { %3448 = vrot.lane.b32.xlu1 %v9751_v23, %s9488_s8 }
 0xac9   :  { %3438 = vrot.lane.b32.xlu0 %v9763_v34, %s9488_s8 }
 0xacd   :  { %3442 = vrot.lane.b32.xlu0 %v9755_v26, %s9488_s8 }
 0xad1   :  { %3446 = vrot.lane.b32.xlu0 %v9759_v27, %s9488_s8 }
 0xad5   :  { %3450 = vrot.lane.b32.xlu0 %v9749_v19, %s9488_s8 }
 0xaeb   :  { %2924 = vmax.xlane.f32.xlu1 %v2923_v43  ;;  %v2904_v43 = vpop.f32.mrf.mxu0 }
 0xaec   :  { %v11016_v62 = vadd.f32 %v10823_v47, %v2904_v43 }
 0xaed   :  { %v8400_v20 = vpop.f32.mrf.mxu0 }
 0xaee   :  { %v11004_v6 = vadd.f32 %v10831_v14, %v8400_v20  ;;  %v2941_v14 = vsel %vm756_vm3, %v11009_v37, -inf  ;;  %v2947_v10 = vsel %vm756_vm3, %v11016_v62, -inf }
 0xaef   :  { %2933 = vmax.xlane.f32.xlu1 %v2932_v33  ;;  %v2944_v33 = vsel %vm756_vm3, %v10984_v46, -inf  ;;  %v2914_v39 = vpop.f32.mrf.mxu0 }
 0xaf0   :  { %v2956_v41 = vsel %vm756_vm3, %v11004_v6, -inf  ;;  %v11021_v18 = vadd.f32 %v10843_v16, %v2914_v39  ;;  %v13128_v16 = vld [vmem:[#allocation10_spill] sm:$0xff]  ;;  %v11032_v39 = vld [vmem:[%s13008_s4 + $0x8] sm:$0xff] }
 0xaf1   :  { %8339 = vmatprep.subr.msk.mxu1 %vm85_vm0, %v11032_v39 }
 0xaf2   :  { %v2953_v47 = vsel %vm756_vm3, %v11021_v18, -inf }
 0xaf3   :  { %2939 = vmax.xlane.f32.xlu1 %v2938_v54 }
 0xaf4   :  { %2927 = vmax.xlane.f32.xlu0 %v2926_v17 }
 0xaf7   :  { %2945 = vmax.xlane.f32.xlu1 %v2944_v33 }
 0xaf8   :  { %2930 = vmax.xlane.f32.xlu0 %v2929_v8 }
 0xafb   :  { %2951 = vmax.xlane.f32.xlu1 %v2950_v63 }
 0xafc   :  { %2936 = vmax.xlane.f32.xlu0 %v2935_v31 }
 0xaff   :  { %2957 = vmax.xlane.f32.xlu1 %v2956_v41 }
 0xb00   :  { %2942 = vmax.xlane.f32.xlu0 %v2941_v14 }
 0xb04   :  { %2948 = vmax.xlane.f32.xlu0 %v2947_v10  ;;  %v2274_v54 = vpop.xlane.xlu1 %2273 }
 0xb05   :  { %9150 = vrcp.f32 %v2274_v54 }
 0xb06   :  { %v2271_v17 = vpop.xlane.xlu0 %2270 }
 0xb07   :  { %9152 = vrcp.f32 %v2271_v17 }
 0xb08   :  { %2954 = vmax.xlane.f32.xlu0 %v2953_v47 }
 0xb0a   :  { %v2277_v43 = vpop.xlane.xlu0 %2276 }
 0xb0b   :  { %9154 = vrcp.f32 %v2277_v43  ;;  %v2280_v33 = vpop.xlane.xlu1 %2279 }
 0xb0c   :  { %9156 = vrcp.f32 %v2280_v33 }
 0xb0f   :  { %v2286_v20 = vpop.xlane.xlu0 %2285  ;;  %v2283_v8 = vpop.xlane.xlu1 %2282 }
 0xb10   :  { %9158 = vrcp.f32 %v2286_v20  ;;  %3075 = vrot.lane.b32.xlu1 %v13128_v16, %s9485_s11 }
 0xb11   :  { %9160 = vrcp.f32 %v2283_v8 }
 0xb12   :  { %v9151_v63 = vpop.eup %9150 }
 0xb13   :  { %v2292_v31 = vpop.xlane.xlu0 %2291  ;;  %v2289_v41 = vpop.xlane.xlu1 %2288  ;;  %v2318_v54 = vmul.f32 %v9151_v63, %v10882_v61  ;;  %v2243_v61 = vsub.f32 %v10846_v48, %v10892_v3 }
 0xb14   :  { %v9153_v14 = vpop.eup %9152  ;;  %9162 = vrcp.f32 %v2292_v31 }
 0xb15   :  { %9164 = vrcp.f32 %v2289_v41  ;;  %v2317_v10 = vmul.f32 %v9153_v14, %v10888_v9  ;;  %v13129_v14 = vld [vmem:[#allocation9_spill] sm:$0xff] }
 0xb17   :  { %v2295_v17 = vpop.xlane.xlu1 %2294  ;;  %8321 = vmatprep.mubr.msk.f32.mxu1 %vm756_vm3, %v2317_v10  ;;  %v2265_v10 = vmul.f32 1.442695, %v2243_v61 }
 0xb18   :  { %v9155_v47 = vpop.eup %9154  ;;  %v2298_v43 = vpop.xlane.xlu0 %2297  ;;  %9166 = vrcp.f32 %v2295_v17  ;;  %8322 = vmatmul.mubr.msk.f32.vlgmr.msra.gmra.mxu1 %vm756_vm3, %v2318_v54 }
 0xb19   :  { %v9157_v33 = vpop.eup %9156  ;;  %9168 = vrcp.f32 %v2298_v43  ;;  %v2319_v20 = vmul.f32 %v9155_v47, %v10895_v38  ;;  %8340 = vmatpush3.msk.msra.mxu1 %vm85_vm0, %v11032_v39 }
 0xb1a   :  { %v2320_v9 = vmul.f32 %v9157_v33, %v10897_v51  ;;  %9170 = vpow2.f32 %v2265_v10 }
 0xb1b   :  { %v3471_v8 = vpop.permute.xlu1 %3470  ;;  %8324 = vmatprep.mubr.msk.f32.mxu1 %vm756_vm3, %v2319_v20 }
 0xb1c   :  { %v11047_v63 = vpop.xlane.xlu0 %2303  ;;  %8325 = vmatmul.mubr.msk.f32.gmra.mxu1 %vm756_vm3, %v2320_v9 }
 0xb1d   :  { %v9159_v31 = vpop.eup %9158 }
 0xb1e   :  { %v9161_v41 = vpop.eup %9160  ;;  %3077 = vrot.lane.b32.xlu0 %v13129_v14, %s9485_s11  ;;  %v2322_v38 = vmul.f32 %v9159_v31, %v10905_v1 }
 0xb1f   :  { %v3467_v54 = vpop.permute.xlu1 %3466  ;;  %v2321_v51 = vmul.f32 %v9161_v41, %v10903_v15 }
 0xb20   :  { %v3473_v17 = vpop.permute.xlu0 %3472 }
 0xb21   :  { %v9163_v48 = vpop.eup %9162  ;;  %8327 = vmatprep.mubr.msk.f32.mxu1 %vm756_vm3, %v2321_v51  ;;  %8465 = vmatprep.subr.msk.mxu0 %vm48_vm1, %v3473_v17 }
 0xb22   :  { %v9165_v3 = vpop.eup %9164  ;;  %3073 = vrot.lane.b32.xlu0 %v9616_v28, %s9485_s11  ;;  %8328 = vmatmul.mubr.msk.f32.gmra.mxu1 %vm756_vm3, %v2322_v38  ;;  %v2324_v47 = vmul.f32 %v9163_v48, %v10913_v50 }
 0xb23   :  { %8466 = vmatpush3.xpose.msk.msra.mxu0 %vm48_vm1, %v3473_v17  ;;  %v3463_v1 = vpop.permute.xlu1 %3462  ;;  %v2323_v15 = vmul.f32 %v9165_v3, %v10911_v2 }
 0xb24   :  { %8467 = vmatprep.subr.msk.mxu0 %vm48_vm1, %v3471_v8  ;;  %v3469_v33 = vpop.permute.xlu0 %3468 }
 0xb25   :  { %v9167_v43 = vpop.eup %9166  ;;  %8330 = vmatprep.mubr.msk.f32.mxu1 %vm756_vm3, %v2323_v15 }
 0xb26   :  { %v9169_v20 = vpop.eup %9168  ;;  %3069 = vrot.lane.b32.xlu0 %v13118_v21, %s9485_s11  ;;  %8331 = vmatmul.mubr.msk.f32.gmra.mxu1 %vm756_vm3, %v2324_v47  ;;  %v2325_v50 = vmul.f32 %v9167_v43, %v10919_v22 }
 0xb27   :  { %8468 = vmatpush3.xpose.msk.msra.mxu0 %vm48_vm1, %v3471_v8  ;;  %v3459_v9 = vpop.permute.xlu1 %3458  ;;  %v2326_v61 = vmul.f32 %v9169_v20, %v10921_v59  ;;  %v11080_v59 = vpop.eup %9170 }
 0xb28   :  { %8469 = vmatprep.subr.msk.mxu0 %vm48_vm1, %v3469_v33  ;;  %8333 = vmatprep.mubr.msk.f32.mxu1 %vm756_vm3, %v2325_v50  ;;  %v3465_v2 = vpop.permute.xlu0 %3464  ;;  %v2299_v41 = vsel %vm756_vm3, %v11080_v59, 0.0 }
 0xb2a   :  { %3065 = vrot.lane.b32.xlu0 %v13119_v7, %s9485_s11  ;;  %8334 = vmatmul.mubr.msk.f32.gmra.mxu1 %vm756_vm3, %v2326_v61 }
 0xb2b   :  { %8470 = vmatpush3.xpose.msk.msra.mxu0 %vm48_vm1, %v3469_v33  ;;  %v3455_v31 = vpop.permute.xlu1 %3454 }
 0xb2c   :  { %8471 = vmatprep.subr.msk.mxu0 %vm48_vm1, %v3467_v54  ;;  %v3461_v8 = vpop.permute.xlu0 %3460 }
 0xb2e   :  { %3061 = vrot.lane.b32.xlu0 %v13121_v49, %s9485_s11 }
 0xb2f   :  { %8472 = vmatpush3.xpose.msk.msra.mxu0 %vm48_vm1, %v3467_v54  ;;  %v3429_v22 = vpop.permute.xlu1 %3428 }
 0xb30   :  { %8473 = vmatprep.subr.msk.mxu0 %vm48_vm1, %v3465_v2  ;;  %8487 = vmatprep.mubr.msk.f32.mxu0 %vm48_vm1, %v3429_v22  ;;  %v3457_v38 = vpop.permute.xlu0 %3456 }
 0xb32   :  { %3055 = vrot.lane.b32.xlu0 %v13122_v45, %s9485_s11 }
 0xb33   :  { %8474 = vmatpush3.xpose.msk.msra.mxu0 %vm48_vm1, %v3465_v2  ;;  %v3433_v51 = vpop.permute.xlu1 %3432 }
 0xb34   :  { %8475 = vmatprep.subr.msk.mxu0 %vm48_vm1, %v3463_v1  ;;  %2300 = vadd.xlane.f32.xlu1 %v2299_v41  ;;  %v3453_v10 = vpop.permute.xlu0 %3452 }
 0xb37   :  { %8476 = vmatpush3.xpose.msk.msra.mxu0 %vm48_vm1, %v3463_v1  ;;  %v3437_v48 = vpop.permute.xlu1 %3436 }
 0xb38   :  { %8477 = vmatprep.subr.msk.mxu0 %vm48_vm1, %v3461_v8  ;;  %v3431_v54 = vpop.permute.xlu0 %3430 }
 0xb3b   :  { %8478 = vmatpush3.xpose.msk.msra.mxu0 %vm48_vm1, %v3461_v8  ;;  %v3441_v47 = vpop.permute.xlu1 %3440 }
 0xb3c   :  { %8479 = vmatprep.subr.msk.mxu0 %vm48_vm1, %v3459_v9  ;;  %v3435_v17 = vpop.permute.xlu0 %3434 }
 0xb3f   :  { %8480 = vmatpush3.xpose.msk.msra.mxu0 %vm48_vm1, %v3459_v9  ;;  %v3445_v15 = vpop.permute.xlu1 %3444 }
 0xb40   :  { %8481 = vmatprep.subr.msk.mxu0 %vm48_vm1, %v3457_v38  ;;  %v3439_v3 = vpop.permute.xlu0 %3438 }
 0xb43   :  { %8482 = vmatpush3.xpose.msk.msra.mxu0 %vm48_vm1, %v3457_v38  ;;  %v3449_v33 = vpop.permute.xlu1 %3448 }
 0xb44   :  { %8483 = vmatprep.subr.msk.mxu0 %vm48_vm1, %v3455_v31  ;;  %v3443_v1 = vpop.permute.xlu0 %3442 }
 0xb45   :  { %3071 = vrot.lane.b32.xlu1 %v9618_v29, %s9485_s11 }
 0xb47   :  { %8484 = vmatpush3.xpose.msk.msra.mxu0 %vm48_vm1, %v3455_v31 }
 0xb48   :  { %8485 = vmatprep.subr.msk.mxu0 %vm48_vm1, %v3453_v10  ;;  %v3447_v43 = vpop.permute.xlu0 %3446 }
 0xb49   :  { %3067 = vrot.lane.b32.xlu1 %v9610_v25, %s9485_s11 }
 0xb4b   :  { %8486 = vmatpush3.xpose.msk.msra.mxu0 %vm48_vm1, %v3453_v10 }
 0xb4c   :  { %v3451_v20 = vpop.permute.xlu0 %3450 }
 0xb4d   :  { %3063 = vrot.lane.b32.xlu1 %v13105_v53, %s9485_s11 }
 0xb4e   :  { %8488 = vmatmul.mubr.msk.f32.vlgmr.msra.gmra.mxu0 %vm48_vm1, %v3431_v54 }
 0xb4f   :  { %8490 = vmatprep.mubr.msk.f32.mxu0 %vm48_vm1, %v3433_v51 }
 0xb51   :  { %3059 = vrot.lane.b32.xlu1 %v13108_v30, %s9485_s11 }
 0xb52   :  { %8491 = vmatmul.mubr.msk.f32.gmra.mxu0 %vm48_vm1, %v3435_v17 }
 0xb53   :  { %8493 = vmatprep.mubr.msk.f32.mxu0 %vm48_vm1, %v3437_v48 }
 0xb55   :  { %3057 = vrot.lane.b32.xlu1 %v13120_v44, %s9485_s11  ;;  %s9490_s11 = smov 108  }
 0xb56   :  { %8494 = vmatmul.mubr.msk.f32.gmra.mxu0 %vm48_vm1, %v3439_v3 }
 0xb57   :  { %8496 = vmatprep.mubr.msk.f32.mxu0 %vm48_vm1, %v3441_v47 }
 0xb59   :  { %4200 = vrot.lane.b32.xlu1 %v9749_v19, %s9489_s19 }
 0xb5a   :  { %8497 = vmatmul.mubr.msk.f32.gmra.mxu0 %vm48_vm1, %v3443_v1 }
 0xb5b   :  { %8499 = vmatprep.mubr.msk.f32.mxu0 %vm48_vm1, %v3445_v15 }
 0xb5e   :  { %8500 = vmatmul.mubr.msk.f32.gmra.mxu0 %vm48_vm1, %v3447_v43 }
 0xb5f   :  { %8502 = vmatprep.mubr.msk.f32.mxu0 %vm48_vm1, %v3449_v33 }
 0xb62   :  { %8503 = vmatmul.mubr.msk.f32.gmra.mxu0 %vm48_vm1, %v3451_v20 }
 0xb74   :  { %v2925_v50 = vpop.xlane.xlu1 %2924 }
 0xb75   :  { %v2959_v9 = vsub.f32 %v10968_v13, %v2925_v50 }
 0xb77   :  { %v2971_v61 = vmul.f32 1.442695, %v2959_v9 }
 0xb78   :  { %v2934_v2 = vpop.xlane.xlu1 %2933 }
 0xb79   :  { %9172 = vpow2.f32 %v2971_v61  ;;  %v2962_v31 = vsub.f32 %v10971_v60, %v2934_v2 }
 0xb7b   :  { %v2977_v38 = vmul.f32 1.442695, %v2962_v31 }
 0xb7c   :  { %v2940_v22 = vpop.xlane.xlu1 %2939 }
 0xb7d   :  { %v2928_v8 = vpop.xlane.xlu0 %2927  ;;  %v2964_v54 = vsub.f32 %v10976_v42, %v2940_v22 }
 0xb7e   :  { %v2960_v41 = vsub.f32 %v10981_v55, %v2928_v8 }
 0xb7f   :  { %v2981_v13 = vmul.f32 1.442695, %v2964_v54 }
 0xb80   :  { %v2973_v10 = vmul.f32 1.442695, %v2960_v41  ;;  %v2946_v51 = vpop.xlane.xlu1 %2945 }
 0xb81   :  { %v2931_v17 = vpop.xlane.xlu0 %2930  ;;  %v2966_v47 = vsub.f32 %v10984_v46, %v2946_v51 }
 0xb82   :  { %9174 = vpow2.f32 %v2973_v10  ;;  %v2961_v48 = vsub.f32 %v10989_v56, %v2931_v17 }
 0xb83   :  { %9176 = vpow2.f32 %v2977_v38  ;;  %v2985_v43 = vmul.f32 1.442695, %v2966_v47 }
 0xb84   :  { %v2975_v3 = vmul.f32 1.442695, %v2961_v48  ;;  %v2952_v1 = vpop.xlane.xlu1 %2951 }
 0xb85   :  { %v2937_v60 = vpop.xlane.xlu0 %2936  ;;  %v2968_v56 = vsub.f32 %v10994_v0, %v2952_v1 }
 0xb86   :  { %v11130_v15 = vpop.eup %9172  ;;  %9178 = vpow2.f32 %v2975_v3  ;;  %v2963_v55 = vsub.f32 %v10999_v24, %v2937_v60 }
 0xb87   :  { %v2995_v42 = vsel %vm756_vm3, %v11130_v15, 0.0  ;;  %9180 = vpow2.f32 %v2981_v13  ;;  %v2989_v9 = vmul.f32 1.442695, %v2968_v56 }
 0xb88   :  { %v2979_v33 = vmul.f32 1.442695, %v2963_v55  ;;  %2996 = vadd.xlane.f32.xlu0 %v2995_v42  ;;  %v2958_v50 = vpop.xlane.xlu1 %2957 }
 0xb89   :  { %v2943_v20 = vpop.xlane.xlu0 %2942  ;;  %v2970_v2 = vsub.f32 %v11004_v6, %v2958_v50  ;;  %v11184_v50 = vpop.f32.mrf.mxu1 }
 0xb8a   :  { %9182 = vpow2.f32 %v2979_v33  ;;  %v2965_v46 = vsub.f32 %v11009_v37, %v2943_v20 }
 0xb8b   :  { %9184 = vpow2.f32 %v2985_v43  ;;  %v2993_v8 = vmul.f32 1.442695, %v2970_v2 }
 0xb8c   :  { %v2983_v61 = vmul.f32 1.442695, %v2965_v46  ;;  %v11186_v46 = vpop.f32.mrf.mxu1  ;;  %v3076_v2 = vpop.permute.xlu1 %3075 }
 0xb8d   :  { %v2949_v24 = vpop.xlane.xlu0 %2948  ;;  %13130 = vst [vmem:[#allocation8_spill] sm:$0xff] %v11186_v46 }
 0xb8e   :  { %9186 = vpow2.f32 %v2983_v61  ;;  %v2967_v31 = vsub.f32 %v11016_v62, %v2949_v24 }
 0xb8f   :  { %v11139_v22 = vpop.eup %9174  ;;  %9188 = vpow2.f32 %v2989_v9  ;;  %v11188_v9 = vpop.f32.mrf.mxu1 }
 0xb90   :  { %v2987_v0 = vmul.f32 1.442695, %v2967_v31  ;;  %v2998_v41 = vsel %vm756_vm3, %v11139_v22, 0.0  ;;  %v11143_v38 = vpop.eup %9176 }
 0xb91   :  { %2999 = vadd.xlane.f32.xlu1 %v2998_v41  ;;  %v11145_v37 = vpop.xlane.xlu0 %2954  ;;  %v3004_v62 = vsel %vm756_vm3, %v11143_v38, 0.0  ;;  %v11192_v61 = vpop.f32.mrf.mxu1 }
 0xb92   :  { %9190 = vpow2.f32 %v2987_v0  ;;  %13131 = vst [vmem:[#allocation6_spill] sm:$0xff] %v11192_v61 }
 0xb93   :  { %v11147_v10 = vpop.eup %9178  ;;  %9192 = vpow2.f32 %v2993_v8  ;;  %v11196_v24 = vpop.f32.mrf.mxu1 }
 0xb94   :  { %v3001_v6 = vsel %vm756_vm3, %v11147_v10, 0.0  ;;  %v11153_v54 = vpop.eup %9180  ;;  %9194 = vrcp.f32 %v11047_v63 }
 0xb95   :  { %v11155_v51 = vpop.permute.xlu0 %3077  ;;  %3002 = vadd.xlane.f32.xlu0 %v3001_v6  ;;  %3005 = vadd.xlane.f32.xlu1 %v3004_v62  ;;  %v3010_v13 = vsel %vm756_vm3, %v11153_v54, 0.0  ;;  %v11203_v8 = vpop.f32.mrf.mxu1 }
 0xb96   :  { %8401 = vmatprep.subr.mxu1 %v11155_v51  ;;  %13132 = vst [vmem:[#allocation4_spill] sm:$0xff] %v11203_v8 }
 0xb97   :  { %v11158_v17 = vpop.eup %9182  ;;  %v11209_v41 = vpop.f32.mrf.mxu1 }
 0xb98   :  { %v3007_v48 = vsel %vm756_vm3, %v11158_v17, 0.0  ;;  %v11164_v3 = vpop.eup %9184 }
 0xb99   :  { %3008 = vadd.xlane.f32.xlu1 %v3007_v48  ;;  %3011 = vadd.xlane.f32.xlu0 %v3010_v13  ;;  %v3016_v60 = vsel %vm756_vm3, %v11164_v3, 0.0  ;;  %v11215_v6 = vpop.f32.mrf.mxu1 }
 0xb9a   :  { %13133 = vst [vmem:[#allocation10_spill] sm:$0xff] %v11215_v6 }
 0xb9b   :  { %v11166_v47 = vpop.eup %9186  ;;  %v11223_v13 = vpop.f32.mrf.mxu1 }
 0xb9c   :  { %v3013_v1 = vsel %vm756_vm3, %v11166_v47, 0.0  ;;  %v11172_v55 = vpop.eup %9188 }
 0xb9d   :  { %3014 = vadd.xlane.f32.xlu1 %v3013_v1  ;;  %3017 = vadd.xlane.f32.xlu0 %v3016_v60  ;;  %v3022_v33 = vsel %vm756_vm3, %v11172_v55, 0.0 }
 0xb9f   :  { %v11174_v42 = vpop.eup %9190 }
 0xba0   :  { %v3019_v43 = vsel %vm756_vm3, %v11174_v42, 0.0  ;;  %v11180_v56 = vpop.eup %9192 }
 0xba1   :  { %3020 = vadd.xlane.f32.xlu1 %v3019_v43  ;;  %3023 = vadd.xlane.f32.xlu0 %v3022_v33  ;;  %v3028_v20 = vsel %vm756_vm3, %v11180_v56, 0.0  ;;  %v9195_v48 = vpop.eup %9194 }
 0xba2   :  { %v2328_v33 = vmul.f32 %v9195_v48, %v10927_v40 }
 0xba5   :  { %3029 = vadd.xlane.f32.xlu0 %v3028_v20  ;;  %v11233_v20 = vpop.f32.mrf.mxu1 }
 0xba6   :  { %13134 = vst [vmem:[#allocation9_spill] sm:$0xff] %v11233_v20 }
 0xba7   :  { %v11241_v6 = vpop.f32.mrf.mxu1 }
 0xba8   :  { %13135 = vst [vmem:[#allocation29_spill] sm:$0xff] %v11241_v6 }
 0xbb2   :  { %4196 = vrot.lane.b32.xlu1 %v9759_v27, %s9489_s19 }
 0xbb6   :  { %4192 = vrot.lane.b32.xlu1 %v9755_v26, %s9489_s19 }
 0xbba   :  { %4188 = vrot.lane.b32.xlu1 %v9763_v34, %s9489_s19 }
 0xbbb   :  { %4198 = vrot.lane.b32.xlu0 %v9751_v23, %s9489_s19 }
 0xbbd   :  { %v2301_v31 = vpop.xlane.xlu1 %2300 }
 0xbbe   :  { %4184 = vrot.lane.b32.xlu1 %v9771_v36, %s9489_s19  ;;  %9196 = vrcp.f32 %v2301_v31 }
 0xbbf   :  { %4194 = vrot.lane.b32.xlu0 %v9767_v35, %s9489_s19 }
 0xbc1   :  { %v3072_v0 = vpop.permute.xlu1 %3071 }
 0xbc2   :  { %4180 = vrot.lane.b32.xlu1 %v13123_v4, %s9489_s19 }
 0xbc3   :  { %4190 = vrot.lane.b32.xlu0 %v13124_v52, %s9489_s19 }
 0xbc5   :  { %v3068_v63 = vpop.permute.xlu1 %3067 }
 0xbc6   :  { %4154 = vrot.lane.b32.xlu1 %v13125_v32, %s9490_s11 }
 0xbc7   :  { %4186 = vrot.lane.b32.xlu0 %v13126_v11, %s9489_s19 }
 0xbc9   :  { %v11221_v62 = vpop.permute.xlu1 %3063 }
 0xbca   :  { %4158 = vrot.lane.b32.xlu1 %v13127_v5, %s9490_s11 }
 0xbcb   :  { %v9197_v1 = vpop.eup %9196  ;;  %4182 = vrot.lane.b32.xlu0 %v13127_v5, %s9489_s19 }
 0xbcc   :  { %v2327_v60 = vmul.f32 %v9197_v1, %v11080_v59  ;;  %v11247_v59 = vpop.f32.mrf.mxu1 }
 0xbcd   :  { %v11230_v43 = vpop.permute.xlu1 %3059  ;;  %13136 = vst [vmem:[#allocation30_spill] sm:$0xff] %v11247_v59 }
 0xbce   :  { %4162 = vrot.lane.b32.xlu1 %v13126_v11, %s9490_s11  ;;  %8336 = vmatprep.mubr.msk.f32.mxu1 %vm756_vm3, %v2327_v60  ;;  %v3074_v60 = vpop.permute.xlu0 %3073 }
 0xbcf   :  { %4178 = vrot.lane.b32.xlu0 %v13125_v32, %s9489_s19  ;;  %8337 = vmatmul.mubr.msk.f32.gmra.mxu1 %vm756_vm3, %v2328_v33 }
 0xbd1   :  { %v3058_v31 = vpop.permute.xlu1 %3057 }
 0xbd2   :  { %4166 = vrot.lane.b32.xlu1 %v13124_v52, %s9490_s11  ;;  %v3070_v61 = vpop.permute.xlu0 %3069 }
 0xbd3   :  { %4156 = vrot.lane.b32.xlu0 %v13123_v4, %s9490_s11 }
 0xbd5   :  { %v4201_v40 = vpop.permute.xlu1 %4200 }
 0xbd6   :  { %4170 = vrot.lane.b32.xlu1 %v9767_v35, %s9490_s11  ;;  %8567 = vmatprep.subr.msk.mxu0 %vm48_vm1, %v4201_v40 }
 0xbd7   :  { %4160 = vrot.lane.b32.xlu0 %v9771_v36, %s9490_s11  ;;  %8568 = vmatpush3.xpose.msk.msra.mxu0 %vm48_vm1, %v4201_v40  ;;  %v2969_v40 = vsub.f32 %v11021_v18, %v11145_v37 }
 0xbd8   :  { %v8323_v48 = vpop.f32.mrf.mxu1 }
 0xbda   :  { %v2467_v1 = vpop.f32.mrf.mxu1 }
 0xbdb   :  { %4164 = vrot.lane.b32.xlu0 %v9763_v34, %s9490_s11  ;;  %8341 = vmatprep.mubr.msk.f32.mxu1 %vm48_vm1, %v2467_v1 }
 0xbdc   :  { %v8326_v33 = vpop.f32.mrf.mxu1  ;;  %8342 = vmatmul.mubr.msk.f32.vlgmr.msra.gmra.mxu1 %vm48_vm1, %v8323_v48  ;;  %v2991_v48 = vmul.f32 1.442695, %v2969_v40  ;;  %v11289_v40 = vld [vmem:[%s13007_s1 + $0x8] sm:$0xff] }
 0xbdd   :  { %8402 = vmatpush3.msra.mxu1 %v11155_v51  ;;  %13137 = vst [vmem:[#allocation31_spill] sm:$0xff] %v11289_v40 }
 0xbde   :  { %8403 = vmatprep.subr.mxu1 %v3076_v2  ;;  %v2477_v8 = vpop.f32.mrf.mxu1  ;;  %9198 = vpow2.f32 %v2991_v48 }
 0xbdf   :  { %4168 = vrot.lane.b32.xlu0 %v9755_v26, %s9490_s11  ;;  %8404 = vmatpush3.msra.mxu1 %v3076_v2 }
 0xbe0   :  { %8344 = vmatprep.mubr.msk.f32.mxu1 %vm48_vm1, %v2477_v8  ;;  %8405 = vmatprep.subr.mxu1 %v3074_v60  ;;  %v3066_v8 = vpop.permute.xlu0 %3065 }
 0xbe1   :  { %8345 = vmatmul.mubr.msk.f32.gmra.mxu1 %vm48_vm1, %v8326_v33 }
 0xbe2   :  { %v8329_v1 = vpop.f32.mrf.mxu1  ;;  %8406 = vmatpush3.msra.mxu1 %v3074_v60 }
 0xbe3   :  { %4172 = vrot.lane.b32.xlu0 %v9759_v27, %s9490_s11  ;;  %8407 = vmatprep.subr.mxu1 %v3072_v0 }
 0xbe4   :  { %v2487_v51 = vpop.f32.mrf.mxu1  ;;  %8408 = vmatpush3.msra.mxu1 %v3072_v0  ;;  %v3062_v60 = vpop.permute.xlu0 %3061 }
 0xbe5   :  { %8347 = vmatprep.mubr.msk.f32.mxu1 %vm48_vm1, %v2487_v51  ;;  %8409 = vmatprep.subr.mxu1 %v3070_v61 }
 0xbe6   :  { %v8332_v2 = vpop.f32.mrf.mxu1  ;;  %8348 = vmatmul.mubr.msk.f32.gmra.mxu1 %vm48_vm1, %v8329_v1 }
 0xbe7   :  { %8410 = vmatpush3.msra.mxu1 %v3070_v61  ;;  %4176 = vrot.lane.b32.xlu0 %v9749_v19, %s9490_s11 }
 0xbe8   :  { %8411 = vmatprep.subr.mxu1 %v3068_v63  ;;  %v2497_v18 = vpop.f32.mrf.mxu1  ;;  %v3056_v61 = vpop.permute.xlu0 %3055 }
 0xbe9   :  { %8412 = vmatpush3.msra.mxu1 %v3068_v63  ;;  %8350 = vmatprep.mubr.msk.f32.mxu1 %vm48_vm1, %v2497_v18 }
 0xbea   :  { %8413 = vmatprep.subr.mxu1 %v3066_v8  ;;  %v8335_v37 = vpop.f32.mrf.mxu1  ;;  %8351 = vmatmul.mubr.msk.f32.gmra.mxu1 %vm48_vm1, %v8332_v2  ;;  %v11299_v2 = vld [vmem:[%s13007_s1 + $0x10] sm:$0xff] }
 0xbeb   :  { %8414 = vmatpush3.msra.mxu1 %v3066_v8  ;;  %v11280_v63 = vpop.eup %9198  ;;  %13138 = vst [vmem:[#allocation32_spill] sm:$0xff] %v11299_v2 }
 0xbec   :  { %8415 = vmatprep.subr.mxu1 %v11221_v62  ;;  %v2507_v0 = vpop.f32.mrf.mxu1 }
 0xbed   :  { %8416 = vmatpush3.msra.mxu1 %v11221_v62  ;;  %8353 = vmatprep.mubr.msk.f32.mxu1 %vm48_vm1, %v2507_v0  ;;  %v3025_v62 = vsel %vm756_vm3, %v11280_v63, 0.0 }
 0xbee   :  { %8417 = vmatprep.subr.mxu1 %v3062_v60  ;;  %8354 = vmatmul.mubr.msk.f32.gmra.mxu1 %vm48_vm1, %v8335_v37 }
 0xbef   :  { %8418 = vmatpush3.msra.mxu1 %v3062_v60 }
 0xbf0   :  { %8419 = vmatprep.subr.mxu1 %v11230_v43 }
 0xbf1   :  { %8420 = vmatpush3.msra.mxu1 %v11230_v43 }
 0xbf2   :  { %8421 = vmatprep.subr.mxu1 %v3058_v31 }
 0xbf3   :  { %8422 = vmatpush3.msra.mxu1 %v3058_v31 }
 0xbf4   :  { %8423 = vmatprep.subr.mxu1 %v3056_v61 }
 0xbf5   :  { %8424 = vmatpush3.msra.mxu1 %v3056_v61  ;;  %v11311_v61 = vld [vmem:[%s13007_s1 + $0x20] sm:$0xff] }
 0xbf6   :  { %13139 = vst [vmem:[#allocation33_spill] sm:$0xff] %v11311_v61 }
 0xbfa   :  { %3026 = vadd.xlane.f32.xlu1 %v3025_v62 }
 0xc0b   :  { %4174 = vrot.lane.b32.xlu1 %v9751_v23, %s9490_s11 }
 0xc0e   :  { %v8489_v33 = vpop.f32.mrf.mxu0 }
 0xc0f   :  { %v11292_v43 = vadd.f32 %v11289_v40, %v8489_v33 }
 0xc10   :  { %v3590_v31 = vpop.f32.mrf.mxu0 }
 0xc11   :  { %v3652_v1 = vsel %vm756_vm3, %v11292_v43, -inf  ;;  %v11306_v60 = vpop.xlane.xlu0 %2996 }
 0xc12   :  { %v8492_v51 = vpop.f32.mrf.mxu0  ;;  %3653 = vmax.xlane.f32.xlu0 %v3652_v1  ;;  %9200 = vrcp.f32 %v11306_v60 }
 0xc14   :  { %v3600_v48 = vpop.f32.mrf.mxu0 }
 0xc15   :  { %v11302_v8 = vadd.f32 %v11299_v2, %v3600_v48 }
 0xc16   :  { %v8495_v18 = vpop.f32.mrf.mxu0 }
 0xc17   :  { %v3655_v37 = vsel %vm756_vm3, %v11302_v8, -inf }
 0xc18   :  { %v3610_v0 = vpop.f32.mrf.mxu0  ;;  %3656 = vmax.xlane.f32.xlu0 %v3655_v37  ;;  %v11323_v37 = vld [vmem:[%s13007_s1 + $0x30] sm:$0xff] }
 0xc19   :  { %v11314_v62 = vadd.f32 %v11311_v61, %v3610_v0  ;;  %13140 = vst [vmem:[#allocation34_spill] sm:$0xff] %v11323_v37 }
 0xc1a   :  { %v8498_v33 = vpop.f32.mrf.mxu0  ;;  %v11316_v1 = vpop.xlane.xlu1 %2999 }
 0xc1b   :  { %v3661_v48 = vsel %vm756_vm3, %v11314_v62, -inf  ;;  %9202 = vrcp.f32 %v11316_v1 }
 0xc1c   :  { %v3620_v46 = vpop.f32.mrf.mxu0  ;;  %3662 = vmax.xlane.f32.xlu0 %v3661_v48  ;;  %v11337_v48 = vld [vmem:[%s13007_s1 + $0x40] sm:$0xff] }
 0xc1d   :  { %v11326_v59 = vadd.f32 %v11323_v37, %v3620_v46  ;;  %13141 = vst [vmem:[#allocation35_spill] sm:$0xff] %v11337_v48 }
 0xc1e   :  { %v8501_v20 = vpop.f32.mrf.mxu0  ;;  %v11328_v6 = vpop.xlane.xlu0 %3002 }
 0xc1f   :  { %v11330_v0 = vpop.xlane.xlu1 %3005  ;;  %v3667_v61 = vsel %vm756_vm3, %v11326_v59, -inf  ;;  %9204 = vrcp.f32 %v11328_v6  ;;  %v9201_v60 = vpop.eup %9200 }
 0xc20   :  { %v3630_v2 = vpop.f32.mrf.mxu0  ;;  %3668 = vmax.xlane.f32.xlu0 %v3667_v61  ;;  %v11351_v61 = vld [vmem:[%s13007_s1 + $0x50] sm:$0xff]  ;;  %9206 = vrcp.f32 %v11330_v0  ;;  %v3043_v0 = vmul.f32 %v9201_v60, %v11130_v15  ;;  %v13151_v15 = vrot.slane %v11032_v39, 4 }
 0xc21   :  { %v11340_v40 = vadd.f32 %v11337_v48, %v3630_v2  ;;  %13143 = vst [vmem:[#allocation37_spill] sm:$0xff] %v11351_v61 }
 0xc22   :  { %v8504_v46 = vpop.f32.mrf.mxu0  ;;  %v11342_v37 = vpop.xlane.xlu0 %3011 }
 0xc23   :  { %13142 = vst [vmem:[#allocation36_spill] sm:$0xff] %v11340_v40  ;;  %v11344_v5 = vpop.xlane.xlu1 %3008  ;;  %v3673_v11 = vsel %vm756_vm3, %v11340_v40, -inf }
 0xc24   :  { %v3640_v32 = vpop.f32.mrf.mxu0  ;;  %3674 = vmax.xlane.f32.xlu0 %v3673_v11  ;;  %v11365_v11 = vld [vmem:[%s13007_s1] sm:$0xff]  ;;  %9208 = vrcp.f32 %v11344_v5 }
 0xc25   :  { %v11354_v52 = vadd.f32 %v11351_v61, %v3640_v32  ;;  %13145 = vst [vmem:[#allocation39_spill] sm:$0xff] %v11365_v11  ;;  %v11368_v35 = vadd.f32 %v11365_v11, %v3590_v31  ;;  %v11377_v61 = vld [vmem:[%s13007_s1 + $0x18] sm:$0xff]  ;;  %v11389_v31 = vld [vmem:[%s13007_s1 + $0x28] sm:$0xff]  ;;  %9210 = vrcp.f32 %v11342_v37 }
 0xc26   :  { %v11356_v2 = vpop.xlane.xlu0 %3017  ;;  %13146 = vst [vmem:[#allocation40_spill] sm:$0xff] %v11377_v61  ;;  %13147 = vst [vmem:[#allocation41_spill] sm:$0xff] %v11389_v31  ;;  %v11392_v11 = vadd.f32 %v11389_v31, %v8495_v18 }
 0xc27   :  { %13144 = vst [vmem:[#allocation38_spill] sm:$0xff] %v11354_v52  ;;  %v11358_v48 = vpop.xlane.xlu1 %3014  ;;  %v3679_v4 = vsel %vm756_vm3, %v11354_v52, -inf  ;;  %v11380_v52 = vadd.f32 %v11377_v61, %v8492_v51  ;;  %v3649_v23 = vsel %vm756_vm3, %v11368_v35, -inf  ;;  %v13066_v61 = vrot.slane %v11032_v39, 4 }
 0xc28   :  { %3680 = vmax.xlane.f32.xlu0 %v3679_v4  ;;  %13148 = vst [vmem:[#allocation42_spill] sm:$0xff] %v11392_v11  ;;  %9212 = vrcp.f32 %v11358_v48  ;;  %v9203_v6 = vpop.eup %9202 }
 0xc29   :  { %v3658_v51 = vsel %vm756_vm3, %v11380_v52, -inf  ;;  %8443 = vmatprep.subr.msk.mxu1 %vm85_vm0, %v13066_v61  ;;  %v11418_v61 = vld [vmem:[%s13007_s1 + $0x48] sm:$0xff]  ;;  %9214 = vrcp.f32 %v11356_v2  ;;  %v3044_v5 = vmul.f32 %v9203_v6, %v11139_v22 }
 0xc2a   :  { %v11370_v36 = vpop.xlane.xlu0 %3023  ;;  %v11421_v40 = vadd.f32 %v11418_v61, %v8501_v20 }
 0xc2b   :  { %v11372_v32 = vpop.xlane.xlu1 %3020 }
 0xc2c   :  { %v3676_v20 = vsel %vm756_vm3, %v11421_v40, -inf  ;;  %9216 = vrcp.f32 %v11372_v32 }
 0xc2d   :  { %9218 = vrcp.f32 %v11370_v36 }
 0xc2e   :  { %v11382_v4 = vpop.xlane.xlu0 %3029 }
 0xc2f   :  { %v4197_v34 = vpop.permute.xlu1 %4196  ;;  %3650 = vmax.xlane.f32.xlu1 %v3649_v23  ;;  %v11406_v23 = vld [vmem:[%s13007_s1 + $0x38] sm:$0xff] }
 0xc30   :  { %13149 = vst [vmem:[#allocation43_spill] sm:$0xff] %v11406_v23  ;;  %v11409_v18 = vadd.f32 %v11406_v23, %v8498_v33 }
 0xc32   :  { %v4199_v26 = vpop.permute.xlu0 %4198  ;;  %v3670_v33 = vsel %vm756_vm3, %v11409_v18, -inf }
 0xc33   :  { %v4193_v27 = vpop.permute.xlu1 %4192  ;;  %3659 = vmax.xlane.f32.xlu1 %v3658_v51  ;;  %8569 = vmatprep.subr.msk.mxu0 %vm48_vm1, %v4199_v26  ;;  %v3664_v51 = vsel %vm756_vm3, %v11392_v11, -inf }
 0xc34   :  { %8570 = vmatpush3.xpose.msk.msra.mxu0 %vm48_vm1, %v4199_v26 }
 0xc35   :  { %8571 = vmatprep.subr.msk.mxu0 %vm48_vm1, %v4197_v34 }
 0xc36   :  { %v4195_v26 = vpop.permute.xlu0 %4194 }
 0xc37   :  { %v4189_v31 = vpop.permute.xlu1 %4188  ;;  %3665 = vmax.xlane.f32.xlu1 %v3664_v51 }
 0xc38   :  { %8572 = vmatpush3.xpose.msk.msra.mxu0 %vm48_vm1, %v4197_v34  ;;  %v11430_v34 = vld [vmem:[%s13007_s1 + $0x58] sm:$0xff] }
 0xc39   :  { %8573 = vmatprep.subr.msk.mxu0 %vm48_vm1, %v4195_v26  ;;  %13150 = vst [vmem:[#allocation44_spill] sm:$0xff] %v11430_v34  ;;  %v11433_v51 = vadd.f32 %v11430_v34, %v8504_v46 }
 0xc3a   :  { %v4191_v11 = vpop.permute.xlu0 %4190 }
 0xc3b   :  { %v4185_v23 = vpop.permute.xlu1 %4184  ;;  %3671 = vmax.xlane.f32.xlu1 %v3670_v33  ;;  %v3682_v46 = vsel %vm756_vm3, %v11433_v51, -inf }
 0xc3c   :  { %8574 = vmatpush3.xpose.msk.msra.mxu0 %vm48_vm1, %v4195_v26 }
 0xc3d   :  { %8575 = vmatprep.subr.msk.mxu0 %vm48_vm1, %v4193_v27 }
 0xc3e   :  { %3803 = vrot.lane.b32.xlu0 %v13129_v14, %s9487_s16  ;;  %v4187_v34 = vpop.permute.xlu0 %4186 }
 0xc3f   :  { %v4181_v33 = vpop.permute.xlu1 %4180  ;;  %3677 = vmax.xlane.f32.xlu1 %v3676_v20 }
 0xc40   :  { %8576 = vmatpush3.xpose.msk.msra.mxu0 %vm48_vm1, %v4193_v27 }
 0xc41   :  { %8577 = vmatprep.subr.msk.mxu0 %vm48_vm1, %v4191_v11 }
 0xc42   :  { %3799 = vrot.lane.b32.xlu0 %v9616_v28, %s9487_s16  ;;  %v4183_v27 = vpop.permute.xlu0 %4182 }
 0xc43   :  { %v4155_v26 = vpop.permute.xlu1 %4154  ;;  %3683 = vmax.xlane.f32.xlu1 %v3682_v46 }
 0xc44   :  { %8591 = vmatprep.mubr.msk.f32.mxu0 %vm48_vm1, %v4155_v26  ;;  %8578 = vmatpush3.xpose.msk.msra.mxu0 %vm48_vm1, %v4191_v11 }
 0xc45   :  { %8579 = vmatprep.subr.msk.mxu0 %vm48_vm1, %v4189_v31 }
 0xc46   :  { %3795 = vrot.lane.b32.xlu0 %v13118_v21, %s9487_s16  ;;  %v4179_v11 = vpop.permute.xlu0 %4178 }
 0xc48   :  { %8580 = vmatpush3.xpose.msk.msra.mxu0 %vm48_vm1, %v4189_v31 }
 0xc49   :  { %8581 = vmatprep.subr.msk.mxu0 %vm48_vm1, %v4187_v34 }
 0xc4a   :  { %3791 = vrot.lane.b32.xlu0 %v13119_v7, %s9487_s16  ;;  %v4157_v31 = vpop.permute.xlu0 %4156 }
 0xc4c   :  { %8582 = vmatpush3.xpose.msk.msra.mxu0 %vm48_vm1, %v4187_v34  ;;  %v4159_v34 = vpop.permute.xlu1 %4158 }
 0xc4d   :  { %8583 = vmatprep.subr.msk.mxu0 %vm48_vm1, %v4185_v23 }
 0xc4e   :  { %3787 = vrot.lane.b32.xlu0 %v13121_v49, %s9487_s16 }
 0xc50   :  { %8584 = vmatpush3.xpose.msk.msra.mxu0 %vm48_vm1, %v4185_v23  ;;  %v4161_v23 = vpop.permute.xlu0 %4160  ;;  %v4163_v20 = vpop.permute.xlu1 %4162 }
 0xc51   :  { %8585 = vmatprep.subr.msk.mxu0 %vm48_vm1, %v4183_v27 }
 0xc52   :  { %3781 = vrot.lane.b32.xlu0 %v13122_v45, %s9487_s16 }
 0xc54   :  { %3801 = vrot.lane.b32.xlu1 %v13128_v16, %s9487_s16  ;;  %8586 = vmatpush3.xpose.msk.msra.mxu0 %vm48_vm1, %v4183_v27  ;;  %v4165_v46 = vpop.permute.xlu0 %4164 }
 0xc55   :  { %8587 = vmatprep.subr.msk.mxu0 %vm48_vm1, %v4181_v33 }
 0xc58   :  { %3797 = vrot.lane.b32.xlu1 %v9618_v29, %s9487_s16  ;;  %8588 = vmatpush3.xpose.msk.msra.mxu0 %vm48_vm1, %v4181_v33  ;;  %v4167_v33 = vpop.permute.xlu1 %4166  ;;  %v4169_v26 = vpop.permute.xlu0 %4168 }
 0xc59   :  { %8589 = vmatprep.subr.msk.mxu0 %vm48_vm1, %v4179_v11 }
 0xc5c   :  { %3793 = vrot.lane.b32.xlu1 %v9610_v25, %s9487_s16  ;;  %8590 = vmatpush3.xpose.msk.msra.mxu0 %vm48_vm1, %v4179_v11  ;;  %v4171_v27 = vpop.permute.xlu1 %4170  ;;  %v4173_v11 = vpop.permute.xlu0 %4172 }
 0xc5f   :  { %8592 = vmatmul.mubr.msk.f32.vlgmr.msra.gmra.mxu0 %vm48_vm1, %v4157_v31 }
 0xc60   :  { %3789 = vrot.lane.b32.xlu1 %v13105_v53, %s9487_s16  ;;  %8594 = vmatprep.mubr.msk.f32.mxu0 %vm48_vm1, %v4159_v34 }
 0xc63   :  { %8595 = vmatmul.mubr.msk.f32.gmra.mxu0 %vm48_vm1, %v4161_v23  ;;  %v4177_v23 = vpop.permute.xlu0 %4176 }
 0xc64   :  { %3785 = vrot.lane.b32.xlu1 %v13108_v30, %s9487_s16  ;;  %8597 = vmatprep.mubr.msk.f32.mxu0 %vm48_vm1, %v4163_v20 }
 0xc67   :  { %8598 = vmatmul.mubr.msk.f32.gmra.mxu0 %vm48_vm1, %v4165_v46  ;;  %v9205_v46 = vpop.eup %9204 }
 0xc68   :  { %3783 = vrot.lane.b32.xlu1 %v13120_v44, %s9487_s16  ;;  %8600 = vmatprep.mubr.msk.f32.mxu0 %vm48_vm1, %v4167_v33  ;;  %v9207_v37 = vpop.eup %9206  ;;  %v3045_v48 = vmul.f32 %v9205_v46, %v11147_v10  ;;  %v1923_v10 = vadd.f32 %v11184_v50, %v10708_v58  ;;  %v1933_v58 = vadd.f32 %v11188_v9, %v10712_v12  ;;  %s9492_s16 = smov 104  }
 0xc69   :  { %v9209_v2 = vpop.eup %9208  ;;  %v3046_v32 = vmul.f32 %v9207_v37, %v11143_v38  ;;  %v1943_v12 = vadd.f32 %v11196_v24, %v10716_v57 }
 0xc6a   :  { %v9211_v22 = vpop.eup %9210  ;;  %v3047_v36 = vmul.f32 %v9209_v2, %v11158_v17 }
 0xc6b   :  { %8601 = vmatmul.mubr.msk.f32.gmra.mxu0 %vm48_vm1, %v4169_v26  ;;  %v9213_v33 = vpop.eup %9212 }
 0xc6c   :  { %4926 = vrot.lane.b32.xlu1 %v9749_v19, %s9491_s21  ;;  %8603 = vmatprep.mubr.msk.f32.mxu0 %vm48_vm1, %v4171_v27  ;;  %v9215_v38 = vpop.eup %9214  ;;  %v3049_v17 = vmul.f32 %v9213_v33, %v11166_v47 }
 0xc6d   :  { %v3050_v60 = vmul.f32 %v9215_v38, %v11164_v3 }
 0xc6f   :  { %8604 = vmatmul.mubr.msk.f32.gmra.mxu0 %vm48_vm1, %v4173_v11 }
 0xc83   :  { %v3027_v31 = vpop.xlane.xlu1 %3026 }
 0xc84   :  { %9220 = vrcp.f32 %v3027_v31 }
 0xc85   :  { %9222 = vrcp.f32 %v11382_v4  ;;  %v3048_v4 = vmul.f32 %v9211_v22, %v11153_v54  ;;  %v13161_v22 = vld [vmem:[#allocation25_spill] sm:$0xff] }
 0xc87   :  { %v4175_v34 = vpop.permute.xlu1 %4174 }
 0xc88   :  { %8606 = vmatprep.mubr.msk.f32.mxu0 %vm48_vm1, %v4175_v34 }
 0xc89   :  { %8607 = vmatmul.mubr.msk.f32.gmra.mxu0 %vm48_vm1, %v4177_v23  ;;  %v9217_v23 = vpop.eup %9216 }
 0xc8a   :  { %v9219_v54 = vpop.eup %9218 }
 0xc8f   :  { %v8338_v20 = vpop.f32.mrf.mxu1 }
 0xc91   :  { %v2517_v1 = vpop.f32.mrf.mxu1  ;;  %v9221_v6 = vpop.eup %9220 }
 0xc92   :  { %8356 = vmatprep.mubr.msk.f32.mxu1 %vm48_vm1, %v2517_v1  ;;  %v3051_v1 = vmul.f32 %v9217_v23, %v11174_v42  ;;  %v9223_v46 = vpop.eup %9222 }
 0xc93   :  { %8357 = vmatmul.mubr.msk.f32.gmra.mxu1 %vm48_vm1, %v8338_v20  ;;  %v3054_v57 = vmul.f32 %v9223_v46, %v11180_v56 }
 0xc94   :  { %8425 = vmatprep.mubr.msk.f32.mxu1 %vm756_vm3, %v3043_v0  ;;  %v3052_v0 = vmul.f32 %v9219_v54, %v11172_v55 }
 0xc97   :  { %8426 = vmatmul.mubr.msk.f32.vlgmr.msra.gmra.mxu1 %vm756_vm3, %v3044_v5  ;;  %v3053_v5 = vmul.f32 %v9221_v6, %v11280_v63  ;;  %v13163_v6 = vld [vmem:[#allocation42_spill] sm:$0xff] }
 0xc98   :  { %8428 = vmatprep.mubr.msk.f32.mxu1 %vm756_vm3, %v3045_v48  ;;  %8444 = vmatpush3.msk.msra.mxu1 %vm85_vm0, %v13151_v15  ;;  %v13158_v48 = vld [vmem:[#allocation23_spill] sm:$0xff] }
 0xc99   :  { %v1953_v2 = vadd.f32 %v11209_v41, %v13158_v48 }
 0xc9b   :  { %v3654_v26 = vpop.xlane.xlu0 %3653  ;;  %8429 = vmatmul.mubr.msk.f32.gmra.mxu1 %vm756_vm3, %v3046_v32 }
 0xc9c   :  { %v3686_v27 = vsub.f32 %v11292_v43, %v3654_v26  ;;  %8431 = vmatprep.mubr.msk.f32.mxu1 %vm756_vm3, %v3047_v36  ;;  %v8343_v39 = vpop.f32.mrf.mxu1  ;;  %v1963_v36 = vadd.f32 %v11223_v13, %v13161_v22 }
 0xc9d   :  { %v11521_v11 = vadd.f32 %v8343_v39, %v1923_v10 }
 0xc9e   :  { %v3699_v31 = vmul.f32 1.442695, %v3686_v27  ;;  %v11524_v34 = vpop.f32.mrf.mxu1 }
 0xc9f   :  { %13152 = vst [vmem:[#allocation45_spill] sm:$0xff] %v11521_v11  ;;  %13153 = vst [vmem:[#allocation46_spill] sm:$0xff] %v11524_v34  ;;  %8432 = vmatmul.mubr.msk.f32.gmra.mxu1 %vm756_vm3, %v3048_v4 }
 0xca0   :  { %9224 = vpow2.f32 %v3699_v31  ;;  %8434 = vmatprep.mubr.msk.f32.mxu1 %vm756_vm3, %v3049_v17 }
 0xca1   :  { %v3657_v50 = vpop.xlane.xlu0 %3656  ;;  %v8346_v43 = vpop.f32.mrf.mxu1 }
 0xca2   :  { %v11532_v20 = vadd.f32 %v8346_v43, %v1933_v58  ;;  %v3687_v39 = vsub.f32 %v11302_v8, %v3657_v50 }
 0xca3   :  { %v11535_v47 = vpop.f32.mrf.mxu1  ;;  %8435 = vmatmul.mubr.msk.f32.gmra.mxu1 %vm756_vm3, %v3050_v60 }
 0xca4   :  { %13154 = vst [vmem:[#allocation47_spill] sm:$0xff] %v11532_v20  ;;  %13155 = vst [vmem:[#allocation48_spill] sm:$0xff] %v11535_v47  ;;  %8437 = vmatprep.mubr.msk.f32.mxu1 %vm756_vm3, %v3051_v1  ;;  %v3701_v13 = vmul.f32 1.442695, %v3687_v39  ;;  %v13178_v47 = vld [vmem:[#allocation32_spill] sm:$0xff]  ;;  %v13189_v20 = vld [vmem:[#allocation29_spill] sm:$0xff] }
 0xca5   :  { %v3663_v9 = vpop.xlane.xlu0 %3662 }
 0xca6   :  { %v8349_v3 = vpop.f32.mrf.mxu1  ;;  %v3689_v31 = vsub.f32 %v11314_v62, %v3663_v9 }
 0xca7   :  { %v11543_v37 = vadd.f32 %v8349_v3, %v1943_v12  ;;  %8438 = vmatmul.mubr.msk.f32.gmra.mxu1 %vm756_vm3, %v3052_v0 }
 0xca8   :  { %v11546_v42 = vpop.f32.mrf.mxu1  ;;  %8440 = vmatprep.mubr.msk.f32.mxu1 %vm756_vm3, %v3053_v5  ;;  %v3705_v43 = vmul.f32 1.442695, %v3689_v31 }
 0xca9   :  { %13156 = vst [vmem:[#allocation49_spill] sm:$0xff] %v11543_v37  ;;  %13157 = vst [vmem:[#allocation50_spill] sm:$0xff] %v11546_v42  ;;  %v3669_v15 = vpop.xlane.xlu0 %3668 }
 0xcaa   :  { %v8352_v24 = vpop.f32.mrf.mxu1  ;;  %v3691_v60 = vsub.f32 %v11326_v59, %v3669_v15 }
 0xcab   :  { %v11552_v55 = vadd.f32 %v8352_v24, %v1953_v2  ;;  %8441 = vmatmul.mubr.msk.f32.gmra.mxu1 %vm756_vm3, %v3054_v57 }
 0xcac   :  { %v11555_v63 = vpop.f32.mrf.mxu1  ;;  %v3709_v50 = vmul.f32 1.442695, %v3691_v60 }
 0xcad   :  { %13159 = vst [vmem:[#allocation23_spill] sm:$0xff] %v11552_v55  ;;  %13160 = vst [vmem:[#allocation51_spill] sm:$0xff] %v11555_v63  ;;  %v11557_v32 = vpop.eup %9224  ;;  %v3675_v33 = vpop.xlane.xlu0 %3674  ;;  %v13186_v55 = vld [vmem:[#allocation37_spill] sm:$0xff] }
 0xcae   :  { %v3724_v10 = vsel %vm756_vm3, %v11557_v32, 0.0  ;;  %v8355_v41 = vpop.f32.mrf.mxu1 }
 0xcaf   :  { %3725 = vadd.xlane.f32.xlu1 %v3724_v10  ;;  %v11563_v26 = vadd.f32 %v8355_v41, %v1963_v36 }
 0xcb1   :  { %13162 = vst [vmem:[#allocation25_spill] sm:$0xff] %v11563_v26  ;;  %v11565_v56 = vpop.xlane.xlu0 %3680 }
 0xcb5   :  { %v11567_v27 = vpop.permute.xlu0 %3803 }
 0xcb6   :  { %8505 = vmatprep.subr.mxu1 %v11567_v27 }
 0xcb8   :  { %v3651_v4 = vpop.xlane.xlu1 %3650 }
 0xcb9   :  { %v3685_v38 = vsub.f32 %v11368_v35, %v3651_v4  ;;  %v13164_v35 = vld [vmem:[#allocation36_spill] sm:$0xff] }
 0xcba   :  { %v3693_v12 = vsub.f32 %v13164_v35, %v3675_v33 }
 0xcbb   :  { %v3697_v17 = vmul.f32 1.442695, %v3685_v38 }
 0xcbc   :  { %v3660_v23 = vpop.xlane.xlu1 %3659 }
 0xcbd   :  { %9226 = vpow2.f32 %v3697_v17  ;;  %v3688_v58 = vsub.f32 %v11380_v52, %v3660_v23  ;;  %v3713_v52 = vmul.f32 1.442695, %v3693_v12 }
 0xcbe   :  { %9228 = vpow2.f32 %v3701_v13 }
 0xcbf   :  { %v3703_v54 = vmul.f32 1.442695, %v3688_v58 }
 0xcc0   :  { %v3666_v1 = vpop.xlane.xlu1 %3665 }
 0xcc1   :  { %9230 = vpow2.f32 %v3703_v54  ;;  %v3690_v8 = vsub.f32 %v13163_v6, %v3666_v1 }
 0xcc2   :  { %9232 = vpow2.f32 %v3705_v43 }
 0xcc3   :  { %v3707_v0 = vmul.f32 1.442695, %v3690_v8 }
 0xcc4   :  { %v3672_v62 = vpop.xlane.xlu1 %3671 }
 0xcc5   :  { %9234 = vpow2.f32 %v3707_v0  ;;  %v3692_v9 = vsub.f32 %v11409_v18, %v3672_v62  ;;  %v13165_v0 = vld [vmem:[#allocation14_spill] sm:$0xff]  ;;  %v13166_v62 = vld [vmem:[#allocation13_spill] sm:$0xff] }
 0xcc6   :  { %9236 = vpow2.f32 %v3709_v50 }
 0xcc7   :  { %v3711_v46 = vmul.f32 1.442695, %v3692_v9  ;;  %v13167_v9 = vld [vmem:[#allocation15_spill] sm:$0xff] }
 0xcc8   :  { %v3678_v3 = vpop.xlane.xlu1 %3677 }
 0xcc9   :  { %9238 = vpow2.f32 %v3711_v46  ;;  %v3694_v59 = vsub.f32 %v11421_v40, %v3678_v3  ;;  %v13169_v46 = vld [vmem:[#allocation17_spill] sm:$0xff]  ;;  %v13170_v3 = vld [vmem:[#allocation16_spill] sm:$0xff] }
 0xcca   :  { %v11579_v5 = vpop.eup %9226  ;;  %9240 = vpow2.f32 %v3713_v52  ;;  %v13168_v52 = vld [vmem:[#allocation12_spill] sm:$0xff] }
 0xccb   :  { %v3715_v48 = vmul.f32 1.442695, %v3694_v59  ;;  %v3721_v2 = vsel %vm756_vm3, %v11579_v5, 0.0  ;;  %v11583_v15 = vpop.eup %9228  ;;  %v13171_v59 = vld [vmem:[#allocation19_spill] sm:$0xff] }
 0xccc   :  { %3722 = vadd.xlane.f32.xlu0 %v3721_v2  ;;  %v3684_v57 = vpop.xlane.xlu1 %3683  ;;  %v3727_v40 = vsel %vm756_vm3, %v11583_v15, 0.0  ;;  %v13173_v2 = vld [vmem:[#allocation11_spill] sm:$0xff] }
 0xccd   :  { %9242 = vpow2.f32 %v3715_v48  ;;  %v3696_v18 = vsub.f32 %v11433_v51, %v3684_v57  ;;  %v13172_v48 = vld [vmem:[#allocation18_spill] sm:$0xff]  ;;  %v13174_v57 = vld [vmem:[#allocation20_spill] sm:$0xff] }
 0xcce   :  { %v11586_v24 = vpop.eup %9230 }
 0xccf   :  { %v3719_v22 = vmul.f32 1.442695, %v3696_v18  ;;  %v3730_v36 = vsel %vm756_vm3, %v11586_v24, 0.0  ;;  %v11592_v33 = vpop.eup %9232  ;;  %v13175_v18 = vld [vmem:[#allocation21_spill] sm:$0xff] }
 0xcd0   :  { %3728 = vadd.xlane.f32.xlu0 %v3727_v40  ;;  %3731 = vadd.xlane.f32.xlu1 %v3730_v36  ;;  %v11594_v10 = vpop.permute.xlu1 %3801  ;;  %v3733_v51 = vsel %vm756_vm3, %v11592_v33, 0.0 }
 0xcd1   :  { %9244 = vpow2.f32 %v3719_v22  ;;  %v13176_v22 = vld [vmem:[#allocation38_spill] sm:$0xff] }
 0xcd2   :  { %v11596_v41 = vpop.eup %9234  ;;  %v3695_v40 = vsub.f32 %v13176_v22, %v11565_v56 }
 0xcd3   :  { %v3736_v39 = vsel %vm756_vm3, %v11596_v41, 0.0  ;;  %v11602_v4 = vpop.eup %9236 }
 0xcd4   :  { %3734 = vadd.xlane.f32.xlu1 %v3733_v51  ;;  %3737 = vadd.xlane.f32.xlu0 %v3736_v39  ;;  %v11604_v38 = vpop.permute.xlu1 %3797  ;;  %v3739_v31 = vsel %vm756_vm3, %v11602_v4, 0.0  ;;  %v3717_v36 = vmul.f32 1.442695, %v3695_v40  ;;  %v13177_v40 = vld [vmem:[#allocation31_spill] sm:$0xff] }
 0xcd6   :  { %v11606_v13 = vpop.eup %9238  ;;  %9246 = vpow2.f32 %v3717_v36 }
 0xcd7   :  { %v3742_v17 = vsel %vm756_vm3, %v11606_v13, 0.0  ;;  %v11612_v23 = vpop.eup %9240 }
 0xcd8   :  { %3740 = vadd.xlane.f32.xlu1 %v3739_v31  ;;  %3743 = vadd.xlane.f32.xlu0 %v3742_v17  ;;  %v11614_v58 = vpop.permute.xlu1 %3793  ;;  %v3745_v60 = vsel %vm756_vm3, %v11612_v23, 0.0 }
 0xcda   :  { %v11616_v43 = vpop.eup %9242 }
 0xcdb   :  { %v3748_v54 = vsel %vm756_vm3, %v11616_v43, 0.0 }
 0xcdc   :  { %3746 = vadd.xlane.f32.xlu1 %v3745_v60  ;;  %3749 = vadd.xlane.f32.xlu0 %v3748_v54  ;;  %v11622_v1 = vpop.permute.xlu1 %3789 }
 0xcde   :  { %v11624_v6 = vpop.eup %9244 }
 0xcdf   :  { %v3754_v8 = vsel %vm756_vm3, %v11624_v6, 0.0 }
 0xce0   :  { %3755 = vadd.xlane.f32.xlu0 %v3754_v8  ;;  %v11628_v50 = vpop.permute.xlu1 %3785 }
 0xce3   :  { %v11684_v60 = vpop.eup %9246 }
 0xce4   :  { %v11630_v35 = vpop.permute.xlu1 %3783  ;;  %v3751_v56 = vsel %vm756_vm3, %v11684_v60, 0.0 }
 0xce8   :  { %v4927_v12 = vpop.permute.xlu1 %4926 }
 0xce9   :  { %8671 = vmatprep.subr.msk.mxu0 %vm48_vm1, %v4927_v12 }
 0xcea   :  { %8672 = vmatpush3.xpose.msk.msra.mxu0 %vm48_vm1, %v4927_v12  ;;  %v3800_v12 = vpop.permute.xlu0 %3799 }
 0xced   :  { %4922 = vrot.lane.b32.xlu1 %v13165_v0, %s9491_s21 }
 0xcee   :  { %v11695_v36 = vpop.permute.xlu0 %3795 }
 0xcf1   :  { %4918 = vrot.lane.b32.xlu1 %v13166_v62, %s9491_s21 }
 0xcf5   :  { %4914 = vrot.lane.b32.xlu1 %v13167_v9, %s9491_s21 }
 0xcf6   :  { %4924 = vrot.lane.b32.xlu0 %v13168_v52, %s9491_s21 }
 0xcf9   :  { %4910 = vrot.lane.b32.xlu1 %v13169_v46, %s9491_s21 }
 0xcfa   :  { %4920 = vrot.lane.b32.xlu0 %v13170_v3, %s9491_s21 }
 0xcfd   :  { %4906 = vrot.lane.b32.xlu1 %v13171_v59, %s9491_s21 }
 0xcfe   :  { %4916 = vrot.lane.b32.xlu0 %v13172_v48, %s9491_s21 }
 0xd01   :  { %4880 = vrot.lane.b32.xlu1 %v13173_v2, %s9492_s16 }
 0xd02   :  { %4912 = vrot.lane.b32.xlu0 %v13174_v57, %s9491_s21 }
 0xd05   :  { %4884 = vrot.lane.b32.xlu1 %v13175_v18, %s9492_s16 }
 0xd06   :  { %4908 = vrot.lane.b32.xlu0 %v13175_v18, %s9491_s21 }
 0xd09   :  { %4888 = vrot.lane.b32.xlu1 %v13174_v57, %s9492_s16 }
 0xd0a   :  { %4904 = vrot.lane.b32.xlu0 %v13173_v2, %s9491_s21 }
 0xd0d   :  { %4892 = vrot.lane.b32.xlu1 %v13172_v48, %s9492_s16 }
 0xd0e   :  { %4882 = vrot.lane.b32.xlu0 %v13171_v59, %s9492_s16 }
 0xd11   :  { %4896 = vrot.lane.b32.xlu1 %v13170_v3, %s9492_s16 }
 0xd12   :  { %4886 = vrot.lane.b32.xlu0 %v13169_v46, %s9492_s16 }
 0xd16   :  { %4890 = vrot.lane.b32.xlu0 %v13167_v9, %s9492_s16 }
 0xd1a   :  { %4894 = vrot.lane.b32.xlu0 %v13166_v62, %s9492_s16 }
 0xd1e   :  { %4898 = vrot.lane.b32.xlu0 %v13165_v0, %s9492_s16 }
 0xd1f   :  { %v8593_v51 = vpop.f32.mrf.mxu0 }
 0xd20   :  { %v11693_v63 = vadd.f32 %v13177_v40, %v8593_v51  ;;  %v11709_v51 = vpop.permute.xlu0 %3791 }
 0xd21   :  { %v11680_v39 = vpop.f32.mrf.mxu0 }
 0xd22   :  { %4902 = vrot.lane.b32.xlu0 %v9749_v19, %s9492_s16  ;;  %v4378_v46 = vsel %vm756_vm3, %v11693_v63, -inf }
 0xd23   :  { %v11682_v31 = vpop.f32.mrf.mxu0 }
 0xd25   :  { %v4326_v17 = vpop.f32.mrf.mxu0 }
 0xd26   :  { %v11698_v34 = vadd.f32 %v13178_v47, %v4326_v17  ;;  %v13182_v17 = vld [vmem:[#allocation34_spill] sm:$0xff] }
 0xd27   :  { %v11686_v54 = vpop.f32.mrf.mxu0 }
 0xd28   :  { %13179 = vst [vmem:[#allocation42_spill] sm:$0xff] %v11698_v34  ;;  %v4381_v18 = vsel %vm756_vm3, %v11698_v34, -inf }
 0xd29   :  { %v4336_v8 = vpop.f32.mrf.mxu0 }
 0xd2b   :  { %v11690_v22 = vpop.f32.mrf.mxu0 }
 0xd2d   :  { %v4346_v42 = vpop.f32.mrf.mxu0 }
 0xd2e   :  { %v11714_v40 = vadd.f32 %v13182_v17, %v4346_v42  ;;  %v11732_v17 = vpop.f32.mrf.mxu1 }
 0xd2f   :  { %v11702_v59 = vpop.f32.mrf.mxu0  ;;  %13187 = vst [vmem:[#allocation12_spill] sm:$0xff] %v11732_v17 }
 0xd30   :  { %13183 = vst [vmem:[#allocation14_spill] sm:$0xff] %v11714_v40 }
 0xd31   :  { %v4356_v47 = vpop.f32.mrf.mxu0 }
 0xd35   :  { %3752 = vadd.xlane.f32.xlu1 %v3751_v56  ;;  %v13180_v56 = vld [vmem:[#allocation33_spill] sm:$0xff] }
 0xd36   :  { %v11705_v2 = vadd.f32 %v13180_v56, %v4336_v8  ;;  %v11720_v8 = vpop.permute.xlu0 %3787  ;;  %v13184_v56 = vld [vmem:[#allocation35_spill] sm:$0xff] }
 0xd37   :  { %v11723_v48 = vadd.f32 %v13184_v56, %v4356_v47 }
 0xd38   :  { %13181 = vst [vmem:[#allocation36_spill] sm:$0xff] %v11705_v2  ;;  %v3726_v11 = vpop.xlane.xlu1 %3725 }
 0xd39   :  { %13185 = vst [vmem:[#allocation13_spill] sm:$0xff] %v11723_v48  ;;  %v4399_v42 = vsel %vm756_vm3, %v11723_v48, -inf }
 0xd3a   :  { %v11734_v37 = vpop.permute.xlu0 %3781 }
 0xd41   :  { %4379 = vmax.xlane.f32.xlu0 %v4378_v46  ;;  %v4387_v46 = vsel %vm756_vm3, %v11705_v2, -inf }
 0xd45   :  { %4382 = vmax.xlane.f32.xlu0 %v4381_v18  ;;  %v4393_v18 = vsel %vm756_vm3, %v11714_v40, -inf }
 0xd46   :  { %4900 = vrot.lane.b32.xlu1 %v13168_v52, %s9492_s16 }
 0xd49   :  { %v11718_v57 = vpop.f32.mrf.mxu0  ;;  %4388 = vmax.xlane.f32.xlu0 %v4387_v46  ;;  %v13188_v46 = vld [vmem:[#allocation27_spill] sm:$0xff] }
 0xd4a   :  { %v1973_v47 = vadd.f32 %v13189_v20, %v13188_v46 }
 0xd4b   :  { %v4366_v26 = vpop.f32.mrf.mxu0 }
 0xd4c   :  { %v11728_v9 = vadd.f32 %v13186_v55, %v4366_v26 }
 0xd4d   :  { %4394 = vmax.xlane.f32.xlu0 %v4393_v18 }
 0xd4e   :  { %v4405_v18 = vsel %vm756_vm3, %v11728_v9, -inf }
 0xd51   :  { %4400 = vmax.xlane.f32.xlu0 %v4399_v42 }
 0xd53   :  { %v8358_v56 = vpop.f32.mrf.mxu1 }
 0xd54   :  { %v11738_v2 = vadd.f32 %v8358_v56, %v1973_v47 }
 0xd55   :  { %v3723_v55 = vpop.xlane.xlu0 %3722  ;;  %4406 = vmax.xlane.f32.xlu0 %v4405_v18  ;;  %v11742_v26 = vpop.f32.mrf.mxu1 }
 0xd56   :  { %9248 = vrcp.f32 %v3723_v55 }
 0xd57   :  { %v8427_v48 = vpop.f32.mrf.mxu1  ;;  %9250 = vrcp.f32 %v3726_v11 }
 0xd59   :  { %v3729_v40 = vpop.xlane.xlu0 %3728  ;;  %v3732_v17 = vpop.xlane.xlu1 %3731 }
 0xd5a   :  { %v3193_v34 = vpop.f32.mrf.mxu1  ;;  %9252 = vrcp.f32 %v3729_v40 }
 0xd5b   :  { %8445 = vmatprep.mubr.msk.f32.mxu1 %vm48_vm1, %v3193_v34  ;;  %9254 = vrcp.f32 %v3732_v17 }
 0xd5c   :  { %v8430_v42 = vpop.f32.mrf.mxu1  ;;  %8446 = vmatmul.mubr.msk.f32.vlgmr.msra.gmra.mxu1 %vm48_vm1, %v8427_v48  ;;  %v13190_v48 = vld [vmem:[#allocation39_spill] sm:$0xff] }
 0xd5d   :  { %8506 = vmatpush3.msra.mxu1 %v11567_v27  ;;  %v3738_v20 = vpop.xlane.xlu0 %3737  ;;  %v3735_v46 = vpop.xlane.xlu1 %3734 }
 0xd5e   :  { %8507 = vmatprep.subr.mxu1 %v11594_v10  ;;  %v3203_v47 = vpop.f32.mrf.mxu1  ;;  %9256 = vrcp.f32 %v3735_v46 }
 0xd5f   :  { %8508 = vmatpush3.msra.mxu1 %v11594_v10  ;;  %8448 = vmatprep.mubr.msk.f32.mxu1 %vm48_vm1, %v3203_v47  ;;  %v11758_v47 = vadd.f32 %v13190_v48, %v11680_v39  ;;  %v13191_v39 = vld [vmem:[#allocation40_spill] sm:$0xff]  ;;  %9258 = vrcp.f32 %v3738_v20  ;;  %v13192_v20 = vld [vmem:[#allocation41_spill] sm:$0xff] }
 0xd60   :  { %8509 = vmatprep.subr.mxu1 %v3800_v12  ;;  %v8433_v56 = vpop.f32.mrf.mxu1  ;;  %8449 = vmatmul.mubr.msk.f32.gmra.mxu1 %vm48_vm1, %v8430_v42  ;;  %v11768_v11 = vadd.f32 %v13191_v39, %v11682_v31 }
 0xd61   :  { %8510 = vmatpush3.msra.mxu1 %v3800_v12  ;;  %v3744_v34 = vpop.xlane.xlu0 %3743  ;;  %v3741_v18 = vpop.xlane.xlu1 %3740 }
 0xd62   :  { %8511 = vmatprep.subr.mxu1 %v11604_v38  ;;  %v3213_v27 = vpop.f32.mrf.mxu1  ;;  %v4384_v46 = vsel %vm756_vm3, %v11768_v11, -inf  ;;  %9260 = vrcp.f32 %v3741_v18 }
 0xd63   :  { %8512 = vmatpush3.msra.mxu1 %v11604_v38  ;;  %8451 = vmatprep.mubr.msk.f32.mxu1 %vm48_vm1, %v3213_v27  ;;  %v9249_v27 = vpop.eup %9248  ;;  %9262 = vrcp.f32 %v3744_v34 }
 0xd64   :  { %8513 = vmatprep.subr.mxu1 %v11695_v36  ;;  %v8436_v10 = vpop.f32.mrf.mxu1  ;;  %8452 = vmatmul.mubr.msk.f32.gmra.mxu1 %vm48_vm1, %v8433_v56  ;;  %v9251_v18 = vpop.eup %9250 }
 0xd65   :  { %8514 = vmatpush3.msra.mxu1 %v11695_v36  ;;  %v3750_v12 = vpop.xlane.xlu0 %3749  ;;  %v3747_v55 = vpop.xlane.xlu1 %3746 }
 0xd66   :  { %8515 = vmatprep.subr.mxu1 %v11614_v58  ;;  %v3223_v38 = vpop.f32.mrf.mxu1  ;;  %9264 = vrcp.f32 %v3747_v55 }
 0xd67   :  { %8516 = vmatpush3.msra.mxu1 %v11614_v58  ;;  %8454 = vmatprep.mubr.msk.f32.mxu1 %vm48_vm1, %v3223_v38  ;;  %v4375_v58 = vsel %vm756_vm3, %v11758_v47, -inf  ;;  %v9253_v48 = vpop.eup %9252  ;;  %v3770_v38 = vmul.f32 %v9251_v18, %v11557_v32  ;;  %9266 = vrcp.f32 %v3750_v12 }
 0xd68   :  { %8517 = vmatprep.subr.mxu1 %v11709_v51  ;;  %v8439_v42 = vpop.f32.mrf.mxu1  ;;  %8455 = vmatmul.mubr.msk.f32.gmra.mxu1 %vm48_vm1, %v8436_v10  ;;  %v11791_v10 = vadd.f32 %v13192_v20, %v11686_v54  ;;  %v3769_v54 = vmul.f32 %v9249_v27, %v11579_v5  ;;  %v3771_v32 = vmul.f32 %v9253_v48, %v11583_v15 }
 0xd69   :  { %8518 = vmatpush3.msra.mxu1 %v11709_v51  ;;  %v11771_v36 = vpop.xlane.xlu0 %3755  ;;  %v4923_v40 = vpop.permute.xlu1 %4922 }
 0xd6a   :  { %8519 = vmatprep.subr.mxu1 %v11622_v1  ;;  %v3233_v56 = vpop.f32.mrf.mxu1  ;;  %4376 = vmax.xlane.f32.xlu1 %v4375_v58  ;;  %v4390_v55 = vsel %vm756_vm3, %v11791_v10, -inf  ;;  %9268 = vrcp.f32 %v11771_v36 }
 0xd6b   :  { %8520 = vmatpush3.msra.mxu1 %v11622_v1  ;;  %8457 = vmatprep.mubr.msk.f32.mxu1 %vm48_vm1, %v3233_v56 }
 0xd6c   :  { %4529 = vrot.lane.b32.xlu0 %v13129_v14, %s9489_s19  ;;  %8521 = vmatprep.subr.mxu1 %v11720_v8  ;;  %v8442_v31 = vpop.f32.mrf.mxu1 }
 0xd6d   :  { %8458 = vmatmul.mubr.msk.f32.gmra.mxu1 %vm48_vm1, %v8439_v42  ;;  %v4925_v51 = vpop.permute.xlu0 %4924  ;;  %v11782_v17 = vpop.permute.xlu1 %4918 }
 0xd6e   :  { %8522 = vmatpush3.msra.mxu1 %v11720_v8  ;;  %v3243_v1 = vpop.f32.mrf.mxu1  ;;  %4385 = vmax.xlane.f32.xlu1 %v4384_v46 }
 0xd6f   :  { %8523 = vmatprep.subr.mxu1 %v11628_v50  ;;  %8673 = vmatprep.subr.msk.mxu0 %vm48_vm1, %v4925_v51 }
 0xd70   :  { %8524 = vmatpush3.msra.mxu1 %v11628_v50  ;;  %8460 = vmatprep.mubr.msk.f32.mxu1 %vm48_vm1, %v3243_v1  ;;  %v13193_v50 = vld [vmem:[#allocation43_spill] sm:$0xff] }
 0xd71   :  { %4525 = vrot.lane.b32.xlu0 %v9616_v28, %s9489_s19  ;;  %8525 = vmatprep.subr.mxu1 %v11630_v35  ;;  %v11798_v8 = vpop.permute.xlu1 %4914  ;;  %v11807_v34 = vadd.f32 %v13193_v50, %v11690_v22  ;;  %v9255_v22 = vpop.eup %9254 }
 0xd72   :  { %8674 = vmatpush3.xpose.msk.msra.mxu0 %vm48_vm1, %v4925_v51  ;;  %8461 = vmatmul.mubr.msk.f32.gmra.mxu1 %vm48_vm1, %v8442_v31  ;;  %v4921_v42 = vpop.permute.xlu0 %4920  ;;  %v9257_v12 = vpop.eup %9256  ;;  %v3772_v15 = vmul.f32 %v9255_v22, %v11586_v24  ;;  %v13194_v24 = vld [vmem:[#allocation44_spill] sm:$0xff] }
 0xd73   :  { %8526 = vmatpush3.msra.mxu1 %v11630_v35  ;;  %8675 = vmatprep.subr.msk.mxu0 %vm48_vm1, %v4923_v40  ;;  %v11820_v35 = vld [vmem:[%s13008_s4 + $0x10] sm:$0xff]  ;;  %v4396_v39 = vsel %vm756_vm3, %v11807_v34, -inf  ;;  %v9259_v58 = vpop.eup %9258  ;;  %v11849_v56 = vadd.f32 %v13194_v24, %v11718_v57 }
 0xd74   :  { %8529 = vmatprep.mubr.msk.f32.mxu1 %vm756_vm3, %v3769_v54  ;;  %8527 = vmatprep.subr.mxu1 %v11734_v37  ;;  %v3774_v46 = vmul.f32 %v9259_v58, %v11596_v41 }
 0xd75   :  { %4391 = vmax.xlane.f32.xlu1 %v4390_v55  ;;  %8528 = vmatpush3.msra.mxu1 %v11734_v37  ;;  %v11815_v5 = vpop.permute.xlu1 %4910  ;;  %v11830_v37 = vadd.f32 %v11418_v61, %v11702_v59  ;;  %v3773_v61 = vmul.f32 %v9257_v12, %v11592_v33  ;;  %v9261_v59 = vpop.eup %9260  ;;  %v4408_v41 = vsel %vm756_vm3, %v11849_v56, -inf }
 0xd76   :  { %4521 = vrot.lane.b32.xlu0 %v13118_v21, %s9489_s19  ;;  %8676 = vmatpush3.xpose.msk.msra.mxu0 %vm48_vm1, %v4923_v40  ;;  %v4917_v31 = vpop.permute.xlu0 %4916  ;;  %v9263_v1 = vpop.eup %9262  ;;  %v3775_v57 = vmul.f32 %v9261_v59, %v11602_v4 }
 0xd77   :  { %8530 = vmatmul.mubr.msk.f32.vlgmr.msra.gmra.mxu1 %vm756_vm3, %v3770_v38  ;;  %8677 = vmatprep.subr.msk.mxu0 %vm48_vm1, %v4921_v42  ;;  %v4402_v51 = vsel %vm756_vm3, %v11830_v37, -inf  ;;  %v9265_v27 = vpop.eup %9264  ;;  %v3776_v20 = vmul.f32 %v9263_v1, %v11606_v13 }
 0xd78   :  { %8532 = vmatprep.mubr.msk.f32.mxu1 %vm756_vm3, %v3771_v32  ;;  %8547 = vmatprep.subr.msk.mxu1 %vm85_vm0, %v11820_v35  ;;  %v9267_v18 = vpop.eup %9266  ;;  %v3777_v4 = vmul.f32 %v9265_v27, %v11612_v23 }
 0xd79   :  { %4397 = vmax.xlane.f32.xlu1 %v4396_v39  ;;  %v4907_v40 = vpop.permute.xlu1 %4906  ;;  %8548 = vmatpush3.msk.msra.mxu1 %vm85_vm0, %v11820_v35 }
 0xd7a   :  { %4517 = vrot.lane.b32.xlu0 %v13119_v7, %s9489_s19  ;;  %8678 = vmatpush3.xpose.msk.msra.mxu0 %vm48_vm1, %v4921_v42  ;;  %v4913_v54 = vpop.permute.xlu0 %4912 }
 0xd7b   :  { %8533 = vmatmul.mubr.msk.f32.gmra.mxu1 %vm756_vm3, %v3772_v15  ;;  %8679 = vmatprep.subr.msk.mxu0 %vm48_vm1, %v11782_v17 }
 0xd7c   :  { %8535 = vmatprep.mubr.msk.f32.mxu1 %vm756_vm3, %v3773_v61 }
 0xd7d   :  { %4403 = vmax.xlane.f32.xlu1 %v4402_v51  ;;  %v4881_v33 = vpop.permute.xlu1 %4880 }
 0xd7e   :  { %4513 = vrot.lane.b32.xlu0 %v13121_v49, %s9489_s19  ;;  %8680 = vmatpush3.xpose.msk.msra.mxu0 %vm48_vm1, %v11782_v17  ;;  %v3778_v17 = vmul.f32 %v9267_v18, %v11616_v43  ;;  %v4909_v13 = vpop.permute.xlu0 %4908 }
 0xd7f   :  { %8536 = vmatmul.mubr.msk.f32.gmra.mxu1 %vm756_vm3, %v3774_v46  ;;  %8681 = vmatprep.subr.msk.mxu0 %vm48_vm1, %v4917_v31 }
 0xd80   :  { %8538 = vmatprep.mubr.msk.f32.mxu1 %vm756_vm3, %v3775_v57  ;;  %8695 = vmatprep.mubr.msk.f32.mxu0 %vm48_vm1, %v4881_v33 }
 0xd81   :  { %4409 = vmax.xlane.f32.xlu1 %v4408_v41 }
 0xd82   :  { %4507 = vrot.lane.b32.xlu0 %v13122_v45, %s9489_s19  ;;  %8682 = vmatpush3.xpose.msk.msra.mxu0 %vm48_vm1, %v4917_v31  ;;  %v4905_v23 = vpop.permute.xlu0 %4904  ;;  %v13211_v45 = vld [vmem:[#allocation25_spill] sm:$0xff] }
 0xd83   :  { %8539 = vmatmul.mubr.msk.f32.gmra.mxu1 %vm756_vm3, %v3776_v20  ;;  %8683 = vmatprep.subr.msk.mxu0 %vm48_vm1, %v11798_v8 }
 0xd84   :  { %8541 = vmatprep.mubr.msk.f32.mxu1 %vm756_vm3, %v3777_v4 }
 0xd86   :  { %5650 = vrot.lane.b32.xlu0 %v13168_v52, %s9493_s23  ;;  %8684 = vmatpush3.xpose.msk.msra.mxu0 %vm48_vm1, %v11798_v8  ;;  %v4883_v43 = vpop.permute.xlu0 %4882  ;;  %v4885_v8 = vpop.permute.xlu1 %4884 }
 0xd87   :  { %8542 = vmatmul.mubr.msk.f32.gmra.mxu1 %vm756_vm3, %v3778_v17  ;;  %8685 = vmatprep.subr.msk.mxu0 %vm48_vm1, %v4913_v54 }
 0xd8a   :  { %5646 = vrot.lane.b32.xlu0 %v13170_v3, %s9493_s23  ;;  %8686 = vmatpush3.xpose.msk.msra.mxu0 %vm48_vm1, %v4913_v54  ;;  %v4887_v48 = vpop.permute.xlu0 %4886  ;;  %v4889_v50 = vpop.permute.xlu1 %4888  ;;  %v13196_v54 = vld [vmem:[#allocation36_spill] sm:$0xff] }
 0xd8b   :  { %8687 = vmatprep.subr.msk.mxu0 %vm48_vm1, %v11815_v5 }
 0xd8e   :  { %8688 = vmatpush3.xpose.msk.msra.mxu0 %vm48_vm1, %v11815_v5  ;;  %v4891_v55 = vpop.permute.xlu0 %4890  ;;  %v4893_v38 = vpop.permute.xlu1 %4892 }
 0xd8f   :  { %8689 = vmatprep.subr.msk.mxu0 %vm48_vm1, %v4909_v13 }
 0xd92   :  { %4527 = vrot.lane.b32.xlu1 %v13128_v16, %s9489_s19  ;;  %8690 = vmatpush3.xpose.msk.msra.mxu0 %vm48_vm1, %v4909_v13  ;;  %v4895_v5 = vpop.permute.xlu0 %4894  ;;  %v4897_v22 = vpop.permute.xlu1 %4896 }
 0xd93   :  { %8691 = vmatprep.subr.msk.mxu0 %vm48_vm1, %v4907_v40 }
 0xd96   :  { %4523 = vrot.lane.b32.xlu1 %v9618_v29, %s9489_s19  ;;  %8692 = vmatpush3.xpose.msk.msra.mxu0 %vm48_vm1, %v4907_v40  ;;  %v4899_v42 = vpop.permute.xlu0 %4898  ;;  %v9269_v40 = vpop.eup %9268 }
 0xd97   :  { %8693 = vmatprep.subr.msk.mxu0 %vm48_vm1, %v4905_v23  ;;  %v3780_v51 = vmul.f32 %v9269_v40, %v11624_v6  ;;  %v13195_v6 = vld [vmem:[#allocation42_spill] sm:$0xff] }
 0xd9a   :  { %4519 = vrot.lane.b32.xlu1 %v9610_v25, %s9489_s19  ;;  %8694 = vmatpush3.xpose.msk.msra.mxu0 %vm48_vm1, %v4905_v23  ;;  %v4903_v39 = vpop.permute.xlu0 %4902 }
 0xd9d   :  { %8696 = vmatmul.mubr.msk.f32.vlgmr.msra.gmra.mxu0 %vm48_vm1, %v4883_v43 }
 0xd9e   :  { %4515 = vrot.lane.b32.xlu1 %v13105_v53, %s9489_s19  ;;  %8698 = vmatprep.mubr.msk.f32.mxu0 %vm48_vm1, %v4885_v8  ;;  %v13197_v8 = vld [vmem:[#allocation14_spill] sm:$0xff] }
 0xda1   :  { %8699 = vmatmul.mubr.msk.f32.gmra.mxu0 %vm48_vm1, %v4887_v48 }
 0xda2   :  { %4511 = vrot.lane.b32.xlu1 %v13108_v30, %s9489_s19  ;;  %8701 = vmatprep.mubr.msk.f32.mxu0 %vm48_vm1, %v4889_v50 }
 0xda5   :  { %8702 = vmatmul.mubr.msk.f32.gmra.mxu0 %vm48_vm1, %v4891_v55 }
 0xda6   :  { %4509 = vrot.lane.b32.xlu1 %v13120_v44, %s9489_s19  ;;  %8704 = vmatprep.mubr.msk.f32.mxu0 %vm48_vm1, %v4893_v38  ;;  %v13198_v38 = vld [vmem:[#allocation13_spill] sm:$0xff]  ;;  %s9494_s19 = smov 100  }
 0xda9   :  { %8705 = vmatmul.mubr.msk.f32.gmra.mxu0 %vm48_vm1, %v4895_v5 }
 0xdaa   :  { %5652 = vrot.lane.b32.xlu1 %v9749_v19, %s9493_s23  ;;  %8707 = vmatprep.mubr.msk.f32.mxu0 %vm48_vm1, %v4897_v22 }
 0xdad   :  { %8708 = vmatmul.mubr.msk.f32.gmra.mxu0 %vm48_vm1, %v4899_v42 }
 0xdae   :  { %5648 = vrot.lane.b32.xlu1 %v13165_v0, %s9493_s23 }
 0xdb2   :  { %5644 = vrot.lane.b32.xlu1 %v13166_v62, %s9493_s23 }
 0xdbe   :  { %v3753_v32 = vpop.xlane.xlu1 %3752 }
 0xdbf   :  { %9270 = vrcp.f32 %v3753_v32 }
 0xdc2   :  { %v4901_v12 = vpop.permute.xlu1 %4900 }
 0xdc3   :  { %8710 = vmatprep.mubr.msk.f32.mxu0 %vm48_vm1, %v4901_v12 }
 0xdc4   :  { %8711 = vmatmul.mubr.msk.f32.gmra.mxu0 %vm48_vm1, %v4903_v39 }
 0xdca   :  { %v4380_v15 = vpop.xlane.xlu0 %4379 }
 0xdcb   :  { %v4412_v58 = vsub.f32 %v11693_v63, %v4380_v15 }
 0xdcc   :  { %v9271_v61 = vpop.eup %9270 }
 0xdcd   :  { %v4425_v59 = vmul.f32 1.442695, %v4412_v58  ;;  %v3779_v24 = vmul.f32 %v9271_v61, %v11684_v60 }
 0xdce   :  { %v4383_v31 = vpop.xlane.xlu0 %4382 }
 0xdcf   :  { %9272 = vpow2.f32 %v4425_v59  ;;  %8544 = vmatprep.mubr.msk.f32.mxu1 %vm756_vm3, %v3779_v24  ;;  %v4413_v27 = vsub.f32 %v13195_v6, %v4383_v31 }
 0xdd0   :  { %8545 = vmatmul.mubr.msk.f32.gmra.mxu1 %vm756_vm3, %v3780_v51 }
 0xdd1   :  { %v4427_v18 = vmul.f32 1.442695, %v4413_v27 }
 0xdd2   :  { %v4389_v36 = vpop.xlane.xlu0 %4388 }
 0xdd3   :  { %v4415_v4 = vsub.f32 %v13196_v54, %v4389_v36 }
 0xdd5   :  { %v4431_v43 = vmul.f32 1.442695, %v4415_v4 }
 0xdd6   :  { %v4395_v46 = vpop.xlane.xlu0 %4394 }
 0xdd7   :  { %v4417_v48 = vsub.f32 %v13197_v8, %v4395_v46 }
 0xdd9   :  { %v4435_v55 = vmul.f32 1.442695, %v4417_v48 }
 0xdda   :  { %v4401_v33 = vpop.xlane.xlu0 %4400 }
 0xddb   :  { %v4419_v5 = vsub.f32 %v13198_v38, %v4401_v33 }
 0xddc   :  { %v11930_v1 = vpop.eup %9272 }
 0xddd   :  { %v4450_v63 = vsel %vm756_vm3, %v11930_v1, 0.0  ;;  %v4439_v32 = vmul.f32 1.442695, %v4419_v5 }
 0xdde   :  { %4451 = vadd.xlane.f32.xlu1 %v4450_v63  ;;  %v11934_v57 = vpop.xlane.xlu0 %4406 }
 0xde2   :  { %v11936_v60 = vpop.permute.xlu0 %4529 }
 0xde3   :  { %8609 = vmatprep.subr.mxu1 %v11936_v60 }
 0xde6   :  { %v11956_v24 = vpop.permute.xlu0 %4525 }
 0xdf3   :  { %v4377_v41 = vpop.xlane.xlu1 %4376 }
 0xdf4   :  { %v4411_v20 = vsub.f32 %v11758_v47, %v4377_v41  ;;  %v11971_v41 = vpop.permute.xlu0 %4521 }
 0xdf6   :  { %v4423_v17 = vmul.f32 1.442695, %v4411_v20 }
 0xdf7   :  { %v4386_v13 = vpop.xlane.xlu1 %4385 }
 0xdf8   :  { %9274 = vpow2.f32 %v4423_v17  ;;  %v4414_v23 = vsub.f32 %v11768_v11, %v4386_v13  ;;  %v11985_v13 = vpop.permute.xlu0 %4517 }
 0xdf9   :  { %9276 = vpow2.f32 %v4427_v18 }
 0xdfa   :  { %v4429_v50 = vmul.f32 1.442695, %v4414_v23 }
 0xdfc   :  { %9278 = vpow2.f32 %v4429_v50  ;;  %v11999_v38 = vpop.permute.xlu0 %4513 }
 0xdfd   :  { %9280 = vpow2.f32 %v4431_v43 }
 0xdfe   :  { %v4392_v22 = vpop.xlane.xlu1 %4391  ;;  %9282 = vpow2.f32 %v4435_v55 }
 0xdff   :  { %v4416_v47 = vsub.f32 %v11791_v10, %v4392_v22 }
 0xe01   :  { %v4433_v42 = vmul.f32 1.442695, %v4416_v47 }
 0xe02   :  { %v4398_v12 = vpop.xlane.xlu1 %4397 }
 0xe03   :  { %9284 = vpow2.f32 %v4433_v42  ;;  %v4418_v11 = vsub.f32 %v11807_v34, %v4398_v12  ;;  %v13199_v42 = vld [vmem:[#allocation45_spill] sm:$0xff] }
 0xe04   :  { %9286 = vpow2.f32 %v4439_v32 }
 0xe05   :  { %v11947_v39 = vpop.eup %9274  ;;  %v4437_v15 = vmul.f32 1.442695, %v4418_v11 }
 0xe06   :  { %v4404_v40 = vpop.xlane.xlu1 %4403  ;;  %v4447_v58 = vsel %vm756_vm3, %v11947_v39, 0.0  ;;  %v11951_v61 = vpop.eup %9276 }
 0xe07   :  { %9288 = vpow2.f32 %v4437_v15  ;;  %v4420_v10 = vsub.f32 %v11830_v37, %v4404_v40  ;;  %4448 = vadd.xlane.f32.xlu0 %v4447_v58  ;;  %v4453_v51 = vsel %vm756_vm3, %v11951_v61, 0.0  ;;  %v12012_v40 = vpop.permute.xlu0 %4507  ;;  %v13200_v58 = vld [vmem:[#allocation47_spill] sm:$0xff] }
 0xe09   :  { %v11954_v59 = vpop.eup %9278  ;;  %v4441_v31 = vmul.f32 1.442695, %v4420_v10 }
 0xe0a   :  { %v4410_v34 = vpop.xlane.xlu1 %4409  ;;  %v4456_v36 = vsel %vm756_vm3, %v11954_v59, 0.0  ;;  %v11962_v46 = vpop.eup %9280 }
 0xe0b   :  { %9290 = vpow2.f32 %v4441_v31  ;;  %v4422_v33 = vsub.f32 %v11849_v56, %v4410_v34  ;;  %4454 = vadd.xlane.f32.xlu0 %v4453_v51  ;;  %4457 = vadd.xlane.f32.xlu1 %v4456_v36  ;;  %v4459_v6 = vsel %vm756_vm3, %v11962_v46, 0.0  ;;  %v11969_v27 = vpop.eup %9282  ;;  %v13201_v36 = vld [vmem:[#allocation49_spill] sm:$0xff] }
 0xe0c   :  { %v4465_v54 = vsel %vm756_vm3, %v11969_v27, 0.0 }
 0xe0d   :  { %v4445_v37 = vmul.f32 1.442695, %v4422_v33 }
 0xe0e   :  { %v11965_v63 = vpop.permute.xlu1 %4527 }
 0xe0f   :  { %9292 = vpow2.f32 %v4445_v37  ;;  %4460 = vadd.xlane.f32.xlu1 %v4459_v6 }
 0xe10   :  { %v11973_v20 = vpop.eup %9284 }
 0xe11   :  { %v4462_v18 = vsel %vm756_vm3, %v11973_v20, 0.0  ;;  %v11981_v4 = vpop.eup %9286 }
 0xe12   :  { %4463 = vadd.xlane.f32.xlu0 %v4462_v18  ;;  %v11977_v56 = vpop.permute.xlu1 %4523  ;;  %v4471_v8 = vsel %vm756_vm3, %v11981_v4, 0.0  ;;  %v5651_v18 = vpop.permute.xlu0 %5650 }
 0xe13   :  { %4466 = vadd.xlane.f32.xlu1 %v4465_v54 }
 0xe14   :  { %v11983_v17 = vpop.eup %9288 }
 0xe15   :  { %v4468_v23 = vsel %vm756_vm3, %v11983_v17, 0.0 }
 0xe16   :  { %4469 = vadd.xlane.f32.xlu0 %v4468_v23  ;;  %v11989_v43 = vpop.permute.xlu1 %4519  ;;  %v13204_v23 = vld [vmem:[#allocation15_spill] sm:$0xff] }
 0xe17   :  { %4472 = vadd.xlane.f32.xlu1 %v4471_v8  ;;  %v13205_v8 = vld [vmem:[#allocation23_spill] sm:$0xff] }
 0xe18   :  { %v11993_v48 = vpop.eup %9290 }
 0xe19   :  { %v4474_v50 = vsel %vm756_vm3, %v11993_v48, 0.0 }
 0xe1a   :  { %4475 = vadd.xlane.f32.xlu0 %v4474_v50  ;;  %v11997_v55 = vpop.permute.xlu1 %4515 }
 0xe1c   :  { %v12001_v5 = vpop.eup %9292  ;;  %v8447_v22 = vpop.f32.mrf.mxu1 }
 0xe1d   :  { %v4480_v47 = vsel %vm756_vm3, %v12001_v5, 0.0  ;;  %v12006_v32 = vadd.f32 %v8447_v22, %v13199_v42  ;;  %v13209_v42 = vld [vmem:[#allocation9_spill] sm:$0xff] }
 0xe1e   :  { %4481 = vadd.xlane.f32.xlu0 %v4480_v47  ;;  %v12008_v12 = vpop.permute.xlu1 %4511  ;;  %v12010_v11 = vpop.f32.mrf.mxu1  ;;  %v13208_v47 = vld [vmem:[#allocation26_spill] sm:$0xff] }
 0xe20   :  { %v8450_v15 = vpop.f32.mrf.mxu1 }
 0xe21   :  { %v12015_v10 = vadd.f32 %v8450_v15, %v13200_v58  ;;  %v1958_v15 = vadd.f32 %v13209_v42, %v13208_v47 }
 0xe22   :  { %v12017_v31 = vpop.permute.xlu1 %4509  ;;  %v12019_v34 = vpop.f32.mrf.mxu1 }
 0xe24   :  { %v8453_v51 = vpop.f32.mrf.mxu1 }
 0xe25   :  { %v12022_v33 = vadd.f32 %v8453_v51, %v13201_v36  ;;  %v13210_v36 = vld [vmem:[#allocation12_spill] sm:$0xff] }
 0xe26   :  { %v5653_v37 = vpop.permute.xlu1 %5652  ;;  %v12024_v6 = vpop.f32.mrf.mxu1 }
 0xe27   :  { %13202 = vst [vmem:[#allocation16_spill] sm:$0xff] %v12022_v33  ;;  %13203 = vst [vmem:[#allocation38_spill] sm:$0xff] %v12024_v6  ;;  %8775 = vmatprep.subr.msk.mxu0 %vm48_vm1, %v5653_v37  ;;  %v5647_v6 = vpop.permute.xlu0 %5646 }
 0xe28   :  { %8776 = vmatpush3.xpose.msk.msra.mxu0 %vm48_vm1, %v5653_v37  ;;  %v8456_v54 = vpop.f32.mrf.mxu1  ;;  %5640 = vrot.lane.b32.xlu1 %v13204_v23, %s9493_s23  ;;  %v2698_v37 = vadd.f32 %v13210_v36, %v1958_v15 }
 0xe29   :  { %8777 = vmatprep.subr.msk.mxu0 %vm48_vm1, %v5651_v18  ;;  %v12032_v50 = vadd.f32 %v8456_v54, %v13205_v8  ;;  %v13212_v8 = vld [vmem:[#allocation28_spill] sm:$0xff] }
 0xe2a   :  { %v12034_v22 = vpop.f32.mrf.mxu1  ;;  %v5649_v58 = vpop.permute.xlu1 %5648 }
 0xe2b   :  { %13206 = vst [vmem:[#allocation31_spill] sm:$0xff] %v12032_v50  ;;  %13207 = vst [vmem:[#allocation32_spill] sm:$0xff] %v12034_v22  ;;  %v13213_v50 = vld [vmem:[#allocation30_spill] sm:$0xff] }
 0xe2c   :  { %8778 = vmatpush3.xpose.msk.msra.mxu0 %vm48_vm1, %v5651_v18  ;;  %v1968_v47 = vadd.f32 %v13213_v50, %v13212_v8  ;;  %v13217_v8 = vld [vmem:[#allocation11_spill] sm:$0xff] }
 0xe2d   :  { %8779 = vmatprep.subr.msk.mxu0 %vm48_vm1, %v5649_v58  ;;  %v8459_v51 = vpop.f32.mrf.mxu1 }
 0xe2e   :  { %v12042_v44 = vadd.f32 %v8459_v51, %v13211_v45  ;;  %v2700_v42 = vadd.f32 %v11742_v26, %v1968_v47  ;;  %v4421_v45 = vsub.f32 %v11728_v9, %v11934_v57  ;;  %v5645_v15 = vpop.permute.xlu1 %5644  ;;  %v13214_v51 = vld [vmem:[#allocation18_spill] sm:$0xff]  ;;  %v13215_v26 = vld [vmem:[#allocation20_spill] sm:$0xff]  ;;  %v13216_v57 = vld [vmem:[#allocation21_spill] sm:$0xff] }
 0xe2f   :  { %v3397_v33 = vpop.f32.mrf.mxu1 }
 0xe30   :  { %8780 = vmatpush3.xpose.msk.msra.mxu0 %vm48_vm1, %v5649_v58  ;;  %v12045_v54 = vadd.f32 %v3397_v33, %v2698_v37  ;;  %v4443_v36 = vmul.f32 1.442695, %v4421_v45 }
 0xe31   :  { %8781 = vmatprep.subr.msk.mxu0 %vm48_vm1, %v5647_v6 }
 0xe32   :  { %v8462_v18 = vpop.f32.mrf.mxu1  ;;  %9294 = vpow2.f32 %v4443_v36 }
 0xe33   :  { %v12052_v22 = vadd.f32 %v8462_v18, %v11738_v2 }
 0xe34   :  { %5642 = vrot.lane.b32.xlu0 %v13214_v51, %s9493_s23  ;;  %8782 = vmatpush3.xpose.msk.msra.mxu0 %vm48_vm1, %v5647_v6  ;;  %v3407_v33 = vpop.f32.mrf.mxu1 }
 0xe35   :  { %v12059_v58 = vadd.f32 %v3407_v33, %v2700_v42  ;;  %8783 = vmatprep.subr.msk.mxu0 %vm48_vm1, %v5645_v15 }
 0xe37   :  { %v8531_v50 = vpop.f32.mrf.mxu1 }
 0xe38   :  { %5638 = vrot.lane.b32.xlu0 %v13215_v26, %s9493_s23  ;;  %8784 = vmatpush3.xpose.msk.msra.mxu0 %vm48_vm1, %v5645_v15 }
 0xe39   :  { %v3919_v2 = vpop.f32.mrf.mxu1 }
 0xe3a   :  { %8549 = vmatprep.mubr.msk.f32.mxu1 %vm48_vm1, %v3919_v2 }
 0xe3b   :  { %v8534_v9 = vpop.f32.mrf.mxu1  ;;  %8550 = vmatmul.mubr.msk.f32.vlgmr.msra.gmra.mxu1 %vm48_vm1, %v8531_v50 }
 0xe3c   :  { %8610 = vmatpush3.msra.mxu1 %v11936_v60  ;;  %5634 = vrot.lane.b32.xlu0 %v13216_v57, %s9493_s23 }
 0xe3d   :  { %8611 = vmatprep.subr.mxu1 %v11965_v63  ;;  %v3929_v6 = vpop.f32.mrf.mxu1 }
 0xe3e   :  { %8612 = vmatpush3.msra.mxu1 %v11965_v63  ;;  %8552 = vmatprep.mubr.msk.f32.mxu1 %vm48_vm1, %v3929_v6 }
 0xe3f   :  { %8613 = vmatprep.subr.mxu1 %v11956_v24  ;;  %v8537_v37 = vpop.f32.mrf.mxu1  ;;  %8553 = vmatmul.mubr.msk.f32.gmra.mxu1 %vm48_vm1, %v8534_v9  ;;  %v12094_v18 = vpop.eup %9294 }
 0xe40   :  { %8614 = vmatpush3.msra.mxu1 %v11956_v24  ;;  %5630 = vrot.lane.b32.xlu0 %v13217_v8, %s9493_s23  ;;  %v13218_v24 = vld [vmem:[#allocation19_spill] sm:$0xff] }
 0xe41   :  { %8615 = vmatprep.subr.mxu1 %v11977_v56  ;;  %v3939_v60 = vpop.f32.mrf.mxu1 }
 0xe42   :  { %8616 = vmatpush3.msra.mxu1 %v11977_v56  ;;  %8555 = vmatprep.mubr.msk.f32.mxu1 %vm48_vm1, %v3939_v60 }
 0xe43   :  { %8617 = vmatprep.subr.mxu1 %v11971_v41  ;;  %v8540_v63 = vpop.f32.mrf.mxu1  ;;  %8556 = vmatmul.mubr.msk.f32.gmra.mxu1 %vm48_vm1, %v8537_v37 }
 0xe44   :  { %8618 = vmatpush3.msra.mxu1 %v11971_v41  ;;  %5608 = vrot.lane.b32.xlu0 %v13218_v24, %s9494_s19  ;;  %v13219_v41 = vld [vmem:[#allocation17_spill] sm:$0xff] }
 0xe45   :  { %8619 = vmatprep.subr.mxu1 %v11989_v43  ;;  %v3949_v47 = vpop.f32.mrf.mxu1 }
 0xe46   :  { %8620 = vmatpush3.msra.mxu1 %v11989_v43  ;;  %8558 = vmatprep.mubr.msk.f32.mxu1 %vm48_vm1, %v3949_v47 }
 0xe47   :  { %8621 = vmatprep.subr.mxu1 %v11985_v13  ;;  %v8543_v56 = vpop.f32.mrf.mxu1  ;;  %8559 = vmatmul.mubr.msk.f32.gmra.mxu1 %vm48_vm1, %v8540_v63 }
 0xe48   :  { %8622 = vmatpush3.msra.mxu1 %v11985_v13  ;;  %5612 = vrot.lane.b32.xlu0 %v13219_v41, %s9494_s19  ;;  %v4477_v13 = vsel %vm756_vm3, %v12094_v18, 0.0 }
 0xe49   :  { %8623 = vmatprep.subr.mxu1 %v11997_v55  ;;  %v3959_v42 = vpop.f32.mrf.mxu1 }
 0xe4a   :  { %8624 = vmatpush3.msra.mxu1 %v11997_v55  ;;  %8561 = vmatprep.mubr.msk.f32.mxu1 %vm48_vm1, %v3959_v42 }
 0xe4b   :  { %8625 = vmatprep.subr.mxu1 %v11999_v38  ;;  %8562 = vmatmul.mubr.msk.f32.gmra.mxu1 %vm48_vm1, %v8543_v56 }
 0xe4c   :  { %8626 = vmatpush3.msra.mxu1 %v11999_v38  ;;  %5616 = vrot.lane.b32.xlu0 %v13204_v23, %s9494_s19  ;;  %v12147_v23 = vld [vmem:[%s13007_s1 + $0x10] sm:$0xff] }
 0xe4d   :  { %8627 = vmatprep.subr.mxu1 %v12008_v12  ;;  %4478 = vadd.xlane.f32.xlu1 %v4477_v13 }
 0xe4e   :  { %8628 = vmatpush3.msra.mxu1 %v12008_v12  ;;  %v12135_v12 = vld [vmem:[%s13007_s1 + $0x8] sm:$0xff] }
 0xe4f   :  { %8629 = vmatprep.subr.mxu1 %v12017_v31 }
 0xe50   :  { %8630 = vmatpush3.msra.mxu1 %v12017_v31  ;;  %5620 = vrot.lane.b32.xlu0 %v13166_v62, %s9494_s19 }
 0xe51   :  { %8631 = vmatprep.subr.mxu1 %v12012_v40 }
 0xe52   :  { %8632 = vmatpush3.msra.mxu1 %v12012_v40 }
 0xe54   :  { %5624 = vrot.lane.b32.xlu0 %v13165_v0, %s9494_s19 }
 0xe58   :  { %5628 = vrot.lane.b32.xlu0 %v9749_v19, %s9494_s19 }
 0xe5d   :  { %v8697_v43 = vpop.f32.mrf.mxu0 }
 0xe5e   :  { %5636 = vrot.lane.b32.xlu1 %v13219_v41, %s9493_s23  ;;  %v12138_v40 = vadd.f32 %v12135_v12, %v8697_v43 }
 0xe5f   :  { %v5042_v55 = vpop.f32.mrf.mxu0 }
 0xe60   :  { %v5104_v15 = vsel %vm756_vm3, %v12138_v40, -inf }
 0xe61   :  { %v12122_v38 = vpop.f32.mrf.mxu0 }
 0xe62   :  { %5632 = vrot.lane.b32.xlu1 %v13218_v24, %s9493_s23  ;;  %v12197_v24 = vld [vmem:[%s13007_s1 + $0x50] sm:$0xff] }
 0xe63   :  { %v5052_v62 = vpop.f32.mrf.mxu0 }
 0xe64   :  { %v12150_v45 = vadd.f32 %v12147_v23, %v5052_v62 }
 0xe65   :  { %v12128_v0 = vpop.f32.mrf.mxu0 }
 0xe66   :  { %5606 = vrot.lane.b32.xlu1 %v13217_v8, %s9494_s19  ;;  %v5107_v36 = vsel %vm756_vm3, %v12150_v45, -inf }
 0xe67   :  { %v5062_v19 = vpop.f32.mrf.mxu0  ;;  %v4452_v41 = vpop.xlane.xlu1 %4451 }
 0xe68   :  { %9296 = vrcp.f32 %v4452_v41 }
 0xe69   :  { %v12142_v31 = vpop.f32.mrf.mxu0 }
 0xe6a   :  { %5610 = vrot.lane.b32.xlu1 %v13216_v57, %s9494_s19 }
 0xe6b   :  { %v5072_v33 = vpop.f32.mrf.mxu0 }
 0xe6e   :  { %5614 = vrot.lane.b32.xlu1 %v13215_v26, %s9494_s19  ;;  %v12168_v26 = vpop.f32.mrf.mxu0 }
 0xe70   :  { %v5082_v57 = vpop.f32.mrf.mxu0 }
 0xe72   :  { %5618 = vrot.lane.b32.xlu1 %v13214_v51, %s9494_s19  ;;  %v12159_v51 = vld [vmem:[%s13007_s1 + $0x20] sm:$0xff] }
 0xe73   :  { %v12162_v50 = vadd.f32 %v12159_v51, %v5062_v19 }
 0xe75   :  { %v5113_v9 = vsel %vm756_vm3, %v12162_v50, -inf }
 0xe76   :  { %5622 = vrot.lane.b32.xlu1 %v13170_v3, %s9494_s19  ;;  %v12173_v3 = vld [vmem:[%s13007_s1 + $0x30] sm:$0xff] }
 0xe77   :  { %5105 = vmax.xlane.f32.xlu0 %v5104_v15  ;;  %v12176_v2 = vadd.f32 %v12173_v3, %v5072_v33  ;;  %v4704_v33 = vrot.slane %v11820_v35, 4 }
 0xe79   :  { %v5119_v37 = vsel %vm756_vm3, %v12176_v2, -inf  ;;  %8651 = vmatprep.subr.msk.mxu1 %vm85_vm0, %v4704_v33 }
 0xe7a   :  { %5626 = vrot.lane.b32.xlu1 %v13168_v52, %s9494_s19  ;;  %v12183_v52 = vld [vmem:[%s13007_s1 + $0x40] sm:$0xff] }
 0xe7b   :  { %5108 = vmax.xlane.f32.xlu0 %v5107_v36  ;;  %v12186_v6 = vadd.f32 %v12183_v52, %v5082_v57  ;;  %v12210_v36 = vld [vmem:[%s13007_s1] sm:$0xff] }
 0xe7d   :  { %v5125_v60 = vsel %vm756_vm3, %v12186_v6, -inf }
 0xe7f   :  { %5114 = vmax.xlane.f32.xlu0 %v5113_v9  ;;  %v12213_v9 = vadd.f32 %v12210_v36, %v5042_v55 }
 0xe81   :  { %v5101_v55 = vsel %vm756_vm3, %v12213_v9, -inf }
 0xe83   :  { %5120 = vmax.xlane.f32.xlu0 %v5119_v37 }
 0xe84   :  { %v12190_v8 = vpop.f32.mrf.mxu0 }
 0xe86   :  { %v5092_v63 = vpop.f32.mrf.mxu0 }
 0xe87   :  { %5126 = vmax.xlane.f32.xlu0 %v5125_v60  ;;  %v12200_v47 = vadd.f32 %v12197_v24, %v5092_v63  ;;  %v9297_v60 = vpop.eup %9296  ;;  %v12219_v63 = vld [vmem:[%s13007_s1 + $0x18] sm:$0xff] }
 0xe88   :  { %v12223_v35 = vadd.f32 %v12219_v63, %v12122_v38 }
 0xe89   :  { %v5131_v56 = vsel %vm756_vm3, %v12200_v47, -inf }
 0xe8b   :  { %5132 = vmax.xlane.f32.xlu0 %v5131_v56 }
 0xe90   :  { %v8546_v42 = vpop.f32.mrf.mxu1  ;;  %v4449_v13 = vpop.xlane.xlu0 %4448 }
 0xe91   :  { %9298 = vrcp.f32 %v4449_v13  ;;  %v4496_v13 = vmul.f32 %v9297_v60, %v11930_v1  ;;  %v5110_v1 = vsel %vm756_vm3, %v12223_v35, -inf }
 0xe92   :  { %v3969_v43 = vpop.f32.mrf.mxu1 }
 0xe93   :  { %8564 = vmatprep.mubr.msk.f32.mxu1 %vm48_vm1, %v3969_v43 }
 0xe94   :  { %8565 = vmatmul.mubr.msk.f32.gmra.mxu1 %vm48_vm1, %v8546_v42  ;;  %v4455_v62 = vpop.xlane.xlu0 %4454  ;;  %v4458_v19 = vpop.xlane.xlu1 %4457 }
 0xe95   :  { %9300 = vrcp.f32 %v4455_v62  ;;  %v12232_v62 = vld [vmem:[%s13007_s1 + $0x28] sm:$0xff] }
 0xe96   :  { %9302 = vrcp.f32 %v4458_v19  ;;  %v12236_v38 = vadd.f32 %v12232_v62, %v12128_v0 }
 0xe98   :  { %v4461_v15 = vpop.xlane.xlu1 %4460 }
 0xe99   :  { %9304 = vrcp.f32 %v4461_v15 }
 0xe9b   :  { %v4464_v57 = vpop.xlane.xlu0 %4463 }
 0xe9c   :  { %9306 = vrcp.f32 %v4464_v57  ;;  %v4467_v37 = vpop.xlane.xlu1 %4466 }
 0xe9d   :  { %9308 = vrcp.f32 %v4467_v37  ;;  %v12250_v37 = vld [vmem:[%s13007_s1 + $0x38] sm:$0xff] }
 0xe9e   :  { %v9299_v56 = vpop.eup %9298  ;;  %5102 = vmax.xlane.f32.xlu1 %v5101_v55  ;;  %v12254_v60 = vadd.f32 %v12250_v37, %v12142_v31  ;;  %v12266_v31 = vld [vmem:[%s13007_s1 + $0x48] sm:$0xff] }
 0xe9f   :  { %v4470_v41 = vpop.xlane.xlu0 %4469  ;;  %v4495_v42 = vmul.f32 %v9299_v56, %v11947_v39 }
 0xea0   :  { %9310 = vrcp.f32 %v4470_v41  ;;  %v4473_v43 = vpop.xlane.xlu1 %4472  ;;  %v12270_v41 = vadd.f32 %v12266_v31, %v12168_v26 }
 0xea1   :  { %5255 = vrot.lane.b32.xlu0 %v13129_v14, %s9491_s21  ;;  %9312 = vrcp.f32 %v4473_v43  ;;  %8633 = vmatprep.mubr.msk.f32.mxu1 %vm756_vm3, %v4495_v42  ;;  %v5122_v42 = vsel %vm756_vm3, %v12254_v60, -inf }
 0xea2   :  { %v9301_v39 = vpop.eup %9300  ;;  %5111 = vmax.xlane.f32.xlu1 %v5110_v1  ;;  %8634 = vmatmul.mubr.msk.f32.vlgmr.msra.gmra.mxu1 %vm756_vm3, %v4496_v13 }
 0xea3   :  { %v9303_v19 = vpop.eup %9302  ;;  %v4476_v15 = vpop.xlane.xlu0 %4475  ;;  %v4497_v57 = vmul.f32 %v9301_v39, %v11951_v61  ;;  %8652 = vmatpush3.msk.msra.mxu1 %vm85_vm0, %v4704_v33  ;;  %v5116_v61 = vsel %vm756_vm3, %v12236_v38, -inf  ;;  %v12284_v39 = vld [vmem:[%s13007_s1 + $0x58] sm:$0xff]  ;;  %s9495_s1 = smov 64  }
 0xea4   :  { %9314 = vrcp.f32 %v4476_v15  ;;  %v4498_v0 = vmul.f32 %v9303_v19, %v11954_v59  ;;  %v12288_v19 = vadd.f32 %v12284_v39, %v12190_v8  ;;  %v5641_v15 = vpop.permute.xlu1 %5640 }
 0xea5   :  { %5251 = vrot.lane.b32.xlu0 %v9616_v28, %s9491_s21  ;;  %8636 = vmatprep.mubr.msk.f32.mxu1 %vm756_vm3, %v4497_v57 }
 0xea6   :  { %v9305_v33 = vpop.eup %9304  ;;  %5117 = vmax.xlane.f32.xlu1 %v5116_v61  ;;  %8637 = vmatmul.mubr.msk.f32.gmra.mxu1 %vm756_vm3, %v4498_v0 }
 0xea7   :  { %v4482_v59 = vpop.xlane.xlu0 %4481  ;;  %v4499_v55 = vmul.f32 %v9305_v33, %v11962_v46  ;;  %v5134_v33 = vsel %vm756_vm3, %v12288_v19, -inf }
 0xea8   :  { %9316 = vrcp.f32 %v4482_v59 }
 0xea9   :  { %v9307_v56 = vpop.eup %9306  ;;  %5247 = vrot.lane.b32.xlu0 %v13118_v21, %s9491_s21  ;;  %8639 = vmatprep.mubr.msk.f32.mxu1 %vm756_vm3, %v4499_v55 }
 0xeaa   :  { %v9309_v13 = vpop.eup %9308  ;;  %5123 = vmax.xlane.f32.xlu1 %v5122_v42  ;;  %v4500_v46 = vmul.f32 %v9307_v56, %v11973_v20 }
 0xeab   :  { %v5643_v43 = vpop.permute.xlu0 %5642  ;;  %v4501_v1 = vmul.f32 %v9309_v13, %v11969_v27  ;;  %v5128_v27 = vsel %vm756_vm3, %v12270_v41, -inf }
 0xeac   :  { %8785 = vmatprep.subr.msk.mxu0 %vm48_vm1, %v5643_v43  ;;  %8640 = vmatmul.mubr.msk.f32.gmra.mxu1 %vm756_vm3, %v4500_v46 }
 0xead   :  { %v9311_v26 = vpop.eup %9310  ;;  %8786 = vmatpush3.xpose.msk.msra.mxu0 %vm48_vm1, %v5643_v43  ;;  %5243 = vrot.lane.b32.xlu0 %v13119_v7, %s9491_s21 }
 0xeae   :  { %v9313_v20 = vpop.eup %9312  ;;  %8787 = vmatprep.subr.msk.mxu0 %vm48_vm1, %v5641_v15  ;;  %5129 = vmax.xlane.f32.xlu1 %v5128_v27  ;;  %v4502_v57 = vmul.f32 %v9311_v26, %v11983_v17 }
 0xeaf   :  { %8642 = vmatprep.mubr.msk.f32.mxu1 %vm756_vm3, %v4501_v1  ;;  %v4503_v8 = vmul.f32 %v9313_v20, %v11981_v4  ;;  %v5639_v61 = vpop.permute.xlu0 %5638 }
 0xeb0   :  { %8643 = vmatmul.mubr.msk.f32.gmra.mxu1 %vm756_vm3, %v4502_v57 }
 0xeb1   :  { %v9315_v0 = vpop.eup %9314  ;;  %8788 = vmatpush3.xpose.msk.msra.mxu0 %vm48_vm1, %v5641_v15  ;;  %5239 = vrot.lane.b32.xlu0 %v13121_v49, %s9491_s21 }
 0xeb2   :  { %8789 = vmatprep.subr.msk.mxu0 %vm48_vm1, %v5639_v61  ;;  %5135 = vmax.xlane.f32.xlu1 %v5134_v33  ;;  %v4504_v17 = vmul.f32 %v9315_v0, %v11993_v48  ;;  %v13221_v33 = vld [vmem:[#allocation8_spill] sm:$0xff] }
 0xeb3   :  { %8645 = vmatprep.mubr.msk.f32.mxu1 %vm756_vm3, %v4503_v8  ;;  %v5635_v4 = vpop.permute.xlu0 %5634 }
 0xeb4   :  { %8646 = vmatmul.mubr.msk.f32.gmra.mxu1 %vm756_vm3, %v4504_v17 }
 0xeb5   :  { %8790 = vmatpush3.xpose.msk.msra.mxu0 %vm48_vm1, %v5639_v61  ;;  %v9317_v43 = vpop.eup %9316  ;;  %v13220_v61 = vld [vmem:[#allocation7_spill] sm:$0xff] }
 0xeb6   :  { %v4506_v27 = vmul.f32 %v9317_v43, %v12001_v5  ;;  %v1918_v17 = vadd.f32 %v13221_v33, %v13220_v61 }
 0xeb7   :  { %v5631_v55 = vpop.permute.xlu0 %5630 }
 0xebb   :  { %v5609_v42 = vpop.permute.xlu0 %5608 }
 0xebf   :  { %v5613_v1 = vpop.permute.xlu0 %5612 }
 0xec3   :  { %5253 = vrot.lane.b32.xlu1 %v13128_v16, %s9491_s21  ;;  %v5617_v20 = vpop.permute.xlu0 %5616 }
 0xec7   :  { %5249 = vrot.lane.b32.xlu1 %v9618_v29, %s9491_s21  ;;  %v5621_v0 = vpop.permute.xlu0 %5620 }
 0xecb   :  { %5245 = vrot.lane.b32.xlu1 %v9610_v25, %s9491_s21 }
 0xecf   :  { %5241 = vrot.lane.b32.xlu1 %v13105_v53, %s9491_s21 }
 0xed3   :  { %5237 = vrot.lane.b32.xlu1 %v13108_v30, %s9491_s21 }
 0xed6   :  { %v4479_v48 = vpop.xlane.xlu1 %4478 }
 0xed7   :  { %9318 = vrcp.f32 %v4479_v48 }
 0xeda   :  { %v5637_v56 = vpop.permute.xlu1 %5636 }
 0xedb   :  { %8791 = vmatprep.subr.msk.mxu0 %vm48_vm1, %v5637_v56 }
 0xedc   :  { %8792 = vmatpush3.xpose.msk.msra.mxu0 %vm48_vm1, %v5637_v56 }
 0xedd   :  { %8793 = vmatprep.subr.msk.mxu0 %vm48_vm1, %v5635_v4 }
 0xede   :  { %v5633_v13 = vpop.permute.xlu1 %5632 }
 0xee0   :  { %8794 = vmatpush3.xpose.msk.msra.mxu0 %vm48_vm1, %v5635_v4  ;;  %v13222_v4 = vld [vmem:[#allocation46_spill] sm:$0xff] }
 0xee1   :  { %8795 = vmatprep.subr.msk.mxu0 %vm48_vm1, %v5633_v13  ;;  %v2690_v48 = vadd.f32 %v13222_v4, %v1918_v17  ;;  %v13228_v17 = vld [vmem:[#allocation50_spill] sm:$0xff] }
 0xee2   :  { %v5607_v46 = vpop.permute.xlu1 %5606 }
 0xee3   :  { %8799 = vmatprep.mubr.msk.f32.mxu0 %vm48_vm1, %v5607_v46  ;;  %v3416_v43 = vadd.f32 %v12010_v11, %v2690_v48 }
 0xee4   :  { %v9319_v59 = vpop.eup %9318  ;;  %8796 = vmatpush3.xpose.msk.msra.mxu0 %vm48_vm1, %v5633_v13  ;;  %v13224_v13 = vld [vmem:[#allocation6_spill] sm:$0xff] }
 0xee5   :  { %8797 = vmatprep.subr.msk.mxu0 %vm48_vm1, %v5631_v55  ;;  %v4505_v26 = vmul.f32 %v9319_v59, %v12094_v18  ;;  %v5625_v18 = vpop.permute.xlu0 %5624 }
 0xee6   :  { %v5611_v15 = vpop.permute.xlu1 %5610 }
 0xee7   :  { %8648 = vmatprep.mubr.msk.f32.mxu1 %vm756_vm3, %v4505_v26 }
 0xee8   :  { %8649 = vmatmul.mubr.msk.f32.gmra.mxu1 %vm756_vm3, %v4506_v27  ;;  %8798 = vmatpush3.xpose.msk.msra.mxu0 %vm48_vm1, %v5631_v55 }
 0xee9   :  { %v5629_v59 = vpop.permute.xlu0 %5628 }
 0xeea   :  { %v5615_v57 = vpop.permute.xlu1 %5614 }
 0xeeb   :  { %8800 = vmatmul.mubr.msk.f32.vlgmr.msra.gmra.mxu0 %vm48_vm1, %v5609_v42  ;;  %v13223_v42 = vld [vmem:[#allocation5_spill] sm:$0xff] }
 0xeec   :  { %8802 = vmatprep.mubr.msk.f32.mxu0 %vm48_vm1, %v5611_v15  ;;  %v1928_v46 = vadd.f32 %v13224_v13, %v13223_v42  ;;  %v13225_v15 = vld [vmem:[#allocation48_spill] sm:$0xff]  ;;  %v13230_v13 = vld [vmem:[#allocation10_spill] sm:$0xff] }
 0xeed   :  { %v13229_v42 = vld [vmem:[#allocation24_spill] sm:$0xff] }
 0xeee   :  { %v5619_v8 = vpop.permute.xlu1 %5618  ;;  %v2692_v27 = vadd.f32 %v13225_v15, %v1928_v46  ;;  %v1948_v46 = vadd.f32 %v13230_v13, %v13229_v42 }
 0xeef   :  { %8803 = vmatmul.mubr.msk.f32.gmra.mxu0 %vm48_vm1, %v5613_v1 }
 0xef0   :  { %8805 = vmatprep.mubr.msk.f32.mxu0 %vm48_vm1, %v5615_v57 }
 0xef2   :  { %v5623_v5 = vpop.permute.xlu1 %5622 }
 0xef3   :  { %8806 = vmatmul.mubr.msk.f32.gmra.mxu0 %vm48_vm1, %v5617_v20 }
 0xef4   :  { %8808 = vmatprep.mubr.msk.f32.mxu0 %vm48_vm1, %v5619_v8  ;;  %v13226_v8 = vld [vmem:[#allocation22_spill] sm:$0xff] }
 0xef6   :  { %v5627_v55 = vpop.permute.xlu1 %5626 }
 0xef7   :  { %8809 = vmatmul.mubr.msk.f32.gmra.mxu0 %vm48_vm1, %v5621_v0  ;;  %v13227_v0 = vld [vmem:[#allocation4_spill] sm:$0xff] }
 0xef8   :  { %8811 = vmatprep.mubr.msk.f32.mxu0 %vm48_vm1, %v5623_v5  ;;  %v1938_v5 = vadd.f32 %v13227_v0, %v13226_v8  ;;  %v13234_v0 = vld [vmem:[#allocation32_spill] sm:$0xff] }
 0xefa   :  { %v2694_v4 = vadd.f32 %v13228_v17, %v1938_v5 }
 0xefb   :  { %v8551_v56 = vpop.f32.mrf.mxu1  ;;  %8812 = vmatmul.mubr.msk.f32.gmra.mxu0 %vm48_vm1, %v5625_v18  ;;  %v3418_v18 = vadd.f32 %v12019_v34, %v2692_v27  ;;  %v13233_v27 = vld [vmem:[#allocation51_spill] sm:$0xff] }
 0xefc   :  { %v12349_v1 = vadd.f32 %v8551_v56, %v12006_v32  ;;  %8814 = vmatprep.mubr.msk.f32.mxu0 %vm48_vm1, %v5627_v55 }
 0xefd   :  { %v4083_v26 = vpop.f32.mrf.mxu1 }
 0xefe   :  { %v12353_v20 = vadd.f32 %v4083_v26, %v3416_v43  ;;  %v13231_v43 = vld [vmem:[#allocation38_spill] sm:$0xff]  ;;  %v13232_v26 = vld [vmem:[#allocation16_spill] sm:$0xff] }
 0xeff   :  { %v8554_v57 = vpop.f32.mrf.mxu1  ;;  %8815 = vmatmul.mubr.msk.f32.gmra.mxu0 %vm48_vm1, %v5629_v59  ;;  %v3420_v59 = vadd.f32 %v13231_v43, %v2694_v4 }
 0xf00   :  { %v12360_v11 = vadd.f32 %v8554_v57, %v12015_v10  ;;  %v5106_v32 = vpop.xlane.xlu0 %5105 }
 0xf01   :  { %v5138_v61 = vsub.f32 %v12138_v40, %v5106_v32  ;;  %v4093_v33 = vpop.f32.mrf.mxu1  ;;  %v2696_v40 = vadd.f32 %v13233_v27, %v1948_v46 }
 0xf02   :  { %v12364_v48 = vadd.f32 %v4093_v33, %v3418_v18  ;;  %v13235_v18 = vld [vmem:[#allocation31_spill] sm:$0xff] }
 0xf03   :  { %v5151_v55 = vmul.f32 1.442695, %v5138_v61  ;;  %v8557_v56 = vpop.f32.mrf.mxu1  ;;  %v3422_v5 = vadd.f32 %v13234_v0, %v2696_v40 }
 0xf04   :  { %v12370_v34 = vadd.f32 %v8557_v56, %v13232_v26  ;;  %v5109_v10 = vpop.xlane.xlu0 %5108 }
 0xf05   :  { %9320 = vpow2.f32 %v5151_v55  ;;  %v4103_v15 = vpop.f32.mrf.mxu1  ;;  %v5139_v26 = vsub.f32 %v12150_v45, %v5109_v10 }
 0xf06   :  { %v12373_v57 = vadd.f32 %v4103_v15, %v3420_v59 }
 0xf07   :  { %v8560_v8 = vpop.f32.mrf.mxu1 }
 0xf08   :  { %v12377_v32 = vadd.f32 %v8560_v8, %v13235_v18  ;;  %v5115_v61 = vpop.xlane.xlu0 %5114 }
 0xf09   :  { %v4113_v33 = vpop.f32.mrf.mxu1  ;;  %v5141_v40 = vsub.f32 %v12162_v50, %v5115_v61 }
 0xf0a   :  { %v12379_v17 = vadd.f32 %v4113_v33, %v3422_v5 }
 0xf0b   :  { %v8563_v4 = vpop.f32.mrf.mxu1  ;;  %v5157_v18 = vmul.f32 1.442695, %v5141_v40 }
 0xf0c   :  { %v12382_v56 = vadd.f32 %v8563_v4, %v12042_v44  ;;  %v5121_v55 = vpop.xlane.xlu0 %5120  ;;  %v5153_v44 = vmul.f32 1.442695, %v5139_v26 }
 0xf0d   :  { %v5143_v33 = vsub.f32 %v12176_v2, %v5121_v55 }
 0xf0f   :  { %v5161_v10 = vmul.f32 1.442695, %v5143_v33 }
 0xf10   :  { %v5127_v42 = vpop.xlane.xlu0 %5126 }
 0xf12   :  { %v12384_v13 = vpop.eup %9320 }
 0xf13   :  { %v5176_v46 = vsel %vm756_vm3, %v12384_v13, 0.0 }
 0xf14   :  { %5177 = vadd.xlane.f32.xlu1 %v5176_v46  ;;  %v5133_v43 = vpop.xlane.xlu0 %5132 }
 0xf18   :  { %v12388_v59 = vpop.permute.xlu0 %5255 }
 0xf19   :  { %8713 = vmatprep.subr.mxu1 %v12388_v59 }
 0xf27   :  { %v5103_v15 = vpop.xlane.xlu1 %5102 }
 0xf28   :  { %v5137_v27 = vsub.f32 %v12213_v9, %v5103_v15  ;;  %v5145_v9 = vsub.f32 %v12186_v6, %v5127_v42  ;;  %v5147_v15 = vsub.f32 %v12200_v47, %v5133_v43 }
 0xf2a   :  { %v5149_v8 = vmul.f32 1.442695, %v5137_v27 }
 0xf2b   :  { %v5112_v0 = vpop.xlane.xlu1 %5111 }
 0xf2c   :  { %9322 = vpow2.f32 %v5149_v8  ;;  %v5140_v5 = vsub.f32 %v12223_v35, %v5112_v0  ;;  %v5165_v35 = vmul.f32 1.442695, %v5145_v9 }
 0xf2d   :  { %9324 = vpow2.f32 %v5153_v44 }
 0xf2e   :  { %v5155_v4 = vmul.f32 1.442695, %v5140_v5 }
 0xf2f   :  { %v5118_v46 = vpop.xlane.xlu1 %5117 }
 0xf30   :  { %9326 = vpow2.f32 %v5155_v4  ;;  %v5142_v45 = vsub.f32 %v12236_v38, %v5118_v46  ;;  %v5169_v38 = vmul.f32 1.442695, %v5147_v15 }
 0xf31   :  { %9328 = vpow2.f32 %v5157_v18 }
 0xf32   :  { %v5159_v26 = vmul.f32 1.442695, %v5142_v45 }
 0xf33   :  { %v5124_v50 = vpop.xlane.xlu1 %5123 }
 0xf34   :  { %9330 = vpow2.f32 %v5159_v26  ;;  %v5144_v61 = vsub.f32 %v12254_v60, %v5124_v50 }
 0xf35   :  { %9332 = vpow2.f32 %v5161_v10 }
 0xf36   :  { %v5163_v27 = vmul.f32 1.442695, %v5144_v61 }
 0xf37   :  { %v5130_v2 = vpop.xlane.xlu1 %5129 }
 0xf38   :  { %9334 = vpow2.f32 %v5163_v27  ;;  %v5146_v55 = vsub.f32 %v12270_v41, %v5130_v2 }
 0xf39   :  { %v12401_v44 = vpop.eup %9322  ;;  %9336 = vpow2.f32 %v5165_v35 }
 0xf3a   :  { %v5167_v40 = vmul.f32 1.442695, %v5146_v55  ;;  %v5173_v6 = vsel %vm756_vm3, %v12401_v44, 0.0  ;;  %v12405_v42 = vpop.eup %9324  ;;  %v12446_v55 = vpop.f32.mrf.mxu1 }
 0xf3b   :  { %5174 = vadd.xlane.f32.xlu0 %v5173_v6  ;;  %v5136_v60 = vpop.xlane.xlu1 %5135  ;;  %v5179_v41 = vsel %vm756_vm3, %v12405_v42, 0.0 }
 0xf3c   :  { %9338 = vpow2.f32 %v5167_v40  ;;  %v5148_v47 = vsub.f32 %v12288_v19, %v5136_v60 }
 0xf3d   :  { %v12408_v43 = vpop.eup %9326  ;;  %9340 = vpow2.f32 %v5169_v38 }
 0xf3e   :  { %v5171_v8 = vmul.f32 1.442695, %v5148_v47  ;;  %v5182_v0 = vsel %vm756_vm3, %v12408_v43, 0.0  ;;  %v12414_v5 = vpop.eup %9328 }
 0xf3f   :  { %5180 = vadd.xlane.f32.xlu0 %v5179_v41  ;;  %5183 = vadd.xlane.f32.xlu1 %v5182_v0  ;;  %v5185_v19 = vsel %vm756_vm3, %v12414_v5, 0.0  ;;  %v5254_v47 = vpop.permute.xlu1 %5253  ;;  %v5252_v0 = vpop.permute.xlu0 %5251 }
 0xf40   :  { %9342 = vpow2.f32 %v5171_v8  ;;  %v13236_v8 = vld [vmem:[#allocation2_spill] sm:$0xff] }
 0xf41   :  { %v12416_v18 = vpop.eup %9330 }
 0xf42   :  { %v5188_v33 = vsel %vm756_vm3, %v12416_v18, 0.0  ;;  %v12422_v4 = vpop.eup %9332 }
 0xf43   :  { %5186 = vadd.xlane.f32.xlu1 %v5185_v19  ;;  %5189 = vadd.xlane.f32.xlu0 %v5188_v33  ;;  %v5191_v45 = vsel %vm756_vm3, %v12422_v4, 0.0  ;;  %v5250_v33 = vpop.permute.xlu1 %5249 }
 0xf45   :  { %v12424_v46 = vpop.eup %9334 }
 0xf46   :  { %v5194_v10 = vsel %vm756_vm3, %v12424_v46, 0.0  ;;  %v12430_v9 = vpop.eup %9336 }
 0xf47   :  { %5192 = vadd.xlane.f32.xlu1 %v5191_v45  ;;  %5195 = vadd.xlane.f32.xlu0 %v5194_v10  ;;  %v5197_v50 = vsel %vm756_vm3, %v12430_v9, 0.0  ;;  %v13237_v45 = vld [vmem:[#allocation3_spill] sm:$0xff] }
 0xf49   :  { %v12432_v26 = vpop.eup %9338 }
 0xf4a   :  { %v5200_v61 = vsel %vm756_vm3, %v12432_v26, 0.0  ;;  %v12438_v35 = vpop.eup %9340 }
 0xf4b   :  { %5198 = vadd.xlane.f32.xlu1 %v5197_v50  ;;  %5201 = vadd.xlane.f32.xlu0 %v5200_v61  ;;  %v5203_v27 = vsel %vm756_vm3, %v12438_v35, 0.0  ;;  %v5246_v50 = vpop.permute.xlu1 %5245 }
 0xf4d   :  { %v12440_v15 = vpop.eup %9342 }
 0xf4e   :  { %v5206_v2 = vsel %vm756_vm3, %v12440_v15, 0.0 }
 0xf4f   :  { %5204 = vadd.xlane.f32.xlu1 %v5203_v27  ;;  %5207 = vadd.xlane.f32.xlu0 %v5206_v2 }
 0xf54   :  { %v8566_v38 = vpop.f32.mrf.mxu1 }
 0xf55   :  { %v12449_v40 = vadd.f32 %v8566_v38, %v12052_v22  ;;  %v5242_v38 = vpop.permute.xlu1 %5241 }
 0xf56   :  { %v4133_v6 = vpop.f32.mrf.mxu1 }
 0xf57   :  { %v12452_v60 = vadd.f32 %v4133_v6, %v12059_v58  ;;  %v5248_v58 = vpop.permute.xlu0 %5247 }
 0xf5b   :  { %v5244_v2 = vpop.permute.xlu0 %5243 }
 0xf60   :  { %5235 = vrot.lane.b32.xlu1 %v13236_v8, %s9491_s21 }
 0xf62   :  { %v8635_v41 = vpop.f32.mrf.mxu1 }
 0xf64   :  { %v4645_v19 = vpop.f32.mrf.mxu1 }
 0xf65   :  { %5233 = vrot.lane.b32.xlu0 %v13237_v45, %s9491_s21  ;;  %8653 = vmatprep.mubr.msk.f32.mxu1 %vm48_vm1, %v4645_v19  ;;  %v5238_v19 = vpop.permute.xlu1 %5237 }
 0xf66   :  { %v8638_v10 = vpop.f32.mrf.mxu1  ;;  %8654 = vmatmul.mubr.msk.f32.vlgmr.msra.gmra.mxu1 %vm48_vm1, %v8635_v41  ;;  %v5240_v41 = vpop.permute.xlu0 %5239 }
 0xf67   :  { %8714 = vmatpush3.msra.mxu1 %v12388_v59 }
 0xf68   :  { %8715 = vmatprep.subr.mxu1 %v5254_v47  ;;  %v4655_v22 = vpop.f32.mrf.mxu1 }
 0xf69   :  { %8716 = vmatpush3.msra.mxu1 %v5254_v47  ;;  %8656 = vmatprep.mubr.msk.f32.mxu1 %vm48_vm1, %v4655_v22 }
 0xf6a   :  { %8717 = vmatprep.subr.mxu1 %v5252_v0  ;;  %8657 = vmatmul.mubr.msk.f32.gmra.mxu1 %vm48_vm1, %v8638_v10 }
 0xf6b   :  { %8718 = vmatpush3.msra.mxu1 %v5252_v0 }
 0xf6c   :  { %v8641_v61 = vpop.f32.mrf.mxu1  ;;  %8719 = vmatprep.subr.mxu1 %v5250_v33 }
 0xf6d   :  { %8720 = vmatpush3.msra.mxu1 %v5250_v33 }
 0xf6e   :  { %v4665_v27 = vpop.f32.mrf.mxu1  ;;  %8721 = vmatprep.subr.mxu1 %v5248_v58 }
 0xf6f   :  { %8659 = vmatprep.mubr.msk.f32.mxu1 %vm48_vm1, %v4665_v27  ;;  %8722 = vmatpush3.msra.mxu1 %v5248_v58 }
 0xf70   :  { %v8644_v59 = vpop.f32.mrf.mxu1  ;;  %8660 = vmatmul.mubr.msk.f32.gmra.mxu1 %vm48_vm1, %v8641_v61  ;;  %8723 = vmatprep.subr.mxu1 %v5246_v50 }
 0xf71   :  { %8724 = vmatpush3.msra.mxu1 %v5246_v50 }
 0xf72   :  { %v4675_v6 = vpop.f32.mrf.mxu1  ;;  %8725 = vmatprep.subr.mxu1 %v5244_v2 }
 0xf73   :  { %8662 = vmatprep.mubr.msk.f32.mxu1 %vm48_vm1, %v4675_v6  ;;  %8726 = vmatpush3.msra.mxu1 %v5244_v2 }
 0xf74   :  { %v8647_v47 = vpop.f32.mrf.mxu1  ;;  %8663 = vmatmul.mubr.msk.f32.gmra.mxu1 %vm48_vm1, %v8644_v59  ;;  %8727 = vmatprep.subr.mxu1 %v5242_v38 }
 0xf75   :  { %8728 = vmatpush3.msra.mxu1 %v5242_v38 }
 0xf76   :  { %v4685_v0 = vpop.f32.mrf.mxu1  ;;  %8729 = vmatprep.subr.mxu1 %v5240_v41 }
 0xf77   :  { %8665 = vmatprep.mubr.msk.f32.mxu1 %vm48_vm1, %v4685_v0  ;;  %8730 = vmatpush3.msra.mxu1 %v5240_v41 }
 0xf78   :  { %8666 = vmatmul.mubr.msk.f32.gmra.mxu1 %vm48_vm1, %v8647_v47  ;;  %8731 = vmatprep.subr.mxu1 %v5238_v19 }
 0xf79   :  { %8732 = vmatpush3.msra.mxu1 %v5238_v19 }
 0xfa8   :  { %v8650_v33 = vpop.f32.mrf.mxu1 }
 0xfaa   :  { %v4695_v10 = vpop.f32.mrf.mxu1 }
 0xfab   :  { %8668 = vmatprep.mubr.msk.f32.mxu1 %vm48_vm1, %v4695_v10  ;;  %v8801_v22 = vpop.f32.mrf.mxu0 }
 0xfac   :  { %v12471_v58 = vadd.f32 %v12135_v12, %v8801_v22  ;;  %8669 = vmatmul.mubr.msk.f32.gmra.mxu1 %vm48_vm1, %v8650_v33 }
 0xfad   :  { %v5768_v50 = vpop.f32.mrf.mxu0 }
 0xfae   :  { %v12475_v61 = vadd.f32 %v12210_v36, %v5768_v50  ;;  %v5830_v27 = vsel %vm756_vm3, %v12471_v58, -inf }
 0xfaf   :  { %v8804_v2 = vpop.f32.mrf.mxu0  ;;  %5831 = vmax.xlane.f32.xlu0 %v5830_v27 }
 0xfb0   :  { %v12480_v59 = vadd.f32 %v12219_v63, %v8804_v2  ;;  %v5827_v38 = vsel %vm756_vm3, %v12475_v61, -inf }
 0xfb1   :  { %v5778_v6 = vpop.f32.mrf.mxu0  ;;  %5828 = vmax.xlane.f32.xlu1 %v5827_v38 }
 0xfb2   :  { %v12485_v12 = vadd.f32 %v12147_v23, %v5778_v6  ;;  %v5836_v41 = vsel %vm756_vm3, %v12480_v59, -inf }
 0xfb3   :  { %v8807_v47 = vpop.f32.mrf.mxu0 }
 0xfb4   :  { %v12488_v36 = vadd.f32 %v12232_v62, %v8807_v47  ;;  %v5833_v0 = vsel %vm756_vm3, %v12485_v12, -inf }
 0xfb5   :  { %v5788_v63 = vpop.f32.mrf.mxu0  ;;  %5837 = vmax.xlane.f32.xlu1 %v5836_v41  ;;  %5834 = vmax.xlane.f32.xlu0 %v5833_v0 }
 0xfb6   :  { %v12495_v19 = vadd.f32 %v12159_v51, %v5788_v63  ;;  %v5842_v62 = vsel %vm756_vm3, %v12488_v36, -inf }
 0xfb7   :  { %v8810_v33 = vpop.f32.mrf.mxu0 }
 0xfb8   :  { %v12498_v23 = vadd.f32 %v12250_v37, %v8810_v33  ;;  %v5839_v10 = vsel %vm756_vm3, %v12495_v19, -inf  ;;  %v5178_v33 = vpop.xlane.xlu1 %5177 }
 0xfb9   :  { %v5798_v22 = vpop.f32.mrf.mxu0  ;;  %5843 = vmax.xlane.f32.xlu1 %v5842_v62  ;;  %5840 = vmax.xlane.f32.xlu0 %v5839_v10 }
 0xfba   :  { %v12505_v50 = vadd.f32 %v12173_v3, %v5798_v22  ;;  %v5848_v37 = vsel %vm756_vm3, %v12498_v23, -inf }
 0xfbb   :  { %v8813_v27 = vpop.f32.mrf.mxu0 }
 0xfbc   :  { %v12508_v51 = vadd.f32 %v12266_v31, %v8813_v27  ;;  %v5845_v2 = vsel %vm756_vm3, %v12505_v50, -inf }
 0xfbd   :  { %v5808_v38 = vpop.f32.mrf.mxu0  ;;  %5849 = vmax.xlane.f32.xlu1 %v5848_v37  ;;  %5846 = vmax.xlane.f32.xlu0 %v5845_v2 }
 0xfbe   :  { %v12515_v6 = vadd.f32 %v12183_v52, %v5808_v38  ;;  %v5854_v31 = vsel %vm756_vm3, %v12508_v51, -inf }
 0xfbf   :  { %v8816_v47 = vpop.f32.mrf.mxu0 }
 0xfc0   :  { %v12518_v3 = vadd.f32 %v12284_v39, %v8816_v47  ;;  %v5851_v41 = vsel %vm756_vm3, %v12515_v6, -inf }
 0xfc1   :  { %v5818_v0 = vpop.f32.mrf.mxu0  ;;  %5855 = vmax.xlane.f32.xlu1 %v5854_v31  ;;  %5852 = vmax.xlane.f32.xlu0 %v5851_v41 }
 0xfc2   :  { %v12525_v63 = vadd.f32 %v12197_v24, %v5818_v0  ;;  %v5860_v52 = vsel %vm756_vm3, %v12518_v3, -inf }
 0xfc4   :  { %v5175_v62 = vpop.xlane.xlu0 %5174  ;;  %v5857_v39 = vsel %vm756_vm3, %v12525_v63, -inf }
 0xfc5   :  { %9344 = vrcp.f32 %v5175_v62  ;;  %5861 = vmax.xlane.f32.xlu1 %v5860_v52  ;;  %5858 = vmax.xlane.f32.xlu0 %v5857_v39 }
 0xfc6   :  { %9346 = vrcp.f32 %v5178_v33 }
 0xfc8   :  { %v5181_v10 = vpop.xlane.xlu0 %5180  ;;  %v5184_v22 = vpop.xlane.xlu1 %5183 }
 0xfc9   :  { %9348 = vrcp.f32 %v5181_v10  ;;  %v12544_v10 = vld [vmem:[%s13008_s4 + $0x18] sm:$0xff] }
 0xfca   :  { %9350 = vrcp.f32 %v5184_v22 }
 0xfcc   :  { %v5190_v27 = vpop.xlane.xlu0 %5189  ;;  %v5187_v37 = vpop.xlane.xlu1 %5186 }
 0xfcd   :  { %9352 = vrcp.f32 %v5187_v37 }
 0xfce   :  { %9354 = vrcp.f32 %v5190_v27 }
 0xfd0   :  { %v5196_v2 = vpop.xlane.xlu0 %5195  ;;  %v5193_v24 = vpop.xlane.xlu1 %5192 }
 0xfd1   :  { %9356 = vrcp.f32 %v5193_v24 }
 0xfd2   :  { %v9345_v38 = vpop.eup %9344  ;;  %9358 = vrcp.f32 %v5196_v2 }
 0xfd3   :  { %v5221_v47 = vmul.f32 %v9345_v38, %v12401_v44  ;;  %v9347_v44 = vpop.eup %9346 }
 0xfd4   :  { %v5202_v31 = vpop.xlane.xlu0 %5201  ;;  %v5199_v41 = vpop.xlane.xlu1 %5198  ;;  %v5222_v22 = vmul.f32 %v9347_v44, %v12384_v13 }
 0xfd5   :  { %8737 = vmatprep.mubr.msk.f32.mxu1 %vm756_vm3, %v5221_v47  ;;  %9360 = vrcp.f32 %v5199_v41 }
 0xfd6   :  { %5979 = vrot.lane.b32.xlu1 %v13128_v16, %s9493_s23  ;;  %v9349_v52 = vpop.eup %9348  ;;  %9362 = vrcp.f32 %v5202_v31 }
 0xfd7   :  { %v9351_v27 = vpop.eup %9350  ;;  %v5223_v37 = vmul.f32 %v9349_v52, %v12405_v42 }
 0xfd8   :  { %v5208_v0 = vpop.xlane.xlu0 %5207  ;;  %v5205_v62 = vpop.xlane.xlu1 %5204  ;;  %v5224_v13 = vmul.f32 %v9351_v27, %v12408_v43 }
 0xfd9   :  { %9364 = vrcp.f32 %v5205_v62 }
 0xfda   :  { %5975 = vrot.lane.b32.xlu1 %v9618_v29, %s9493_s23  ;;  %v9353_v2 = vpop.eup %9352  ;;  %9366 = vrcp.f32 %v5208_v0 }
 0xfdb   :  { %5981 = vrot.lane.b32.xlu0 %v13129_v14, %s9493_s23  ;;  %v9355_v42 = vpop.eup %9354  ;;  %v5225_v24 = vmul.f32 %v9353_v2, %v12414_v5 }
 0xfdc   :  { %v5236_v33 = vpop.permute.xlu1 %5235  ;;  %v5234_v39 = vpop.permute.xlu0 %5233  ;;  %v5226_v47 = vmul.f32 %v9355_v42, %v12416_v18 }
 0xfdd   :  { %8733 = vmatprep.subr.mxu1 %v5236_v33 }
 0xfde   :  { %5971 = vrot.lane.b32.xlu1 %v9610_v25, %s9493_s23  ;;  %8734 = vmatpush3.msra.mxu1 %v5236_v33  ;;  %v9357_v38 = vpop.eup %9356 }
 0xfdf   :  { %5977 = vrot.lane.b32.xlu0 %v9616_v28, %s9493_s23  ;;  %8735 = vmatprep.subr.mxu1 %v5234_v39  ;;  %v9359_v43 = vpop.eup %9358  ;;  %v5227_v31 = vmul.f32 %v9357_v38, %v12422_v4 }
 0xfe0   :  { %8736 = vmatpush3.msra.mxu1 %v5234_v39  ;;  %v5228_v5 = vmul.f32 %v9359_v43, %v12424_v46 }
 0xfe1   :  { %8738 = vmatmul.mubr.msk.f32.vlgmr.msra.gmra.mxu1 %vm756_vm3, %v5222_v22  ;;  %8755 = vmatprep.subr.msk.mxu1 %vm85_vm0, %v12544_v10 }
 0xfe2   :  { %5967 = vrot.lane.b32.xlu1 %v13105_v53, %s9493_s23  ;;  %8740 = vmatprep.mubr.msk.f32.mxu1 %vm756_vm3, %v5223_v37  ;;  %v9361_v41 = vpop.eup %9360 }
 0xfe3   :  { %5973 = vrot.lane.b32.xlu0 %v13118_v21, %s9493_s23  ;;  %8756 = vmatpush3.msk.msra.mxu1 %vm85_vm0, %v12544_v10  ;;  %v9363_v0 = vpop.eup %9362  ;;  %v5229_v62 = vmul.f32 %v9361_v41, %v12430_v9 }
 0xfe4   :  { %v5230_v18 = vmul.f32 %v9363_v0, %v12432_v26 }
 0xfe5   :  { %8741 = vmatmul.mubr.msk.f32.gmra.mxu1 %vm756_vm3, %v5224_v13 }
 0xfe6   :  { %5963 = vrot.lane.b32.xlu1 %v13108_v30, %s9493_s23  ;;  %8743 = vmatprep.mubr.msk.f32.mxu1 %vm756_vm3, %v5225_v24  ;;  %v9365_v44 = vpop.eup %9364 }
 0xfe7   :  { %5969 = vrot.lane.b32.xlu0 %v13119_v7, %s9493_s23  ;;  %v9367_v4 = vpop.eup %9366  ;;  %v5231_v33 = vmul.f32 %v9365_v44, %v12438_v35 }
 0xfe8   :  { %v5232_v52 = vmul.f32 %v9367_v4, %v12440_v15 }
 0xfe9   :  { %8744 = vmatmul.mubr.msk.f32.gmra.mxu1 %vm756_vm3, %v5226_v47 }
 0xfea   :  { %8746 = vmatprep.mubr.msk.f32.mxu1 %vm756_vm3, %v5227_v31 }
 0xfeb   :  { %5965 = vrot.lane.b32.xlu0 %v13121_v49, %s9493_s23 }
 0xfed   :  { %8747 = vmatmul.mubr.msk.f32.gmra.mxu1 %vm756_vm3, %v5228_v5 }
 0xfee   :  { %8749 = vmatprep.mubr.msk.f32.mxu1 %vm756_vm3, %v5229_v62 }
 0xff1   :  { %8750 = vmatmul.mubr.msk.f32.gmra.mxu1 %vm756_vm3, %v5230_v18 }
 0xff2   :  { %8752 = vmatprep.mubr.msk.f32.mxu1 %vm756_vm3, %v5231_v33 }
 0xff5   :  { %8753 = vmatmul.mubr.msk.f32.gmra.mxu1 %vm756_vm3, %v5232_v52 }
0x1026   :  { %v8655_v46 = vpop.f32.mrf.mxu1 }
0x1027   :  { %v12585_v9 = vadd.f32 %v8655_v46, %v12349_v1 }
0x1028   :  { %v4809_v39 = vpop.f32.mrf.mxu1 }
0x1029   :  { %v12588_v22 = vadd.f32 %v4809_v39, %v12353_v20 }
0x102a   :  { %v8658_v26 = vpop.f32.mrf.mxu1 }
0x102b   :  { %v12591_v27 = vadd.f32 %v8658_v26, %v12360_v11 }
0x102c   :  { %v4819_v35 = vpop.f32.mrf.mxu1 }
0x102d   :  { %v12594_v37 = vadd.f32 %v4819_v35, %v12364_v48  ;;  %v4150_v48 = vadd.f32 %v12446_v55, %v12045_v54 }
0x1030   :  { %v8661_v2 = vpop.f32.mrf.mxu1 }
0x1031   :  { %v12597_v15 = vadd.f32 %v8661_v2, %v12370_v34 }
0x1032   :  { %v4829_v13 = vpop.f32.mrf.mxu1 }
0x1033   :  { %v12600_v1 = vadd.f32 %v4829_v13, %v12373_v57 }
0x1034   :  { %v8664_v42 = vpop.f32.mrf.mxu1 }
0x1035   :  { %v12603_v20 = vadd.f32 %v8664_v42, %v12377_v32 }
0x1036   :  { %v4839_v24 = vpop.f32.mrf.mxu1 }
0x1037   :  { %v12606_v11 = vadd.f32 %v4839_v24, %v12379_v17 }
0x1038   :  { %v8667_v38 = vpop.f32.mrf.mxu1  ;;  %v5832_v47 = vpop.xlane.xlu0 %5831 }
0x1039   :  { %v12611_v34 = vadd.f32 %v8667_v38, %v12382_v56  ;;  %v5864_v43 = vsub.f32 %v12471_v58, %v5832_v47 }
0x103a   :  { %v4849_v57 = vpop.f32.mrf.mxu1  ;;  %v5829_v31 = vpop.xlane.xlu1 %5828 }
0x103b   :  { %v5877_v41 = vmul.f32 1.442695, %v5864_v43  ;;  %v12614_v5 = vadd.f32 %v4849_v57, %v4150_v48  ;;  %v5863_v32 = vsub.f32 %v12475_v61, %v5829_v31 }
0x103d   :  { %9368 = vpow2.f32 %v5877_v41  ;;  %v5875_v17 = vmul.f32 1.442695, %v5863_v32 }
0x103e   :  { %v5835_v0 = vpop.xlane.xlu0 %5834  ;;  %v5838_v62 = vpop.xlane.xlu1 %5837 }
0x103f   :  { %9370 = vpow2.f32 %v5875_v17  ;;  %v5865_v44 = vsub.f32 %v12485_v12, %v5835_v0  ;;  %v5866_v54 = vsub.f32 %v12480_v59, %v5838_v62 }
0x1041   :  { %v5879_v56 = vmul.f32 1.442695, %v5865_v44  ;;  %v5881_v55 = vmul.f32 1.442695, %v5866_v54 }
0x1042   :  { %v5841_v18 = vpop.xlane.xlu0 %5840  ;;  %v5844_v58 = vpop.xlane.xlu1 %5843 }
0x1043   :  { %9372 = vpow2.f32 %v5879_v56  ;;  %v5867_v4 = vsub.f32 %v12495_v19, %v5841_v18  ;;  %v5868_v33 = vsub.f32 %v12488_v36, %v5844_v58 }
0x1044   :  { %9374 = vpow2.f32 %v5881_v55 }
0x1045   :  { %v5883_v61 = vmul.f32 1.442695, %v5867_v4  ;;  %v5885_v52 = vmul.f32 1.442695, %v5868_v33 }
0x1046   :  { %v5847_v46 = vpop.xlane.xlu0 %5846  ;;  %v5850_v39 = vpop.xlane.xlu1 %5849 }
0x1047   :  { %9376 = vpow2.f32 %v5883_v61  ;;  %v5869_v26 = vsub.f32 %v12505_v50, %v5847_v46  ;;  %v5870_v12 = vsub.f32 %v12498_v23, %v5850_v39 }
0x1048   :  { %9378 = vpow2.f32 %v5885_v52 }
0x1049   :  { %v5887_v59 = vmul.f32 1.442695, %v5869_v26  ;;  %v5889_v35 = vmul.f32 1.442695, %v5870_v12 }
0x104a   :  { %v12623_v2 = vpop.eup %9368  ;;  %v5853_v13 = vpop.xlane.xlu0 %5852 }
0x104b   :  { %v5856_v42 = vpop.xlane.xlu1 %5855  ;;  %9380 = vpow2.f32 %v5887_v59  ;;  %v5871_v36 = vsub.f32 %v12515_v6, %v5853_v13  ;;  %v5902_v24 = vsel %vm756_vm3, %v12623_v2, 0.0 }
0x104c   :  { %v5872_v19 = vsub.f32 %v12508_v51, %v5856_v42  ;;  %v12629_v38 = vpop.eup %9370  ;;  %9382 = vpow2.f32 %v5889_v35  ;;  %5903 = vadd.xlane.f32.xlu1 %v5902_v24 }
0x104d   :  { %v5891_v23 = vmul.f32 1.442695, %v5871_v36  ;;  %v5899_v47 = vsel %vm756_vm3, %v12629_v38, 0.0 }
0x104e   :  { %v5893_v50 = vmul.f32 1.442695, %v5872_v19  ;;  %v5859_v48 = vpop.xlane.xlu0 %5858  ;;  %5900 = vadd.xlane.f32.xlu0 %v5899_v47 }
0x104f   :  { %v5862_v43 = vpop.xlane.xlu1 %5861  ;;  %9384 = vpow2.f32 %v5891_v23  ;;  %v5873_v6 = vsub.f32 %v12525_v63, %v5859_v48 }
0x1050   :  { %v5874_v51 = vsub.f32 %v12518_v3, %v5862_v43  ;;  %v12635_v57 = vpop.eup %9372  ;;  %9386 = vpow2.f32 %v5893_v50 }
0x1051   :  { %v12637_v31 = vpop.eup %9374  ;;  %v5895_v41 = vmul.f32 1.442695, %v5873_v6  ;;  %v5905_v17 = vsel %vm756_vm3, %v12635_v57, 0.0 }
0x1052   :  { %v5897_v32 = vmul.f32 1.442695, %v5874_v51  ;;  %v5982_v0 = vpop.permute.xlu0 %5981  ;;  %5906 = vadd.xlane.f32.xlu0 %v5905_v17  ;;  %v5908_v62 = vsel %vm756_vm3, %v12637_v31, 0.0 }
0x1053   :  { %9388 = vpow2.f32 %v5895_v41  ;;  %5909 = vadd.xlane.f32.xlu1 %v5908_v62  ;;  %8817 = vmatprep.subr.mxu1 %v5982_v0  ;;  %v5980_v36 = vpop.permute.xlu1 %5979 }
0x1054   :  { %v12643_v63 = vpop.eup %9376  ;;  %9390 = vpow2.f32 %v5897_v32 }
0x1055   :  { %v12645_v3 = vpop.eup %9378  ;;  %v5911_v44 = vsel %vm756_vm3, %v12643_v63, 0.0 }
0x1056   :  { %v5914_v54 = vsel %vm756_vm3, %v12645_v3, 0.0  ;;  %v5978_v24 = vpop.permute.xlu0 %5977 }
0x1057   :  { %5912 = vadd.xlane.f32.xlu1 %v5911_v44  ;;  %5915 = vadd.xlane.f32.xlu0 %v5914_v54  ;;  %v5976_v50 = vpop.permute.xlu1 %5975 }
0x1058   :  { %v12651_v56 = vpop.eup %9380 }
0x1059   :  { %v12653_v55 = vpop.eup %9382  ;;  %v5917_v18 = vsel %vm756_vm3, %v12651_v56, 0.0 }
0x105a   :  { %v5920_v58 = vsel %vm756_vm3, %v12653_v55, 0.0 }
0x105b   :  { %5918 = vadd.xlane.f32.xlu1 %v5917_v18  ;;  %5921 = vadd.xlane.f32.xlu0 %v5920_v58  ;;  %v5972_v43 = vpop.permute.xlu1 %5971 }
0x105c   :  { %v12659_v4 = vpop.eup %9384 }
0x105d   :  { %v12661_v33 = vpop.eup %9386  ;;  %v5923_v61 = vsel %vm756_vm3, %v12659_v4, 0.0 }
0x105e   :  { %v5926_v52 = vsel %vm756_vm3, %v12661_v33, 0.0 }
0x105f   :  { %5924 = vadd.xlane.f32.xlu1 %v5923_v61  ;;  %5927 = vadd.xlane.f32.xlu0 %v5926_v52  ;;  %v5968_v17 = vpop.permute.xlu1 %5967 }
0x1060   :  { %v12667_v46 = vpop.eup %9388 }
0x1061   :  { %v12669_v39 = vpop.eup %9390  ;;  %v5929_v26 = vsel %vm756_vm3, %v12667_v46, 0.0 }
0x1062   :  { %v5932_v12 = vsel %vm756_vm3, %v12669_v39, 0.0 }
0x1063   :  { %5930 = vadd.xlane.f32.xlu1 %v5929_v26  ;;  %5933 = vadd.xlane.f32.xlu0 %v5932_v12  ;;  %v5964_v18 = vpop.permute.xlu1 %5963 }
0x106c   :  { %v8670_v59 = vpop.f32.mrf.mxu1 }
0x106d   :  { %v12676_v35 = vadd.f32 %v8670_v59, %v12449_v40 }
0x106e   :  { %v4859_v13 = vpop.f32.mrf.mxu1 }
0x106f   :  { %v12679_v42 = vadd.f32 %v4859_v13, %v12452_v60  ;;  %v5974_v60 = vpop.permute.xlu0 %5973 }
0x1073   :  { %v5970_v41 = vpop.permute.xlu0 %5969 }
0x1074   :  { %5961 = vrot.lane.b32.xlu1 %v13236_v8, %s9493_s23 }
0x1077   :  { %v5966_v44 = vpop.permute.xlu0 %5965 }
0x1079   :  { %5959 = vrot.lane.b32.xlu0 %v13237_v45, %s9493_s23 }
0x10a1   :  { %v8739_v19 = vpop.f32.mrf.mxu1 }
0x10a3   :  { %v5371_v23 = vpop.f32.mrf.mxu1 }
0x10a4   :  { %8757 = vmatprep.mubr.msk.f32.mxu1 %vm48_vm1, %v5371_v23 }
0x10a5   :  { %v8742_v47 = vpop.f32.mrf.mxu1  ;;  %8758 = vmatmul.mubr.msk.f32.vlgmr.msra.gmra.mxu1 %vm48_vm1, %v8739_v19 }
0x10a6   :  { %8818 = vmatpush3.msra.mxu1 %v5982_v0 }
0x10a7   :  { %8819 = vmatprep.subr.mxu1 %v5980_v36  ;;  %v5381_v40 = vpop.f32.mrf.mxu1 }
0x10a8   :  { %8820 = vmatpush3.msra.mxu1 %v5980_v36  ;;  %8760 = vmatprep.mubr.msk.f32.mxu1 %vm48_vm1, %v5381_v40 }
0x10a9   :  { %8821 = vmatprep.subr.mxu1 %v5978_v24  ;;  %v8745_v48 = vpop.f32.mrf.mxu1  ;;  %8761 = vmatmul.mubr.msk.f32.gmra.mxu1 %vm48_vm1, %v8742_v47 }
0x10aa   :  { %8822 = vmatpush3.msra.mxu1 %v5978_v24 }
0x10ab   :  { %8823 = vmatprep.subr.mxu1 %v5976_v50  ;;  %v5391_v6 = vpop.f32.mrf.mxu1 }
0x10ac   :  { %8824 = vmatpush3.msra.mxu1 %v5976_v50  ;;  %8763 = vmatprep.mubr.msk.f32.mxu1 %vm48_vm1, %v5391_v6 }
0x10ad   :  { %8825 = vmatprep.subr.mxu1 %v5974_v60  ;;  %v8748_v51 = vpop.f32.mrf.mxu1  ;;  %8764 = vmatmul.mubr.msk.f32.gmra.mxu1 %vm48_vm1, %v8745_v48 }
0x10ae   :  { %8826 = vmatpush3.msra.mxu1 %v5974_v60 }
0x10af   :  { %8827 = vmatprep.subr.mxu1 %v5972_v43  ;;  %v5401_v32 = vpop.f32.mrf.mxu1 }
0x10b0   :  { %8828 = vmatpush3.msra.mxu1 %v5972_v43  ;;  %8766 = vmatprep.mubr.msk.f32.mxu1 %vm48_vm1, %v5401_v32 }
0x10b1   :  { %8829 = vmatprep.subr.mxu1 %v5970_v41  ;;  %v8751_v0 = vpop.f32.mrf.mxu1  ;;  %8767 = vmatmul.mubr.msk.f32.gmra.mxu1 %vm48_vm1, %v8748_v51 }
0x10b2   :  { %8830 = vmatpush3.msra.mxu1 %v5970_v41 }
0x10b3   :  { %8831 = vmatprep.subr.mxu1 %v5968_v17  ;;  %v5411_v62 = vpop.f32.mrf.mxu1 }
0x10b4   :  { %8832 = vmatpush3.msra.mxu1 %v5968_v17  ;;  %8769 = vmatprep.mubr.msk.f32.mxu1 %vm48_vm1, %v5411_v62 }
0x10b5   :  { %8833 = vmatprep.subr.mxu1 %v5966_v44  ;;  %v8754_v54 = vpop.f32.mrf.mxu1  ;;  %8770 = vmatmul.mubr.msk.f32.gmra.mxu1 %vm48_vm1, %v8751_v0 }
0x10b6   :  { %8834 = vmatpush3.msra.mxu1 %v5966_v44 }
0x10b7   :  { %8835 = vmatprep.subr.mxu1 %v5964_v18  ;;  %v5421_v58 = vpop.f32.mrf.mxu1 }
0x10b8   :  { %8836 = vmatpush3.msra.mxu1 %v5964_v18  ;;  %8772 = vmatprep.mubr.msk.f32.mxu1 %vm48_vm1, %v5421_v58  ;;  %v6156_v58 = vrot.slane %v12544_v10, 4 }
0x10b9   :  { %8773 = vmatmul.mubr.msk.f32.gmra.mxu1 %vm48_vm1, %v8754_v54 }
0x10d5   :  { %v5904_v52 = vpop.xlane.xlu1 %5903 }
0x10d7   :  { %v5901_v61 = vpop.xlane.xlu0 %5900 }
0x10d8   :  { %9392 = vrcp.f32 %v5901_v61 }
0x10d9   :  { %9394 = vrcp.f32 %v5904_v52 }
0x10db   :  { %v5907_v26 = vpop.xlane.xlu0 %5906 }
0x10dc   :  { %v5910_v12 = vpop.xlane.xlu1 %5909  ;;  %9396 = vrcp.f32 %v5907_v26 }
0x10dd   :  { %9398 = vrcp.f32 %v5910_v12 }
0x10e0   :  { %v5916_v59 = vpop.xlane.xlu0 %5915  ;;  %v5913_v13 = vpop.xlane.xlu1 %5912 }
0x10e1   :  { %9400 = vrcp.f32 %v5913_v13 }
0x10e2   :  { %9402 = vrcp.f32 %v5916_v59 }
0x10e4   :  { %v5922_v36 = vpop.xlane.xlu0 %5921  ;;  %v5919_v19 = vpop.xlane.xlu1 %5918 }
0x10e5   :  { %v9393_v24 = vpop.eup %9392  ;;  %9404 = vrcp.f32 %v5919_v19 }
0x10e6   :  { %v5947_v23 = vmul.f32 %v9393_v24, %v12629_v38  ;;  %9406 = vrcp.f32 %v5922_v36  ;;  %v9395_v48 = vpop.eup %9394 }
0x10e7   :  { %v5948_v38 = vmul.f32 %v9395_v48, %v12623_v2 }
0x10e8   :  { %v5928_v50 = vpop.xlane.xlu0 %5927  ;;  %v5925_v47 = vpop.xlane.xlu1 %5924  ;;  %8841 = vmatprep.mubr.msk.f32.mxu1 %vm756_vm3, %v5947_v23 }
0x10e9   :  { %9408 = vrcp.f32 %v5925_v47  ;;  %v9397_v6 = vpop.eup %9396 }
0x10ea   :  { %9410 = vrcp.f32 %v5928_v50  ;;  %v9399_v41 = vpop.eup %9398  ;;  %v5949_v32 = vmul.f32 %v9397_v6, %v12635_v57 }
0x10eb   :  { %v5950_v0 = vmul.f32 %v9399_v41, %v12637_v31 }
0x10ec   :  { %v5934_v40 = vpop.xlane.xlu0 %5933  ;;  %v5931_v60 = vpop.xlane.xlu1 %5930 }
0x10ed   :  { %9412 = vrcp.f32 %v5931_v60 }
0x10ee   :  { %v9401_v17 = vpop.eup %9400  ;;  %9414 = vrcp.f32 %v5934_v40 }
0x10ef   :  { %v9403_v62 = vpop.eup %9402  ;;  %v5951_v44 = vmul.f32 %v9401_v17, %v12643_v63 }
0x10f0   :  { %v5962_v43 = vpop.permute.xlu1 %5961  ;;  %v5960_v51 = vpop.permute.xlu0 %5959  ;;  %v5952_v2 = vmul.f32 %v9403_v62, %v12645_v3 }
0x10f1   :  { %8837 = vmatprep.subr.mxu1 %v5962_v43 }
0x10f2   :  { %8838 = vmatpush3.msra.mxu1 %v5962_v43  ;;  %v9405_v54 = vpop.eup %9404 }
0x10f3   :  { %8839 = vmatprep.subr.mxu1 %v5960_v51  ;;  %v9407_v18 = vpop.eup %9406  ;;  %v5953_v57 = vmul.f32 %v9405_v54, %v12651_v56 }
0x10f4   :  { %8840 = vmatpush3.msra.mxu1 %v5960_v51  ;;  %v5954_v31 = vmul.f32 %v9407_v18, %v12653_v55 }
0x10f5   :  { %8842 = vmatmul.mubr.msk.f32.vlgmr.msra.gmra.mxu1 %vm756_vm3, %v5948_v38  ;;  %8859 = vmatprep.subr.msk.mxu1 %vm85_vm0, %v6156_v58 }
0x10f6   :  { %8844 = vmatprep.mubr.msk.f32.mxu1 %vm756_vm3, %v5949_v32  ;;  %v9409_v61 = vpop.eup %9408  ;;  %8860 = vmatpush3.msk.msra.mxu1 %vm85_vm0, %v6156_v58 }
0x10f7   :  { %v9411_v63 = vpop.eup %9410  ;;  %v5955_v52 = vmul.f32 %v9409_v61, %v12659_v4 }
0x10f8   :  { %v5956_v56 = vmul.f32 %v9411_v63, %v12661_v33 }
0x10f9   :  { %8845 = vmatmul.mubr.msk.f32.gmra.mxu1 %vm756_vm3, %v5950_v0 }
0x10fa   :  { %8847 = vmatprep.mubr.msk.f32.mxu1 %vm756_vm3, %v5951_v44  ;;  %v9413_v3 = vpop.eup %9412 }
0x10fb   :  { %v9415_v26 = vpop.eup %9414  ;;  %v5957_v12 = vmul.f32 %v9413_v3, %v12667_v46 }
0x10fc   :  { %v5958_v55 = vmul.f32 %v9415_v26, %v12669_v39 }
0x10fd   :  { %8848 = vmatmul.mubr.msk.f32.gmra.mxu1 %vm756_vm3, %v5952_v2 }
0x10fe   :  { %8850 = vmatprep.mubr.msk.f32.mxu1 %vm756_vm3, %v5953_v57 }
0x1101   :  { %8851 = vmatmul.mubr.msk.f32.gmra.mxu1 %vm756_vm3, %v5954_v31 }
0x1102   :  { %8853 = vmatprep.mubr.msk.f32.mxu1 %vm756_vm3, %v5955_v52 }
0x1105   :  { %8854 = vmatmul.mubr.msk.f32.gmra.mxu1 %vm756_vm3, %v5956_v56 }
0x1106   :  { %8856 = vmatprep.mubr.msk.f32.mxu1 %vm756_vm3, %v5957_v12 }
0x1109   :  { %8857 = vmatmul.mubr.msk.f32.gmra.mxu1 %vm756_vm3, %v5958_v55 }
0x1165   :  { %v8759_v59 = vpop.f32.mrf.mxu1 }
0x1166   :  { %v5595_v4 = vadd.f32 %v8759_v59, %v12585_v9 }
0x1167   :  { %v5535_v13 = vpop.f32.mrf.mxu1 }
0x1168   :  { %v5594_v36 = vadd.f32 %v5535_v13, %v12588_v22 }
0x1169   :  { %v8762_v19 = vpop.f32.mrf.mxu1 }
0x116a   :  { %v5597_v33 = vadd.f32 %v8762_v19, %v12591_v27 }
0x116b   :  { %v5545_v24 = vpop.f32.mrf.mxu1 }
0x116c   :  { %v5596_v46 = vadd.f32 %v5545_v24, %v12594_v37 }
0x116d   :  { %v8765_v23 = vpop.f32.mrf.mxu1 }
0x116e   :  { %v5599_v50 = vadd.f32 %v8765_v23, %v12597_v15 }
0x116f   :  { %v5555_v47 = vpop.f32.mrf.mxu1 }
0x1170   :  { %v5598_v39 = vadd.f32 %v5555_v47, %v12600_v1 }
0x1171   :  { %v8768_v40 = vpop.f32.mrf.mxu1 }
0x1172   :  { %v5601_v60 = vadd.f32 %v8768_v40, %v12603_v20 }
0x1173   :  { %v5565_v48 = vpop.f32.mrf.mxu1 }
0x1174   :  { %v12732_v9 = vadd.f32 %v5565_v48, %v12606_v11 }
0x1175   :  { %v8771_v22 = vpop.f32.mrf.mxu1 }
0x1176   :  { %v12735_v43 = vadd.f32 %v8771_v22, %v12611_v34 }
0x1177   :  { %v5575_v27 = vpop.f32.mrf.mxu1 }
0x1178   :  { %v12738_v37 = vadd.f32 %v5575_v27, %v12614_v5 }
0x1179   :  { %v8774_v6 = vpop.f32.mrf.mxu1 }
0x117a   :  { %v12741_v15 = vadd.f32 %v8774_v6, %v12676_v35 }
0x117b   :  { %v5585_v1 = vpop.f32.mrf.mxu1 }
0x117c   :  { %v12744_v51 = vadd.f32 %v5585_v1, %v12679_v42 }
0x11b5   :  { %v8843_v20 = vpop.f32.mrf.mxu1 }
0x11b7   :  { %v6097_v38 = vpop.f32.mrf.mxu1 }
0x11b8   :  { %8861 = vmatprep.mubr.msk.f32.mxu1 %vm48_vm1, %v6097_v38 }
0x11b9   :  { %v8846_v11 = vpop.f32.mrf.mxu1  ;;  %8862 = vmatmul.mubr.msk.f32.vlgmr.msra.gmra.mxu1 %vm48_vm1, %v8843_v20 }
0x11bb   :  { %v6107_v34 = vpop.f32.mrf.mxu1 }
0x11bc   :  { %8864 = vmatprep.mubr.msk.f32.mxu1 %vm48_vm1, %v6107_v34 }
0x11bd   :  { %v8849_v5 = vpop.f32.mrf.mxu1  ;;  %8865 = vmatmul.mubr.msk.f32.gmra.mxu1 %vm48_vm1, %v8846_v11 }
0x11bf   :  { %v6117_v41 = vpop.f32.mrf.mxu1 }
0x11c0   :  { %8867 = vmatprep.mubr.msk.f32.mxu1 %vm48_vm1, %v6117_v41 }
0x11c1   :  { %v8852_v35 = vpop.f32.mrf.mxu1  ;;  %8868 = vmatmul.mubr.msk.f32.gmra.mxu1 %vm48_vm1, %v8849_v5 }
0x11c3   :  { %v6127_v42 = vpop.f32.mrf.mxu1 }
0x11c4   :  { %8870 = vmatprep.mubr.msk.f32.mxu1 %vm48_vm1, %v6127_v42 }
0x11c5   :  { %v8855_v32 = vpop.f32.mrf.mxu1  ;;  %8871 = vmatmul.mubr.msk.f32.gmra.mxu1 %vm48_vm1, %v8852_v35 }
0x11c7   :  { %v6137_v17 = vpop.f32.mrf.mxu1 }
0x11c8   :  { %8873 = vmatprep.mubr.msk.f32.mxu1 %vm48_vm1, %v6137_v17 }
0x11c9   :  { %v8858_v0 = vpop.f32.mrf.mxu1  ;;  %8874 = vmatmul.mubr.msk.f32.gmra.mxu1 %vm48_vm1, %v8855_v32 }
0x11cb   :  { %v6147_v62 = vpop.f32.mrf.mxu1 }
0x11cc   :  { %8876 = vmatprep.mubr.msk.f32.mxu1 %vm48_vm1, %v6147_v62 }
0x11cd   :  { %8877 = vmatmul.mubr.msk.f32.gmra.mxu1 %vm48_vm1, %v8858_v0 }
0x1279   :  { %v8863_v44 = vpop.f32.mrf.mxu1 }
0x127a   :  { %v6321_v54 = vadd.f32 %v8863_v44, %v5595_v4 }
0x127b   :  { %v6261_v2 = vpop.f32.mrf.mxu1 }
0x127c   :  { %v12759_v18 = vadd.f32 %v13236_v8, %v6321_v54  ;;  %v6320_v57 = vadd.f32 %v6261_v2, %v5594_v36 }
0x127d   :  { %v8866_v58 = vpop.f32.mrf.mxu1 }
0x127e   :  { %v12762_v61 = vadd.f32 %v6320_v57, %v13237_v45  ;;  %v6323_v31 = vadd.f32 %v8866_v58, %v5597_v33  ;;  %v6347_v63 = vsel %vm214_vm2, %v12759_v18, 0.0 }
0x127f   :  { %6348 = vadd.xlane.f32.xlu0 %v6347_v63  ;;  %v6271_v52 = vpop.f32.mrf.mxu1 }
0x1280   :  { %v12767_v3 = vadd.f32 %v13121_v49, %v6323_v31  ;;  %v6322_v56 = vadd.f32 %v6271_v52, %v5596_v46  ;;  %v6344_v26 = vsel %vm214_vm2, %v12762_v61, 0.0 }
0x1281   :  { %6345 = vadd.xlane.f32.xlu1 %v6344_v26  ;;  %v8869_v8 = vpop.f32.mrf.mxu1 }
0x1282   :  { %v12772_v12 = vadd.f32 %v6322_v56, %v13108_v30  ;;  %v6325_v45 = vadd.f32 %v8869_v8, %v5599_v50  ;;  %v6353_v13 = vsel %vm214_vm2, %v12767_v3, 0.0 }
0x1283   :  { %v6281_v55 = vpop.f32.mrf.mxu1 }
0x1284   :  { %v12775_v59 = vadd.f32 %v13119_v7, %v6325_v45  ;;  %v6324_v4 = vadd.f32 %v6281_v55, %v5598_v39  ;;  %v6350_v49 = vsel %vm214_vm2, %v12772_v12, 0.0 }
0x1285   :  { %6354 = vadd.xlane.f32.xlu1 %v6353_v13  ;;  %6351 = vadd.xlane.f32.xlu0 %v6350_v49  ;;  %v8872_v36 = vpop.f32.mrf.mxu1 }
0x1286   :  { %v12782_v19 = vadd.f32 %v6324_v4, %v13105_v53  ;;  %v6327_v30 = vadd.f32 %v8872_v36, %v5601_v60  ;;  %v6359_v46 = vsel %vm214_vm2, %v12775_v59, 0.0 }
0x1287   :  { %v6291_v33 = vpop.f32.mrf.mxu1 }
0x1288   :  { %v12785_v24 = vadd.f32 %v13118_v21, %v6327_v30  ;;  %v6326_v7 = vadd.f32 %v6291_v33, %v12732_v9  ;;  %v6356_v23 = vsel %vm214_vm2, %v12782_v19, 0.0 }
0x1289   :  { %6360 = vadd.xlane.f32.xlu1 %v6359_v46  ;;  %6357 = vadd.xlane.f32.xlu0 %v6356_v23  ;;  %v8875_v50 = vpop.f32.mrf.mxu1 }
0x128a   :  { %v12793_v47 = vadd.f32 %v6326_v7, %v9610_v25  ;;  %v6329_v53 = vadd.f32 %v8875_v50, %v12735_v43  ;;  %v6365_v60 = vsel %vm214_vm2, %v12785_v24, 0.0 }
0x128b   :  { %v6301_v39 = vpop.f32.mrf.mxu1 }
0x128c   :  { %v12797_v21 = vadd.f32 %v9616_v28, %v6329_v53  ;;  %v6328_v40 = vadd.f32 %v6301_v39, %v12738_v37  ;;  %v6362_v48 = vsel %vm214_vm2, %v12793_v47, 0.0 }
0x128d   :  { %6366 = vadd.xlane.f32.xlu1 %v6365_v60  ;;  %6363 = vadd.xlane.f32.xlu0 %v6362_v48  ;;  %v8878_v9 = vpop.f32.mrf.mxu1 }
0x128e   :  { %v12805_v25 = vadd.f32 %v6328_v40, %v9618_v29  ;;  %v6331_v22 = vadd.f32 %v8878_v9, %v12741_v15  ;;  %v6371_v37 = vsel %vm214_vm2, %v12797_v21, 0.0  ;;  %v9476_v15 = vld [vmem:[%s13008_s4 + $0x10] sm:$0xff] }
0x128f   :  { %v6311_v43 = vpop.f32.mrf.mxu1 }
0x1290   :  { %v12809_v28 = vadd.f32 %v13129_v14, %v6331_v22  ;;  %v6330_v27 = vadd.f32 %v6311_v43, %v12744_v51  ;;  %v6368_v6 = vsel %vm214_vm2, %v12805_v25, 0.0 }
0x1291   :  { %6372 = vadd.xlane.f32.xlu1 %v6371_v37  ;;  %6369 = vadd.xlane.f32.xlu0 %v6368_v6 }
0x1292   :  { %v12817_v1 = vadd.f32 %v6330_v27, %v13128_v16  ;;  %v6377_v29 = vsel %vm214_vm2, %v12809_v28, 0.0 }
0x1294   :  { %v6374_v14 = vsel %vm214_vm2, %v12817_v1, 0.0 }
0x1295   :  { %6378 = vadd.xlane.f32.xlu1 %v6377_v29  ;;  %6375 = vadd.xlane.f32.xlu0 %v6374_v14 }
0x12a6   :  { %6508 = vrot.lane.b32.xlu1 %v9476_v15, %s9480_s3 }
0x12ab   :  { %6510 = vrot.lane.b32.xlu0 %v12544_v10, %s9480_s3 }
0x1308   :  { %v6349_v51 = vpop.xlane.xlu0 %6348 }
0x1309   :  { %v6381_v16 = vmul.f32 0.03125, %v6349_v51 }
0x130a   :  { %v6346_v20 = vpop.xlane.xlu1 %6345 }
0x130b   :  { %v12830_v38 = vsub.f32 %v12759_v18, %v6381_v16  ;;  %v6380_v11 = vmul.f32 0.03125, %v6346_v20 }
0x130d   :  { %v12833_v34 = vsub.f32 %v12762_v61, %v6380_v11  ;;  %v6405_v5 = vmul.f32 %v12830_v38, %v12830_v38 }
0x130e   :  { %v6355_v41 = vpop.xlane.xlu1 %6354  ;;  %v6352_v35 = vpop.xlane.xlu0 %6351 }
0x130f   :  { %v6383_v42 = vmul.f32 0.03125, %v6355_v41  ;;  %v6382_v32 = vmul.f32 0.03125, %v6352_v35  ;;  %v6419_v17 = vsel %vm214_vm2, %v6405_v5, 0.0  ;;  %v6404_v10 = vmul.f32 %v12833_v34, %v12833_v34 }
0x1310   :  { %6420 = vadd.xlane.f32.xlu1 %v6419_v17 }
0x1311   :  { %v12841_v0 = vsub.f32 %v12767_v3, %v6383_v42  ;;  %v12844_v62 = vsub.f32 %v12772_v12, %v6382_v32  ;;  %v6416_v44 = vsel %vm214_vm2, %v6404_v10, 0.0  ;;  %v9477_v10 = vld [vmem:[%s13008_s4 + $0x8] sm:$0xff] }
0x1312   :  { %v6361_v54 = vpop.xlane.xlu1 %6360  ;;  %v6358_v2 = vpop.xlane.xlu0 %6357  ;;  %6417 = vadd.xlane.f32.xlu0 %v6416_v44  ;;  %v9478_v44 = vld [vmem:[%s13008_s4] sm:$0xff] }
0x1313   :  { %v6385_v57 = vmul.f32 0.03125, %v6361_v54  ;;  %v6384_v58 = vmul.f32 0.03125, %v6358_v2  ;;  %v6407_v31 = vmul.f32 %v12841_v0, %v12841_v0  ;;  %v6406_v63 = vmul.f32 %v12844_v62, %v12844_v62  ;;  %v7397_v54 = vld [vmem:[%s13008_s4 + $0x20] ss:$0 sm:$0xff]  ;;  %v6700_v2 = vld [vmem:[%s13009_s5 + $0x38] sm:$0xff] }
0x1314   :  { %8905 = vmatprep.subr.mxu1 %v6700_v2 }
0x1315   :  { %v12852_v52 = vsub.f32 %v12775_v59, %v6385_v57  ;;  %v12855_v56 = vsub.f32 %v12782_v19, %v6384_v58  ;;  %v6425_v26 = vsel %vm214_vm2, %v6407_v31, 0.0  ;;  %v6422_v8 = vsel %vm214_vm2, %v6406_v63, 0.0  ;;  %v6699_v57 = vld [vmem:[%s13009_s5 + $0x30] sm:$0xff]  ;;  %8906 = vmatpush3.msra.mxu1 %v6700_v2  ;;  %v6698_v58 = vld [vmem:[%s13009_s5 + $0x28] sm:$0xff]  ;;  %v6697_v31 = vld [vmem:[%s13009_s5 + $0x20] sm:$0xff] }
0x1316   :  { %v6367_v45 = vpop.xlane.xlu1 %6366  ;;  %v6364_v55 = vpop.xlane.xlu0 %6363  ;;  %6426 = vadd.xlane.f32.xlu1 %v6425_v26  ;;  %6423 = vadd.xlane.f32.xlu0 %v6422_v8  ;;  %v6696_v63 = vld [vmem:[%s13009_s5 + $0x18] sm:$0xff] }
0x1317   :  { %v6387_v4 = vmul.f32 0.03125, %v6367_v45  ;;  %v6386_v13 = vmul.f32 0.03125, %v6364_v55  ;;  %v6409_v49 = vmul.f32 %v12852_v52, %v12852_v52  ;;  %v6408_v36 = vmul.f32 %v12855_v56, %v12855_v56  ;;  %8907 = vmatprep.subr.mxu1 %v6699_v57 }
0x1318   :  { %8908 = vmatpush3.msra.mxu1 %v6699_v57 }
0x1319   :  { %v12864_v30 = vsub.f32 %v12785_v24, %v6387_v4  ;;  %v12867_v33 = vsub.f32 %v12793_v47, %v6386_v13  ;;  %v6431_v7 = vsel %vm214_vm2, %v6409_v49, 0.0  ;;  %v6428_v46 = vsel %vm214_vm2, %v6408_v36, 0.0  ;;  %8909 = vmatprep.subr.mxu1 %v6698_v58 }
0x131a   :  { %v6373_v23 = vpop.xlane.xlu1 %6372  ;;  %v6370_v50 = vpop.xlane.xlu0 %6369  ;;  %6432 = vadd.xlane.f32.xlu1 %v6431_v7  ;;  %6429 = vadd.xlane.f32.xlu0 %v6428_v46 }
0x131b   :  { %v6389_v53 = vmul.f32 0.03125, %v6373_v23  ;;  %v6388_v39 = vmul.f32 0.03125, %v6370_v50  ;;  %v6411_v40 = vmul.f32 %v12864_v30, %v12864_v30  ;;  %v6410_v60 = vmul.f32 %v12867_v33, %v12867_v33  ;;  %8910 = vmatpush3.msra.mxu1 %v6698_v58 }
0x131c   :  { %8911 = vmatprep.subr.mxu1 %v6697_v31 }
0x131d   :  { %v12876_v48 = vsub.f32 %v12797_v21, %v6389_v53  ;;  %v12879_v9 = vsub.f32 %v12805_v25, %v6388_v39  ;;  %v6437_v22 = vsel %vm214_vm2, %v6411_v40, 0.0  ;;  %v6434_v43 = vsel %vm214_vm2, %v6410_v60, 0.0  ;;  %8912 = vmatpush3.msra.mxu1 %v6697_v31 }
0x131e   :  { %6438 = vadd.xlane.f32.xlu1 %v6437_v22  ;;  %v6379_v27 = vpop.xlane.xlu1 %6378  ;;  %6435 = vadd.xlane.f32.xlu0 %v6434_v43  ;;  %v6376_v37 = vpop.xlane.xlu0 %6375 }
0x131f   :  { %v6391_v6 = vmul.f32 0.03125, %v6379_v27  ;;  %v6390_v29 = vmul.f32 0.03125, %v6376_v37  ;;  %v6413_v14 = vmul.f32 %v12876_v48, %v12876_v48  ;;  %v6412_v15 = vmul.f32 %v12879_v9, %v12879_v9  ;;  %8913 = vmatprep.subr.mxu1 %v6696_v63 }
0x1320   :  { %8914 = vmatpush3.msra.mxu1 %v6696_v63 }
0x1321   :  { %v12888_v51 = vsub.f32 %v12809_v28, %v6391_v6  ;;  %v12891_v16 = vsub.f32 %v12817_v1, %v6390_v29  ;;  %v6443_v20 = vsel %vm214_vm2, %v6413_v14, 0.0  ;;  %v6440_v11 = vsel %vm214_vm2, %v6412_v15, 0.0 }
0x1322   :  { %6444 = vadd.xlane.f32.xlu1 %v6443_v20  ;;  %6441 = vadd.xlane.f32.xlu0 %v6440_v11  ;;  %v6511_v5 = vpop.permute.xlu0 %6510  ;;  %v6509_v41 = vpop.permute.xlu1 %6508 }
0x1323   :  { %v6415_v35 = vmul.f32 %v12888_v51, %v12888_v51  ;;  %v6414_v42 = vmul.f32 %v12891_v16, %v12891_v16  ;;  %8879 = vmatprep.subr.mxu0 %v6511_v5 }
0x1324   :  { %8880 = vmatpush3.msra.mxu0 %v6511_v5 }
0x1325   :  { %v6449_v32 = vsel %vm214_vm2, %v6415_v35, 0.0  ;;  %v6446_v17 = vsel %vm214_vm2, %v6414_v42, 0.0  ;;  %8881 = vmatprep.subr.mxu0 %v6509_v41 }
0x1326   :  { %6450 = vadd.xlane.f32.xlu1 %v6449_v32  ;;  %6447 = vadd.xlane.f32.xlu0 %v6446_v17 }
0x1327   :  { %8882 = vmatpush3.msra.mxu0 %v6509_v41 }
0x1337   :  { %6506 = vrot.lane.b32.xlu1 %v9477_v10, %s9480_s3 }
0x133b   :  { %6517 = vrot.lane.b32.xlu1 %v7397_v54, %s9480_s3 }
0x133c   :  { %6504 = vrot.lane.b32.xlu0 %v9478_v44, %s9480_s3 }
0x1399   :  { %v6421_v26 = vpop.xlane.xlu1 %6420 }
0x139a   :  { %v6453_v55 = vmul.f32 0.03125, %v6421_v26 }
0x139b   :  { %v6418_v8 = vpop.xlane.xlu0 %6417 }
0x139c   :  { %v6452_v45 = vmul.f32 0.03125, %v6418_v8  ;;  %v6465_v7 = vadd.f32 1e-05, %v6453_v55 }
0x139e   :  { %v6464_v4 = vadd.f32 1e-05, %v6452_v45 }
0x139f   :  { %v6427_v13 = vpop.xlane.xlu1 %6426  ;;  %v6424_v49 = vpop.xlane.xlu0 %6423 }
0x13a0   :  { %9416 = vrsqrt.f32 %v6464_v4  ;;  %v6454_v36 = vmul.f32 0.03125, %v6424_v49  ;;  %v6455_v46 = vmul.f32 0.03125, %v6427_v13 }
0x13a1   :  { %9418 = vrsqrt.f32 %v6465_v7 }
0x13a2   :  { %v6466_v23 = vadd.f32 1e-05, %v6454_v36  ;;  %v6467_v40 = vadd.f32 1e-05, %v6455_v46 }
0x13a3   :  { %v6433_v50 = vpop.xlane.xlu1 %6432  ;;  %v6430_v53 = vpop.xlane.xlu0 %6429 }
0x13a4   :  { %v6456_v39 = vmul.f32 0.03125, %v6430_v53  ;;  %v6457_v60 = vmul.f32 0.03125, %v6433_v50  ;;  %9420 = vrsqrt.f32 %v6466_v23 }
0x13a5   :  { %9422 = vrsqrt.f32 %v6467_v40 }
0x13a6   :  { %v6468_v22 = vadd.f32 1e-05, %v6456_v39  ;;  %v6469_v6 = vadd.f32 1e-05, %v6457_v60 }
0x13a7   :  { %v6439_v43 = vpop.xlane.xlu1 %6438  ;;  %v6436_v27 = vpop.xlane.xlu0 %6435 }
0x13a8   :  { %v6458_v37 = vmul.f32 0.03125, %v6436_v27  ;;  %v6459_v29 = vmul.f32 0.03125, %v6439_v43  ;;  %9424 = vrsqrt.f32 %v6468_v22 }
0x13a9   :  { %9426 = vrsqrt.f32 %v6469_v6 }
0x13aa   :  { %v6470_v14 = vadd.f32 1e-05, %v6458_v37  ;;  %v6471_v41 = vadd.f32 1e-05, %v6459_v29 }
0x13ab   :  { %v6445_v15 = vpop.xlane.xlu1 %6444  ;;  %v6442_v20 = vpop.xlane.xlu0 %6441 }
0x13ac   :  { %v6460_v11 = vmul.f32 0.03125, %v6442_v20  ;;  %v6461_v35 = vmul.f32 0.03125, %v6445_v15  ;;  %9428 = vrsqrt.f32 %v6470_v14 }
0x13ad   :  { %v9417_v5 = vpop.eup %9416  ;;  %9430 = vrsqrt.f32 %v6471_v41 }
0x13ae   :  { %v6488_v42 = vmul.f32 %v9417_v5, %v12833_v34  ;;  %v6472_v32 = vadd.f32 1e-05, %v6460_v11  ;;  %v6473_v54 = vadd.f32 1e-05, %v6461_v35  ;;  %v9419_v57 = vpop.eup %9418 }
0x13af   :  { %v6451_v17 = vpop.xlane.xlu1 %6450  ;;  %v6448_v10 = vpop.xlane.xlu0 %6447  ;;  %v6489_v34 = vmul.f32 %v9419_v57, %v12830_v38 }
0x13b0   :  { %v6462_v44 = vmul.f32 0.03125, %v6448_v10  ;;  %8887 = vmatprep.mubr.msk.f32.mxu0 %vm214_vm2, %v6488_v42  ;;  %v6463_v2 = vmul.f32 0.03125, %v6451_v17  ;;  %9432 = vrsqrt.f32 %v6472_v32 }
0x13b1   :  { %v9421_v26 = vpop.eup %9420  ;;  %9434 = vrsqrt.f32 %v6473_v54 }
0x13b2   :  { %v6474_v58 = vadd.f32 1e-05, %v6462_v44  ;;  %v6475_v8 = vadd.f32 1e-05, %v6463_v2  ;;  %v9423_v45 = vpop.eup %9422  ;;  %v6490_v55 = vmul.f32 %v9421_v26, %v12844_v62 }
0x13b3   :  { %v6507_v31 = vpop.permute.xlu1 %6506  ;;  %v6505_v63 = vpop.permute.xlu0 %6504  ;;  %v6491_v13 = vmul.f32 %v9423_v45, %v12841_v0 }
0x13b4   :  { %8883 = vmatprep.subr.mxu0 %v6507_v31  ;;  %9436 = vrsqrt.f32 %v6474_v58 }
0x13b5   :  { %8884 = vmatpush3.msra.mxu0 %v6507_v31  ;;  %v9425_v4 = vpop.eup %9424  ;;  %9438 = vrsqrt.f32 %v6475_v8 }
0x13b6   :  { %8885 = vmatprep.subr.mxu0 %v6505_v63  ;;  %v9427_v49 = vpop.eup %9426  ;;  %v6492_v36 = vmul.f32 %v9425_v4, %v12855_v56 }
0x13b7   :  { %8886 = vmatpush3.msra.mxu0 %v6505_v63  ;;  %v6493_v7 = vmul.f32 %v9427_v49, %v12852_v52 }
0x13b8   :  { %8888 = vmatmul.mubr.msk.f32.vlgmr.msra.gmra.mxu0 %vm214_vm2, %v6489_v34 }
0x13b9   :  { %8890 = vmatprep.mubr.msk.f32.mxu0 %vm214_vm2, %v6490_v55  ;;  %v9429_v38 = vpop.eup %9428 }
0x13ba   :  { %v9431_v46 = vpop.eup %9430  ;;  %v6494_v62 = vmul.f32 %v9429_v38, %v12867_v33 }
0x13bb   :  { %v6495_v0 = vmul.f32 %v9431_v46, %v12864_v30  ;;  %v6695_v30 = vld [vmem:[%s13009_s5 + $0x10] sm:$0xff]  ;;  %v9496_v46 = vmov 0.0  }
0x13bc   :  { %8891 = vmatmul.mubr.msk.f32.gmra.mxu0 %vm214_vm2, %v6491_v13  ;;  %8915 = vmatprep.subr.mxu1 %v6695_v30 }
0x13bd   :  { %8893 = vmatprep.mubr.msk.f32.mxu0 %vm214_vm2, %v6492_v36  ;;  %v9433_v23 = vpop.eup %9432  ;;  %8916 = vmatpush3.msra.mxu1 %v6695_v30 }
0x13be   :  { %v9435_v50 = vpop.eup %9434  ;;  %v6496_v56 = vmul.f32 %v9433_v23, %v12879_v9  ;;  %v6693_v9 = vld [vmem:[%s13009_s5] sm:$0xff]  ;;  %8939 = vmatprep.subr.mxu0 %v9496_v46 }
0x13bf   :  { %v6497_v52 = vmul.f32 %v9435_v50, %v12876_v48  ;;  %v6694_v48 = vld [vmem:[%s13009_s5 + $0x8] sm:$0xff] }
0x13c0   :  { %8894 = vmatmul.mubr.msk.f32.gmra.mxu0 %vm214_vm2, %v6493_v7  ;;  %8917 = vmatprep.subr.mxu1 %v6694_v48 }
0x13c1   :  { %8896 = vmatprep.mubr.msk.f32.mxu0 %vm214_vm2, %v6494_v62  ;;  %v9437_v53 = vpop.eup %9436  ;;  %8918 = vmatpush3.msra.mxu1 %v6694_v48 }
0x13c2   :  { %v9439_v39 = vpop.eup %9438  ;;  %v6498_v33 = vmul.f32 %v9437_v53, %v12891_v16  ;;  %8919 = vmatprep.subr.mxu1 %v6693_v9  ;;  %v6518_v16 = vpop.permute.xlu1 %6517 }
0x13c3   :  { %v6499_v40 = vmul.f32 %v9439_v39, %v12888_v51  ;;  %8920 = vmatpush3.msra.mxu1 %v6693_v9  ;;  %v9479_v51 = vld [vmem:[%s13004_s2] sm:$0xf] }
0x13c4   :  { %8897 = vmatmul.mubr.msk.f32.gmra.mxu0 %vm214_vm2, %v6495_v0  ;;  %6863 = vrot.lane.b32.xlu0 %v9479_v51, %s9495_s1 }
0x13c5   :  { %8899 = vmatprep.mubr.msk.f32.mxu0 %vm214_vm2, %v6496_v56 }
0x13c8   :  { %8900 = vmatmul.mubr.msk.f32.gmra.mxu0 %vm214_vm2, %v6497_v52 }
0x13c9   :  { %8902 = vmatprep.mubr.msk.f32.mxu0 %vm214_vm2, %v6498_v33 }
0x13cc   :  { %8903 = vmatmul.mubr.msk.f32.gmra.mxu0 %vm214_vm2, %v6499_v40 }
0x13cd   :  { %8963 = vmatprep.mubr.msk.f32.mxu0 %vm9497_vm5, %v9496_v46 }
0x1478   :  { %v8889_v60 = vpop.f32.mrf.mxu0 }
0x1479   :  { %v6628_v22 = vadd.f32 %v8889_v60, %v6518_v16 }
0x147a   :  { %v6622_v43 = vpop.f32.mrf.mxu0 }
0x147b   :  { %v6623_v27 = vadd.f32 %v6622_v43, %v6518_v16  ;;  %v6682_v29 = vmax.f32 %v6628_v22, 0.0  ;;  %v6864_v22 = vpop.permute.xlu0 %6863 }
0x147c   :  { %v8892_v37 = vpop.f32.mrf.mxu0 }
0x147d   :  { %v6681_v6 = vmax.f32 %v6623_v27, 0.0  ;;  %v6638_v14 = vadd.f32 %v8892_v37, %v6518_v16 }
0x147e   :  { %v6632_v15 = vpop.f32.mrf.mxu0 }
0x147f   :  { %v6633_v20 = vadd.f32 %v6632_v15, %v6518_v16  ;;  %8921 = vmatprep.mubr.msk.f32.mxu1 %vm6701_vm4, %v6681_v6  ;;  %v6684_v41 = vmax.f32 %v6638_v14, 0.0 }
0x1480   :  { %v8895_v11 = vpop.f32.mrf.mxu0  ;;  %8922 = vmatmul.mubr.msk.f32.vlgmr.msra.gmra.mxu1 %vm6701_vm4, %v6682_v29 }
0x1481   :  { %v6683_v5 = vmax.f32 %v6633_v20, 0.0  ;;  %v6648_v35 = vadd.f32 %v8895_v11, %v6518_v16 }
0x1482   :  { %v6642_v42 = vpop.f32.mrf.mxu0 }
0x1483   :  { %v6643_v32 = vadd.f32 %v6642_v42, %v6518_v16  ;;  %8924 = vmatprep.mubr.msk.f32.mxu1 %vm6701_vm4, %v6683_v5  ;;  %v6686_v44 = vmax.f32 %v6648_v35, 0.0 }
0x1484   :  { %v8898_v17 = vpop.f32.mrf.mxu0  ;;  %8925 = vmatmul.mubr.msk.f32.gmra.mxu1 %vm6701_vm4, %v6684_v41 }
0x1485   :  { %v6685_v10 = vmax.f32 %v6643_v32, 0.0  ;;  %v6658_v54 = vadd.f32 %v8898_v17, %v6518_v16 }
0x1486   :  { %v6652_v2 = vpop.f32.mrf.mxu0 }
0x1487   :  { %v6653_v57 = vadd.f32 %v6652_v2, %v6518_v16  ;;  %8927 = vmatprep.mubr.msk.f32.mxu1 %vm6701_vm4, %v6685_v10  ;;  %v6688_v63 = vmax.f32 %v6658_v54, 0.0 }
0x1488   :  { %v8901_v58 = vpop.f32.mrf.mxu0  ;;  %8928 = vmatmul.mubr.msk.f32.gmra.mxu1 %vm6701_vm4, %v6686_v44 }
0x1489   :  { %v6687_v31 = vmax.f32 %v6653_v57, 0.0  ;;  %v6668_v26 = vadd.f32 %v8901_v58, %v6518_v16 }
0x148a   :  { %v6662_v34 = vpop.f32.mrf.mxu0 }
0x148b   :  { %v6663_v8 = vadd.f32 %v6662_v34, %v6518_v16  ;;  %8930 = vmatprep.mubr.msk.f32.mxu1 %vm6701_vm4, %v6687_v31  ;;  %v6690_v4 = vmax.f32 %v6668_v26, 0.0 }
0x148c   :  { %v8904_v45 = vpop.f32.mrf.mxu0  ;;  %8931 = vmatmul.mubr.msk.f32.gmra.mxu1 %vm6701_vm4, %v6688_v63 }
0x148d   :  { %v6689_v55 = vmax.f32 %v6663_v8, 0.0  ;;  %v6678_v13 = vadd.f32 %v8904_v45, %v6518_v16 }
0x148e   :  { %v6672_v49 = vpop.f32.mrf.mxu0 }
0x148f   :  { %v6673_v36 = vadd.f32 %v6672_v49, %v6518_v16  ;;  %8933 = vmatprep.mubr.msk.f32.mxu1 %vm6701_vm4, %v6689_v55  ;;  %v6692_v7 = vmax.f32 %v6678_v13, 0.0 }
0x1490   :  { %8934 = vmatmul.mubr.msk.f32.gmra.mxu1 %vm6701_vm4, %v6690_v4 }
0x1491   :  { %v6691_v38 = vmax.f32 %v6673_v36, 0.0 }
0x1493   :  { %8936 = vmatprep.mubr.msk.f32.mxu1 %vm6701_vm4, %v6691_v38 }
0x1494   :  { %8937 = vmatmul.mubr.msk.f32.gmra.mxu1 %vm6701_vm4, %v6692_v7 }
0x1540   :  { %v8923_v62 = vpop.f32.mrf.mxu1 }
0x1542   :  { %v6804_v23 = vpop.f32.mrf.mxu1 }
0x1544   :  { %v8926_v0 = vpop.f32.mrf.mxu1 }
0x1546   :  { %v6814_v50 = vpop.f32.mrf.mxu1 }
0x1548   :  { %v8929_v56 = vpop.f32.mrf.mxu1 }
0x154a   :  { %v6824_v53 = vpop.f32.mrf.mxu1 }
0x154c   :  { %v8932_v52 = vpop.f32.mrf.mxu1 }
0x154e   :  { %v6834_v39 = vpop.f32.mrf.mxu1 }
0x1550   :  { %v8935_v33 = vpop.f32.mrf.mxu1 }
0x1551   :  { %v6850_v16 = vadd.f32 %v8935_v33, %v12797_v21  ;;  %v6830_v21 = vadd.f32 %v8929_v56, %v12775_v59  ;;  %v6810_v59 = vadd.f32 %v8923_v62, %v12759_v18 }
0x1552   :  { %v6844_v40 = vpop.f32.mrf.mxu1 }
0x1553   :  { %v6845_v60 = vadd.f32 %v6844_v40, %v12805_v25  ;;  %v6825_v25 = vadd.f32 %v6824_v53, %v12782_v19  ;;  %v6805_v19 = vadd.f32 %v6804_v23, %v12762_v61 }
0x1554   :  { %v8938_v30 = vpop.f32.mrf.mxu1 }
0x1555   :  { %v6860_v48 = vadd.f32 %v8938_v30, %v12809_v28  ;;  %v6840_v28 = vadd.f32 %v8932_v52, %v12785_v24  ;;  %v6820_v24 = vadd.f32 %v8926_v0, %v12767_v3 }
0x1556   :  { %v6854_v9 = vpop.f32.mrf.mxu1 }
0x1557   :  { %8940 = vmatpush3.xpose.msk.msra.mxu0 %vm214_vm2, %v6860_v48  ;;  %v6855_v51 = vadd.f32 %v6854_v9, %v12817_v1  ;;  %v6835_v1 = vadd.f32 %v6834_v39, %v12793_v47  ;;  %v6815_v47 = vadd.f32 %v6814_v50, %v12772_v12 }
0x1558   :  { %8941 = vmatprep.subr.mxu0 %v9496_v46 }
0x155b   :  { %8942 = vmatpush3.xpose.msk.msra.mxu0 %vm214_vm2, %v6855_v51 }
0x155c   :  { %8943 = vmatprep.subr.mxu0 %v9496_v46 }
0x155f   :  { %8944 = vmatpush3.xpose.msk.msra.mxu0 %vm214_vm2, %v6850_v16 }
0x1560   :  { %8945 = vmatprep.subr.mxu0 %v9496_v46 }
0x1563   :  { %8946 = vmatpush3.xpose.msk.msra.mxu0 %vm214_vm2, %v6845_v60 }
0x1564   :  { %8947 = vmatprep.subr.mxu0 %v9496_v46 }
0x1567   :  { %8948 = vmatpush3.xpose.msk.msra.mxu0 %vm214_vm2, %v6840_v28 }
0x1568   :  { %8949 = vmatprep.subr.mxu0 %v9496_v46 }
0x156b   :  { %8950 = vmatpush3.xpose.msk.msra.mxu0 %vm214_vm2, %v6835_v1 }
0x156c   :  { %8951 = vmatprep.subr.mxu0 %v9496_v46 }
0x156f   :  { %8952 = vmatpush3.xpose.msk.msra.mxu0 %vm214_vm2, %v6830_v21 }
0x1570   :  { %8953 = vmatprep.subr.mxu0 %v9496_v46 }
0x1573   :  { %8954 = vmatpush3.xpose.msk.msra.mxu0 %vm214_vm2, %v6825_v25 }
0x1574   :  { %8955 = vmatprep.subr.mxu0 %v9496_v46 }
0x1577   :  { %8956 = vmatpush3.xpose.msk.msra.mxu0 %vm214_vm2, %v6820_v24 }
0x1578   :  { %8957 = vmatprep.subr.mxu0 %v9496_v46 }
0x157b   :  { %8958 = vmatpush3.xpose.msk.msra.mxu0 %vm214_vm2, %v6815_v47 }
0x157c   :  { %8959 = vmatprep.subr.mxu0 %v9496_v46 }
0x157f   :  { %8960 = vmatpush3.xpose.msk.msra.mxu0 %vm214_vm2, %v6810_v59 }
0x1580   :  { %8961 = vmatprep.subr.mxu0 %v9496_v46 }
0x1583   :  { %8962 = vmatpush3.xpose.msk.msra.mxu0 %vm214_vm2, %v6805_v19 }
0x1586   :  { %8964 = vmatmul.mubr.msk.f32.vlgmr.msra.gmra.mxu0 %vm214_vm2, %v6864_v22 }
0x1646   :  { %v6969_v3 = vpop.f32.mrf.mxu0 }
0x1647   :  { %6974 = vst.msk [vmem:[%s13010_s6] sm:$0xf] %vm6973_vm6, %v6969_v3 }
0x1648   :  { %v8965_v12 = vpop.f32.mrf.mxu0 }

</bundles_post_ra>
